<compile_context>
chip_gen: v5e
topology: v5e:2x2
jax: 0.10.0
libtpu: 0.0.40
codegen_flags: <defaults>
</compile_context>

<pallas_src>
import functools

import jax
import jax.numpy as jnp
from jax import lax
from jax.experimental import pallas as pl
from jax.experimental.pallas import tpu as pltpu

LANE = 128


def _round_up(n, m):
    return ((n + m - 1) // m) * m


def _pad_axis(a, axis, target):
    pad = target - a.shape[axis]
    if pad <= 0:
        return a
    widths = [(0, 0)] * a.ndim
    widths[axis] = (0, pad)
    return jnp.pad(a, widths)


def _residual_block_kernel(x_ref, w1sc_ref, b1sc_ref, w2_ref, b2_ref,
                           w3_ref, b3_ref, wfc1_ref, wfc2_ref, out_ref, *, W):
    f32 = jnp.float32
    bf16 = jnp.bfloat16
    HW = x_ref.shape[1]
    Cm = w2_ref.shape[2]                    # padded mid channels (multiple of 128)

    x = x_ref[0]                            # (HW, Cin) bf16 (cast in the wrapper)

    # --- fused conv1 (1x1) + shortcut (1x1), folded BN: one MXU matmul ---------------
    h = jnp.dot(x, w1sc_ref[...], preferred_element_type=f32) + b1sc_ref[...]
    h1 = jnp.maximum(h[:, :Cm], 0.0)        # (HW, Cm) f32 — 128-aligned, lane-dense
    sc = h[:, Cm:]                          # (HW, Co) f32 — slice starts on a 128 lane

    # --- conv2 (3x3, stride=1, SAME): 3 accumulating dots, one per ky ----------------
    # (HW, 1) edge masks (depend only on the pixel's column index).
    col = lax.broadcasted_iota(jnp.int32, (HW, 1), 0) % W
    mask_l = (col >= 1).astype(f32)         # pixel (i, j-1) exists
    mask_r = (col <= W - 2).astype(f32)     # pixel (i, j+1) exists

    # +-1-pixel shifts on the XLU; wrapped rows are zeroed by the masks.
    left = (pltpu.roll(h1, shift=1, axis=0) * mask_l).astype(bf16)
    right = (pltpu.roll(h1, shift=HW - 1, axis=0) * mask_r).astype(bf16)
    u = jnp.concatenate([left, h1.astype(bf16), right], axis=1)   # (HW, 3*Cm) bf16, kx-major

    # Whole-row (ky) shifts are sublane-aligned (W % 8 == 0): zero band + aligned slice.
    zband = jnp.zeros((W, 3 * Cm), bf16)
    up = jnp.concatenate([zband, u[:-W]], axis=0)      # source row i-1 (ky = 0)
    down = jnp.concatenate([u[W:], zband], axis=0)     # source row i+1 (ky = 2)

    acc = jnp.dot(up, w2_ref[0], preferred_element_type=f32)
    acc = acc + jnp.dot(u, w2_ref[1], preferred_element_type=f32)
    acc = acc + jnp.dot(down, w2_ref[2], preferred_element_type=f32)
    h2 = jnp.maximum(acc + b2_ref[...], 0.0)           # (HW, Cm) f32

    # --- conv3 (1x1) + folded BN -------------------------------------------------------
    h3 = jnp.dot(h2.astype(bf16), w3_ref[...], preferred_element_type=f32) + b3_ref[...]

    # --- SE: global average pool -> FC -> ReLU -> FC -> sigmoid -> channel scale -------
    y = jnp.mean(h3, axis=0, keepdims=True)            # (1, Co)
    y = jnp.maximum(jnp.dot(y, wfc1_ref[...], preferred_element_type=f32), 0.0)
    y = jax.nn.sigmoid(jnp.dot(y, wfc2_ref[...], preferred_element_type=f32))

    # --- SE scale + residual add + ReLU --------------------------------------------------
    # TODO(synk): nn.Dropout2d(0.1) is identity in eval mode; training-mode channel
    # dropout is not implemented here.
    out_ref[0] = jnp.maximum(h3 * y + sc, 0.0)


def residual_block(x, kp):
    """x: (B, H, W, Cin) float32 NHWC.  kp: packed (padded) params.  Returns (B, H, W, Cout)."""
    B, H, W, Cin = x.shape
    Cm = kp["w2"].shape[2]                  # padded mid channels
    Co = kp["w3"].shape[1]                  # padded out channels
    Cred = kp["wfc1"].shape[1]
    Cout = kp["cout"]                       # true (unpadded) out channels
    HW = H * W

    # Lane-friendly bf16 input: x is only ever an MXU operand, so the wrapper-side cast
    # halves the HBM->VMEM input DMA and the double-buffered input block.
    x2 = x.reshape(B, HW, Cin).astype(jnp.bfloat16)

    weights = (kp["w1sc"], kp["b1sc"], kp["w2"], kp["b2"], kp["w3"], kp["b3"],
               kp["wfc1"], kp["wfc2"])

    # Scoped VMEM limit derived from the real per-step footprint (blocks + temporaries).
    bytes_w = sum(int(a.size) * a.dtype.itemsize for a in weights)
    bytes_io = 2 * HW * Cin * 2 + 2 * HW * Co * 4                  # double-buffered x / out
    bytes_tmp = HW * ((Cm + Co) * 4        # fused conv1+shortcut output h
                      + 4 * Cm * 4         # h1, rolled pieces (f32 before cast), acc/h2
                      + 3 * (3 * Cm) * 2   # u, up, down (bf16)
                      + 3 * Co * 4)        # h3, sc, output staging
    vmem_limit = int(min(96 * 2**20, max(16 * 2**20, 2 * (bytes_w + bytes_io + bytes_tmp))))

    flops = (2 * B * HW * (Cin * (Cm + Co) + 9 * Cm * Cm + Cm * Co) + 4 * B * Co * Cred)
    bytes_accessed = int(x2.size * 2 + B * HW * Co * 4 + bytes_w)

    def make_call(single_buffer_weights):
        # Grid-invariant operands are never re-fetched, so one buffer suffices (saves
        # weight VMEM, important on the 64 MiB v7x part at production widths).
        mode = pl.Buffered(1) if single_buffer_weights else None

        def fixed(shape):
            idx = lambda b, _n=len(shape): (0,) * _n
            if mode is None:
                return pl.BlockSpec(shape, idx)
            return pl.BlockSpec(shape, idx, pipeline_mode=mode)

        grid_spec = pltpu.PrefetchScalarGridSpec(
            num_scalar_prefetch=0,
            grid=(B,),
            in_specs=[
                pl.BlockSpec((1, HW, Cin), lambda b: (b, 0, 0)),          # x (bf16)
                fixed((Cin, Cm + Co)), fixed((1, Cm + Co)),               # fused conv1+shortcut
                fixed((3, 3 * Cm, Cm)), fixed((1, Cm)),                   # conv2 per-ky slabs
                fixed((Cm, Co)), fixed((1, Co)),                          # conv3
                fixed((Co, Cred)), fixed((Cred, Co)),                     # SE FCs
            ],
            out_specs=pl.BlockSpec((1, HW, Co), lambda b: (b, 0, 0)),
        )
        return pl.pallas_call(
            functools.partial(_residual_block_kernel, W=W),
            out_shape=jax.ShapeDtypeStruct((B, HW, Co), jnp.float32),
            grid_spec=grid_spec,
            compiler_params=pltpu.CompilerParams(
                dimension_semantics=("parallel",),
                vmem_limit_bytes=vmem_limit),
            cost_estimate=pl.CostEstimate(
                flops=flops, transcendentals=B * Co, bytes_accessed=bytes_accessed),
        )

    out = None
    for single in (True, False):           # fall back if this build rejects pl.Buffered(1)
        try:
            out = make_call(single)(x2, *weights)
            jax.block_until_ready(out)
            break
        except Exception:
            if not single:
                raise

    # Drop the zero channel padding and restore NHWC.
    return out.reshape(B, H, W, Co)[..., :Cout]


def init_params(key, in_channels, out_channels, expansion=4, reduction=16, eps=1e-5):
    """Deterministic synthetic params; BN (inference) folded into conv weights."""
    Cmid = out_channels // expansion
    Cout = out_channels * expansion
    Cred = Cout // reduction
    ks = jax.random.split(key, 10)

    def w(k, shape):
        return 0.1 * jax.random.normal(k, shape, jnp.float32)

    def bn(k, c):
        k1, k2, k3, k4 = jax.random.split(k, 4)
        gamma = 1.0 + 0.1 * jax.random.normal(k1, (c,), jnp.float32)
        beta = 0.1 * jax.random.normal(k2, (c,), jnp.float32)
        mean = 0.1 * jax.random.normal(k3, (c,), jnp.float32)
        var = jax.random.uniform(k4, (c,), jnp.float32, minval=0.5, maxval=1.5)
        scale = gamma / jnp.sqrt(var + eps)
        shift = beta - mean * scale
        return scale, shift

    w1 = w(ks[0], (in_channels, Cmid));      s1, sh1 = bn(ks[1], Cmid)
    w2 = w(ks[2], (3, 3, Cmid, Cmid));       s2, sh2 = bn(ks[3], Cmid)
    w3 = w(ks[4], (Cmid, Cout));             s3, sh3 = bn(ks[5], Cout)
    wsc = w(ks[6], (in_channels, Cout));     ssc, shsc = bn(ks[7], Cout)
    wfc1 = w(ks[8], (Cout, Cred))            # Linear(Cout, Cred), pre-transposed
    wfc2 = w(ks[9], (Cred, Cout))            # Linear(Cred, Cout), pre-transposed

    return dict(
        w1f=w1 * s1[None, :],                b1=sh1[None, :],
        w2f=w2 * s2[None, None, None, :],    b2=sh2[None, :],
        w3f=w3 * s3[None, :],                b3=sh3[None, :],
        wscf=wsc * ssc[None, :],             bsc=shsc[None, :],
        wfc1=wfc1, wfc2=wfc2,
    )


def pack_params(p):
    """Kernel layout: zero-pad channel axes to 128 lanes, fuse conv1+shortcut weights,
    split the 3x3 weight into per-ky (3*Cm, Cm) slabs (rows ordered kx, ci), bf16 MXU
    operands, f32 biases/SE weights."""
    Cmid = p["w1f"].shape[1]
    Cout = p["w3f"].shape[1]
    Cm = _round_up(Cmid, LANE)
    Co = _round_up(Cout, LANE)

    w1 = _pad_axis(p["w1f"], 1, Cm)
    wsc = _pad_axis(p["wscf"], 1, Co)
    b1 = _pad_axis(p["b1"], 1, Cm)
    bsc = _pad_axis(p["bsc"], 1, Co)
    w2 = _pad_axis(_pad_axis(p["w2f"], 2, Cm), 3, Cm)        # (3, 3, Cm, Cm) HWIO
    w3 = _pad_axis(_pad_axis(p["w3f"], 0, Cm), 1, Co)

    return dict(
        w1sc=jnp.concatenate([w1, wsc], axis=1).astype(jnp.bfloat16),   # (Cin, Cm+Co)
        b1sc=jnp.concatenate([b1, bsc], axis=1),                        # (1, Cm+Co) f32
        w2=w2.reshape(3, 3 * Cm, Cm).astype(jnp.bfloat16),              # per-ky slabs
        b2=_pad_axis(p["b2"], 1, Cm),
        w3=w3.astype(jnp.bfloat16),
        b3=_pad_axis(p["b3"], 1, Co),
        wfc1=_pad_axis(p["wfc1"], 0, Co),                               # (Co, Cred)
        wfc2=_pad_axis(p["wfc2"], 1, Co),                               # (Cred, Co)
        cout=Cout,
    )


def ref_forward(x, p):
    """Pure-JAX reference (same folded params, same bf16-operand / f32-accumulate policy)."""
    f32, bf16 = jnp.float32, jnp.bfloat16
    xb = x.astype(bf16)
    h1 = jax.nn.relu(jnp.einsum("bhwc,cd->bhwd", xb, p["w1f"].astype(bf16),
                                preferred_element_type=f32) + p["b1"])
    dn = lax.conv_dimension_numbers(h1.shape, p["w2f"].shape, ("NHWC", "HWIO", "NHWC"))
    h2 = lax.conv_general_dilated(h1.astype(bf16), p["w2f"].astype(bf16), (1, 1), "SAME",
                                  dimension_numbers=dn,
                                  preferred_element_type=f32) + p["b2"]
    h2 = jax.nn.relu(h2)
    h3 = jnp.einsum("bhwc,cd->bhwd", h2.astype(bf16), p["w3f"].astype(bf16),
                    preferred_element_type=f32) + p["b3"]
    y = jnp.mean(h3, axis=(1, 2))                       # global average pool
    y = jax.nn.relu(y @ p["wfc1"])
    y = jax.nn.sigmoid(y @ p["wfc2"])
    h3 = h3 * y[:, None, None, :]
    sc = jnp.einsum("bhwc,cd->bhwd", xb, p["wscf"].astype(bf16),
                    preferred_element_type=f32) + p["bsc"]
    return jax.nn.relu(h3 + sc)


if __name__ == "__main__":
    key = jax.random.PRNGKey(0)
    kx, kparam = jax.random.split(key)

    B, H, W = 2, 16, 16
    in_channels, out_channels, expansion, reduction = 16, 16, 4, 16   # Cmid=4, Cout=64

    x = jax.random.normal(kx, (B, H, W, in_channels), jnp.float32)
    params = init_params(kparam, in_channels, out_channels,
                         expansion=expansion, reduction=reduction)
    kparams = pack_params(params)

    out = jax.block_until_ready(residual_block(x, kparams))
    ref = ref_forward(x, params)

    assert out.shape == (B, H, W, out_channels * expansion), out.shape
    err = float(jnp.max(jnp.abs(out - ref)))
    if err > 5e-3:
        raise ValueError(f"Pallas kernel mismatch vs reference, max abs err = {err}")
    print("KERNEL_OK")
</pallas_src>

<mosaic_0001>
module attributes {stable_mosaic.version = 11 : i64} {
  func.func @_residual_block_kernel(%arg0: i32, %arg1: memref<1x256x16xbf16, #tpu.memory_space<vmem>>, %arg2: memref<16x256xbf16, #tpu.memory_space<vmem>>, %arg3: memref<1x256xf32, #tpu.memory_space<vmem>>, %arg4: memref<3x384x128xbf16, #tpu.memory_space<vmem>>, %arg5: memref<1x128xf32, #tpu.memory_space<vmem>>, %arg6: memref<128x128xbf16, #tpu.memory_space<vmem>>, %arg7: memref<1x128xf32, #tpu.memory_space<vmem>>, %arg8: memref<128x4xf32, #tpu.memory_space<vmem>>, %arg9: memref<4x128xf32, #tpu.memory_space<vmem>>, %arg10: memref<1x256x128xf32, #tpu.memory_space<vmem>>) attributes {dimension_semantics = [#tpu.dimension_semantics<parallel>], iteration_bounds = array<i64: 2>, scalar_prefetch = 0 : i64, scratch_operands = 0 : i64, tpu.core_type = #tpu.core_type<tc>, window_params = [{transform_indices = @transform_0, window_bounds = array<i64: 1, 256, 16>}, {pipeline_mode = #tpu.pipeline_mode<synchronous>, transform_indices = @transform_1, window_bounds = array<i64: 16, 256>}, {pipeline_mode = #tpu.pipeline_mode<synchronous>, transform_indices = @transform_2, window_bounds = array<i64: 1, 256>}, {pipeline_mode = #tpu.pipeline_mode<synchronous>, transform_indices = @transform_3, window_bounds = array<i64: 3, 384, 128>}, {pipeline_mode = #tpu.pipeline_mode<synchronous>, transform_indices = @transform_4, window_bounds = array<i64: 1, 128>}, {pipeline_mode = #tpu.pipeline_mode<synchronous>, transform_indices = @transform_5, window_bounds = array<i64: 128, 128>}, {pipeline_mode = #tpu.pipeline_mode<synchronous>, transform_indices = @transform_6, window_bounds = array<i64: 1, 128>}, {pipeline_mode = #tpu.pipeline_mode<synchronous>, transform_indices = @transform_7, window_bounds = array<i64: 128, 4>}, {pipeline_mode = #tpu.pipeline_mode<synchronous>, transform_indices = @transform_8, window_bounds = array<i64: 4, 128>}, {transform_indices = @transform_9, window_bounds = array<i64: 1, 256, 128>}]} {
    %c0 = arith.constant 0 : index
    %c0_0 = arith.constant 0 : index
    %c0_1 = arith.constant 0 : index
    %0 = vector.load %arg1[%c0, %c0_0, %c0_1] : memref<1x256x16xbf16, #tpu.memory_space<vmem>>, vector<1x256x16xbf16>
    %1 = vector.shape_cast %0 : vector<1x256x16xbf16> to vector<256x16xbf16>
    %c0_2 = arith.constant 0 : index
    %c0_3 = arith.constant 0 : index
    %2 = vector.load %arg2[%c0_2, %c0_3] : memref<16x256xbf16, #tpu.memory_space<vmem>>, vector<16x256xbf16>
    %cst = arith.constant dense<0.000000e+00> : vector<256x256xf32>
    %3 = tpu.matmul %1, %2, %cst {dimension_numbers = #tpu.dot_dimension_numbers<[1], [0], [0], [1], [0, 0, 1, 1], [], []>} : vector<256x16xbf16>, vector<16x256xbf16>, vector<256x256xf32> -> vector<256x256xf32>
    %c0_4 = arith.constant 0 : index
    %c0_5 = arith.constant 0 : index
    %4 = vector.load %arg3[%c0_4, %c0_5] : memref<1x256xf32, #tpu.memory_space<vmem>>, vector<1x256xf32>
    %5 = vector.broadcast %4 : vector<1x256xf32> to vector<256x256xf32>
    %6 = arith.addf %3, %5 : vector<256x256xf32>
    %7 = vector.extract_strided_slice %6 {offsets = [0, 0], sizes = [256, 128], strides = [1, 1]} : vector<256x256xf32> to vector<256x128xf32>
    %cst_6 = arith.constant 0.000000e+00 : f32
    %8 = vector.broadcast %cst_6 : f32 to vector<256x128xf32>
    %9 = arith.maximumf %7, %8 : vector<256x128xf32>
    %10 = vector.extract_strided_slice %6 {offsets = [0, 128], sizes = [256, 128], strides = [1, 1]} : vector<256x256xf32> to vector<256x128xf32>
    %11 = tpu.iota {dimensions = array<i32: 0>} : vector<256x1xi32>
    %c16_i32 = arith.constant 16 : i32
    %c0_i32 = arith.constant 0 : i32
    %12 = arith.cmpi eq, %c16_i32, %c0_i32 : i32
    %c1_i32 = arith.constant 1 : i32
    %13 = arith.select %12, %c1_i32, %c16_i32 : i32
    %14 = vector.broadcast %13 : i32 to vector<256x1xi32>
    %15 = arith.remsi %11, %14 : vector<256x1xi32>
    %c0_i32_7 = arith.constant 0 : i32
    %16 = vector.broadcast %c0_i32_7 : i32 to vector<256x1xi32>
    %17 = arith.cmpi ne, %15, %16 : vector<256x1xi32>
    %c0_i32_8 = arith.constant 0 : i32
    %18 = vector.broadcast %c0_i32_8 : i32 to vector<256x1xi32>
    %19 = arith.cmpi slt, %15, %18 : vector<256x1xi32>
    %c0_i32_9 = arith.constant 0 : i32
    %20 = arith.cmpi slt, %13, %c0_i32_9 : i32
    %21 = vector.broadcast %20 : i1 to vector<256x1xi1>
    %22 = vector.broadcast %21 : vector<256x1xi1> to vector<256x1xi1>
    %23 = arith.xori %19, %22 : vector<256x1xi1>
    %24 = arith.andi %23, %17 : vector<256x1xi1>
    %25 = vector.broadcast %13 : i32 to vector<256x1xi32>
    %26 = arith.addi %15, %25 : vector<256x1xi32>
    %27 = arith.select %24, %26, %15 : vector<256x1xi1>, vector<256x1xi32>
    %c1_i32_10 = arith.constant 1 : i32
    %28 = vector.broadcast %c1_i32_10 : i32 to vector<256x1xi32>
    %29 = arith.cmpi sge, %27, %28 : vector<256x1xi32>
    %30 = arith.extui %29 : vector<256x1xi1> to vector<256x1xi32>
    %31 = arith.sitofp %30 : vector<256x1xi32> to vector<256x1xf32>
    %c14_i32 = arith.constant 14 : i32
    %32 = vector.broadcast %c14_i32 : i32 to vector<256x1xi32>
    %33 = arith.cmpi sle, %27, %32 : vector<256x1xi32>
    %34 = arith.extui %33 : vector<256x1xi1> to vector<256x1xi32>
    %35 = arith.sitofp %34 : vector<256x1xi32> to vector<256x1xf32>
    %c1_i32_11 = arith.constant 1 : i32
    %36 = tpu.dynamic_rotate %9 by %c1_i32_11 dim 0 : vector<256x128xf32>, i32 -> vector<256x128xf32>
    %37 = vector.broadcast %31 : vector<256x1xf32> to vector<256x128xf32>
    %38 = arith.mulf %36, %37 : vector<256x128xf32>
    %39 = arith.truncf %38 : vector<256x128xf32> to vector<256x128xbf16>
    %c255_i32 = arith.constant 255 : i32
    %40 = tpu.dynamic_rotate %9 by %c255_i32 dim 0 : vector<256x128xf32>, i32 -> vector<256x128xf32>
    %41 = vector.broadcast %35 : vector<256x1xf32> to vector<256x128xf32>
    %42 = arith.mulf %40, %41 : vector<256x128xf32>
    %43 = arith.truncf %42 : vector<256x128xf32> to vector<256x128xbf16>
    %44 = arith.truncf %9 : vector<256x128xf32> to vector<256x128xbf16>
    %45 = tpu.concatenate %39, %44, %43 in 1 : vector<256x128xbf16>, vector<256x128xbf16>, vector<256x128xbf16> -> vector<256x384xbf16>
    %cst_12 = arith.constant 0.000000e+00 : bf16
    %46 = vector.broadcast %cst_12 : bf16 to vector<16x384xbf16>
    %47 = vector.extract_strided_slice %45 {offsets = [0, 0], sizes = [240, 384], strides = [1, 1]} : vector<256x384xbf16> to vector<240x384xbf16>
    %48 = tpu.concatenate %46, %47 in 0 : vector<16x384xbf16>, vector<240x384xbf16> -> vector<256x384xbf16>
    %49 = vector.extract_strided_slice %45 {offsets = [16, 0], sizes = [240, 384], strides = [1, 1]} : vector<256x384xbf16> to vector<240x384xbf16>
    %50 = tpu.concatenate %49, %46 in 0 : vector<240x384xbf16>, vector<16x384xbf16> -> vector<256x384xbf16>
    %c0_13 = arith.constant 0 : index
    %c0_14 = arith.constant 0 : index
    %c0_15 = arith.constant 0 : index
    %51 = vector.load %arg4[%c0_13, %c0_14, %c0_15] : memref<3x384x128xbf16, #tpu.memory_space<vmem>>, vector<1x384x128xbf16>
    %52 = vector.shape_cast %51 : vector<1x384x128xbf16> to vector<384x128xbf16>
    %cst_16 = arith.constant dense<0.000000e+00> : vector<256x128xf32>
    %53 = tpu.matmul %48, %52, %cst_16 {dimension_numbers = #tpu.dot_dimension_numbers<[1], [0], [0], [1], [0, 0, 1, 1], [], []>} : vector<256x384xbf16>, vector<384x128xbf16>, vector<256x128xf32> -> vector<256x128xf32>
    %c1 = arith.constant 1 : index
    %c0_17 = arith.constant 0 : index
    %c0_18 = arith.constant 0 : index
    %54 = vector.load %arg4[%c1, %c0_17, %c0_18] : memref<3x384x128xbf16, #tpu.memory_space<vmem>>, vector<1x384x128xbf16>
    %55 = vector.shape_cast %54 : vector<1x384x128xbf16> to vector<384x128xbf16>
    %cst_19 = arith.constant dense<0.000000e+00> : vector<256x128xf32>
    %56 = tpu.matmul %45, %55, %cst_19 {dimension_numbers = #tpu.dot_dimension_numbers<[1], [0], [0], [1], [0, 0, 1, 1], [], []>} : vector<256x384xbf16>, vector<384x128xbf16>, vector<256x128xf32> -> vector<256x128xf32>
    %57 = arith.addf %53, %56 : vector<256x128xf32>
    %c2 = arith.constant 2 : index
    %c0_20 = arith.constant 0 : index
    %c0_21 = arith.constant 0 : index
    %58 = vector.load %arg4[%c2, %c0_20, %c0_21] : memref<3x384x128xbf16, #tpu.memory_space<vmem>>, vector<1x384x128xbf16>
    %59 = vector.shape_cast %58 : vector<1x384x128xbf16> to vector<384x128xbf16>
    %cst_22 = arith.constant dense<0.000000e+00> : vector<256x128xf32>
    %60 = tpu.matmul %50, %59, %cst_22 {dimension_numbers = #tpu.dot_dimension_numbers<[1], [0], [0], [1], [0, 0, 1, 1], [], []>} : vector<256x384xbf16>, vector<384x128xbf16>, vector<256x128xf32> -> vector<256x128xf32>
    %61 = arith.addf %57, %60 : vector<256x128xf32>
    %c0_23 = arith.constant 0 : index
    %c0_24 = arith.constant 0 : index
    %62 = vector.load %arg5[%c0_23, %c0_24] : memref<1x128xf32, #tpu.memory_space<vmem>>, vector<1x128xf32>
    %63 = vector.broadcast %62 : vector<1x128xf32> to vector<256x128xf32>
    %64 = arith.addf %61, %63 : vector<256x128xf32>
    %cst_25 = arith.constant 0.000000e+00 : f32
    %65 = vector.broadcast %cst_25 : f32 to vector<256x128xf32>
    %66 = arith.maximumf %64, %65 : vector<256x128xf32>
    %67 = arith.truncf %66 : vector<256x128xf32> to vector<256x128xbf16>
    %c0_26 = arith.constant 0 : index
    %c0_27 = arith.constant 0 : index
    %68 = vector.load %arg6[%c0_26, %c0_27] : memref<128x128xbf16, #tpu.memory_space<vmem>>, vector<128x128xbf16>
    %cst_28 = arith.constant dense<0.000000e+00> : vector<256x128xf32>
    %69 = tpu.matmul %67, %68, %cst_28 {dimension_numbers = #tpu.dot_dimension_numbers<[1], [0], [0], [1], [0, 0, 1, 1], [], []>} : vector<256x128xbf16>, vector<128x128xbf16>, vector<256x128xf32> -> vector<256x128xf32>
    %c0_29 = arith.constant 0 : index
    %c0_30 = arith.constant 0 : index
    %70 = vector.load %arg7[%c0_29, %c0_30] : memref<1x128xf32, #tpu.memory_space<vmem>>, vector<1x128xf32>
    %71 = vector.broadcast %70 : vector<1x128xf32> to vector<256x128xf32>
    %72 = arith.addf %69, %71 : vector<256x128xf32>
    %cst_31 = arith.constant dense<0.000000e+00> : vector<128xf32>
    %73 = vector.multi_reduction <add>, %72, %cst_31 [0] : vector<256x128xf32> to vector<128xf32>
    %74 = vector.shape_cast %73 : vector<128xf32> to vector<1x128xf32>
    %cst_32 = arith.constant 2.560000e+02 : f32
    %75 = vector.broadcast %cst_32 : f32 to vector<1x128xf32>
    %76 = arith.divf %74, %75 : vector<1x128xf32>
    %c0_33 = arith.constant 0 : index
    %c0_34 = arith.constant 0 : index
    %77 = vector.load %arg8[%c0_33, %c0_34] : memref<128x4xf32, #tpu.memory_space<vmem>>, vector<128x4xf32>
    %cst_35 = arith.constant dense<0.000000e+00> : vector<1x4xf32>
    %78 = tpu.matmul %76, %77, %cst_35 {dimension_numbers = #tpu.dot_dimension_numbers<[1], [0], [0], [1], [0, 0, 1, 1], [], []>} : vector<1x128xf32>, vector<128x4xf32>, vector<1x4xf32> -> vector<1x4xf32>
    %cst_36 = arith.constant 0.000000e+00 : f32
    %79 = vector.broadcast %cst_36 : f32 to vector<1x4xf32>
    %80 = arith.maximumf %78, %79 : vector<1x4xf32>
    %c0_37 = arith.constant 0 : index
    %c0_38 = arith.constant 0 : index
    %81 = vector.load %arg9[%c0_37, %c0_38] : memref<4x128xf32, #tpu.memory_space<vmem>>, vector<4x128xf32>
    %cst_39 = arith.constant dense<0.000000e+00> : vector<1x128xf32>
    %82 = tpu.matmul %80, %81, %cst_39 {dimension_numbers = #tpu.dot_dimension_numbers<[1], [0], [0], [1], [0, 0, 1, 1], [], []>} : vector<1x4xf32>, vector<4x128xf32>, vector<1x128xf32> -> vector<1x128xf32>
    %83 = arith.negf %82 : vector<1x128xf32>
    %84 = math.exp %83 : vector<1x128xf32>
    %cst_40 = arith.constant 1.000000e+00 : f32
    %85 = vector.broadcast %cst_40 : f32 to vector<1x128xf32>
    %86 = arith.addf %85, %84 : vector<1x128xf32>
    %87 = arith.divf %85, %86 : vector<1x128xf32>
    %88 = vector.broadcast %87 : vector<1x128xf32> to vector<256x128xf32>
    %89 = arith.mulf %72, %88 : vector<256x128xf32>
    %90 = arith.addf %89, %10 : vector<256x128xf32>
    %cst_41 = arith.constant 0.000000e+00 : f32
    %91 = vector.broadcast %cst_41 : f32 to vector<256x128xf32>
    %92 = arith.maximumf %90, %91 : vector<256x128xf32>
    %c0_42 = arith.constant 0 : index
    %c0_43 = arith.constant 0 : index
    %c0_44 = arith.constant 0 : index
    %93 = vector.load %arg10[%c0_42, %c0_43, %c0_44] : memref<1x256x128xf32, #tpu.memory_space<vmem>>, vector<1x256x128xf32>
    %94 = vector.shape_cast %93 : vector<1x256x128xf32> to vector<256x128xf32>
    %95 = vector.shape_cast %92 : vector<256x128xf32> to vector<1x256x128xf32>
    tpu.vector_store %arg10[%c0_42, %c0_43, %c0_44], %95 {strides = array<i32>} : memref<1x256x128xf32, #tpu.memory_space<vmem>>, vector<1x256x128xf32>,
    return
  }
  func.func @transform_0(%arg0: i32) -> (i32, i32, i32) {
    %c0_i32 = arith.constant 0 : i32
    %c0_i32_0 = arith.constant 0 : i32
    %c0_i32_1 = arith.constant 0 : i32
    return %arg0, %c0_i32, %c0_i32_0 : i32, i32, i32
  }
  func.func @transform_1(%arg0: i32) -> (i32, i32) {
    %c0_i32 = arith.constant 0 : i32
    %c0_i32_0 = arith.constant 0 : i32
    %c0_i32_1 = arith.constant 0 : i32
    return %c0_i32, %c0_i32_0 : i32, i32
  }
  func.func @transform_2(%arg0: i32) -> (i32, i32) {
    %c0_i32 = arith.constant 0 : i32
    %c0_i32_0 = arith.constant 0 : i32
    %c0_i32_1 = arith.constant 0 : i32
    return %c0_i32, %c0_i32_0 : i32, i32
  }
  func.func @transform_3(%arg0: i32) -> (i32, i32, i32) {
    %c0_i32 = arith.constant 0 : i32
    %c0_i32_0 = arith.constant 0 : i32
    %c0_i32_1 = arith.constant 0 : i32
    %c0_i32_2 = arith.constant 0 : i32
    return %c0_i32, %c0_i32_0, %c0_i32_1 : i32, i32, i32
  }
  func.func @transform_4(%arg0: i32) -> (i32, i32) {
    %c0_i32 = arith.constant 0 : i32
    %c0_i32_0 = arith.constant 0 : i32
    %c0_i32_1 = arith.constant 0 : i32
    return %c0_i32, %c0_i32_0 : i32, i32
  }
  func.func @transform_5(%arg0: i32) -> (i32, i32) {
    %c0_i32 = arith.constant 0 : i32
    %c0_i32_0 = arith.constant 0 : i32
    %c0_i32_1 = arith.constant 0 : i32
    return %c0_i32, %c0_i32_0 : i32, i32
  }
  func.func @transform_6(%arg0: i32) -> (i32, i32) {
    %c0_i32 = arith.constant 0 : i32
    %c0_i32_0 = arith.constant 0 : i32
    %c0_i32_1 = arith.constant 0 : i32
    return %c0_i32, %c0_i32_0 : i32, i32
  }
  func.func @transform_7(%arg0: i32) -> (i32, i32) {
    %c0_i32 = arith.constant 0 : i32
    %c0_i32_0 = arith.constant 0 : i32
    %c0_i32_1 = arith.constant 0 : i32
    return %c0_i32, %c0_i32_0 : i32, i32
  }
  func.func @transform_8(%arg0: i32) -> (i32, i32) {
    %c0_i32 = arith.constant 0 : i32
    %c0_i32_0 = arith.constant 0 : i32
    %c0_i32_1 = arith.constant 0 : i32
    return %c0_i32, %c0_i32_0 : i32, i32
  }
  func.func @transform_9(%arg0: i32) -> (i32, i32, i32) {
    %c0_i32 = arith.constant 0 : i32
    %c0_i32_0 = arith.constant 0 : i32
    %c0_i32_1 = arith.constant 0 : i32
    return %arg0, %c0_i32, %c0_i32_0 : i32, i32, i32
  }
}

module attributes {stable_mosaic.version = 11 : i64} {
  func.func @_residual_block_kernel(%arg0: i32, %arg1: memref<1x256x16xbf16, #tpu.memory_space<vmem>>, %arg2: memref<16x256xbf16, #tpu.memory_space<vmem>>, %arg3: memref<1x256xf32, #tpu.memory_space<vmem>>, %arg4: memref<3x384x128xbf16, #tpu.memory_space<vmem>>, %arg5: memref<1x128xf32, #tpu.memory_space<vmem>>, %arg6: memref<128x128xbf16, #tpu.memory_space<vmem>>, %arg7: memref<1x128xf32, #tpu.memory_space<vmem>>, %arg8: memref<128x4xf32, #tpu.memory_space<vmem>>, %arg9: memref<4x128xf32, #tpu.memory_space<vmem>>, %arg10: memref<1x256x128xf32, #tpu.memory_space<vmem>>) attributes {dimension_semantics = [#tpu.dimension_semantics<parallel>], iteration_bounds = array<i64: 2>, scalar_prefetch = 0 : i64, scratch_operands = 0 : i64, tpu.core_type = #tpu.core_type<tc>, window_params = [{transform_indices = @transform_0, window_bounds = array<i64: 1, 256, 16>}, {pipeline_mode = #tpu.pipeline_mode<synchronous>, transform_indices = @transform_1, window_bounds = array<i64: 16, 256>}, {pipeline_mode = #tpu.pipeline_mode<synchronous>, transform_indices = @transform_2, window_bounds = array<i64: 1, 256>}, {pipeline_mode = #tpu.pipeline_mode<synchronous>, transform_indices = @transform_3, window_bounds = array<i64: 3, 384, 128>}, {pipeline_mode = #tpu.pipeline_mode<synchronous>, transform_indices = @transform_4, window_bounds = array<i64: 1, 128>}, {pipeline_mode = #tpu.pipeline_mode<synchronous>, transform_indices = @transform_5, window_bounds = array<i64: 128, 128>}, {pipeline_mode = #tpu.pipeline_mode<synchronous>, transform_indices = @transform_6, window_bounds = array<i64: 1, 128>}, {pipeline_mode = #tpu.pipeline_mode<synchronous>, transform_indices = @transform_7, window_bounds = array<i64: 128, 4>}, {pipeline_mode = #tpu.pipeline_mode<synchronous>, transform_indices = @transform_8, window_bounds = array<i64: 4, 128>}, {transform_indices = @transform_9, window_bounds = array<i64: 1, 256, 128>}]} {
    %c0 = arith.constant 0 : index
    %c0_0 = arith.constant 0 : index
    %c0_1 = arith.constant 0 : index
    %0 = vector.load %arg1[%c0, %c0_0, %c0_1] : memref<1x256x16xbf16, #tpu.memory_space<vmem>>, vector<1x256x16xbf16>
    %1 = vector.shape_cast %0 : vector<1x256x16xbf16> to vector<256x16xbf16>
    %c0_2 = arith.constant 0 : index
    %c0_3 = arith.constant 0 : index
    %2 = vector.load %arg2[%c0_2, %c0_3] : memref<16x256xbf16, #tpu.memory_space<vmem>>, vector<16x256xbf16>
    %cst = arith.constant dense<0.000000e+00> : vector<256x256xf32>
    %3 = tpu.matmul %1, %2, %cst {dimension_numbers = #tpu.dot_dimension_numbers<[1], [0], [0], [1], [0, 0, 1, 1], [], []>} : vector<256x16xbf16>, vector<16x256xbf16>, vector<256x256xf32> -> vector<256x256xf32>
    %c0_4 = arith.constant 0 : index
    %c0_5 = arith.constant 0 : index
    %4 = vector.load %arg3[%c0_4, %c0_5] : memref<1x256xf32, #tpu.memory_space<vmem>>, vector<1x256xf32>
    %5 = vector.broadcast %4 : vector<1x256xf32> to vector<256x256xf32>
    %6 = arith.addf %3, %5 : vector<256x256xf32>
    %7 = vector.extract_strided_slice %6 {offsets = [0, 0], sizes = [256, 128], strides = [1, 1]} : vector<256x256xf32> to vector<256x128xf32>
    %cst_6 = arith.constant 0.000000e+00 : f32
    %8 = vector.broadcast %cst_6 : f32 to vector<256x128xf32>
    %9 = arith.maximumf %7, %8 : vector<256x128xf32>
    %10 = vector.extract_strided_slice %6 {offsets = [0, 128], sizes = [256, 128], strides = [1, 1]} : vector<256x256xf32> to vector<256x128xf32>
    %11 = tpu.iota {dimensions = array<i32: 0>} : vector<256x1xi32>
    %c16_i32 = arith.constant 16 : i32
    %c0_i32 = arith.constant 0 : i32
    %12 = arith.cmpi eq, %c16_i32, %c0_i32 : i32
    %c1_i32 = arith.constant 1 : i32
    %13 = arith.select %12, %c1_i32, %c16_i32 : i32
    %14 = vector.broadcast %13 : i32 to vector<256x1xi32>
    %15 = arith.remsi %11, %14 : vector<256x1xi32>
    %c0_i32_7 = arith.constant 0 : i32
    %16 = vector.broadcast %c0_i32_7 : i32 to vector<256x1xi32>
    %17 = arith.cmpi ne, %15, %16 : vector<256x1xi32>
    %c0_i32_8 = arith.constant 0 : i32
    %18 = vector.broadcast %c0_i32_8 : i32 to vector<256x1xi32>
    %19 = arith.cmpi slt, %15, %18 : vector<256x1xi32>
    %c0_i32_9 = arith.constant 0 : i32
    %20 = arith.cmpi slt, %13, %c0_i32_9 : i32
    %21 = vector.broadcast %20 : i1 to vector<256x1xi1>
    %22 = vector.broadcast %21 : vector<256x1xi1> to vector<256x1xi1>
    %23 = arith.xori %19, %22 : vector<256x1xi1>
    %24 = arith.andi %23, %17 : vector<256x1xi1>
    %25 = vector.broadcast %13 : i32 to vector<256x1xi32>
    %26 = arith.addi %15, %25 : vector<256x1xi32>
    %27 = arith.select %24, %26, %15 : vector<256x1xi1>, vector<256x1xi32>
    %c1_i32_10 = arith.constant 1 : i32
    %28 = vector.broadcast %c1_i32_10 : i32 to vector<256x1xi32>
    %29 = arith.cmpi sge, %27, %28 : vector<256x1xi32>
    %30 = arith.extui %29 : vector<256x1xi1> to vector<256x1xi32>
    %31 = arith.sitofp %30 : vector<256x1xi32> to vector<256x1xf32>
    %c14_i32 = arith.constant 14 : i32
    %32 = vector.broadcast %c14_i32 : i32 to vector<256x1xi32>
    %33 = arith.cmpi sle, %27, %32 : vector<256x1xi32>
    %34 = arith.extui %33 : vector<256x1xi1> to vector<256x1xi32>
    %35 = arith.sitofp %34 : vector<256x1xi32> to vector<256x1xf32>
    %c1_i32_11 = arith.constant 1 : i32
    %36 = tpu.dynamic_rotate %9 by %c1_i32_11 dim 0 : vector<256x128xf32>, i32 -> vector<256x128xf32>
    %37 = vector.broadcast %31 : vector<256x1xf32> to vector<256x128xf32>
    %38 = arith.mulf %36, %37 : vector<256x128xf32>
    %39 = arith.truncf %38 : vector<256x128xf32> to vector<256x128xbf16>
    %c255_i32 = arith.constant 255 : i32
    %40 = tpu.dynamic_rotate %9 by %c255_i32 dim 0 : vector<256x128xf32>, i32 -> vector<256x128xf32>
    %41 = vector.broadcast %35 : vector<256x1xf32> to vector<256x128xf32>
    %42 = arith.mulf %40, %41 : vector<256x128xf32>
    %43 = arith.truncf %42 : vector<256x128xf32> to vector<256x128xbf16>
    %44 = arith.truncf %9 : vector<256x128xf32> to vector<256x128xbf16>
    %45 = tpu.concatenate %39, %44, %43 in 1 : vector<256x128xbf16>, vector<256x128xbf16>, vector<256x128xbf16> -> vector<256x384xbf16>
    %cst_12 = arith.constant 0.000000e+00 : bf16
    %46 = vector.broadcast %cst_12 : bf16 to vector<16x384xbf16>
    %47 = vector.extract_strided_slice %45 {offsets = [0, 0], sizes = [240, 384], strides = [1, 1]} : vector<256x384xbf16> to vector<240x384xbf16>
    %48 = tpu.concatenate %46, %47 in 0 : vector<16x384xbf16>, vector<240x384xbf16> -> vector<256x384xbf16>
    %49 = vector.extract_strided_slice %45 {offsets = [16, 0], sizes = [240, 384], strides = [1, 1]} : vector<256x384xbf16> to vector<240x384xbf16>
    %50 = tpu.concatenate %49, %46 in 0 : vector<240x384xbf16>, vector<16x384xbf16> -> vector<256x384xbf16>
    %c0_13 = arith.constant 0 : index
    %c0_14 = arith.constant 0 : index
    %c0_15 = arith.constant 0 : index
    %51 = vector.load %arg4[%c0_13, %c0_14, %c0_15] : memref<3x384x128xbf16, #tpu.memory_space<vmem>>, vector<1x384x128xbf16>
    %52 = vector.shape_cast %51 : vector<1x384x128xbf16> to vector<384x128xbf16>
    %cst_16 = arith.constant dense<0.000000e+00> : vector<256x128xf32>
    %53 = tpu.matmul %48, %52, %cst_16 {dimension_numbers = #tpu.dot_dimension_numbers<[1], [0], [0], [1], [0, 0, 1, 1], [], []>} : vector<256x384xbf16>, vector<384x128xbf16>, vector<256x128xf32> -> vector<256x128xf32>
    %c1 = arith.constant 1 : index
    %c0_17 = arith.constant 0 : index
    %c0_18 = arith.constant 0 : index
    %54 = vector.load %arg4[%c1, %c0_17, %c0_18] : memref<3x384x128xbf16, #tpu.memory_space<vmem>>, vector<1x384x128xbf16>
    %55 = vector.shape_cast %54 : vector<1x384x128xbf16> to vector<384x128xbf16>
    %cst_19 = arith.constant dense<0.000000e+00> : vector<256x128xf32>
    %56 = tpu.matmul %45, %55, %cst_19 {dimension_numbers = #tpu.dot_dimension_numbers<[1], [0], [0], [1], [0, 0, 1, 1], [], []>} : vector<256x384xbf16>, vector<384x128xbf16>, vector<256x128xf32> -> vector<256x128xf32>
    %57 = arith.addf %53, %56 : vector<256x128xf32>
    %c2 = arith.constant 2 : index
    %c0_20 = arith.constant 0 : index
    %c0_21 = arith.constant 0 : index
    %58 = vector.load %arg4[%c2, %c0_20, %c0_21] : memref<3x384x128xbf16, #tpu.memory_space<vmem>>, vector<1x384x128xbf16>
    %59 = vector.shape_cast %58 : vector<1x384x128xbf16> to vector<384x128xbf16>
    %cst_22 = arith.constant dense<0.000000e+00> : vector<256x128xf32>
    %60 = tpu.matmul %50, %59, %cst_22 {dimension_numbers = #tpu.dot_dimension_numbers<[1], [0], [0], [1], [0, 0, 1, 1], [], []>} : vector<256x384xbf16>, vector<384x128xbf16>, vector<256x128xf32> -> vector<256x128xf32>
    %61 = arith.addf %57, %60 : vector<256x128xf32>
    %c0_23 = arith.constant 0 : index
    %c0_24 = arith.constant 0 : index
    %62 = vector.load %arg5[%c0_23, %c0_24] : memref<1x128xf32, #tpu.memory_space<vmem>>, vector<1x128xf32>
    %63 = vector.broadcast %62 : vector<1x128xf32> to vector<256x128xf32>
    %64 = arith.addf %61, %63 : vector<256x128xf32>
    %cst_25 = arith.constant 0.000000e+00 : f32
    %65 = vector.broadcast %cst_25 : f32 to vector<256x128xf32>
    %66 = arith.maximumf %64, %65 : vector<256x128xf32>
    %67 = arith.truncf %66 : vector<256x128xf32> to vector<256x128xbf16>
    %c0_26 = arith.constant 0 : index
    %c0_27 = arith.constant 0 : index
    %68 = vector.load %arg6[%c0_26, %c0_27] : memref<128x128xbf16, #tpu.memory_space<vmem>>, vector<128x128xbf16>
    %cst_28 = arith.constant dense<0.000000e+00> : vector<256x128xf32>
    %69 = tpu.matmul %67, %68, %cst_28 {dimension_numbers = #tpu.dot_dimension_numbers<[1], [0], [0], [1], [0, 0, 1, 1], [], []>} : vector<256x128xbf16>, vector<128x128xbf16>, vector<256x128xf32> -> vector<256x128xf32>
    %c0_29 = arith.constant 0 : index
    %c0_30 = arith.constant 0 : index
    %70 = vector.load %arg7[%c0_29, %c0_30] : memref<1x128xf32, #tpu.memory_space<vmem>>, vector<1x128xf32>
    %71 = vector.broadcast %70 : vector<1x128xf32> to vector<256x128xf32>
    %72 = arith.addf %69, %71 : vector<256x128xf32>
    %cst_31 = arith.constant dense<0.000000e+00> : vector<128xf32>
    %73 = vector.multi_reduction <add>, %72, %cst_31 [0] : vector<256x128xf32> to vector<128xf32>
    %74 = vector.shape_cast %73 : vector<128xf32> to vector<1x128xf32>
    %cst_32 = arith.constant 2.560000e+02 : f32
    %75 = vector.broadcast %cst_32 : f32 to vector<1x128xf32>
    %76 = arith.divf %74, %75 : vector<1x128xf32>
    %c0_33 = arith.constant 0 : index
    %c0_34 = arith.constant 0 : index
    %77 = vector.load %arg8[%c0_33, %c0_34] : memref<128x4xf32, #tpu.memory_space<vmem>>, vector<128x4xf32>
    %cst_35 = arith.constant dense<0.000000e+00> : vector<1x4xf32>
    %78 = tpu.matmul %76, %77, %cst_35 {dimension_numbers = #tpu.dot_dimension_numbers<[1], [0], [0], [1], [0, 0, 1, 1], [], []>} : vector<1x128xf32>, vector<128x4xf32>, vector<1x4xf32> -> vector<1x4xf32>
    %cst_36 = arith.constant 0.000000e+00 : f32
    %79 = vector.broadcast %cst_36 : f32 to vector<1x4xf32>
    %80 = arith.maximumf %78, %79 : vector<1x4xf32>
    %c0_37 = arith.constant 0 : index
    %c0_38 = arith.constant 0 : index
    %81 = vector.load %arg9[%c0_37, %c0_38] : memref<4x128xf32, #tpu.memory_space<vmem>>, vector<4x128xf32>
    %cst_39 = arith.constant dense<0.000000e+00> : vector<1x128xf32>
    %82 = tpu.matmul %80, %81, %cst_39 {dimension_numbers = #tpu.dot_dimension_numbers<[1], [0], [0], [1], [0, 0, 1, 1], [], []>} : vector<1x4xf32>, vector<4x128xf32>, vector<1x128xf32> -> vector<1x128xf32>
    %83 = arith.negf %82 : vector<1x128xf32>
    %84 = math.exp %83 : vector<1x128xf32>
    %cst_40 = arith.constant 1.000000e+00 : f32
    %85 = vector.broadcast %cst_40 : f32 to vector<1x128xf32>
    %86 = arith.addf %85, %84 : vector<1x128xf32>
    %87 = arith.divf %85, %86 : vector<1x128xf32>
    %88 = vector.broadcast %87 : vector<1x128xf32> to vector<256x128xf32>
    %89 = arith.mulf %72, %88 : vector<256x128xf32>
    %90 = arith.addf %89, %10 : vector<256x128xf32>
    %cst_41 = arith.constant 0.000000e+00 : f32
    %91 = vector.broadcast %cst_41 : f32 to vector<256x128xf32>
    %92 = arith.maximumf %90, %91 : vector<256x128xf32>
    %c0_42 = arith.constant 0 : index
    %c0_43 = arith.constant 0 : index
    %c0_44 = arith.constant 0 : index
    %93 = vector.load %arg10[%c0_42, %c0_43, %c0_44] : memref<1x256x128xf32, #tpu.memory_space<vmem>>, vector<1x256x128xf32>
    %94 = vector.shape_cast %93 : vector<1x256x128xf32> to vector<256x128xf32>
    %95 = vector.shape_cast %92 : vector<256x128xf32> to vector<1x256x128xf32>
    tpu.vector_store %arg10[%c0_42, %c0_43, %c0_44], %95 {strides = array<i32>} : memref<1x256x128xf32, #tpu.memory_space<vmem>>, vector<1x256x128xf32>,
    return
  }
  func.func @transform_0(%arg0: i32) -> (i32, i32, i32) {
    %c0_i32 = arith.constant 0 : i32
    %c0_i32_0 = arith.constant 0 : i32
    %c0_i32_1 = arith.constant 0 : i32
    return %arg0, %c0_i32, %c0_i32_0 : i32, i32, i32
  }
  func.func @transform_1(%arg0: i32) -> (i32, i32) {
    %c0_i32 = arith.constant 0 : i32
    %c0_i32_0 = arith.constant 0 : i32
    %c0_i32_1 = arith.constant 0 : i32
    return %c0_i32, %c0_i32_0 : i32, i32
  }
  func.func @transform_2(%arg0: i32) -> (i32, i32) {
    %c0_i32 = arith.constant 0 : i32
    %c0_i32_0 = arith.constant 0 : i32
    %c0_i32_1 = arith.constant 0 : i32
    return %c0_i32, %c0_i32_0 : i32, i32
  }
  func.func @transform_3(%arg0: i32) -> (i32, i32, i32) {
    %c0_i32 = arith.constant 0 : i32
    %c0_i32_0 = arith.constant 0 : i32
    %c0_i32_1 = arith.constant 0 : i32
    %c0_i32_2 = arith.constant 0 : i32
    return %c0_i32, %c0_i32_0, %c0_i32_1 : i32, i32, i32
  }
  func.func @transform_4(%arg0: i32) -> (i32, i32) {
    %c0_i32 = arith.constant 0 : i32
    %c0_i32_0 = arith.constant 0 : i32
    %c0_i32_1 = arith.constant 0 : i32
    return %c0_i32, %c0_i32_0 : i32, i32
  }
  func.func @transform_5(%arg0: i32) -> (i32, i32) {
    %c0_i32 = arith.constant 0 : i32
    %c0_i32_0 = arith.constant 0 : i32
    %c0_i32_1 = arith.constant 0 : i32
    return %c0_i32, %c0_i32_0 : i32, i32
  }
  func.func @transform_6(%arg0: i32) -> (i32, i32) {
    %c0_i32 = arith.constant 0 : i32
    %c0_i32_0 = arith.constant 0 : i32
    %c0_i32_1 = arith.constant 0 : i32
    return %c0_i32, %c0_i32_0 : i32, i32
  }
  func.func @transform_7(%arg0: i32) -> (i32, i32) {
    %c0_i32 = arith.constant 0 : i32
    %c0_i32_0 = arith.constant 0 : i32
    %c0_i32_1 = arith.constant 0 : i32
    return %c0_i32, %c0_i32_0 : i32, i32
  }
  func.func @transform_8(%arg0: i32) -> (i32, i32) {
    %c0_i32 = arith.constant 0 : i32
    %c0_i32_0 = arith.constant 0 : i32
    %c0_i32_1 = arith.constant 0 : i32
    return %c0_i32, %c0_i32_0 : i32, i32
  }
  func.func @transform_9(%arg0: i32) -> (i32, i32, i32) {
    %c0_i32 = arith.constant 0 : i32
    %c0_i32_0 = arith.constant 0 : i32
    %c0_i32_1 = arith.constant 0 : i32
    return %arg0, %c0_i32, %c0_i32_0 : i32, i32, i32
  }
}

</mosaic_0001>

<bundles_post_ra>
// kernel: tpu_custom_call.1
= control target key start
LH: loop header
LB: loop body
LE: loop exit
PB: predicated region body
PF: predicated region fallthrough
CT: control target
= control target key end

     0   :  { %14 = vsyncpa [#allocation3], 0  ;;  %s6469_s0 = inlined_call_operand.vmem [shape: bf16[2,256,16], index: 0, kind: input, shape index: {}]   ;;  %s6470_s1 = inlined_call_operand.vmem [shape: bf16[16,256], index: 1, kind: input, shape index: {}]   ;;  %s6471_s2 = inlined_call_operand.vmem [shape: f32[1,256], index: 2, kind: input, shape index: {}]   ;;  %s6472_s3 = inlined_call_operand.hbm [shape: bf16[3,384,128], index: 3, kind: input, shape index: {}]   ;;  %s6473_s4 = inlined_call_operand.vmem [shape: f32[1,128], index: 4, kind: input, shape index: {}]   ;;  %s6474_s5 = inlined_call_operand.vmem [shape: bf16[128,128], index: 5, kind: input, shape index: {}]   ;;  %s6475_s6 = inlined_call_operand.vmem [shape: f32[1,128], index: 6, kind: input, shape index: {}]   ;;  %s6476_s7 = inlined_call_operand.vmem [shape: f32[128,4], index: 7, kind: input, shape index: {}]   ;;  %s6477_s8 = inlined_call_operand.vmem [shape: f32[4,128], index: 8, kind: input, shape index: {}]   ;;  %s6478_s9 = inlined_call_operand.hbm [shape: f32[2,256,128], index: 9, kind: output, shape index: {}]  }
   0x1   :  { %15 = vsyncpa [#allocation4], 0 }
   0x2   :  { %17 = vsyncpa [#allocation4 + $0x1], 0  ;;  %s4721_s30 = smov 0   ;;  %s4723_s10 = smov 0  }
   0x3   :  { %s4725_s11 = smov 0   ;;  %s4727_s12 = smov 0  }
   0x4 LB: > { %s4742_s13 = sadd.s32 4294967295, %s4661_s12   ;;  %s3926_s14 = sadd.s32 4294967294, %s4661_s12   ;;  %s4661_s12 = sphi %s4727_s12, %s6731_s12   ;;  %s4657_s11 = sphi %s4725_s11, %s6730_s11   ;;  %s4653_s10 = sphi %s4723_s10, %s6729_s10   ;;  %s4649_s30 = sphi %s4721_s30, %s6728_s30  }
   0x5   : > { %s4746_s15 = sadd.s32 1, %s4661_s12   ;;  %s224_s16 = sadd.s32 1, %s4657_s11 }
   0x6   : > { %s221_s17 = ssub.s32 %s4661_s12, %s4746_s15  ;;  %p234_p0 = scmp.ne.s32.totalorder %s4657_s11, %s4653_s10 }
   0x7   : > { %p222_p1 = scmp.eq.s32.totalorder %s221_s17, 0  ;;  %p235_p2 = scmp.eq.s32.totalorder %s4742_s13, 1 }
   0x8   : > { %p240_p3 = scmp.ne.s32.totalorder %s4653_s10, %s4649_s30  ;;  %p241_p4 = scmp.eq.s32.totalorder %s3926_s14, 1 }
   0x9   : > { %s4757_s18 = scalar_select %p222_p1, %s4657_s11, %s224_s16  }
   0xa   : > { %p4759_p5 = por %p235_p2, %p234_p0  ;;  %p4763_p6 = por %p241_p4, %p240_p3 }
   0xb   : > { %p3927_p7 = scmp.ge.s32.totalorder %s4661_s12, 1  ;;  %p248_p8 = scmp.lt.s32.totalorder %s4661_s12, 3 }
   0xc   : > { %p4513_p9 = scmp.eq.s32.totalorder %s4742_s13, 0  ;;  %s265_s23 = sshll.u32 %s6472_s3, 4  ;;  %s266_s23 = int_to_ptr.hbm [resolvable:$true] %s265_s23 }
   0xd   : > { %p249_p10 = pnand %p3927_p7, %p248_p8  ;;  %s4663_s24 = smov [#allocation2]  }
   0xe   : > { %s267_s25 = sshll.u32 %s4663_s24, 4  ;;  %s4664_s26 = smov 64   ;;  %s268_s25 = int_to_ptr.vmem [resolvable:$true] %s267_s25 }
   0xf   : > { %p4505_p11 = pneg %p249_p10  ;;  %s4665_s27 = smov 4  }
  0x10   : > { %306 = sbr.rel (%p249_p10) target bundleno = 1804 (0x70c), region = 56 }
  0x11   : > { %p4506_p12 = pnand %p4513_p9, %p4505_p11 }
  0x13   : > { %4508 = dma.hbm_to_vmem [thread:$0]  (!%p4506_p12), %s266_s23, 9216, %s268_s25, [#allocation3], %s4664_s26, %s4664_s26, %s4665_s27  }
  0x15   : > { %4640 = dma.done.wait (%p4513_p9), [#allocation3], 9216  }
  0x16   : > { %4642 = vsyncadd (%p4513_p9), [#allocation3], 4294958080  ;;  %p343_p13 = scmp.lt.s32.totalorder %s4742_s13, 1  ;;  %v4001_v0 = vld [vmem:[%s6470_s1] sm:$0xf]  ;;  %vm479_vm0 = vcmask 130048   ;;  %v738_v27 = vlaneseq }
  0x17   : > { %v4417_v1 = vld [vmem:[%s6470_s1 + $0x4] sm:$0xf0]  ;;  %v4457_v9 = vld [vmem:[#allocation2 + $0x138] sm:$0xff]  ;;  %v4416_v10 = vld [vmem:[%s6470_s1 + $0x4] sm:$0xf]  ;;  %v6481_v53 = vmov 0.0  }
  0x18   : > { %s344_s28 = scalar_select %p343_p13, %s4742_s13, 1  ;;  %v4002_v2 = vor.u32 %v4417_v1, %v4001_v0  ;;  %v4003_v11 = vld [vmem:[%s6470_s1 + $0x8] sm:$0xf0]  ;;  %2255 = vmatpush.bf16.msra.mxu3 %v4457_v9  ;;  %v4456_v13 = vld [vmem:[#allocation2 + $0x130] sm:$0xff]  ;;  %v4454_v15 = vld [vmem:[#allocation2 + $0x120] sm:$0xff]  ;;  %v4842_v30 = vshrl.u32 %v738_v27, 7 }
  0x19   : > { %v4006_v12 = vor.u32 %v4416_v10, %v4003_v11  ;;  %v4455_v14 = vld [vmem:[#allocation2 + $0x128] sm:$0xff]  ;;  %v4453_v17 = vld [vmem:[#allocation2 + $0x118] sm:$0xff]  ;;  %v4452_v18 = vld [vmem:[#allocation2 + $0x110] sm:$0xff]  ;;  %s340_s27 = sand.u32 1, %s4653_s10   ;;  %s4498_s14 = sshll.u32 %s4742_s13, 8 }
  0x1a   : > { %s4399_s29 = sshll.u32 %s344_s28, 7  ;;  %535 = vmatpush.bf16.msra.mxu0 %v4002_v2  ;;  %v4451_v19 = vld [vmem:[#allocation2 + $0x108] sm:$0xff]  ;;  %v4450_v20 = vld [vmem:[#allocation2 + $0x100] sm:$0xff]  ;;  %v740_v32 = vadd.s32 8, %v4842_v30  ;;  %vm1379_vm1 = vcmp.lt.s32.totalorder %v4842_v30, 1  ;;  %v741_v35 = vadd.s32 16, %v4842_v30 }
  0x1b   : > { %s4784_s17 = scalar_lea.vmem %s6469_s0, %s4399_s29  ;;  %624 = vmatpush.bf16.msra.mxu1 %v4006_v12  ;;  %v383_v22 = vld [vmem:[%s6471_s2] sm:$0x3]  ;;  %vm1508_vm2 = vcmp.lt.s32.totalorder %v4842_v30, 7  ;;  %v742_v0 = vadd.s32 24, %v4842_v30  ;;  %s3932_s28 = sshll.u32 %s340_s27, 8 }
  0x1c   : > { %v4400_v3 = vld [vmem:[%s4784_s17] sm:$0xff]  ;;  %v4401_v4 = vld [vmem:[%s4784_s17 + $0x8] sm:$0xff]  ;;  %v4402_v5 = vld [vmem:[%s4784_s17 + $0x10] sm:$0xff]  ;;  %2256 = vmatpush.bf16.msra.mxu3 %v4456_v13  ;;  %v4832_v23 = vperm.slane %v383_v22, 0  ;;  %v782_v39 = vand.u32 15, %v740_v32  ;;  %v789_v45 = vand.u32 15, %v741_v35 }
  0x1d   : > { %4007 = vmatmul.msk.bf16.vlgmr.msra.gmra.mxu0 %vm479_vm0, %v4400_v3  ;;  %v4403_v6 = vld [vmem:[%s4784_s17 + $0x18] sm:$0xff]  ;;  %v4801_v7 = vld [vmem:[%s4784_s17 + $0x20] sm:$0xff]  ;;  %v4806_v8 = vld [vmem:[%s4784_s17 + $0x28] sm:$0xff]  ;;  %s6321_s29 = scalar_lea.vmem [#allocation5], %s3932_s28  ;;  %s3837_s23 = scalar_lea.sflag [#allocation4], %s340_s27 }
  0x1e   : > { %4023 = vmatmul.msk.bf16.vlgmr.msra.gmra.mxu1 %vm479_vm0, %v4400_v3  ;;  %v4818_v16 = vld [vmem:[%s4784_s17 + $0x30] sm:$0xff]  ;;  %v4824_v21 = vld [vmem:[%s4784_s17 + $0x38] sm:$0xff]  ;;  %v4835_v24 = vld [vmem:[%s4784_s17 + $0x40] sm:$0xff]  ;;  %vm1252_vm3 = vcmp.le.s32.totalorder %v782_v39, 14  ;;  %vm1157_vm4 = vcmp.ge.s32.totalorder %v789_v45, 1  ;;  %s3849_s21 = sshll.u32 %s6321_s29, 4  ;;  %s3850_s21 = int_to_ptr.vmem [resolvable:$true] %s3849_s21 }
  0x1f   : > { %v4853_v40 = vld [vmem:[%s4784_s17 + $0x48] sm:$0xff]  ;;  %v4055_v54 = vsel %vm1252_vm3, 1.0, %v6481_v53  ;;  %v4040_v57 = vsel %vm1157_vm4, 1.0, %v6481_v53 }
  0x20   : > { %2257 = vmatpush.bf16.msra.mxu3 %v4455_v14  ;;  %v4887_v14 = vld [vmem:[%s4784_s17 + $0x50] sm:$0xff] }
  0x24   : > { %2258 = vmatpush.bf16.msra.mxu3 %v4454_v15 }
  0x28   : > { %2259 = vmatpush.bf16.msra.mxu3 %v4453_v17 }
  0x2c   : > { %2260 = vmatpush.bf16.msra.mxu3 %v4452_v18 }
  0x2d   : > { %4008 = vmatmul.msk.bf16.gmra.mxu0 %vm479_vm0, %v4401_v4 }
  0x2e   : > { %4024 = vmatmul.msk.bf16.gmra.mxu1 %vm479_vm0, %v4401_v4 }
  0x30   : > { %2261 = vmatpush.bf16.msra.mxu3 %v4451_v19 }
  0x34   : > { %2262 = vmatpush.bf16.msra.mxu3 %v4450_v20 }
  0x3d   : > { %4009 = vmatmul.msk.bf16.gmra.mxu0 %vm479_vm0, %v4402_v5 }
  0x3e   : > { %4025 = vmatmul.msk.bf16.gmra.mxu1 %vm479_vm0, %v4402_v5 }
  0x4d   : > { %4010 = vmatmul.msk.bf16.gmra.mxu0 %vm479_vm0, %v4403_v6 }
  0x4e   : > { %4026 = vmatmul.msk.bf16.gmra.mxu1 %vm479_vm0, %v4403_v6  ;;  %v743_v6 = vadd.s32 32, %v4842_v30 }
  0x5d   : > { %4011 = vmatmul.msk.bf16.gmra.mxu0 %vm479_vm0, %v4801_v7 }
  0x5e   : > { %4027 = vmatmul.msk.bf16.gmra.mxu1 %vm479_vm0, %v4801_v7  ;;  %v796_v7 = vand.u32 15, %v742_v0 }
  0x60   : > { %vm1254_vm5 = vcmp.le.s32.totalorder %v796_v7, 14 }
  0x6d   : > { %4012 = vmatmul.msk.bf16.gmra.mxu0 %vm479_vm0, %v4806_v8 }
  0x6e   : > { %4028 = vmatmul.msk.bf16.gmra.mxu1 %vm479_vm0, %v4806_v8 }
  0x7d   : > { %4013 = vmatmul.msk.bf16.gmra.mxu0 %vm479_vm0, %v4818_v16 }
  0x7e   : > { %4029 = vmatmul.msk.bf16.gmra.mxu1 %vm479_vm0, %v4818_v16 }
  0x8d   : > { %4014 = vmatmul.msk.bf16.gmra.mxu0 %vm479_vm0, %v4824_v21 }
  0x8e   : > { %4030 = vmatmul.msk.bf16.gmra.mxu1 %vm479_vm0, %v4824_v21 }
  0x9a   : > { %v537_v25 = vpop.f32.mrf.mxu0 }
  0x9b   : > { %v538_v26 = vadd.f32 %v537_v25, %v4832_v23  ;;  %v803_v25 = vand.u32 15, %v743_v6 }
  0x9d   : > { %4015 = vmatmul.msk.bf16.gmra.mxu0 %vm479_vm0, %v4835_v24  ;;  %v4840_v28 = vmax.f32 %v538_v26, 0.0  ;;  %vm1159_vm6 = vcmp.ge.s32.totalorder %v803_v25, 1 }
  0x9e   : > { %v4041_v39 = vsel %vm1159_vm6, 1.0, %v6481_v53  ;;  %4031 = vmatmul.msk.bf16.gmra.mxu1 %vm479_vm0, %v4835_v24  ;;  %v751_v24 = vadd.s32 96, %v4842_v30 }
  0x9f   : > { %v1605_v34 = vpack.c.bf16 %v4840_v28, %v4840_v28  ;;  %v6480_v36 = vrot.slane %v4840_v28, 7  ;;  %v6479_v49 = vrot.slane %v4840_v28, 1 }
  0xa1   : > { %v1765_v41 = vunpack.c.l.b16 %v1605_v34 }
  0xa2   : > { %v539_v29 = vpop.f32.mrf.mxu0 }
  0xa3   : > { %v540_v31 = vadd.f32 %v539_v29, %v4832_v23 }
  0xa5   : > { %v707_v33 = vmax.f32 %v540_v31, 0.0 }
  0xa7   : > { %v1348_v37 = vrot.slane %v707_v33, 7  ;;  %v1606_v38 = vpack.c.bf16 %v707_v33, %v707_v33  ;;  %v1477_v46 = vrot.slane %v707_v33, 1 }
  0xa9   : > { %v1766_v42 = vunpack.c.l.b16 %v1606_v38  ;;  %v4859_v43 = vsel %vm1379_vm1, %v6480_v36, %v1348_v37  ;;  %v1539_v55 = vsel %vm1508_vm2, %v6479_v49, %v1477_v46 }
  0xaa   : > { %v542_v44 = vpop.f32.mrf.mxu0  ;;  %v1573_v61 = vpack.c.bf16 %v1539_v55, %v1539_v55 }
  0xab   : > { %v543_v47 = vadd.f32 %v542_v44, %v4832_v23  ;;  %v4862_v48 = vpack.c.b16 %v1766_v42, %v1765_v41 }
  0xac   : > { %v1861_v4 = vunpack.c.l.b16 %v1573_v61 }
  0xad   : > { %6532 = vst [vmem:[#allocation8_spill] sm:$0xff] %v4862_v48  ;;  %v708_v50 = vmax.f32 %v543_v47, 0.0  ;;  %4016 = vmatmul.msk.bf16.gmra.mxu0 %vm479_vm0, %v4853_v40  ;;  %2263 = vmatmul.bf16.vlgmr.msra.gmra.mxu3 %v4862_v48 }
  0xae   : > { %4032 = vmatmul.msk.bf16.gmra.mxu1 %vm479_vm0, %v4853_v40 }
  0xaf   : > { %v1349_v51 = vrot.slane %v708_v50, 7  ;;  %v1478_v52 = vrot.slane %v708_v50, 1  ;;  %v1607_v2 = vpack.c.bf16 %v708_v50, %v708_v50  ;;  %v744_v50 = vadd.s32 40, %v4842_v30 }
  0xb1   : > { %v1538_v56 = vsel %vm1508_vm2, %v1477_v46, %v1478_v52  ;;  %v1409_v58 = vsel %vm1379_vm1, %v1348_v37, %v1349_v51  ;;  %v1767_v15 = vunpack.c.l.b16 %v1607_v2  ;;  %v4056_v37 = vsel %vm1254_vm5, 1.0, %v6481_v53 }
  0xb2   : > { %v544_v59 = vpop.f32.mrf.mxu0  ;;  %v1542_v60 = vmul.f32 %v4055_v54, %v1538_v56  ;;  %v1414_v1 = vmul.f32 %v4040_v57, %v1409_v58  ;;  %v745_v57 = vadd.s32 48, %v4842_v30  ;;  %v810_v8 = vand.u32 15, %v744_v50 }
  0xb3   : > { %v545_v62 = vadd.f32 %v544_v59, %v4832_v23 }
  0xb4   : > { %v1574_v63 = vpack.c.bf16 %v1542_v60, %v1542_v60  ;;  %v1446_v13 = vpack.c.bf16 %v1414_v1, %v1414_v1  ;;  %v817_v6 = vand.u32 15, %v745_v57  ;;  %vm1256_vm7 = vcmp.le.s32.totalorder %v810_v8, 14 }
  0xb5   : > { %v709_v3 = vmax.f32 %v545_v62, 0.0 }
  0xb6   : > { %v1862_v5 = vunpack.c.l.b16 %v1574_v63  ;;  %v1671_v29 = vunpack.c.l.b16 %v1446_v13  ;;  %v4915_v63 = vld [vmem:[%s4784_s17 + $0x58] sm:$0xff]  ;;  %vm1161_vm8 = vcmp.ge.s32.totalorder %v817_v6, 1 }
  0xb7   : > { %v1350_v9 = vrot.slane %v709_v3, 7  ;;  %v1479_v10 = vrot.slane %v709_v3, 1  ;;  %v1608_v11 = vpack.c.bf16 %v709_v3, %v709_v3 }
  0xb8   : > { %v4884_v12 = vpack.c.b16 %v1862_v5, %v1861_v4 }
  0xb9   : > { %v1768_v17 = vunpack.c.l.b16 %v1608_v11  ;;  %v1537_v18 = vsel %vm1508_vm2, %v1478_v52, %v1479_v10  ;;  %v1408_v19 = vsel %vm1379_vm1, %v1349_v51, %v1350_v9 }
  0xba   : > { %v547_v20 = vpop.f32.mrf.mxu0  ;;  %v1447_v22 = vpack.c.bf16 %v1408_v19, %v1408_v19  ;;  %v1575_v45 = vpack.c.bf16 %v1537_v18, %v1537_v18  ;;  %v4057_v19 = vsel %vm1256_vm7, 1.0, %v6481_v53 }
  0xbb   : > { %v548_v26 = vadd.f32 %v547_v20, %v4832_v23  ;;  %v4894_v27 = vpack.c.b16 %v1768_v17, %v1767_v15 }
  0xbc   : > { %v1672_v31 = vunpack.c.l.b16 %v1447_v22  ;;  %v1863_v55 = vunpack.c.l.b16 %v1575_v45  ;;  %v4042_v22 = vsel %vm1161_vm8, 1.0, %v6481_v53 }
  0xbd   : > { %6533 = vst [vmem:[#allocation9_spill] sm:$0xff] %v4894_v27  ;;  %v710_v32 = vmax.f32 %v548_v26, 0.0  ;;  %4017 = vmatmul.msk.bf16.gmra.mxu0 %vm479_vm0, %v4887_v14  ;;  %2268 = vmatmul.bf16.gmra.mxu3 %v4894_v27 }
  0xbe   : > { %v4899_v33 = vpack.c.b16 %v1672_v31, %v1671_v29  ;;  %4033 = vmatmul.msk.bf16.gmra.mxu1 %vm479_vm0, %v4887_v14 }
  0xbf   : > { %v1351_v34 = vrot.slane %v710_v32, 7  ;;  %v1480_v35 = vrot.slane %v710_v32, 1  ;;  %v1609_v52 = vpack.c.bf16 %v710_v32, %v710_v32 }
  0xc1   : > { %v1536_v38 = vsel %vm1508_vm2, %v1479_v10, %v1480_v35  ;;  %v1407_v41 = vsel %vm1379_vm1, %v1350_v9, %v1351_v34  ;;  %v1769_v0 = vunpack.c.l.b16 %v1609_v52  ;;  %v4943_v52 = vld [vmem:[%s4784_s17 + $0x60] sm:$0xff] }
  0xc2   : > { %v549_v42 = vpop.f32.mrf.mxu0  ;;  %v1544_v44 = vmul.f32 %v4056_v37, %v1536_v38  ;;  %v1416_v51 = vmul.f32 %v4041_v39, %v1407_v41 }
  0xc3   : > { %v550_v46 = vadd.f32 %v549_v42, %v4832_v23 }
  0xc4   : > { %v1576_v47 = vpack.c.bf16 %v1544_v44, %v1544_v44  ;;  %v1448_v62 = vpack.c.bf16 %v1416_v51, %v1416_v51  ;;  %v747_v44 = vadd.s32 64, %v4842_v30 }
  0xc5   : > { %v711_v54 = vmax.f32 %v550_v46, 0.0 }
  0xc6   : > { %v1864_v56 = vunpack.c.l.b16 %v1576_v47  ;;  %v1673_v11 = vunpack.c.l.b16 %v1448_v62 }
  0xc7   : > { %v1352_v58 = vrot.slane %v711_v54, 7  ;;  %v1481_v59 = vrot.slane %v711_v54, 1  ;;  %v1610_v60 = vpack.c.bf16 %v711_v54, %v711_v54 }
  0xc8   : > { %v4912_v61 = vpack.c.b16 %v1864_v56, %v1863_v55 }
  0xc9   : > { %v1770_v1 = vunpack.c.l.b16 %v1610_v60  ;;  %v1535_v2 = vsel %vm1508_vm2, %v1480_v35, %v1481_v59  ;;  %v1406_v3 = vsel %vm1379_vm1, %v1351_v34, %v1352_v58  ;;  %v746_v35 = vadd.s32 56, %v4842_v30 }
  0xca   : > { %6534 = vst [vmem:[#allocation10_spill] sm:$0xff] %v4912_v61  ;;  %v552_v4 = vpop.f32.mrf.mxu0  ;;  %v1449_v5 = vpack.c.bf16 %v1406_v3, %v1406_v3  ;;  %v1577_v31 = vpack.c.bf16 %v1535_v2, %v1535_v2  ;;  %v831_v60 = vand.u32 15, %v747_v44 }
  0xcb   : > { %v553_v9 = vadd.f32 %v552_v4, %v4832_v23  ;;  %v4922_v10 = vpack.c.b16 %v1770_v1, %v1769_v0  ;;  %v824_v16 = vand.u32 15, %v746_v35  ;;  %v4465_v0 = vld [vmem:[#allocation2 + $0x178] sm:$0xff] }
  0xcc   : > { %v1674_v7 = vunpack.c.l.b16 %v1449_v5  ;;  %v1865_v41 = vunpack.c.l.b16 %v1577_v31  ;;  %2344 = vmatpush.bf16.msrb.mxu0 %v4465_v0  ;;  %vm1163_vm10 = vcmp.ge.s32.totalorder %v831_v60, 1 }
  0xcd   : > { %6535 = vst [vmem:[#allocation11_spill] sm:$0xff] %v4922_v10  ;;  %v712_v13 = vmax.f32 %v553_v9, 0.0  ;;  %4018 = vmatmul.msk.bf16.gmra.mxu0 %vm479_vm0, %v4915_v63  ;;  %2273 = vmatmul.bf16.gmra.mxu3 %v4922_v10  ;;  %vm1258_vm9 = vcmp.le.s32.totalorder %v824_v16, 14 }
  0xce   : > { %v4927_v15 = vpack.c.b16 %v1674_v7, %v1673_v11  ;;  %v4058_v9 = vsel %vm1258_vm9, 1.0, %v6481_v53  ;;  %v4464_v11 = vld [vmem:[#allocation2 + $0x170] sm:$0xff]  ;;  %4034 = vmatmul.msk.bf16.gmra.mxu1 %vm479_vm0, %v4915_v63 }
  0xcf   : > { %v1353_v17 = vrot.slane %v712_v13, 7  ;;  %v1482_v18 = vrot.slane %v712_v13, 1  ;;  %v1611_v38 = vpack.c.bf16 %v712_v13, %v712_v13  ;;  %v4043_v13 = vsel %vm1163_vm10, 1.0, %v6481_v53 }
  0xd0   : > { %2345 = vmatpush.bf16.msrb.mxu0 %v4464_v11 }
  0xd1   : > { %v1534_v20 = vsel %vm1508_vm2, %v1481_v59, %v1482_v18  ;;  %v1405_v25 = vsel %vm1379_vm1, %v1352_v58, %v1353_v17  ;;  %v1771_v54 = vunpack.c.l.b16 %v1611_v38  ;;  %v749_v38 = vadd.s32 80, %v4842_v30 }
  0xd2   : > { %v554_v26 = vpop.f32.mrf.mxu0  ;;  %v1546_v29 = vmul.f32 %v4057_v19, %v1534_v20  ;;  %v1418_v37 = vmul.f32 %v4042_v22, %v1405_v25  ;;  %v4463_v25 = vld [vmem:[#allocation2 + $0x168] sm:$0xff] }
  0xd3   : > { %v555_v32 = vadd.f32 %v554_v26, %v4832_v23 }
  0xd4   : > { %v1578_v34 = vpack.c.bf16 %v1546_v29, %v1546_v29  ;;  %v1450_v51 = vpack.c.bf16 %v1418_v37, %v1418_v37  ;;  %v748_v29 = vadd.s32 72, %v4842_v30  ;;  %2346 = vmatpush.bf16.msrb.mxu0 %v4463_v25 }
  0xd5   : > { %v713_v39 = vmax.f32 %v555_v32, 0.0 }
  0xd6   : > { %v1866_v42 = vunpack.c.l.b16 %v1578_v34  ;;  %v1675_v1 = vunpack.c.l.b16 %v1450_v51 }
  0xd7   : > { %v1354_v45 = vrot.slane %v713_v39, 7  ;;  %v1483_v46 = vrot.slane %v713_v39, 1  ;;  %v1612_v47 = vpack.c.bf16 %v713_v39, %v713_v39 }
  0xd8   : > { %v4940_v50 = vpack.c.b16 %v1866_v42, %v1865_v41  ;;  %v4462_v42 = vld [vmem:[#allocation2 + $0x160] sm:$0xff] }
  0xd9   : > { %v1772_v55 = vunpack.c.l.b16 %v1612_v47  ;;  %v1533_v56 = vsel %vm1508_vm2, %v1482_v18, %v1483_v46  ;;  %v1404_v57 = vsel %vm1379_vm1, %v1353_v17, %v1354_v45  ;;  %v4971_v47 = vld [vmem:[%s4784_s17 + $0x68] sm:$0xff]  ;;  %2347 = vmatpush.bf16.msrb.mxu0 %v4462_v42 }
  0xda   : > { %6536 = vst [vmem:[#allocation12_spill] sm:$0xff] %v4940_v50  ;;  %v557_v58 = vpop.f32.mrf.mxu0  ;;  %v1451_v59 = vpack.c.bf16 %v1404_v57, %v1404_v57  ;;  %v1579_v20 = vpack.c.bf16 %v1533_v56, %v1533_v56 }
  0xdb   : > { %v558_v8 = vadd.f32 %v557_v58, %v4832_v23  ;;  %v4950_v62 = vpack.c.b16 %v1772_v55, %v1771_v54  ;;  %v845_v58 = vand.u32 15, %v749_v38 }
  0xdc   : > { %v1676_v2 = vunpack.c.l.b16 %v1451_v59  ;;  %v1867_v35 = vunpack.c.l.b16 %v1579_v20 }
  0xdd   : > { %6537 = vst [vmem:[#allocation13_spill] sm:$0xff] %v4950_v62  ;;  %v714_v3 = vmax.f32 %v558_v8, 0.0  ;;  %4019 = vmatmul.msk.bf16.gmra.mxu0 %vm479_vm0, %v4943_v52  ;;  %2278 = vmatmul.bf16.gmra.mxu3 %v4950_v62  ;;  %v4461_v8 = vld [vmem:[#allocation2 + $0x158] sm:$0xff]  ;;  %vm1165_vm12 = vcmp.ge.s32.totalorder %v845_v58, 1 }
  0xde   : > { %v4955_v4 = vpack.c.b16 %v1676_v2, %v1675_v1  ;;  %2348 = vmatpush.bf16.msrb.mxu0 %v4461_v8 }
  0xdf   : > { %v1355_v5 = vrot.slane %v714_v3, 7  ;;  %v1484_v6 = vrot.slane %v714_v3, 1  ;;  %v1613_v32 = vpack.c.bf16 %v714_v3, %v714_v3 }
  0xe1   : > { %v1532_v7 = vsel %vm1508_vm2, %v1483_v46, %v1484_v6  ;;  %v1403_v17 = vsel %vm1379_vm1, %v1354_v45, %v1355_v5  ;;  %v838_v45 = vand.u32 15, %v748_v29  ;;  %v1773_v16 = vunpack.c.l.b16 %v1613_v32 }
  0xe2   : > { %v559_v18 = vpop.f32.mrf.mxu0  ;;  %v1548_v19 = vmul.f32 %v4058_v9, %v1532_v7  ;;  %v1420_v31 = vmul.f32 %v4043_v13, %v1403_v17  ;;  %v4985_v9 = vpop.f32.mrf.mxu1  ;;  %v4460_v7 = vld [vmem:[#allocation2 + $0x150] sm:$0xff]  ;;  %v4044_v17 = vsel %vm1165_vm12, 1.0, %v6481_v53 }
  0xe3   : > { %v560_v22 = vadd.f32 %v559_v18, %v4832_v23  ;;  %vm1260_vm11 = vcmp.le.s32.totalorder %v838_v45, 14  ;;  %6540 = vst [vmem:[#allocation16_spill] sm:$0xff] %v4985_v9  ;;  %2349 = vmatpush.bf16.msrb.mxu0 %v4460_v7 }
  0xe4   : > { %v1580_v26 = vpack.c.bf16 %v1548_v19, %v1548_v19  ;;  %v1452_v46 = vpack.c.bf16 %v1420_v31, %v1420_v31  ;;  %v4059_v11 = vsel %vm1260_vm11, 1.0, %v6481_v53  ;;  %v750_v31 = vadd.s32 88, %v4842_v30 }
  0xe5   : > { %v715_v34 = vmax.f32 %v560_v22, 0.0 }
  0xe6   : > { %v1868_v37 = vunpack.c.l.b16 %v1580_v26  ;;  %v1677_v0 = vunpack.c.l.b16 %v1452_v46  ;;  %v4459_v26 = vld [vmem:[#allocation2 + $0x148] sm:$0xff] }
  0xe7   : > { %v1356_v39 = vrot.slane %v715_v34, 7  ;;  %v1485_v21 = vrot.slane %v715_v34, 1  ;;  %v1614_v41 = vpack.c.bf16 %v715_v34, %v715_v34  ;;  %2350 = vmatpush.bf16.msrb.mxu0 %v4459_v26 }
  0xe8   : > { %v4968_v44 = vpack.c.b16 %v1868_v37, %v1867_v35 }
  0xe9   : > { %v1774_v51 = vunpack.c.l.b16 %v1614_v41  ;;  %v1531_v54 = vsel %vm1508_vm2, %v1484_v6, %v1485_v21  ;;  %v1402_v55 = vsel %vm1379_vm1, %v1355_v5, %v1356_v39 }
  0xea   : > { %6538 = vst [vmem:[#allocation14_spill] sm:$0xff] %v4968_v44  ;;  %v562_v56 = vpop.f32.mrf.mxu0  ;;  %v1453_v57 = vpack.c.bf16 %v1402_v55, %v1402_v55  ;;  %v1581_v20 = vpack.c.bf16 %v1531_v54, %v1531_v54  ;;  %v4998_v45 = vpop.f32.mrf.mxu1  ;;  %v5003_v54 = vld [vmem:[%s4784_s17 + $0x70] sm:$0xff]  ;;  %4035 = vmatmul.msk.bf16.gmra.mxu1 %vm479_vm0, %v4943_v52 }
  0xeb   : > { %v563_v59 = vadd.f32 %v562_v56, %v4832_v23  ;;  %v4978_v60 = vpack.c.b16 %v1774_v51, %v1773_v16  ;;  %6541 = vst [vmem:[#allocation17_spill] sm:$0xff] %v4998_v45  ;;  %v852_v16 = vand.u32 15, %v750_v31 }
  0xec   : > { %v1678_v1 = vunpack.c.l.b16 %v1453_v57  ;;  %v1869_v37 = vunpack.c.l.b16 %v1581_v20 }
  0xed   : > { %6539 = vst [vmem:[#allocation15_spill] sm:$0xff] %v4978_v60  ;;  %v716_v2 = vmax.f32 %v563_v59, 0.0  ;;  %4020 = vmatmul.msk.bf16.gmra.mxu0 %vm479_vm0, %v4971_v47  ;;  %2283 = vmatmul.bf16.gmra.mxu3 %v4978_v60  ;;  %vm1262_vm13 = vcmp.le.s32.totalorder %v852_v16, 14 }
  0xee   : > { %v4983_v3 = vpack.c.b16 %v1678_v1, %v1677_v0  ;;  %v859_v0 = vand.u32 15, %v751_v24 }
  0xef   : > { %v1357_v5 = vrot.slane %v716_v2, 7  ;;  %v1486_v6 = vrot.slane %v716_v2, 1  ;;  %v1615_v34 = vpack.c.bf16 %v716_v2, %v716_v2 }
  0xf0   : > { %vm1167_vm14 = vcmp.ge.s32.totalorder %v859_v0, 1 }
  0xf1   : > { %v1530_v13 = vsel %vm1508_vm2, %v1485_v21, %v1486_v6  ;;  %v1401_v22 = vsel %vm1379_vm1, %v1356_v39, %v1357_v5  ;;  %v4458_v39 = vld [vmem:[#allocation2 + $0x140] sm:$0xff]  ;;  %v1775_v55 = vunpack.c.l.b16 %v1615_v34 }
  0xf2   : > { %v564_v18 = vpop.f32.mrf.mxu0  ;;  %v1550_v19 = vmul.f32 %v4059_v11, %v1530_v13  ;;  %v1422_v32 = vmul.f32 %v4044_v17, %v1401_v22  ;;  %2351 = vmatpush.bf16.msrb.mxu0 %v4458_v39  ;;  %v4045_v22 = vsel %vm1167_vm14, 1.0, %v6481_v53  ;;  %v753_v39 = vadd.s32 112, %v4842_v30 }
  0xf3   : > { %v565_v25 = vadd.f32 %v564_v18, %v4832_v23  ;;  %v5017_v18 = vpop.f32.mrf.mxu1 }
  0xf4   : > { %v1582_v29 = vpack.c.bf16 %v1550_v19, %v1550_v19  ;;  %v1454_v51 = vpack.c.bf16 %v1422_v32, %v1422_v32  ;;  %6544 = vst [vmem:[#allocation20_spill] sm:$0xff] %v5017_v18  ;;  %v4060_v19 = vsel %vm1262_vm13, 1.0, %v6481_v53 }
  0xf5   : > { %v717_v35 = vmax.f32 %v565_v25, 0.0 }
  0xf6   : > { %v1870_v38 = vunpack.c.l.b16 %v1582_v29  ;;  %v1679_v11 = vunpack.c.l.b16 %v1454_v51 }
  0xf7   : > { %v1358_v21 = vrot.slane %v717_v35, 7  ;;  %v1487_v41 = vrot.slane %v717_v35, 1  ;;  %v1616_v42 = vpack.c.bf16 %v717_v35, %v717_v35  ;;  %v752_v35 = vadd.s32 104, %v4842_v30 }
  0xf8   : > { %v5000_v46 = vpack.c.b16 %v1870_v38, %v1869_v37 }
  0xf9   : > { %v1776_v56 = vunpack.c.l.b16 %v1616_v42  ;;  %v1529_v57 = vsel %vm1508_vm2, %v1486_v6, %v1487_v41  ;;  %v1400_v58 = vsel %vm1379_vm1, %v1357_v5, %v1358_v21 }
  0xfa   : > { %6542 = vst [vmem:[#allocation18_spill] sm:$0xff] %v5000_v46  ;;  %v567_v59 = vpop.f32.mrf.mxu0  ;;  %v1455_v8 = vpack.c.bf16 %v1400_v58, %v1400_v58  ;;  %v1583_v31 = vpack.c.bf16 %v1529_v57, %v1529_v57  ;;  %v5035_v58 = vld [vmem:[%s4784_s17 + $0x78] sm:$0xff]  ;;  %s3848_s17 = scalar_lea.hbm %s6478_s9, %s4498_s14  ;;  %s4615_s14 = scalar_lea.hbm %s6478_s9, 512 }
  0xfb   : > { %v568_v1 = vadd.f32 %v567_v59, %v4832_v23  ;;  %v5010_v2 = vpack.c.b16 %v1776_v56, %v1775_v55  ;;  %v5030_v55 = vpop.f32.mrf.mxu1  ;;  %v866_v56 = vand.u32 15, %v752_v35  ;;  %4036 = vmatmul.msk.bf16.gmra.mxu1 %vm479_vm0, %v4971_v47  ;;  %s3851_s22 = sshll.u32 %s3848_s17, 4  ;;  %s3852_s22 = int_to_ptr.hbm [resolvable:$true] %s3851_s22 }
  0xfc   : > { %v1680_v7 = vunpack.c.l.b16 %v1455_v8  ;;  %6545 = vst [vmem:[#allocation21_spill] sm:$0xff] %v5030_v55  ;;  %s4609_s24 = sshra.s32 %s3852_s22, 4  ;;  %s4610_s24 = int_to_ptr.hbm [resolvable:$true] %s4609_s24 }
  0xfd   : > { %6543 = vst [vmem:[#allocation19_spill] sm:$0xff] %v5010_v2  ;;  %v718_v13 = vmax.f32 %v568_v1, 0.0  ;;  %4021 = vmatmul.msk.bf16.gmra.mxu0 %vm479_vm0, %v5003_v54  ;;  %2288 = vmatmul.bf16.gmra.mxu3 %v5010_v2  ;;  %vm1264_vm15 = vcmp.le.s32.totalorder %v866_v56, 14  ;;  %s4611_s25 = scalar_lea.hbm %s4610_s24, 256  ;;  %p4616_p3 = scmp.lt.s32.totalorder %s4610_s24, %s6478_s9 }
  0xfe   : > { %v5015_v6 = vpack.c.b16 %v1680_v7, %v1679_v11  ;;  %p4612_p0 = scmp.ne.s32.totalorder %s4610_s24, %s4611_s25  ;;  %p4617_p4 = scmp.lt.s32.totalorder %s4615_s14, %s4611_s25 }
  0xff   : > { %v1359_v5 = vrot.slane %v718_v13, 7  ;;  %v1488_v17 = vrot.slane %v718_v13, 1  ;;  %v1617_v38 = vpack.c.bf16 %v718_v13, %v718_v13  ;;  %v873_v13 = vand.u32 15, %v753_v39 }
 0x100   : > { %p4613_p1 = pnand %p4612_p0, %p4759_p5  ;;  %p4618_p7 = por %p4617_p4, %p4616_p3 }
 0x101   : > { %v1528_v20 = vsel %vm1508_vm2, %v1487_v41, %v1488_v17  ;;  %v1399_v25 = vsel %vm1379_vm1, %v1358_v21, %v1359_v5  ;;  %v1871_v41 = vunpack.c.l.b16 %v1583_v31  ;;  %v1777_v59 = vunpack.c.l.b16 %v1617_v38 }
 0x102   : > { %v569_v26 = vpop.f32.mrf.mxu0  ;;  %v1552_v29 = vmul.f32 %v4060_v19, %v1528_v20  ;;  %v1424_v37 = vmul.f32 %v4045_v22, %v1399_v25  ;;  %vm1169_vm3 = vcmp.ge.s32.totalorder %v873_v13, 1  ;;  %p4614_p2 = pneg %p4613_p1 }
 0x103   : > { %v570_v32 = vadd.f32 %v569_v26, %v4832_v23  ;;  %v5049_v31 = vpop.f32.mrf.mxu1  ;;  %v4046_v35 = vsel %vm1169_vm3, 1.0, %v6481_v53 }
 0x104   : > { %v1584_v34 = vpack.c.bf16 %v1552_v29, %v1552_v29  ;;  %v1456_v57 = vpack.c.bf16 %v1424_v37, %v1424_v37  ;;  %6548 = vst [vmem:[#allocation24_spill] sm:$0xff] %v5049_v31  ;;  %v761_v31 = vadd.s32 176, %v4842_v30  ;;  %p4619_p8 = pnand %p4618_p7, %p4614_p2 }
 0x105   : > { %v719_v24 = vmax.f32 %v570_v32, 0.0  ;;  %v4061_v32 = vsel %vm1264_vm15, 1.0, %v6481_v53 }
 0x106   : > { %v1872_v42 = vunpack.c.l.b16 %v1584_v34  ;;  %v1681_v22 = vunpack.c.l.b16 %v1456_v57 }
 0x107   : > { %v1360_v21 = vrot.slane %v719_v24, 7  ;;  %v1489_v16 = vrot.slane %v719_v24, 1  ;;  %v1618_v51 = vpack.c.bf16 %v719_v24, %v719_v24 }
 0x108   : > { %v5032_v40 = vpack.c.b16 %v1872_v42, %v1871_v41 }
 0x109   : > { %v1778_v8 = vunpack.c.l.b16 %v1618_v51  ;;  %v1527_v0 = vsel %vm1508_vm2, %v1488_v17, %v1489_v16  ;;  %v1398_v1 = vsel %vm1379_vm1, %v1359_v5, %v1360_v21  ;;  %v754_v51 = vadd.s32 120, %v4842_v30 }
 0x10a   : > { %6546 = vst [vmem:[#allocation22_spill] sm:$0xff] %v5032_v40  ;;  %v572_v11 = vpop.f32.mrf.mxu0  ;;  %v1457_v7 = vpack.c.bf16 %v1398_v1, %v1398_v1  ;;  %v1585_v41 = vpack.c.bf16 %v1527_v0, %v1527_v0  ;;  %v755_v1 = vadd.s32 128, %v4842_v30 }
 0x10b   : > { %v573_v19 = vadd.f32 %v572_v11, %v4832_v23  ;;  %v5042_v20 = vpack.c.b16 %v1778_v8, %v1777_v59  ;;  %v5062_v13 = vpop.f32.mrf.mxu1  ;;  %v880_v0 = vand.u32 15, %v754_v51  ;;  %4037 = vmatmul.msk.bf16.gmra.mxu1 %vm479_vm0, %v5003_v54 }
 0x10c   : > { %v1682_v25 = vunpack.c.l.b16 %v1457_v7  ;;  %6549 = vst [vmem:[#allocation25_spill] sm:$0xff] %v5062_v13 }
 0x10d   : > { %6547 = vst [vmem:[#allocation23_spill] sm:$0xff] %v5042_v20  ;;  %v720_v26 = vmax.f32 %v573_v19, 0.0  ;;  %4022 = vmatmul.msk.bf16.gmra.mxu0 %vm479_vm0, %v5035_v58  ;;  %2293 = vmatmul.bf16.gmra.mxu3 %v5042_v20  ;;  %vm1266_vm4 = vcmp.le.s32.totalorder %v880_v0, 14 }
 0x10e   : > { %v5047_v17 = vpack.c.b16 %v1682_v25, %v1681_v22 }
 0x10f   : > { %v1361_v5 = vrot.slane %v720_v26, 7  ;;  %v1490_v29 = vrot.slane %v720_v26, 1  ;;  %v1619_v57 = vpack.c.bf16 %v720_v26, %v720_v26 }
 0x111   : > { %v1526_v34 = vsel %vm1508_vm2, %v1489_v16, %v1490_v29  ;;  %v1397_v37 = vsel %vm1379_vm1, %v1360_v21, %v1361_v5  ;;  %v1873_v16 = vunpack.c.l.b16 %v1585_v41  ;;  %v1779_v22 = vunpack.c.l.b16 %v1619_v57 }
 0x112   : > { %v574_v38 = vpop.f32.mrf.mxu0  ;;  %v1554_v24 = vmul.f32 %v4061_v32, %v1526_v34  ;;  %v1426_v56 = vmul.f32 %v4046_v35, %v1397_v37  ;;  %v887_v37 = vand.u32 15, %v755_v1  ;;  %v4062_v57 = vsel %vm1266_vm4, 1.0, %v6481_v53 }
 0x113   : > { %v575_v42 = vadd.f32 %v574_v38, %v4832_v23 }
 0x114   : > { %v1586_v39 = vpack.c.bf16 %v1554_v24, %v1554_v24  ;;  %v1458_v19 = vpack.c.bf16 %v1426_v56, %v1426_v56  ;;  %vm1171_vm5 = vcmp.ge.s32.totalorder %v887_v37, 1  ;;  %v5077_v56 = vpop.f32.mrf.mxu1 }
 0x115   : > { %v721_v59 = vmax.f32 %v575_v42, 0.0  ;;  %6552 = vst [vmem:[#allocation28_spill] sm:$0xff] %v5077_v56 }
 0x116   : > { %v1874_v8 = vunpack.c.l.b16 %v1586_v39  ;;  %v1683_v41 = vunpack.c.l.b16 %v1458_v19 }
 0x117   : > { %v1362_v11 = vrot.slane %v721_v59, 7  ;;  %v1491_v21 = vrot.slane %v721_v59, 1  ;;  %v1620_v7 = vpack.c.bf16 %v721_v59, %v721_v59 }
 0x118   : > { %v5064_v14 = vpack.c.b16 %v1874_v8, %v1873_v16  ;;  %v4047_v16 = vsel %vm1171_vm5, 1.0, %v6481_v53 }
 0x119   : > { %v1780_v25 = vunpack.c.l.b16 %v1620_v7  ;;  %v1525_v32 = vsel %vm1508_vm2, %v1490_v29, %v1491_v21  ;;  %v1396_v26 = vsel %vm1379_vm1, %v1361_v5, %v1362_v11 }
 0x11a   : > { %6550 = vst [vmem:[#allocation26_spill] sm:$0xff] %v5064_v14  ;;  %v577_v34 = vpop.f32.mrf.mxu0  ;;  %v1459_v35 = vpack.c.bf16 %v1396_v26, %v1396_v26  ;;  %v1587_v0 = vpack.c.bf16 %v1525_v32, %v1525_v32 }
 0x11b   : > { %v578_v38 = vadd.f32 %v577_v34, %v4832_v23  ;;  %v5071_v24 = vpack.c.b16 %v1780_v25, %v1779_v22  ;;  %v756_v25 = vadd.s32 136, %v4842_v30 }
 0x11c   : > { %v1684_v42 = vunpack.c.l.b16 %v1459_v35  ;;  %v5090_v49 = vpop.f32.mrf.mxu1  ;;  %4038 = vmatmul.msk.bf16.gmra.mxu1 %vm479_vm0, %v5035_v58 }
 0x11d   : > { %6551 = vst [vmem:[#allocation27_spill] sm:$0xff] %v5071_v24  ;;  %v722_v39 = vmax.f32 %v578_v38, 0.0  ;;  %2298 = vmatmul.bf16.gmra.mxu3 %v5071_v24  ;;  %2352 = vmatmul.bf16.vlgmr.msrb.gmra.mxu0 %v4884_v12  ;;  %v757_v38 = vadd.s32 144, %v4842_v30  ;;  %v894_v32 = vand.u32 15, %v756_v25 }
 0x11e   : > { %v5075_v51 = vpack.c.b16 %v1684_v42, %v1683_v41  ;;  %6553 = vst [vmem:[#allocation29_spill] sm:$0xff] %v5090_v49 }
 0x11f   : > { %v1363_v29 = vrot.slane %v722_v39, 7  ;;  %v1492_v5 = vrot.slane %v722_v39, 1  ;;  %v1621_v34 = vpack.c.bf16 %v722_v39, %v722_v39  ;;  %vm1268_vm6 = vcmp.le.s32.totalorder %v894_v32, 14 }
 0x121   : > { %v1524_v59 = vsel %vm1508_vm2, %v1491_v21, %v1492_v5  ;;  %v1395_v8 = vsel %vm1379_vm1, %v1362_v11, %v1363_v29  ;;  %v1875_v21 = vunpack.c.l.b16 %v1587_v0  ;;  %v901_v0 = vand.u32 15, %v757_v38 }
 0x122   : > { %v579_v1 = vpop.f32.mrf.mxu0  ;;  %v1556_v7 = vmul.f32 %v4062_v57, %v1524_v59  ;;  %v1428_v26 = vmul.f32 %v4047_v16, %v1395_v8  ;;  %v1781_v59 = vunpack.c.l.b16 %v1621_v34 }
 0x123   : > { %v580_v19 = vadd.f32 %v579_v1, %v4832_v23  ;;  %vm1173_vm7 = vcmp.ge.s32.totalorder %v901_v0, 1  ;;  %v758_v0 = vadd.s32 152, %v4842_v30 }
 0x124   : > { %v1588_v22 = vpack.c.bf16 %v1556_v7, %v1556_v7  ;;  %v1460_v57 = vpack.c.bf16 %v1428_v26, %v1428_v26  ;;  %v5105_v34 = vpop.f32.mrf.mxu1  ;;  %v4048_v32 = vsel %vm1173_vm7, 1.0, %v6481_v53 }
 0x125   : > { %v723_v35 = vmax.f32 %v580_v19, 0.0  ;;  %6555 = vst [vmem:[#allocation31_spill] sm:$0xff] %v5105_v34 }
 0x126   : > { %v1876_v37 = vunpack.c.l.b16 %v1588_v22 }
 0x127   : > { %v1364_v41 = vrot.slane %v723_v35, 7  ;;  %v1493_v11 = vrot.slane %v723_v35, 1  ;;  %v1622_v42 = vpack.c.bf16 %v723_v35, %v723_v35  ;;  %v1685_v35 = vunpack.c.l.b16 %v1460_v57 }
 0x128   : > { %v5092_v63 = vpack.c.b16 %v1876_v37, %v1875_v21  ;;  %v4063_v37 = vsel %vm1268_vm6, 1.0, %v6481_v53  ;;  %v759_v53 = vadd.s32 160, %v4842_v30 }
 0x129   : > { %v1782_v1 = vunpack.c.l.b16 %v1622_v42  ;;  %v1523_v16 = vsel %vm1508_vm2, %v1492_v5, %v1493_v11  ;;  %v1394_v39 = vsel %vm1379_vm1, %v1363_v29, %v1364_v41 }
 0x12a   : > { %v582_v8 = vpop.f32.mrf.mxu0  ;;  %v1461_v7 = vpack.c.bf16 %v1394_v39, %v1394_v39  ;;  %v1589_v39 = vpack.c.bf16 %v1523_v16, %v1523_v16 }
 0x12b   : > { %v583_v19 = vadd.f32 %v582_v8, %v4832_v23  ;;  %v5099_v22 = vpack.c.b16 %v1782_v1, %v1781_v59 }
 0x12c   : > { %v1686_v21 = vunpack.c.l.b16 %v1461_v7  ;;  %v5120_v56 = vpop.f32.mrf.mxu1 }
 0x12d   : > { %6554 = vst [vmem:[#allocation30_spill] sm:$0xff] %v5099_v22  ;;  %v724_v25 = vmax.f32 %v583_v19, 0.0  ;;  %2303 = vmatmul.bf16.gmra.mxu3 %v5099_v22  ;;  %2357 = vmatmul.bf16.gmra.mxu0 %v4912_v61 }
 0x12e   : > { %v5103_v26 = vpack.c.b16 %v1686_v21, %v1685_v35  ;;  %6556 = vst [vmem:[#allocation32_spill] sm:$0xff] %v5120_v56 }
 0x12f   : > { %v1365_v5 = vrot.slane %v724_v25, 7  ;;  %v1494_v29 = vrot.slane %v724_v25, 1  ;;  %v1623_v35 = vpack.c.bf16 %v724_v25, %v724_v25 }
 0x130   : > { %v5108_v38 = vpop.f32.mrf.mxu3 }
 0x131   : > { %v1522_v42 = vsel %vm1508_vm2, %v1493_v11, %v1494_v29  ;;  %v1393_v57 = vsel %vm1379_vm1, %v1364_v41, %v1365_v5  ;;  %v1877_v11 = vunpack.c.l.b16 %v1589_v39 }
 0x132   : > { %v584_v59 = vpop.f32.mrf.mxu0  ;;  %v1558_v1 = vmul.f32 %v4063_v37, %v1522_v42  ;;  %v1430_v19 = vmul.f32 %v4048_v32, %v1393_v57  ;;  %v908_v37 = vand.u32 15, %v758_v0 }
 0x133   : > { %v585_v8 = vadd.f32 %v584_v59, %v4832_v23  ;;  %v1783_v59 = vunpack.c.l.b16 %v1623_v35 }
 0x134   : > { %v1590_v7 = vpack.c.bf16 %v1558_v1, %v1558_v1  ;;  %v1462_v42 = vpack.c.bf16 %v1430_v19, %v1430_v19  ;;  %vm1270_vm8 = vcmp.le.s32.totalorder %v908_v37, 14  ;;  %v5137_v19 = vpop.f32.mrf.mxu1 }
 0x135   : > { %v725_v21 = vmax.f32 %v585_v8, 0.0  ;;  %v915_v8 = vand.u32 15, %v759_v53  ;;  %6558 = vst [vmem:[#allocation34_spill] sm:$0xff] %v5137_v19  ;;  %v6559_v53 = vmov 0.0  }
 0x136   : > { %v1878_v36 = vunpack.c.l.b16 %v1590_v7  ;;  %v4064_v35 = vsel %vm1270_vm8, 1.0, %v6559_v53  ;;  %vm3660_vm8 = vcmask 31744  }
 0x137   : > { %v1366_v34 = vrot.slane %v725_v21, 7  ;;  %v1495_v41 = vrot.slane %v725_v21, 1  ;;  %v1624_v49 = vpack.c.bf16 %v725_v21, %v725_v21  ;;  %vm1175_vm9 = vcmp.ge.s32.totalorder %v915_v8, 1 }
 0x138   : > { %v5122_v52 = vpop.f32.mrf.mxu3  ;;  %v5124_v16 = vpack.c.b16 %v1878_v36, %v1877_v11  ;;  %v1687_v36 = vunpack.c.l.b16 %v1462_v42  ;;  %v4049_v42 = vsel %vm1175_vm9, 1.0, %v6559_v53 }
 0x139   : > { %v1784_v1 = vunpack.c.l.b16 %v1624_v49  ;;  %v1521_v25 = vsel %vm1508_vm2, %v1494_v29, %v1495_v41  ;;  %v1392_v32 = vsel %vm1379_vm1, %v1365_v5, %v1366_v34 }
 0x13a   : > { %v587_v57 = vpop.f32.mrf.mxu0  ;;  %v1463_v39 = vpack.c.bf16 %v1392_v32, %v1392_v32 }
 0x13b   : > { %v588_v7 = vadd.f32 %v587_v57, %v4832_v23  ;;  %v5131_v21 = vpack.c.b16 %v1784_v1, %v1783_v59 }
 0x13c   : > { %v1688_v11 = vunpack.c.l.b16 %v1463_v39  ;;  %v1591_v39 = vpack.c.bf16 %v1521_v25, %v1521_v25  ;;  %v5152_v45 = vpop.f32.mrf.mxu1 }
 0x13d   : > { %6557 = vst [vmem:[#allocation33_spill] sm:$0xff] %v5131_v21  ;;  %v726_v0 = vmax.f32 %v588_v7, 0.0  ;;  %2308 = vmatmul.bf16.gmra.mxu3 %v5131_v21  ;;  %2362 = vmatmul.bf16.gmra.mxu0 %v4940_v50 }
 0x13e   : > { %v5135_v49 = vpack.c.b16 %v1688_v11, %v1687_v36  ;;  %v760_v36 = vadd.s32 168, %v4842_v30  ;;  %6560 = vst [vmem:[#allocation35_spill] sm:$0xff] %v5152_v45  ;;  %v4424_v45 = vld [vmem:[#allocation2 + $0x30] sm:$0xff] }
 0x13f   : > { %v1367_v29 = vrot.slane %v726_v0, 7  ;;  %v1496_v5 = vrot.slane %v726_v0, 1  ;;  %v1625_v19 = vpack.c.bf16 %v726_v0, %v726_v0 }
 0x140   : > { %v5140_v32 = vpop.f32.mrf.mxu3 }
 0x141   : > { %v1520_v37 = vsel %vm1508_vm2, %v1495_v41, %v1496_v5  ;;  %v1391_v59 = vsel %vm1379_vm1, %v1366_v34, %v1367_v29  ;;  %v1879_v41 = vunpack.c.l.b16 %v1591_v39 }
 0x142   : > { %v589_v1 = vpop.f32.mrf.mxu0  ;;  %v1560_v57 = vmul.f32 %v4064_v35, %v1520_v37  ;;  %v1432_v11 = vmul.f32 %v4049_v42, %v1391_v59  ;;  %v922_v35 = vand.u32 15, %v760_v36 }
 0x143   : > { %v590_v8 = vadd.f32 %v589_v1, %v4832_v23  ;;  %v1785_v1 = vunpack.c.l.b16 %v1625_v19 }
 0x144   : > { %v1592_v7 = vpack.c.bf16 %v1560_v57, %v1560_v57  ;;  %v1464_v37 = vpack.c.bf16 %v1432_v11, %v1432_v11  ;;  %vm1272_vm10 = vcmp.le.s32.totalorder %v922_v35, 14  ;;  %v5169_v19 = vpop.f32.mrf.mxu1 }
 0x145   : > { %v727_v56 = vmax.f32 %v590_v8, 0.0  ;;  %v929_v8 = vand.u32 15, %v761_v31  ;;  %6563 = vst [vmem:[#allocation38_spill] sm:$0xff] %v5169_v19  ;;  %v4065_v31 = vsel %vm1272_vm10, 1.0, %v6559_v53 }
 0x146   : > { %v1880_v13 = vunpack.c.l.b16 %v1592_v7 }
 0x147   : > { %v1368_v55 = vrot.slane %v727_v56, 7  ;;  %v1497_v34 = vrot.slane %v727_v56, 1  ;;  %v1626_v18 = vpack.c.bf16 %v727_v56, %v727_v56  ;;  %vm1177_vm11 = vcmp.ge.s32.totalorder %v929_v8, 1 }
 0x148   : > { %v5154_v47 = vpop.f32.mrf.mxu3  ;;  %v5156_v25 = vpack.c.b16 %v1880_v13, %v1879_v41  ;;  %v1689_v13 = vunpack.c.l.b16 %v1464_v37  ;;  %v4050_v37 = vsel %vm1177_vm11, 1.0, %v6559_v53 }
 0x149   : > { %v1786_v57 = vunpack.c.l.b16 %v1626_v18  ;;  %v1519_v0 = vsel %vm1508_vm2, %v1496_v5, %v1497_v34  ;;  %v1390_v42 = vsel %vm1379_vm1, %v1367_v29, %v1368_v55 }
 0x14a   : > { %6561 = vst [vmem:[#allocation36_spill] sm:$0xff] %v5156_v25  ;;  %v592_v59 = vpop.f32.mrf.mxu0  ;;  %v1465_v39 = vpack.c.bf16 %v1390_v42, %v1390_v42 }
 0x14b   : > { %v593_v56 = vadd.f32 %v592_v59, %v4832_v23  ;;  %v5163_v7 = vpack.c.b16 %v1786_v57, %v1785_v1  ;;  %v4425_v1 = vld [vmem:[#allocation2 + $0x38] sm:$0xff] }
 0x14c   : > { %v1690_v41 = vunpack.c.l.b16 %v1465_v39  ;;  %v1593_v39 = vpack.c.bf16 %v1519_v0, %v1519_v0  ;;  %2577 = vmatpush.bf16.msrb.mxu1 %v4425_v1  ;;  %v5184_v54 = vpop.f32.mrf.mxu1 }
 0x14d   : > { %6562 = vst [vmem:[#allocation37_spill] sm:$0xff] %v5163_v7  ;;  %v728_v36 = vmax.f32 %v593_v56, 0.0  ;;  %2313 = vmatmul.bf16.gmra.mxu3 %v5163_v7  ;;  %2367 = vmatmul.bf16.gmra.mxu0 %v4968_v44 }
 0x14e   : > { %v5167_v18 = vpack.c.b16 %v1690_v41, %v1689_v13  ;;  %v762_v13 = vadd.s32 184, %v4842_v30  ;;  %v1881_v9 = vunpack.c.l.b16 %v1593_v39  ;;  %6564 = vst [vmem:[#allocation39_spill] sm:$0xff] %v5184_v54  ;;  %v4448_v54 = vld [vmem:[#allocation2 + $0xf0] sm:$0xff] }
 0x14f   : > { %v1369_v5 = vrot.slane %v728_v36, 7  ;;  %v1498_v29 = vrot.slane %v728_v36, 1  ;;  %v1627_v19 = vpack.c.bf16 %v728_v36, %v728_v36 }
 0x150   : > { %v5172_v11 = vpop.f32.mrf.mxu3  ;;  %2578 = vmatpush.bf16.msrb.mxu1 %v4424_v45  ;;  %v936_v1 = vand.u32 15, %v762_v13 }
 0x151   : > { %v1518_v35 = vsel %vm1508_vm2, %v1497_v34, %v1498_v29  ;;  %v1389_v57 = vsel %vm1379_vm1, %v1368_v55, %v1369_v5  ;;  %v763_v55 = vadd.s32 192, %v4842_v30 }
 0x152   : > { %v594_v42 = vpop.f32.mrf.mxu0  ;;  %v1562_v59 = vmul.f32 %v4065_v31, %v1518_v35  ;;  %v1434_v41 = vmul.f32 %v4050_v37, %v1389_v57  ;;  %v1787_v37 = vunpack.c.l.b16 %v1627_v19  ;;  %v4423_v57 = vld [vmem:[#allocation2 + $0x28] sm:$0xff]  ;;  %vm1274_vm12 = vcmp.le.s32.totalorder %v936_v1, 14  ;;  %v4449_v1 = vld [vmem:[#allocation2 + $0xf8] sm:$0xff] }
 0x153   : > { %v595_v8 = vadd.f32 %v594_v42, %v4832_v23  ;;  %2166 = vmatpush.bf16.msra.mxu2 %v4449_v1 }
 0x154   : > { %v1594_v56 = vpack.c.bf16 %v1562_v59, %v1562_v59  ;;  %v1466_v35 = vpack.c.bf16 %v1434_v41, %v1434_v41  ;;  %2579 = vmatpush.bf16.msrb.mxu1 %v4423_v57  ;;  %v5201_v41 = vpop.f32.mrf.mxu1 }
 0x155   : > { %v729_v34 = vmax.f32 %v595_v8, 0.0  ;;  %6567 = vst [vmem:[#allocation42_spill] sm:$0xff] %v5201_v41 }
 0x156   : > { %v1882_v7 = vunpack.c.l.b16 %v1594_v56  ;;  %v943_v56 = vand.u32 15, %v763_v55  ;;  %v4066_v55 = vsel %vm1274_vm12, 1.0, %v6559_v53 }
 0x157   : > { %v1370_v21 = vrot.slane %v729_v34, 7  ;;  %v1499_v22 = vrot.slane %v729_v34, 1  ;;  %v1628_v24 = vpack.c.bf16 %v729_v34, %v729_v34  ;;  %2167 = vmatpush.bf16.msra.mxu2 %v4448_v54 }
 0x158   : > { %v5186_v0 = vpop.f32.mrf.mxu3  ;;  %v5188_v31 = vpack.c.b16 %v1882_v7, %v1881_v9  ;;  %v1691_v9 = vunpack.c.l.b16 %v1466_v35  ;;  %vm1179_vm13 = vcmp.ge.s32.totalorder %v943_v56, 1  ;;  %v4421_v35 = vld [vmem:[#allocation2 + $0x18] sm:$0xff] }
 0x159   : > { %v1788_v36 = vunpack.c.l.b16 %v1628_v24  ;;  %v1517_v42 = vsel %vm1508_vm2, %v1498_v29, %v1499_v22  ;;  %v1388_v59 = vsel %vm1379_vm1, %v1369_v5, %v1370_v21  ;;  %v4422_v24 = vld [vmem:[#allocation2 + $0x20] sm:$0xff]  ;;  %v4051_v57 = vsel %vm1179_vm13, 1.0, %v6559_v53 }
 0x15a   : > { %6565 = vst [vmem:[#allocation40_spill] sm:$0xff] %v5188_v31  ;;  %v597_v39 = vpop.f32.mrf.mxu0  ;;  %v1467_v8 = vpack.c.bf16 %v1388_v59, %v1388_v59  ;;  %2580 = vmatpush.bf16.msrb.mxu1 %v4422_v24  ;;  %v1595_v56 = vpack.c.bf16 %v1517_v42, %v1517_v42  ;;  %v765_v42 = vadd.s32 208, %v4842_v30 }
 0x15b   : > { %v598_v45 = vadd.f32 %v597_v39, %v4832_v23  ;;  %v5195_v34 = vpack.c.b16 %v1788_v36, %v1787_v37 }
 0x15c   : > { %v1692_v7 = vunpack.c.l.b16 %v1467_v8  ;;  %v1883_v20 = vunpack.c.l.b16 %v1595_v56  ;;  %v5215_v58 = vpop.f32.mrf.mxu1 }
 0x15d   : > { %6566 = vst [vmem:[#allocation41_spill] sm:$0xff] %v5195_v34  ;;  %v730_v19 = vmax.f32 %v598_v45, 0.0  ;;  %2318 = vmatmul.bf16.gmra.mxu3 %v5195_v34  ;;  %2372 = vmatmul.bf16.gmra.mxu0 %v5000_v46  ;;  %v4420_v34 = vld [vmem:[#allocation2 + $0x10] sm:$0xff] }
 0x15e   : > { %v5199_v29 = vpack.c.b16 %v1692_v7, %v1691_v9  ;;  %2581 = vmatpush.bf16.msrb.mxu1 %v4421_v35  ;;  %v764_v7 = vadd.s32 200, %v4842_v30  ;;  %6568 = vst [vmem:[#allocation43_spill] sm:$0xff] %v5215_v58  ;;  %v4444_v58 = vld [vmem:[#allocation2 + $0xd0] sm:$0xff] }
 0x15f   : > { %v1371_v5 = vrot.slane %v730_v19, 7  ;;  %v1500_v13 = vrot.slane %v730_v19, 1 }
 0x160   : > { %v5204_v37 = vpop.f32.mrf.mxu3  ;;  %v950_v35 = vand.u32 15, %v764_v7 }
 0x161   : > { %v1516_v36 = vsel %vm1508_vm2, %v1499_v22, %v1500_v13  ;;  %v1387_v59 = vsel %vm1379_vm1, %v1370_v21, %v1371_v5  ;;  %v1629_v22 = vpack.c.bf16 %v730_v19, %v730_v19 }
 0x162   : > { %v599_v39 = vpop.f32.mrf.mxu0  ;;  %v1564_v8 = vmul.f32 %v4066_v55, %v1516_v36  ;;  %v1436_v24 = vmul.f32 %v4051_v57, %v1387_v59  ;;  %2582 = vmatpush.bf16.msrb.mxu1 %v4420_v34  ;;  %v4447_v59 = vld [vmem:[#allocation2 + $0xe8] sm:$0xff]  ;;  %vm1276_vm0 = vcmp.le.s32.totalorder %v950_v35, 14 }
 0x163   : > { %v600_v45 = vadd.f32 %v599_v39, %v4832_v23  ;;  %v1789_v36 = vunpack.c.l.b16 %v1629_v22  ;;  %v4419_v39 = vld [vmem:[#allocation2 + $0x8] sm:$0xff]  ;;  %2168 = vmatpush.bf16.msra.mxu2 %v4447_v59  ;;  %v4445_v59 = vld [vmem:[#allocation2 + $0xd8] sm:$0xff] }
 0x164   : > { %v1596_v9 = vpack.c.bf16 %v1564_v8, %v1564_v8  ;;  %v1468_v19 = vpack.c.bf16 %v1436_v24, %v1436_v24 }
 0x165   : > { %v731_v41 = vmax.f32 %v600_v45, 0.0 }
 0x166   : > { %v1884_v21 = vunpack.c.l.b16 %v1596_v9  ;;  %2583 = vmatpush.bf16.msrb.mxu1 %v4419_v39  ;;  %v4441_v9 = vld [vmem:[#allocation2 + $0xb8] sm:$0xff] }
 0x167   : > { %v1372_v2 = vrot.slane %v731_v41, 7  ;;  %v1501_v60 = vrot.slane %v731_v41, 1  ;;  %v1630_v62 = vpack.c.bf16 %v731_v41, %v731_v41  ;;  %2755 = vmatpush.bf16.msrb.mxu3 %v4441_v9 }
 0x168   : > { %v5218_v55 = vpop.f32.mrf.mxu3  ;;  %v5220_v1 = vpack.c.b16 %v1884_v21, %v1883_v20  ;;  %v957_v20 = vand.u32 15, %v765_v42  ;;  %v4067_v42 = vsel %vm1276_vm0, 1.0, %v6559_v53 }
 0x169   : > { %v1790_v57 = vunpack.c.l.b16 %v1630_v62  ;;  %v1515_v8 = vsel %vm1508_vm2, %v1500_v13, %v1501_v60  ;;  %v1386_v41 = vsel %vm1379_vm1, %v1371_v5, %v1372_v2  ;;  %v1693_v62 = vunpack.c.l.b16 %v1468_v19  ;;  %v4446_v13 = vld [vmem:[#allocation2 + $0xe0] sm:$0xff]  ;;  %v4440_v19 = vld [vmem:[#allocation2 + $0xb0] sm:$0xff] }
 0x16a   : > { %6569 = vst [vmem:[#allocation44_spill] sm:$0xff] %v5220_v1  ;;  %v602_v54 = vpop.f32.mrf.mxu0  ;;  %v1469_v34 = vpack.c.bf16 %v1386_v41, %v1386_v41  ;;  %v4418_v5 = vld [vmem:[#allocation2] sm:$0xff]  ;;  %2169 = vmatpush.bf16.msra.mxu2 %v4446_v13  ;;  %vm1181_vm14 = vcmp.ge.s32.totalorder %v957_v20, 1 }
 0x16b   : > { %v603_v56 = vadd.f32 %v602_v54, %v4832_v23  ;;  %v5227_v45 = vpack.c.b16 %v1790_v57, %v1789_v36  ;;  %v5233_v57 = vpop.f32.mrf.mxu1  ;;  %2584 = vmatpush.bf16.msrb.mxu1 %v4418_v5  ;;  %v6503_v54 = vmov 0   ;;  %2756 = vmatpush.bf16.msrb.mxu3 %v4440_v19  ;;  %v4052_v9 = vsel %vm1181_vm14, 1.0, %v6559_v53 }
 0x16c   : > { %v1694_v7 = vunpack.c.l.b16 %v1469_v34  ;;  %6571 = vst [vmem:[#allocation46_spill] sm:$0xff] %v5233_v57  ;;  %v766_v5 = vadd.s32 216, %v4842_v30 }
 0x16d   : > { %6570 = vst [vmem:[#allocation45_spill] sm:$0xff] %v5227_v45  ;;  %v732_v24 = vmax.f32 %v603_v56, 0.0  ;;  %2323 = vmatmul.bf16.gmra.mxu3 %v5227_v45  ;;  %2377 = vmatmul.bf16.gmra.mxu0 %v5032_v40  ;;  %v1597_v56 = vpack.c.bf16 %v1515_v8, %v1515_v8  ;;  %v767_v8 = vadd.s32 224, %v4842_v30 }
 0x16e   : > { %v5231_v22 = vpack.c.b16 %v1694_v7, %v1693_v62  ;;  %2585 = vmatmul.bf16.vlgmr.msrb.gmra.mxu1 %v6503_v54  ;;  %2170 = vmatpush.bf16.msra.mxu2 %v4445_v59  ;;  %v4439_v7 = vld [vmem:[#allocation2 + $0xa8] sm:$0xff] }
 0x16f   : > { %v1373_v21 = vrot.slane %v732_v24, 7  ;;  %v1502_v36 = vrot.slane %v732_v24, 1  ;;  %2757 = vmatpush.bf16.msrb.mxu3 %v4439_v7  ;;  %v1885_v19 = vunpack.c.l.b16 %v1597_v56 }
 0x170   : > { %v5236_v35 = vpop.f32.mrf.mxu3 }
 0x171   : > { %6572 = vst [vmem:[#allocation47_spill] sm:$0xff] %v5236_v35  ;;  %v1514_v39 = vsel %vm1508_vm2, %v1501_v60, %v1502_v36  ;;  %v1385_v62 = vsel %vm1379_vm1, %v1372_v2, %v1373_v21  ;;  %v1631_v60 = vpack.c.bf16 %v732_v24, %v732_v24  ;;  %v964_v24 = vand.u32 15, %v766_v5  ;;  %v4437_v5 = vld [vmem:[#allocation2 + $0x98] sm:$0xff] }
 0x172   : > { %v604_v41 = vpop.f32.mrf.mxu0  ;;  %v1566_v34 = vmul.f32 %v4067_v42, %v1514_v39  ;;  %v1438_v45 = vmul.f32 %v4052_v9, %v1385_v62  ;;  %2171 = vmatpush.bf16.msra.mxu2 %v4444_v58  ;;  %v4443_v9 = vld [vmem:[#allocation2 + $0xc8] sm:$0xff] }
 0x173   : > { %v605_v20 = vadd.f32 %v604_v41, %v4832_v23  ;;  %v5247_v2 = vpop.f32.mrf.mxu1  ;;  %v4438_v41 = vld [vmem:[#allocation2 + $0xa0] sm:$0xff]  ;;  %vm1278_vm15 = vcmp.le.s32.totalorder %v964_v24, 14 }
 0x174   : > { %v1598_v13 = vpack.c.bf16 %v1566_v34, %v1566_v34  ;;  %6573 = vst [vmem:[#allocation48_spill] sm:$0xff] %v5247_v2  ;;  %v1470_v62 = vpack.c.bf16 %v1438_v45, %v1438_v45  ;;  %2758 = vmatpush.bf16.msrb.mxu3 %v4438_v41  ;;  %v4442_v45 = vld [vmem:[#allocation2 + $0xc0] sm:$0xff] }
 0x175   : > { %v733_v57 = vmax.f32 %v605_v20, 0.0  ;;  %v1791_v20 = vunpack.c.l.b16 %v1631_v60 }
 0x176   : > { %v1886_v42 = vunpack.c.l.b16 %v1598_v13  ;;  %v971_v13 = vand.u32 15, %v767_v8  ;;  %2172 = vmatpush.bf16.msra.mxu2 %v4443_v9 }
 0x177   : > { %v1374_v39 = vrot.slane %v733_v57, 7  ;;  %v1503_v54 = vrot.slane %v733_v57, 1  ;;  %v1632_v48 = vpack.c.bf16 %v733_v57, %v733_v57 }
 0x178   : > { %v5249_v59 = vpop.f32.mrf.mxu3  ;;  %v5251_v34 = vpack.c.b16 %v1886_v42, %v1885_v19  ;;  %2759 = vmatpush.bf16.msrb.mxu3 %v4437_v5  ;;  %vm1183_vm3 = vcmp.ge.s32.totalorder %v971_v13, 1  ;;  %v4433_v13 = vld [vmem:[#allocation2 + $0x78] sm:$0xff] }
 0x179   : > { %6574 = vst [vmem:[#allocation49_spill] sm:$0xff] %v5249_v59  ;;  %v1792_v10 = vunpack.c.l.b16 %v1632_v48  ;;  %v1513_v56 = vsel %vm1508_vm2, %v1502_v36, %v1503_v54  ;;  %v1384_v57 = vsel %vm1379_vm1, %v1373_v21, %v1374_v39  ;;  %v1695_v36 = vunpack.c.l.b16 %v1470_v62 }
 0x17a   : > { %6575 = vst [vmem:[#allocation50_spill] sm:$0xff] %v5251_v34  ;;  %v607_v7 = vpop.f32.mrf.mxu0  ;;  %v1471_v19 = vpack.c.bf16 %v1384_v57, %v1384_v57  ;;  %2173 = vmatpush.bf16.msra.mxu2 %v4442_v45  ;;  %v4053_v62 = vsel %vm1183_vm3, 1.0, %v6559_v53  ;;  %v1599_v5 = vpack.c.bf16 %v1513_v56, %v1513_v56  ;;  %v4434_v56 = vld [vmem:[#allocation2 + $0x80] sm:$0xff] }
 0x17b   : > { %v608_v58 = vadd.f32 %v607_v7, %v4832_v23  ;;  %v5258_v2 = vpack.c.b16 %v1792_v10, %v1791_v20  ;;  %v5262_v8 = vpop.f32.mrf.mxu1  ;;  %v4068_v10 = vsel %vm1278_vm15, 1.0, %v6559_v53  ;;  %v4436_v20 = vld [vmem:[#allocation2 + $0x90] sm:$0xff] }
 0x17c   : > { %v1696_v60 = vunpack.c.l.b16 %v1471_v19  ;;  %6577 = vst [vmem:[#allocation52_spill] sm:$0xff] %v5262_v8  ;;  %2760 = vmatpush.bf16.msrb.mxu3 %v4436_v20  ;;  %v1887_v27 = vunpack.c.l.b16 %v1599_v5 }
 0x17d   : > { %6576 = vst [vmem:[#allocation51_spill] sm:$0xff] %v5258_v2  ;;  %v734_v48 = vmax.f32 %v608_v58, 0.0  ;;  %2328 = vmatmul.bf16.gmra.mxu3 %v5258_v2  ;;  %2382 = vmatmul.bf16.gmra.mxu0 %v5064_v14  ;;  %v4435_v58 = vld [vmem:[#allocation2 + $0x88] sm:$0xff] }
 0x17e   : > { %v5265_v41 = vpack.c.b16 %v1696_v60, %v1695_v36  ;;  %2666 = vmatpush.bf16.msrb.mxu2 %v4433_v13  ;;  %v768_v60 = vadd.s32 232, %v4842_v30 }
 0x17f   : > { %v1375_v21 = vrot.slane %v734_v48, 7  ;;  %v1504_v42 = vrot.slane %v734_v48, 1  ;;  %v1633_v2 = vpack.c.bf16 %v734_v48, %v734_v48 }
 0x180   : > { %6578 = vst [vmem:[#allocation53_spill] sm:$0xff] %v5265_v41  ;;  %v5267_v24 = vpop.f32.mrf.mxu3  ;;  %2761 = vmatpush.bf16.msrb.mxu3 %v4435_v58 }
 0x181   : > { %6579 = vst [vmem:[#allocation54_spill] sm:$0xff] %v5267_v24  ;;  %v1512_v9 = vsel %vm1508_vm2, %v1503_v54, %v1504_v42  ;;  %v1383_v7 = vsel %vm1379_vm1, %v1374_v39, %v1375_v21  ;;  %v769_v39 = vadd.s32 240, %v4842_v30  ;;  %v1793_v13 = vunpack.c.l.b16 %v1633_v2 }
 0x182   : > { %v609_v57 = vpop.f32.mrf.mxu0  ;;  %v1568_v19 = vmul.f32 %v4068_v10, %v1512_v9  ;;  %v1440_v8 = vmul.f32 %v4053_v62, %v1383_v7  ;;  %v978_v9 = vand.u32 15, %v768_v60  ;;  %v770_v2 = vadd.s32 248, %v4842_v30 }
 0x183   : > { %v610_v45 = vadd.f32 %v609_v57, %v4832_v23  ;;  %v5281_v62 = vpop.f32.mrf.mxu1 }
 0x184   : > { %v1600_v36 = vpack.c.bf16 %v1568_v19, %v1568_v19  ;;  %v1472_v57 = vpack.c.bf16 %v1440_v8, %v1440_v8  ;;  %6582 = vst [vmem:[#allocation57_spill] sm:$0xff] %v5281_v62  ;;  %2762 = vmatpush.bf16.msrb.mxu3 %v4434_v56  ;;  %vm1280_vm4 = vcmp.le.s32.totalorder %v978_v9, 14  ;;  %v992_v9 = vand.u32 15, %v770_v2 }
 0x185   : > { %v735_v54 = vmax.f32 %v610_v45, 0.0  ;;  %v985_v45 = vand.u32 15, %v769_v39  ;;  %v775_v39 = vand.u32 15, %v4842_v30 }
 0x186   : > { %v1888_v24 = vunpack.c.l.b16 %v1600_v36  ;;  %v1697_v8 = vunpack.c.l.b16 %v1472_v57  ;;  %vm1282_vm7 = vcmp.le.s32.totalorder %v992_v9, 14 }
 0x187   : > { %v1376_v41 = vrot.slane %v735_v54, 7  ;;  %v1505_v59 = vrot.slane %v735_v54, 1  ;;  %v1634_v20 = vpack.c.bf16 %v735_v54, %v735_v54  ;;  %vm1185_vm5 = vcmp.ge.s32.totalorder %v985_v45, 1 }
 0x188   : > { %v5277_v35 = vpop.f32.mrf.mxu3  ;;  %v5279_v10 = vpack.c.b16 %v1888_v24, %v1887_v27  ;;  %vm1155_vm6 = vcmp.ge.s32.totalorder %v775_v39, 1 }
 0x189   : > { %6580 = vst [vmem:[#allocation55_spill] sm:$0xff] %v5277_v35  ;;  %v1794_v19 = vunpack.c.l.b16 %v1634_v20  ;;  %v1511_v48 = vsel %vm1508_vm2, %v1504_v42, %v1505_v59  ;;  %v1382_v7 = vsel %vm1379_vm1, %v1375_v21, %v1376_v41  ;;  %v4069_v20 = vsel %vm1280_vm4, 1.0, %v6559_v53 }
 0x18a   : > { %6581 = vst [vmem:[#allocation56_spill] sm:$0xff] %v5279_v10  ;;  %v612_v58 = vpop.f32.mrf.mxu0  ;;  %v1473_v5 = vpack.c.bf16 %v1382_v7, %v1382_v7 }
 0x18b   : > { %v613_v36 = vadd.f32 %v612_v58, %v4832_v23  ;;  %v5288_v27 = vpack.c.b16 %v1794_v19, %v1793_v13  ;;  %v4054_v13 = vsel %vm1185_vm5, 1.0, %v6559_v53 }
 0x18c   : > { %v1698_v24 = vunpack.c.l.b16 %v1473_v5  ;;  %v1601_v5 = vpack.c.bf16 %v1511_v48, %v1511_v48 }
 0x18d   : > { %6583 = vst [vmem:[#allocation58_spill] sm:$0xff] %v5288_v27  ;;  %v736_v60 = vmax.f32 %v613_v36, 0.0  ;;  %2333 = vmatmul.bf16.gmra.mxu3 %v5288_v27  ;;  %2387 = vmatmul.bf16.gmra.mxu0 %v5092_v63  ;;  %v5305_v36 = vpop.f32.mrf.mxu1 }
 0x18e   : > { %v5293_v42 = vpack.c.b16 %v1698_v24, %v1697_v8  ;;  %6586 = vst [vmem:[#allocation61_spill] sm:$0xff] %v5305_v36  ;;  %v1889_v27 = vunpack.c.l.b16 %v1601_v5 }
 0x18f   : > { %v1377_v21 = vrot.slane %v736_v60, 7  ;;  %v1506_v54 = vrot.slane %v736_v60, 1  ;;  %v1635_v8 = vpack.c.bf16 %v736_v60, %v736_v60 }
 0x190   : > { %6584 = vst [vmem:[#allocation59_spill] sm:$0xff] %v5293_v42  ;;  %v5297_v56 = vpop.f32.mrf.mxu3 }
 0x191   : > { %6585 = vst [vmem:[#allocation60_spill] sm:$0xff] %v5297_v56  ;;  %v1510_v57 = vsel %vm1508_vm2, %v1505_v59, %v1506_v54  ;;  %v1381_v19 = vsel %vm1379_vm1, %v1376_v41, %v1377_v21  ;;  %v4039_v59 = vsel %vm1155_vm6, 1.0, %v6559_v53  ;;  %v1795_v48 = vunpack.c.l.b16 %v1635_v8 }
 0x192   : > { %v614_v7 = vpop.f32.mrf.mxu0  ;;  %v1570_v58 = vmul.f32 %v4069_v20, %v1510_v57  ;;  %v1442_v2 = vmul.f32 %v4054_v13, %v1381_v19  ;;  %v4070_v20 = vsel %vm1282_vm7, 1.0, %v6559_v53  ;;  %v6588_v13 = vrot.slane %v4840_v28, 7 }
 0x193   : > { %v615_v45 = vadd.f32 %v614_v7, %v4832_v23  ;;  %v1445_v23 = vpack.c.bf16 %v4859_v43, %v4859_v43  ;;  %v6589_v53 = vrot.slane %v4840_v28, 1 }
 0x194   : > { %v1602_v24 = vpack.c.bf16 %v1570_v58, %v1570_v58  ;;  %v1474_v60 = vpack.c.bf16 %v1442_v2, %v1442_v2 }
 0x195   : > { %v737_v62 = vmax.f32 %v615_v45, 0.0  ;;  %v5333_v28 = vpop.f32.mrf.mxu1 }
 0x196   : > { %v1890_v56 = vunpack.c.l.b16 %v1602_v24  ;;  %6591 = vst [vmem:[#allocation64_spill] sm:$0xff] %v5333_v28  ;;  %v4470_v28 = vld [vmem:[#allocation2 + $0x1a0] sm:$0xff] }
 0x197   : > { %v1378_v42 = vrot.slane %v737_v62, 7  ;;  %v1507_v35 = vrot.slane %v737_v62, 1  ;;  %v1636_v41 = vpack.c.bf16 %v737_v62, %v737_v62 }
 0x198   : > { %v5311_v39 = vpack.c.b16 %v1890_v56, %v1889_v27  ;;  %v5313_v57 = vpop.f32.mrf.mxu3 }
 0x199   : > { %v1796_v9 = vunpack.c.l.b16 %v1636_v41  ;;  %v1411_v19 = vsel %vm1379_vm1, %v1378_v42, %v6588_v13  ;;  %v1509_v62 = vsel %vm1508_vm2, %v1506_v54, %v1507_v35  ;;  %v1540_v7 = vsel %vm1508_vm2, %v1507_v35, %v6589_v53 }
 0x19a   : > { %6587 = vst [vmem:[#allocation62_spill] sm:$0xff] %v5311_v39  ;;  %v5325_v43 = vpop.f32.mrf.mxu0  ;;  %v1412_v27 = vmul.f32 %v4039_v59, %v1411_v19  ;;  %v1572_v56 = vmul.f32 %v4070_v20, %v1540_v7  ;;  %v1603_v58 = vpack.c.bf16 %v1509_v62, %v1509_v62  ;;  %v1380_v5 = vsel %vm1379_vm1, %v1377_v21, %v1378_v42 }
 0x19b   : > { %v5329_v45 = vpack.c.b16 %v1796_v9, %v1795_v48  ;;  %v1475_v8 = vpack.c.bf16 %v1380_v5, %v1380_v5  ;;  %v1699_v35 = vunpack.c.l.b16 %v1474_v60  ;;  %v1670_v59 = vunpack.c.l.b16 %v1445_v23  ;;  %v4432_v48 = vld [vmem:[#allocation2 + $0x70] sm:$0xff] }
 0x19c   : > { %v1444_v24 = vpack.c.bf16 %v1412_v27, %v1412_v27  ;;  %v1604_v2 = vpack.c.bf16 %v1572_v56, %v1572_v56  ;;  %v1891_v20 = vunpack.c.l.b16 %v1603_v58  ;;  %2667 = vmatpush.bf16.msrb.mxu2 %v4432_v48  ;;  %v6594_v53 = vmov 0   ;;  %v4473_v48 = vld [vmem:[#allocation2 + $0x1b8] sm:$0xff] }
 0x19d   : > { %6590 = vst [vmem:[#allocation63_spill] sm:$0xff] %v5329_v45  ;;  %2338 = vmatmul.bf16.gmra.mxu3 %v5329_v45  ;;  %2392 = vmatmul.bf16.gmra.mxu0 %v5124_v16  ;;  %v1700_v54 = vunpack.c.l.b16 %v1475_v8  ;;  %v5343_v62 = vpop.f32.mrf.mxu1  ;;  %vm3664_vm1 = vcmask 1043456  }
 0x19e   : > { %v1669_v41 = vunpack.c.l.b16 %v1444_v24  ;;  %v1892_v13 = vunpack.c.l.b16 %v1604_v2  ;;  %6593 = vst [vmem:[#allocation66_spill] sm:$0xff] %v5343_v62  ;;  %v4431_v2 = vld [vmem:[#allocation2 + $0x68] sm:$0xff]  ;;  %3037 = vmatpush.bf16.msra.mxu0 %v4473_v48 }
 0x19f   : > { %v5335_v19 = vpack.c.b16 %v1700_v54, %v1699_v35 }
 0x1a0   : > { %v1701_v30 = vpack.c.b16 %v1670_v59, %v1669_v41  ;;  %v5337_v42 = vpack.c.b16 %v1892_v13, %v1891_v20  ;;  %v5341_v9 = vpop.f32.mrf.mxu3  ;;  %2668 = vmatpush.bf16.msrb.mxu2 %v4431_v2 }
 0x1a2   : > { %6592 = vst [vmem:[#allocation65_spill] sm:$0xff] %v5337_v42  ;;  %2174 = vmatmul.bf16.vlgmr.msra.gmra.mxu2 %v1701_v30  ;;  %v5339_v21 = vpop.f32.mrf.mxu0  ;;  %2590 = vmatmul.bf16.gmra.mxu1 %v1701_v30 }
 0x1a5   : > { %v5351_v7 = vpop.f32.mrf.mxu1 }
 0x1a6   : > { %6595 = vst [vmem:[#allocation67_spill] sm:$0xff] %v5351_v7 }
 0x1a8   : > { %v5347_v23 = vpop.f32.mrf.mxu3 }
 0x1aa   : > { %v5345_v60 = vpop.f32.mrf.mxu0 }
 0x1ad   : > { %2397 = vmatmul.bf16.gmra.mxu0 %v5156_v25  ;;  %2763 = vmatmul.bf16.vlgmr.msrb.gmra.mxu3 %v6594_v53  ;;  %v5361_v5 = vpop.f32.mrf.mxu1 }
 0x1ae   : > { %6596 = vst [vmem:[#allocation68_spill] sm:$0xff] %v5361_v5  ;;  %v4430_v5 = vld [vmem:[#allocation2 + $0x60] sm:$0xff] }
 0x1af   : > { %2669 = vmatpush.bf16.msrb.mxu2 %v4430_v5 }
 0x1b0   : > { %v5357_v56 = vpop.f32.mrf.mxu3 }
 0x1b2   : > { %2179 = vmatmul.bf16.gmra.mxu2 %v4899_v33  ;;  %v5354_v27 = vpop.f32.mrf.mxu0  ;;  %2595 = vmatmul.bf16.gmra.mxu1 %v4899_v33 }
 0x1b5   : > { %v5371_v35 = vpop.f32.mrf.mxu1 }
 0x1b6   : > { %6598 = vst [vmem:[#allocation70_spill] sm:$0xff] %v5371_v35 }
 0x1b8   : > { %v5365_v8 = vpop.f32.mrf.mxu3 }
 0x1b9   : > { %6597 = vst [vmem:[#allocation69_spill] sm:$0xff] %v5365_v8 }
 0x1ba   : > { %v5359_v58 = vpop.f32.mrf.mxu0 }
 0x1bd   : > { %2402 = vmatmul.bf16.gmra.mxu0 %v5188_v31  ;;  %2768 = vmatmul.bf16.gmra.mxu3 %v4884_v12  ;;  %v5379_v12 = vpop.f32.mrf.mxu1 }
 0x1be   : > { %6600 = vst [vmem:[#allocation72_spill] sm:$0xff] %v5379_v12  ;;  %v4472_v12 = vld [vmem:[#allocation2 + $0x1b0] sm:$0xff] }
 0x1bf   : > { %3038 = vmatpush.bf16.msra.mxu0 %v4472_v12  ;;  %v4467_v12 = vld [vmem:[#allocation2 + $0x188] sm:$0xff] }
 0x1c0   : > { %v5375_v41 = vpop.f32.mrf.mxu3 }
 0x1c1   : > { %6599 = vst [vmem:[#allocation71_spill] sm:$0xff] %v5375_v41 }
 0x1c2   : > { %2184 = vmatmul.bf16.gmra.mxu2 %v4927_v15  ;;  %v5368_v24 = vpop.f32.mrf.mxu0  ;;  %2600 = vmatmul.bf16.gmra.mxu1 %v4927_v15 }
 0x1c5   : > { %v5387_v13 = vpop.f32.mrf.mxu1 }
 0x1c6   : > { %6602 = vst [vmem:[#allocation74_spill] sm:$0xff] %v5387_v13  ;;  %v4471_v13 = vld [vmem:[#allocation2 + $0x1a8] sm:$0xff] }
 0x1c7   : > { %3039 = vmatpush.bf16.msra.mxu0 %v4471_v13 }
 0x1c8   : > { %v5385_v20 = vpop.f32.mrf.mxu3 }
 0x1c9   : > { %6601 = vst [vmem:[#allocation73_spill] sm:$0xff] %v5385_v20 }
 0x1ca   : > { %v5373_v54 = vpop.f32.mrf.mxu0 }
 0x1cb   : > { %3040 = vmatpush.bf16.msra.mxu0 %v4470_v28 }
 0x1cd   : > { %2407 = vmatmul.bf16.gmra.mxu0 %v5220_v1  ;;  %2773 = vmatmul.bf16.gmra.mxu3 %v4912_v61  ;;  %v5399_v7 = vpop.f32.mrf.mxu1  ;;  %v4468_v61 = vld [vmem:[#allocation2 + $0x190] sm:$0xff] }
 0x1ce   : > { %6604 = vst [vmem:[#allocation76_spill] sm:$0xff] %v5399_v7  ;;  %v4466_v7 = vld [vmem:[#allocation2 + $0x180] sm:$0xff] }
 0x1d0   : > { %v5393_v2 = vpop.f32.mrf.mxu3 }
 0x1d1   : > { %6603 = vst [vmem:[#allocation75_spill] sm:$0xff] %v5393_v2 }
 0x1d2   : > { %2189 = vmatmul.bf16.gmra.mxu2 %v4955_v4  ;;  %v5382_v59 = vpop.f32.mrf.mxu0  ;;  %2605 = vmatmul.bf16.gmra.mxu1 %v4955_v4 }
 0x1d5   : > { %v5407_v48 = vpop.f32.mrf.mxu1 }
 0x1d6   : > { %6606 = vst [vmem:[#allocation78_spill] sm:$0xff] %v5407_v48 }
 0x1d8   : > { %v5401_v62 = vpop.f32.mrf.mxu3 }
 0x1d9   : > { %6605 = vst [vmem:[#allocation77_spill] sm:$0xff] %v5401_v62 }
 0x1da   : > { %v5389_v30 = vpop.f32.mrf.mxu0 }
 0x1dd   : > { %2412 = vmatmul.bf16.gmra.mxu0 %v5251_v34  ;;  %2778 = vmatmul.bf16.gmra.mxu3 %v4940_v50  ;;  %v4469_v50 = vld [vmem:[#allocation2 + $0x198] sm:$0xff]  ;;  %v5415_v28 = vpop.f32.mrf.mxu1 }
 0x1de   : > { %3041 = vmatpush.bf16.msra.mxu0 %v4469_v50  ;;  %6608 = vst [vmem:[#allocation80_spill] sm:$0xff] %v5415_v28 }
 0x1e0   : > { %v5411_v5 = vpop.f32.mrf.mxu3 }
 0x1e1   : > { %6607 = vst [vmem:[#allocation79_spill] sm:$0xff] %v5411_v5 }
 0x1e2   : > { %2194 = vmatmul.bf16.gmra.mxu2 %v4983_v3  ;;  %v5396_v35 = vpop.f32.mrf.mxu0  ;;  %2610 = vmatmul.bf16.gmra.mxu1 %v4983_v3 }
 0x1e3   : > { %3042 = vmatpush.bf16.msra.mxu0 %v4468_v61  ;;  %v4429_v61 = vld [vmem:[#allocation2 + $0x58] sm:$0xff] }
 0x1e4   : > { %2670 = vmatpush.bf16.msrb.mxu2 %v4429_v61 }
 0x1e5   : > { %v5423_v48 = vpop.f32.mrf.mxu1 }
 0x1e6   : > { %6610 = vst [vmem:[#allocation82_spill] sm:$0xff] %v5423_v48 }
 0x1e7   : > { %3043 = vmatpush.bf16.msra.mxu0 %v4467_v12 }
 0x1ea   : > { %v5403_v36 = vpop.f32.mrf.mxu0 }
 0x1eb   : > { %3044 = vmatpush.bf16.msra.mxu0 %v4466_v7 }
 0x1ed   : > { %2417 = vmatmul.bf16.gmra.mxu0 %v5279_v10  ;;  %2783 = vmatmul.bf16.gmra.mxu3 %v4968_v44  ;;  %v5417_v44 = vpop.f32.mrf.mxu3  ;;  %v2586_v7 = vpop.f32.mrf.mxu1 }
 0x1ee   : > { %6609 = vst [vmem:[#allocation81_spill] sm:$0xff] %v5417_v44 }
 0x1f2   : > { %2199 = vmatmul.bf16.gmra.mxu2 %v5015_v6  ;;  %2615 = vmatmul.bf16.gmra.mxu1 %v5015_v6  ;;  %v5413_v13 = vpop.f32.mrf.mxu0 }
 0x1f5   : > { %v5427_v28 = vpop.f32.mrf.mxu3  ;;  %v2588_v48 = vpop.f32.mrf.mxu1 }
 0x1f6   : > { %6611 = vst [vmem:[#allocation83_spill] sm:$0xff] %v5427_v28 }
 0x1fa   : > { %v5421_v50 = vpop.f32.mrf.mxu0 }
 0x1fd   : > { %2422 = vmatmul.bf16.gmra.mxu0 %v5311_v39  ;;  %2788 = vmatmul.bf16.gmra.mxu3 %v5000_v46  ;;  %v5433_v46 = vpop.f32.mrf.mxu3 }
 0x1fe   : > { %6612 = vst [vmem:[#allocation84_spill] sm:$0xff] %v5433_v46 }
 0x202   : > { %2204 = vmatmul.bf16.gmra.mxu2 %v5047_v17  ;;  %2620 = vmatmul.bf16.gmra.mxu1 %v5047_v17  ;;  %v5429_v12 = vpop.f32.mrf.mxu0 }
 0x205   : > { %v5439_v44 = vpop.f32.mrf.mxu3 }
 0x206   : > { %6613 = vst [vmem:[#allocation85_spill] sm:$0xff] %v5439_v44 }
 0x20a   : > { %v5435_v45 = vpop.f32.mrf.mxu0 }
 0x20d   : > { %2427 = vmatmul.bf16.gmra.mxu0 %v5337_v42  ;;  %2793 = vmatmul.bf16.gmra.mxu3 %v5032_v40  ;;  %v4428_v40 = vld [vmem:[#allocation2 + $0x50] sm:$0xff]  ;;  %v5447_v46 = vpop.f32.mrf.mxu3 }
 0x20e   : > { %2671 = vmatpush.bf16.msrb.mxu2 %v4428_v40  ;;  %6614 = vst [vmem:[#allocation86_spill] sm:$0xff] %v5447_v46 }
 0x212   : > { %2209 = vmatmul.bf16.gmra.mxu2 %v5075_v51  ;;  %2625 = vmatmul.bf16.gmra.mxu1 %v5075_v51  ;;  %v5441_v61 = vpop.f32.mrf.mxu0 }
 0x215   : > { %v5458_v40 = vpop.f32.mrf.mxu3 }
 0x21a   : > { %v5449_v5 = vpop.f32.mrf.mxu0 }
 0x21d   : > { %2798 = vmatmul.bf16.gmra.mxu3 %v5064_v14  ;;  %3045 = vmatmul.bf16.vlgmr.msra.gmra.mxu0 %v4899_v33 }
 0x21f   : > { %v2591_v42 = vpop.f32.mrf.mxu1 }
 0x222   : > { %2214 = vmatmul.bf16.gmra.mxu2 %v5103_v26  ;;  %2630 = vmatmul.bf16.gmra.mxu1 %v5103_v26  ;;  %v5460_v41 = vpop.f32.mrf.mxu0 }
 0x225   : > { %v2175_v28 = vpop.f32.mrf.mxu2 }
 0x226   : > { %v2265_v44 = vadd.f32 %v5108_v38, %v2175_v28 }
 0x227   : > { %v2593_v62 = vpop.f32.mrf.mxu1 }
 0x228   : > { %v2354_v2 = vadd.f32 %v5325_v43, %v2265_v44 }
 0x22a   : > { %v5453_v14 = vadd.f32 %v2586_v7, %v2354_v2  ;;  %v5471_v28 = vpop.f32.mrf.mxu0 }
 0x22d   : > { %v2177_v33 = vpop.f32.mrf.mxu2  ;;  %2803 = vmatmul.bf16.gmra.mxu3 %v5092_v63  ;;  %3050 = vmatmul.bf16.gmra.mxu0 %v4927_v15 }
 0x22e   : > { %v2267_v20 = vadd.f32 %v5122_v52, %v2177_v33  ;;  %v5469_v52 = vpop.f32.mrf.mxu3 }
 0x22f   : > { %v2596_v46 = vpop.f32.mrf.mxu1 }
 0x230   : > { %v2356_v8 = vadd.f32 %v5339_v21, %v2267_v20 }
 0x232   : > { %2219 = vmatmul.bf16.gmra.mxu2 %v5135_v49  ;;  %2635 = vmatmul.bf16.gmra.mxu1 %v5135_v49  ;;  %v5465_v44 = vadd.f32 %v2588_v48, %v2356_v8 }
 0x235   : > { %v2180_v38 = vpop.f32.mrf.mxu2 }
 0x236   : > { %v2270_v43 = vadd.f32 %v5140_v32, %v2180_v38  ;;  %v4427_v32 = vld [vmem:[#allocation2 + $0x48] sm:$0xff]  ;;  %v5483_v48 = vpop.f32.mrf.mxu3 }
 0x237   : > { %v2598_v2 = vpop.f32.mrf.mxu1  ;;  %2672 = vmatpush.bf16.msrb.mxu2 %v4427_v32 }
 0x238   : > { %v2359_v15 = vadd.f32 %v5345_v60, %v2270_v43 }
 0x23a   : > { %v5473_v7 = vadd.f32 %v2591_v42, %v2359_v15  ;;  %v5485_v42 = vpop.f32.mrf.mxu0 }
 0x23d   : > { %v2182_v33 = vpop.f32.mrf.mxu2  ;;  %2808 = vmatmul.bf16.gmra.mxu3 %v5124_v16  ;;  %3055 = vmatmul.bf16.gmra.mxu0 %v4955_v4 }
 0x23e   : > { %v2272_v21 = vadd.f32 %v5154_v47, %v2182_v33 }
 0x23f   : > { %v2601_v8 = vpop.f32.mrf.mxu1 }
 0x240   : > { %v2361_v20 = vadd.f32 %v5354_v27, %v2272_v21  ;;  %v5491_v27 = vpop.f32.mrf.mxu3 }
 0x242   : > { %2224 = vmatmul.bf16.gmra.mxu2 %v5167_v18  ;;  %2640 = vmatmul.bf16.gmra.mxu1 %v5167_v18  ;;  %v5481_v60 = vadd.f32 %v2593_v62, %v2361_v20  ;;  %v5495_v62 = vpop.f32.mrf.mxu0 }
 0x245   : > { %v2185_v38 = vpop.f32.mrf.mxu2 }
 0x246   : > { %v2275_v4 = vadd.f32 %v5172_v11, %v2185_v38 }
 0x247   : > { %v2603_v43 = vpop.f32.mrf.mxu1 }
 0x248   : > { %v2364_v47 = vadd.f32 %v5359_v58, %v2275_v4  ;;  %v5504_v4 = vpop.f32.mrf.mxu3 }
 0x249   : > { %6615 = vst [vmem:[#allocation87_spill] sm:$0xff] %v5504_v4 }
 0x24a   : > { %v5489_v15 = vadd.f32 %v2596_v46, %v2364_v47  ;;  %v4481_v46 = vld [vmem:[#allocation2 + $0x1f8] sm:$0xff]  ;;  %v4480_v47 = vld [vmem:[#allocation2 + $0x1f0] sm:$0xff] }
 0x24b   : > { %3126 = vmatpush.bf16.msra.mxu1 %v4481_v46 }
 0x24d   : > { %v2187_v33 = vpop.f32.mrf.mxu2  ;;  %2813 = vmatmul.bf16.gmra.mxu3 %v5156_v25  ;;  %3060 = vmatmul.bf16.gmra.mxu0 %v4983_v3  ;;  %v5506_v25 = vpop.f32.mrf.mxu0 }
 0x24e   : > { %v2277_v21 = vadd.f32 %v5186_v0, %v2187_v33 }
 0x24f   : > { %v2606_v20 = vpop.f32.mrf.mxu1  ;;  %3127 = vmatpush.bf16.msra.mxu1 %v4480_v47 }
 0x250   : > { %v2366_v32 = vadd.f32 %v5368_v24, %v2277_v21  ;;  %v4479_v24 = vld [vmem:[#allocation2 + $0x1e8] sm:$0xff] }
 0x252   : > { %2229 = vmatmul.bf16.gmra.mxu2 %v5199_v29  ;;  %2645 = vmatmul.bf16.gmra.mxu1 %v5199_v29  ;;  %v5501_v11 = vadd.f32 %v2598_v2, %v2366_v32  ;;  %v4478_v32 = vld [vmem:[#allocation2 + $0x1e0] sm:$0xff] }
 0x253   : > { %3128 = vmatpush.bf16.msra.mxu1 %v4479_v24 }
 0x255   : > { %v2190_v58 = vpop.f32.mrf.mxu2  ;;  %v5517_v4 = vpop.f32.mrf.mxu0 }
 0x256   : > { %v2280_v38 = vadd.f32 %v5204_v37, %v2190_v58  ;;  %v5515_v58 = vpop.f32.mrf.mxu3 }
 0x257   : > { %v2608_v3 = vpop.f32.mrf.mxu1  ;;  %6616 = vst [vmem:[#allocation88_spill] sm:$0xff] %v5515_v58  ;;  %3129 = vmatpush.bf16.msra.mxu1 %v4478_v32  ;;  %v6618_v32 = vld [vmem:[#allocation49_spill] sm:$0xff] }
 0x258   : > { %v2369_v0 = vadd.f32 %v5373_v54, %v2280_v38  ;;  %v4426_v54 = vld [vmem:[#allocation2 + $0x40] sm:$0xff]  ;;  %v6617_v38 = vld [vmem:[#allocation47_spill] sm:$0xff] }
 0x259   : > { %2673 = vmatpush.bf16.msrb.mxu2 %v4426_v54 }
 0x25a   : > { %v5509_v33 = vadd.f32 %v2601_v8, %v2369_v0 }
 0x25d   : > { %v2192_v21 = vpop.f32.mrf.mxu2  ;;  %2818 = vmatmul.bf16.gmra.mxu3 %v5188_v31  ;;  %3065 = vmatmul.bf16.gmra.mxu0 %v5015_v6  ;;  %v4477_v6 = vld [vmem:[#allocation2 + $0x1d8] sm:$0xff]  ;;  %v4475_v31 = vld [vmem:[#allocation2 + $0x1c8] sm:$0xff]  ;;  %v5529_v58 = vpop.f32.mrf.mxu0 }
 0x25e   : > { %v2282_v2 = vadd.f32 %v5218_v55, %v2192_v21  ;;  %3130 = vmatpush.bf16.msra.mxu1 %v4477_v6  ;;  %v4474_v6 = vld [vmem:[#allocation2 + $0x1c0] sm:$0xff] }
 0x25f   : > { %v2611_v37 = vpop.f32.mrf.mxu1 }
 0x260   : > { %v2371_v46 = vadd.f32 %v5382_v59, %v2282_v2  ;;  %v4476_v59 = vld [vmem:[#allocation2 + $0x1d0] sm:$0xff]  ;;  %v5527_v2 = vpop.f32.mrf.mxu3 }
 0x262   : > { %2234 = vmatmul.bf16.gmra.mxu2 %v5231_v22  ;;  %2650 = vmatmul.bf16.gmra.mxu1 %v5231_v22  ;;  %v5521_v8 = vadd.f32 %v2603_v43, %v2371_v46 }
 0x263   : > { %3131 = vmatpush.bf16.msra.mxu1 %v4476_v59 }
 0x265   : > { %v2195_v55 = vpop.f32.mrf.mxu2  ;;  %v5541_v59 = vpop.f32.mrf.mxu0 }
 0x266   : > { %v2285_v47 = vadd.f32 %v6617_v38, %v2195_v55 }
 0x267   : > { %v2613_v0 = vpop.f32.mrf.mxu1  ;;  %3132 = vmatpush.bf16.msra.mxu1 %v4475_v31 }
 0x268   : > { %v2374_v24 = vadd.f32 %v5389_v30, %v2285_v47  ;;  %v5539_v38 = vpop.f32.mrf.mxu3 }
 0x269   : > { %6620 = vst [vmem:[#allocation47_spill] sm:$0xff] %v5539_v38 }
 0x26a   : > { %v5525_v21 = vadd.f32 %v2606_v20, %v2374_v24  ;;  %v6619_v20 = vld [vmem:[#allocation53_spill] sm:$0xff] }
 0x26b   : > { %3133 = vmatpush.bf16.msra.mxu1 %v4474_v6 }
 0x26d   : > { %v2197_v43 = vpop.f32.mrf.mxu2  ;;  %2823 = vmatmul.bf16.gmra.mxu3 %v5220_v1  ;;  %3070 = vmatmul.bf16.gmra.mxu0 %v5047_v17  ;;  %v6621_v17 = vld [vmem:[#allocation54_spill] sm:$0xff]  ;;  %v5552_v1 = vpop.f32.mrf.mxu0 }
 0x26e   : > { %v2287_v46 = vadd.f32 %v6618_v32, %v2197_v43 }
 0x26f   : > { %v2616_v54 = vpop.f32.mrf.mxu1 }
 0x270   : > { %v2376_v30 = vadd.f32 %v5396_v35, %v2287_v46  ;;  %v5550_v6 = vpop.f32.mrf.mxu3 }
 0x271   : > { %6623 = vst [vmem:[#allocation49_spill] sm:$0xff] %v5550_v6 }
 0x272   : > { %2239 = vmatmul.bf16.gmra.mxu2 %v6619_v20  ;;  %2655 = vmatmul.bf16.gmra.mxu1 %v6619_v20  ;;  %v5537_v55 = vadd.f32 %v2608_v3, %v2376_v30  ;;  %v6622_v3 = vld [vmem:[#allocation55_spill] sm:$0xff] }
 0x275   : > { %v2200_v47 = vpop.f32.mrf.mxu2 }
 0x276   : > { %v2290_v24 = vadd.f32 %v6621_v17, %v2200_v47  ;;  %v6624_v47 = vld [vmem:[#allocation59_spill] sm:$0xff] }
 0x277   : > { %v2618_v43 = vpop.f32.mrf.mxu1 }
 0x278   : > { %v2379_v31 = vadd.f32 %v5403_v36, %v2290_v24  ;;  %v4489_v36 = vld [vmem:[#allocation2 + $0x238] sm:$0xff]  ;;  %v6625_v24 = vld [vmem:[#allocation60_spill] sm:$0xff] }
 0x279   : > { %3215 = vmatpush.bf16.msra.mxu2 %v4489_v36  ;;  %v6627_v36 = vld [vmem:[#allocation9_spill] sm:$0xff] }
 0x27a   : > { %v5545_v32 = vadd.f32 %v2611_v37, %v2379_v31 }
 0x27d   : > { %v2202_v35 = vpop.f32.mrf.mxu2  ;;  %2828 = vmatmul.bf16.gmra.mxu3 %v5251_v34  ;;  %3075 = vmatmul.bf16.gmra.mxu0 %v5075_v51  ;;  %v5563_v34 = vpop.f32.mrf.mxu0 }
 0x27e   : > { %v2292_v46 = vadd.f32 %v6622_v3, %v2202_v35  ;;  %v5561_v3 = vpop.f32.mrf.mxu3 }
 0x27f   : > { %v2621_v30 = vpop.f32.mrf.mxu1  ;;  %6626 = vst [vmem:[#allocation53_spill] sm:$0xff] %v5561_v3 }
 0x280   : > { %v2381_v38 = vadd.f32 %v5413_v13, %v2292_v46 }
 0x282   : > { %2244 = vmatmul.bf16.gmra.mxu2 %v6624_v47  ;;  %2660 = vmatmul.bf16.gmra.mxu1 %v6624_v47  ;;  %v5557_v37 = vadd.f32 %v2613_v0, %v2381_v38 }
 0x285   : > { %v2205_v17 = vpop.f32.mrf.mxu2 }
 0x286   : > { %v2295_v51 = vadd.f32 %v6625_v24, %v2205_v17  ;;  %v5575_v17 = vpop.f32.mrf.mxu3 }
 0x287   : > { %v2623_v31 = vpop.f32.mrf.mxu1  ;;  %6628 = vst [vmem:[#allocation54_spill] sm:$0xff] %v5575_v17 }
 0x288   : > { %v2384_v35 = vadd.f32 %v5421_v50, %v2295_v51 }
 0x28a   : > { %v5565_v6 = vadd.f32 %v2616_v54, %v2384_v35  ;;  %v5577_v54 = vpop.f32.mrf.mxu0 }
 0x28d   : > { %v2207_v13 = vpop.f32.mrf.mxu2  ;;  %2833 = vmatmul.bf16.gmra.mxu3 %v5279_v10  ;;  %3080 = vmatmul.bf16.gmra.mxu0 %v5103_v26 }
 0x28e   : > { %v2297_v0 = vadd.f32 %v5313_v57, %v2207_v13  ;;  %v5583_v13 = vpop.f32.mrf.mxu3 }
 0x28f   : > { %v2626_v38 = vpop.f32.mrf.mxu1  ;;  %6629 = vst [vmem:[#allocation55_spill] sm:$0xff] %v5583_v13 }
 0x290   : > { %v2386_v46 = vadd.f32 %v5429_v12, %v2297_v0 }
 0x292   : > { %2249 = vmatmul.bf16.gmra.mxu2 %v5335_v19  ;;  %3134 = vmatmul.bf16.vlgmr.msra.gmra.mxu1 %v6627_v36  ;;  %v5573_v50 = vadd.f32 %v2618_v43, %v2386_v46  ;;  %v5587_v43 = vpop.f32.mrf.mxu0 }
 0x295   : > { %v2210_v24 = vpop.f32.mrf.mxu2 }
 0x296   : > { %v2300_v51 = vadd.f32 %v5341_v9, %v2210_v24  ;;  %v6630_v9 = vld [vmem:[#allocation11_spill] sm:$0xff] }
 0x297   : > { %v2628_v35 = vpop.f32.mrf.mxu1 }
 0x298   : > { %v2389_v26 = vadd.f32 %v5435_v45, %v2300_v51  ;;  %v4488_v45 = vld [vmem:[#allocation2 + $0x230] sm:$0xff] }
 0x299   : > { %3216 = vmatpush.bf16.msra.mxu2 %v4488_v45  ;;  %v6633_v45 = vld [vmem:[#allocation13_spill] sm:$0xff] }
 0x29a   : > { %v5581_v57 = vadd.f32 %v2621_v30, %v2389_v26  ;;  %v5596_v26 = vpop.f32.mrf.mxu0 }
 0x29d   : > { %v2212_v12 = vpop.f32.mrf.mxu2  ;;  %2838 = vmatmul.bf16.gmra.mxu3 %v5311_v39  ;;  %3085 = vmatmul.bf16.gmra.mxu0 %v5135_v49 }
 0x29e   : > { %v2302_v0 = vadd.f32 %v5347_v23, %v2212_v12 }
 0x29f   : > { %v2631_v46 = vpop.f32.mrf.mxu1 }
 0x2a0   : > { %v2391_v10 = vadd.f32 %v5441_v61, %v2302_v0  ;;  %v6631_v61 = vld [vmem:[#allocation69_spill] sm:$0xff] }
 0x2a2   : > { %2674 = vmatmul.bf16.vlgmr.msrb.gmra.mxu2 %v6594_v53  ;;  %3139 = vmatmul.bf16.gmra.mxu1 %v6630_v9  ;;  %v5593_v30 = vadd.f32 %v2623_v31, %v2391_v10  ;;  %v5604_v10 = vpop.f32.mrf.mxu0  ;;  %v6632_v31 = vld [vmem:[#allocation8_spill] sm:$0xff] }
 0x2a5   : > { %v2215_v24 = vpop.f32.mrf.mxu2 }
 0x2a6   : > { %v2305_v51 = vadd.f32 %v5357_v56, %v2215_v24 }
 0x2a7   : > { %v2633_v39 = vpop.f32.mrf.mxu1 }
 0x2a8   : > { %v2394_v49 = vadd.f32 %v5449_v5, %v2305_v51  ;;  %v6634_v51 = vld [vmem:[#allocation71_spill] sm:$0xff] }
 0x2aa   : > { %v5599_v23 = vadd.f32 %v2626_v38, %v2394_v49 }
 0x2ad   : > { %v2217_v12 = vpop.f32.mrf.mxu2  ;;  %3090 = vmatmul.bf16.gmra.mxu0 %v5167_v18  ;;  %v5614_v18 = vpop.f32.mrf.mxu0 }
 0x2ae   : > { %v2307_v0 = vadd.f32 %v6631_v61, %v2217_v12  ;;  %v6635_v61 = vld [vmem:[#allocation73_spill] sm:$0xff] }
 0x2af   : > { %v2636_v24 = vpop.f32.mrf.mxu1 }
 0x2b0   : > { %v2396_v13 = vadd.f32 %v5460_v41, %v2307_v0 }
 0x2b2   : > { %2679 = vmatmul.bf16.gmra.mxu2 %v6632_v31  ;;  %3144 = vmatmul.bf16.gmra.mxu1 %v6633_v45  ;;  %v5608_v56 = vadd.f32 %v2628_v35, %v2396_v13  ;;  %v6636_v35 = vld [vmem:[#allocation15_spill] sm:$0xff]  ;;  %v4487_v13 = vld [vmem:[#allocation2 + $0x228] sm:$0xff] }
 0x2b3   : > { %3217 = vmatpush.bf16.msra.mxu2 %v4487_v13 }
 0x2b5   : > { %v2220_v5 = vpop.f32.mrf.mxu2 }
 0x2b6   : > { %v2310_v38 = vadd.f32 %v6634_v51, %v2220_v5  ;;  %v6637_v51 = vld [vmem:[#allocation75_spill] sm:$0xff] }
 0x2b7   : > { %v2638_v12 = vpop.f32.mrf.mxu1 }
 0x2b8   : > { %v2399_v49 = vadd.f32 %v5471_v28, %v2310_v38 }
 0x2ba   : > { %v5612_v17 = vadd.f32 %v2631_v46, %v2399_v49  ;;  %v5623_v46 = vpop.f32.mrf.mxu0 }
 0x2bd   : > { %v2222_v41 = vpop.f32.mrf.mxu2  ;;  %3095 = vmatmul.bf16.gmra.mxu0 %v5199_v29 }
 0x2be   : > { %v2312_v0 = vadd.f32 %v6635_v61, %v2222_v41 }
 0x2bf   : > { %v2641_v49 = vpop.f32.mrf.mxu1 }
 0x2c0   : > { %v2401_v31 = vadd.f32 %v5485_v42, %v2312_v0  ;;  %v6638_v42 = vld [vmem:[#allocation77_spill] sm:$0xff] }
 0x2c2   : > { %2684 = vmatmul.bf16.gmra.mxu2 %v6627_v36  ;;  %3149 = vmatmul.bf16.gmra.mxu1 %v6636_v35  ;;  %v5621_v5 = vadd.f32 %v2633_v39, %v2401_v31  ;;  %v5631_v61 = vpop.f32.mrf.mxu0  ;;  %v6639_v31 = vld [vmem:[#allocation19_spill] sm:$0xff] }
 0x2c5   : > { %v2225_v28 = vpop.f32.mrf.mxu2 }
 0x2c6   : > { %v2315_v38 = vadd.f32 %v6637_v51, %v2225_v28 }
 0x2c7   : > { %v2643_v0 = vpop.f32.mrf.mxu1 }
 0x2c8   : > { %v2404_v29 = vadd.f32 %v5495_v62, %v2315_v38  ;;  %v6640_v62 = vld [vmem:[#allocation79_spill] sm:$0xff] }
 0x2ca   : > { %v5627_v3 = vadd.f32 %v2636_v24, %v2404_v29  ;;  %v5640_v38 = vpop.f32.mrf.mxu0 }
 0x2cd   : > { %v2227_v41 = vpop.f32.mrf.mxu2  ;;  %3100 = vmatmul.bf16.gmra.mxu0 %v5231_v22 }
 0x2ce   : > { %v2317_v36 = vadd.f32 %v6638_v42, %v2227_v41 }
 0x2cf   : > { %v2646_v29 = vpop.f32.mrf.mxu1 }
 0x2d0   : > { %v2406_v39 = vadd.f32 %v5506_v25, %v2317_v36  ;;  %v6641_v25 = vld [vmem:[#allocation81_spill] sm:$0xff]  ;;  %v4486_v36 = vld [vmem:[#allocation2 + $0x220] sm:$0xff] }
 0x2d1   : > { %3218 = vmatpush.bf16.msra.mxu2 %v4486_v36 }
 0x2d2   : > { %2689 = vmatmul.bf16.gmra.mxu2 %v6630_v9  ;;  %3154 = vmatmul.bf16.gmra.mxu1 %v6639_v31  ;;  %v5636_v13 = vadd.f32 %v2638_v12, %v2406_v39  ;;  %v6642_v12 = vld [vmem:[#allocation23_spill] sm:$0xff] }
 0x2d5   : > { %v2230_v28 = vpop.f32.mrf.mxu2 }
 0x2d6   : > { %v2320_v24 = vadd.f32 %v6640_v62, %v2230_v28  ;;  %v6643_v62 = vld [vmem:[#allocation83_spill] sm:$0xff] }
 0x2d8   : > { %v2409_v51 = vadd.f32 %v5517_v4, %v2320_v24  ;;  %v5651_v4 = vpop.f32.mrf.mxu0 }
 0x2da   : > { %v5642_v22 = vadd.f32 %v2641_v49, %v2409_v51  ;;  %v2648_v49 = vpop.f32.mrf.mxu1 }
 0x2dd   : > { %v2232_v41 = vpop.f32.mrf.mxu2  ;;  %3105 = vmatmul.bf16.gmra.mxu0 %v6619_v20 }
 0x2de   : > { %v2322_v42 = vadd.f32 %v6641_v25, %v2232_v41 }
 0x2e0   : > { %v2411_v9 = vadd.f32 %v5529_v58, %v2322_v42  ;;  %v5658_v58 = vpop.f32.mrf.mxu0 }
 0x2e2   : > { %2694 = vmatmul.bf16.gmra.mxu2 %v6633_v45  ;;  %3159 = vmatmul.bf16.gmra.mxu1 %v6642_v12  ;;  %v5649_v39 = vadd.f32 %v2643_v0, %v2411_v9  ;;  %v6644_v45 = vld [vmem:[#allocation84_spill] sm:$0xff]  ;;  %v2651_v0 = vpop.f32.mrf.mxu1  ;;  %v6645_v9 = vld [vmem:[#allocation27_spill] sm:$0xff] }
 0x2e5   : > { %v2235_v28 = vpop.f32.mrf.mxu2 }
 0x2e6   : > { %v2325_v24 = vadd.f32 %v6643_v62, %v2235_v28 }
 0x2e8   : > { %v2414_v20 = vadd.f32 %v5541_v59, %v2325_v24  ;;  %v6646_v59 = vld [vmem:[#allocation85_spill] sm:$0xff]  ;;  %v5667_v62 = vpop.f32.mrf.mxu0 }
 0x2ea   : > { %v5655_v51 = vadd.f32 %v2646_v29, %v2414_v20  ;;  %v2653_v24 = vpop.f32.mrf.mxu1 }
 0x2ed   : > { %v2237_v41 = vpop.f32.mrf.mxu2  ;;  %3110 = vmatmul.bf16.gmra.mxu0 %v6624_v47 }
 0x2ee   : > { %v2327_v25 = vadd.f32 %v6644_v45, %v2237_v41 }
 0x2f0   : > { %v2416_v42 = vadd.f32 %v5552_v1, %v2327_v25  ;;  %v6647_v1 = vld [vmem:[#allocation86_spill] sm:$0xff]  ;;  %v5675_v25 = vpop.f32.mrf.mxu0 }
 0x2f2   : > { %2699 = vmatmul.bf16.gmra.mxu2 %v6636_v35  ;;  %3164 = vmatmul.bf16.gmra.mxu1 %v6645_v9  ;;  %v5664_v36 = vadd.f32 %v2648_v49, %v2416_v42  ;;  %v6648_v49 = vld [vmem:[#allocation30_spill] sm:$0xff]  ;;  %v4485_v42 = vld [vmem:[#allocation2 + $0x218] sm:$0xff] }
 0x2f3   : > { %3219 = vmatpush.bf16.msra.mxu2 %v4485_v42 }
 0x2f5   : > { %v2240_v28 = vpop.f32.mrf.mxu2 }
 0x2f6   : > { %v2330_v29 = vadd.f32 %v6646_v59, %v2240_v28 }
 0x2f8   : > { %v2419_v47 = vadd.f32 %v5563_v34, %v2330_v29  ;;  %v2656_v34 = vpop.f32.mrf.mxu1 }
 0x2fa   : > { %v5670_v20 = vadd.f32 %v2651_v0, %v2419_v47  ;;  %v5685_v47 = vpop.f32.mrf.mxu0 }
 0x2fd   : > { %v2242_v41 = vpop.f32.mrf.mxu2  ;;  %3115 = vmatmul.bf16.gmra.mxu0 %v5335_v19 }
 0x2fe   : > { %v2332_v45 = vadd.f32 %v6647_v1, %v2242_v41  ;;  %v6649_v1 = vld [vmem:[#allocation33_spill] sm:$0xff] }
 0x300   : > { %v2421_v35 = vadd.f32 %v5577_v54, %v2332_v45  ;;  %v2658_v54 = vpop.f32.mrf.mxu1 }
 0x302   : > { %2704 = vmatmul.bf16.gmra.mxu2 %v6639_v31  ;;  %3169 = vmatmul.bf16.gmra.mxu1 %v6648_v49  ;;  %v5679_v28 = vadd.f32 %v2653_v24, %v2421_v35 }
 0x305   : > { %v2245_v0 = vpop.f32.mrf.mxu2 }
 0x306   : > { %v2335_v59 = vadd.f32 %v5458_v40, %v2245_v0 }
 0x308   : > { %v2424_v19 = vadd.f32 %v5587_v43, %v2335_v59  ;;  %v2661_v35 = vpop.f32.mrf.mxu1 }
 0x30a   : > { %v5683_v29 = vadd.f32 %v2656_v34, %v2424_v19  ;;  %v4497_v34 = vld [vmem:[%s6474_s5 + $0x38] sm:$0xff]  ;;  %v6650_v19 = vld [vmem:[#allocation37_spill] sm:$0xff] }
 0x30b   : > { %3488 = vmatpush.bf16.msra.mxu3 %v4497_v34 }
 0x30d   : > { %v2247_v41 = vpop.f32.mrf.mxu2  ;;  %3120 = vmatmul.bf16.gmra.mxu0 %v6594_v53 }
 0x30e   : > { %v2337_v31 = vadd.f32 %v5469_v52, %v2247_v41 }
 0x310   : > { %v2426_v24 = vadd.f32 %v5596_v26, %v2337_v31  ;;  %v2663_v59 = vpop.f32.mrf.mxu1 }
 0x312   : > { %2709 = vmatmul.bf16.gmra.mxu2 %v6642_v12  ;;  %3174 = vmatmul.bf16.gmra.mxu1 %v6649_v1  ;;  %v5692_v45 = vadd.f32 %v2658_v54, %v2426_v24 }
 0x315   : > { %v2250_v40 = vpop.f32.mrf.mxu2 }
 0x316   : > { %v2340_v43 = vadd.f32 %v5483_v48, %v2250_v40  ;;  %v4484_v48 = vld [vmem:[#allocation2 + $0x210] sm:$0xff] }
 0x317   : > { %3220 = vmatpush.bf16.msra.mxu2 %v4484_v48  ;;  %v4496_v40 = vld [vmem:[%s6474_s5 + $0x30] sm:$0xff]  ;;  %v4495_v48 = vld [vmem:[%s6474_s5 + $0x28] sm:$0xff] }
 0x318   : > { %v2429_v42 = vadd.f32 %v5604_v10, %v2340_v43  ;;  %3489 = vmatpush.bf16.msra.mxu3 %v4496_v40  ;;  %v5721_v43 = vpop.f32.mrf.mxu1 }
 0x31a   : > { %v5699_v52 = vadd.f32 %v2661_v35, %v2429_v42 }
 0x31c   : > { %3490 = vmatpush.bf16.msra.mxu3 %v4495_v48 }
 0x31d   : > { %v2252_v26 = vpop.f32.mrf.mxu2 }
 0x31e   : > { %v2342_v12 = vadd.f32 %v5491_v27, %v2252_v26  ;;  %v6651_v27 = vld [vmem:[#allocation41_spill] sm:$0xff] }
 0x320   : > { %v2431_v0 = vadd.f32 %v5614_v18, %v2342_v12 }
 0x322   : > { %2714 = vmatmul.bf16.gmra.mxu2 %v6645_v9  ;;  %3179 = vmatmul.bf16.gmra.mxu1 %v6650_v19  ;;  %v5705_v54 = vadd.f32 %v2663_v59, %v2431_v0 }
 0x325   : > { %v2675_v10 = vpop.f32.mrf.mxu2 }
 0x326   : > { %v5708_v41 = vadd.f32 %v2675_v10, %v5453_v14 }
 0x32d   : > { %v2677_v31 = vpop.f32.mrf.mxu2 }
 0x32e   : > { %v5711_v24 = vadd.f32 %v2677_v31, %v5465_v44  ;;  %v6652_v44 = vld [vmem:[#allocation45_spill] sm:$0xff]  ;;  %v4482_v31 = vld [vmem:[#allocation2 + $0x200] sm:$0xff] }
 0x332   : > { %2719 = vmatmul.bf16.gmra.mxu2 %v6648_v49  ;;  %3184 = vmatmul.bf16.gmra.mxu1 %v6651_v27  ;;  %v4483_v49 = vld [vmem:[#allocation2 + $0x208] sm:$0xff] }
 0x333   : > { %3221 = vmatpush.bf16.msra.mxu2 %v4483_v49 }
 0x335   : > { %v2680_v18 = vpop.f32.mrf.mxu2 }
 0x336   : > { %v5716_v9 = vadd.f32 %v2680_v18, %v5473_v7  ;;  %v5728_v7 = vpop.f32.mrf.mxu1 }
 0x337   : > { %3222 = vmatpush.bf16.msra.mxu2 %v4482_v31 }
 0x33d   : > { %v2682_v14 = vpop.f32.mrf.mxu2 }
 0x33e   : > { %v5724_v35 = vadd.f32 %v2682_v14, %v5481_v60  ;;  %v5736_v0 = vpop.f32.mrf.mxu1  ;;  %v6653_v60 = vld [vmem:[#allocation51_spill] sm:$0xff] }
 0x342   : > { %2724 = vmatmul.bf16.gmra.mxu2 %v6649_v1  ;;  %3189 = vmatmul.bf16.gmra.mxu1 %v6652_v44 }
 0x345   : > { %v2685_v42 = vpop.f32.mrf.mxu2 }
 0x346   : > { %v5731_v34 = vadd.f32 %v2685_v42, %v5489_v15  ;;  %v5746_v15 = vpop.f32.mrf.mxu1 }
 0x34d   : > { %v2687_v26 = vpop.f32.mrf.mxu2 }
 0x34e   : > { %v5734_v12 = vadd.f32 %v2687_v26, %v5501_v11  ;;  %v5753_v18 = vpop.f32.mrf.mxu1 }
 0x352   : > { %2729 = vmatmul.bf16.gmra.mxu2 %v6650_v19  ;;  %3194 = vmatmul.bf16.gmra.mxu1 %v6653_v60  ;;  %v6654_v19 = vld [vmem:[#allocation58_spill] sm:$0xff] }
 0x355   : > { %v2690_v1 = vpop.f32.mrf.mxu2 }
 0x356   : > { %v5741_v59 = vadd.f32 %v2690_v1, %v5509_v33  ;;  %v5758_v49 = vpop.f32.mrf.mxu1 }
 0x35d   : > { %v2692_v10 = vpop.f32.mrf.mxu2 }
 0x35e   : > { %v5749_v11 = vadd.f32 %v2692_v10, %v5521_v8  ;;  %v6655_v8 = vld [vmem:[#allocation63_spill] sm:$0xff]  ;;  %v5768_v1 = vpop.f32.mrf.mxu1 }
 0x362   : > { %2734 = vmatmul.bf16.gmra.mxu2 %v6651_v27  ;;  %3199 = vmatmul.bf16.gmra.mxu1 %v6654_v19 }
 0x365   : > { %v2695_v33 = vpop.f32.mrf.mxu2 }
 0x366   : > { %v5756_v40 = vadd.f32 %v2695_v33, %v5525_v21  ;;  %v4494_v21 = vld [vmem:[%s6474_s5 + $0x20] sm:$0xff] }
 0x367   : > { %3491 = vmatpush.bf16.msra.mxu3 %v4494_v21 }
 0x36d   : > { %v2697_v14 = vpop.f32.mrf.mxu2 }
 0x36e   : > { %v5761_v42 = vadd.f32 %v2697_v14, %v5537_v55  ;;  %v5776_v55 = vpop.f32.mrf.mxu1 }
 0x372   : > { %2739 = vmatmul.bf16.gmra.mxu2 %v6652_v44  ;;  %3204 = vmatmul.bf16.gmra.mxu1 %v6655_v8 }
 0x375   : > { %v2700_v27 = vpop.f32.mrf.mxu2 }
 0x376   : > { %v5766_v26 = vadd.f32 %v2700_v27, %v5545_v32 }
 0x37d   : > { %v2702_v48 = vpop.f32.mrf.mxu2 }
 0x37e   : > { %v5774_v10 = vadd.f32 %v2702_v48, %v5557_v37 }
 0x382   : > { %2744 = vmatmul.bf16.gmra.mxu2 %v6653_v60  ;;  %3209 = vmatmul.bf16.gmra.mxu1 %v6594_v53  ;;  %v4493_v60 = vld [vmem:[%s6474_s5 + $0x18] sm:$0xff] }
 0x383   : > { %3492 = vmatpush.bf16.msra.mxu3 %v4493_v60 }
 0x385   : > { %v2705_v44 = vpop.f32.mrf.mxu2 }
 0x386   : > { %v5781_v32 = vadd.f32 %v2705_v44, %v5565_v6  ;;  %v6656_v6 = vld [vmem:[#allocation10_spill] sm:$0xff] }
 0x38d   : > { %v2707_v31 = vpop.f32.mrf.mxu2 }
 0x38e   : > { %v5784_v33 = vadd.f32 %v2707_v31, %v5573_v50 }
 0x392   : > { %2749 = vmatmul.bf16.gmra.mxu2 %v6654_v19 }
 0x395   : > { %v2710_v14 = vpop.f32.mrf.mxu2 }
 0x396   : > { %v5788_v37 = vadd.f32 %v2710_v14, %v5581_v57  ;;  %v6657_v57 = vld [vmem:[#allocation12_spill] sm:$0xff] }
 0x39d   : > { %v2712_v8 = vpop.f32.mrf.mxu2 }
 0x39e   : > { %v5794_v27 = vadd.f32 %v2712_v8, %v5593_v30  ;;  %v4492_v30 = vld [vmem:[%s6474_s5 + $0x10] sm:$0xff] }
 0x39f   : > { %3493 = vmatpush.bf16.msra.mxu3 %v4492_v30  ;;  %v4491_v30 = vld [vmem:[%s6474_s5 + $0x8] sm:$0xff] }
 0x3a2   : > { %3223 = vmatmul.bf16.vlgmr.msra.gmra.mxu2 %v6656_v6  ;;  %v5817_v6 = vpop.f32.mrf.mxu3 }
 0x3a3   : > { %3494 = vmatpush.bf16.msra.mxu3 %v4491_v30 }
 0x3a5   : > { %v2715_v21 = vpop.f32.mrf.mxu2 }
 0x3a6   : > { %v5798_v50 = vadd.f32 %v2715_v21, %v5599_v23  ;;  %v6658_v23 = vld [vmem:[#allocation14_spill] sm:$0xff] }
 0x3ad   : > { %v2717_v19 = vpop.f32.mrf.mxu2 }
 0x3ae   : > { %v5801_v48 = vadd.f32 %v2717_v19, %v5608_v56  ;;  %v6659_v19 = vld [vmem:[#allocation18_spill] sm:$0xff] }
 0x3b2   : > { %3228 = vmatmul.bf16.gmra.mxu2 %v6657_v57 }
 0x3b5   : > { %v2720_v44 = vpop.f32.mrf.mxu2 }
 0x3b6   : > { %v5805_v31 = vadd.f32 %v2720_v44, %v5612_v17 }
 0x3bd   : > { %v2722_v14 = vpop.f32.mrf.mxu2 }
 0x3be   : > { %v5811_v60 = vadd.f32 %v2722_v14, %v5621_v5  ;;  %v5826_v5 = vpop.f32.mrf.mxu3 }
 0x3c2   : > { %3233 = vmatmul.bf16.gmra.mxu2 %v6658_v23 }
 0x3c5   : > { %v2725_v8 = vpop.f32.mrf.mxu2 }
 0x3c6   : > { %v5815_v56 = vadd.f32 %v2725_v8, %v5627_v3  ;;  %v5834_v23 = vpop.f32.mrf.mxu3 }
 0x3cd   : > { %v2727_v21 = vpop.f32.mrf.mxu2 }
 0x3ce   : > { %v5820_v17 = vadd.f32 %v2727_v21, %v5636_v13  ;;  %v6662_v13 = vld [vmem:[#allocation22_spill] sm:$0xff] }
 0x3d2   : > { %3238 = vmatmul.bf16.gmra.mxu2 %v6659_v19 }
 0x3d5   : > { %v2730_v57 = vpop.f32.mrf.mxu2 }
 0x3d6   : > { %v5824_v44 = vadd.f32 %v2730_v57, %v5642_v22  ;;  %v5840_v22 = vpop.f32.mrf.mxu3 }
 0x3d8   : > { %6660 = vst [vmem:[#allocation59_spill] sm:$0xff] %v5824_v44  ;;  %v6665_v44 = vld [vmem:[#allocation26_spill] sm:$0xff] }
 0x3dd   : > { %v2732_v3 = vpop.f32.mrf.mxu2 }
 0x3de   : > { %v5832_v14 = vadd.f32 %v2732_v3, %v5649_v39  ;;  %v5846_v30 = vpop.f32.mrf.mxu3 }
 0x3e0   : > { %6661 = vst [vmem:[#allocation60_spill] sm:$0xff] %v5832_v14 }
 0x3e2   : > { %3243 = vmatmul.bf16.gmra.mxu2 %v6662_v13  ;;  %v4490_v13 = vld [vmem:[%s6474_s5] sm:$0xff] }
 0x3e3   : > { %3495 = vmatpush.bf16.msra.mxu3 %v4490_v13 }
 0x3e5   : > { %v2735_v8 = vpop.f32.mrf.mxu2 }
 0x3e6   : > { %v5838_v21 = vadd.f32 %v2735_v8, %v5655_v51 }
 0x3e8   : > { %6663 = vst [vmem:[#allocation9_spill] sm:$0xff] %v5838_v21  ;;  %v5857_v21 = vpop.f32.mrf.mxu3 }
 0x3ed   : > { %v2737_v19 = vpop.f32.mrf.mxu2 }
 0x3ee   : > { %v5843_v57 = vadd.f32 %v2737_v19, %v5664_v36 }
 0x3f0   : > { %6664 = vst [vmem:[#allocation11_spill] sm:$0xff] %v5843_v57  ;;  %v5863_v19 = vpop.f32.mrf.mxu3 }
 0x3f2   : > { %3248 = vmatmul.bf16.gmra.mxu2 %v6665_v44 }
 0x3f5   : > { %v2740_v39 = vpop.f32.mrf.mxu2 }
 0x3f6   : > { %v5849_v3 = vadd.f32 %v2740_v39, %v5670_v20 }
 0x3f8   : > { %6666 = vst [vmem:[#allocation69_spill] sm:$0xff] %v5849_v3  ;;  %v5869_v13 = vpop.f32.mrf.mxu3 }
 0x3fd   : > { %v2742_v51 = vpop.f32.mrf.mxu2 }
 0x3fe   : > { %v5855_v8 = vadd.f32 %v2742_v51, %v5679_v28 }
 0x400   : > { %6667 = vst [vmem:[#allocation8_spill] sm:$0xff] %v5855_v8  ;;  %v5874_v8 = vpop.f32.mrf.mxu3 }
 0x402   : > { %3253 = vmatmul.bf16.gmra.mxu2 %v5092_v63 }
 0x405   : > { %v2745_v36 = vpop.f32.mrf.mxu2 }
 0x406   : > { %v5861_v44 = vadd.f32 %v2745_v36, %v5683_v29  ;;  %v6672_v36 = vld [vmem:[#allocation36_spill] sm:$0xff] }
 0x408   : > { %6668 = vst [vmem:[#allocation13_spill] sm:$0xff] %v5861_v44  ;;  %v5884_v3 = vpop.f32.mrf.mxu3 }
 0x40d   : > { %v2747_v20 = vpop.f32.mrf.mxu2 }
 0x40e   : > { %v5866_v39 = vadd.f32 %v2747_v20, %v5692_v45  ;;  %v3136_v45 = vadd.f32 %v5721_v43, %v5623_v46 }
 0x410   : > { %6669 = vst [vmem:[#allocation71_spill] sm:$0xff] %v5866_v39 }
 0x412   : > { %3258 = vmatmul.bf16.gmra.mxu2 %v5124_v16  ;;  %v6673_v16 = vld [vmem:[#allocation87_spill] sm:$0xff] }
 0x413   : > { %v2765_v39 = vadd.f32 %v6673_v16, %v5708_v41 }
 0x415   : > { %v2750_v28 = vpop.f32.mrf.mxu2 }
 0x416   : > { %v5872_v51 = vadd.f32 %v2750_v28, %v5699_v52  ;;  %v3138_v28 = vadd.f32 %v5728_v7, %v5631_v61  ;;  %v5900_v61 = vpop.f32.mrf.mxu0  ;;  %v3141_v7 = vadd.f32 %v5736_v0, %v5640_v38  ;;  %v6676_v38 = vld [vmem:[#allocation47_spill] sm:$0xff] }
 0x417   : > { %v2772_v0 = vadd.f32 %v6676_v38, %v5724_v35 }
 0x418   : > { %6670 = vst [vmem:[#allocation73_spill] sm:$0xff] %v5872_v51  ;;  %v5904_v51 = vpop.f32.mrf.mxu1 }
 0x41d   : > { %v2752_v63 = vpop.f32.mrf.mxu2 }
 0x41e   : > { %v5877_v29 = vadd.f32 %v2752_v63, %v5705_v54  ;;  %v5891_v54 = vld [vmem:[%s6473_s4] ss:$0 sm:$0xff] }
 0x420   : > { %6671 = vst [vmem:[#allocation15_spill] sm:$0xff] %v5877_v29 }
 0x422   : > { %3263 = vmatmul.bf16.gmra.mxu2 %v6672_v36  ;;  %v6674_v36 = vld [vmem:[#allocation88_spill] sm:$0xff] }
 0x423   : > { %v2767_v46 = vadd.f32 %v6674_v36, %v5711_v24 }
 0x425   : > { %v3224_v20 = vpop.f32.mrf.mxu2 }
 0x426   : > { %v3225_v44 = vadd.f32 %v3224_v20, %v3136_v45  ;;  %v5896_v45 = vpop.f32.mrf.mxu3 }
 0x428   : > { %v3304_v52 = vadd.f32 %v3225_v44, %v2765_v39  ;;  %v6675_v39 = vld [vmem:[#allocation40_spill] sm:$0xff] }
 0x42a   : > { %v3340_v29 = vadd.f32 %v5891_v54, %v3304_v52  ;;  %v2770_v52 = vadd.f32 %v5527_v2, %v5716_v9  ;;  %v6677_v9 = vld [vmem:[#allocation44_spill] sm:$0xff] }
 0x42c   : > { %v3372_v20 = vmax.f32 %v3340_v29, 0.0 }
 0x42d   : > { %v3226_v63 = vpop.f32.mrf.mxu2 }
 0x42e   : > { %v3227_v43 = vadd.f32 %v3226_v63, %v3138_v28 }
 0x430   : > { %v3305_v41 = vadd.f32 %v3227_v43, %v2767_v46  ;;  %v5908_v46 = vpop.f32.mrf.mxu3  ;;  %v3143_v43 = vadd.f32 %v5746_v15, %v5651_v4 }
 0x432   : > { %v3341_v44 = vadd.f32 %v5891_v54, %v3305_v41  ;;  %3268 = vmatmul.bf16.gmra.mxu2 %v6675_v39  ;;  %v3068_v39 = vpop.f32.mrf.mxu0 }
 0x434   : > { %v3373_v16 = vmax.f32 %v3341_v44, 0.0  ;;  %v3157_v44 = vpop.f32.mrf.mxu1 }
 0x435   : > { %v3229_v24 = vpop.f32.mrf.mxu2 }
 0x436   : > { %v3404_v28 = vpack.c.bf16 %v3373_v16, %v3372_v20  ;;  %v3230_v63 = vadd.f32 %v3229_v24, %v3141_v7  ;;  %v3146_v7 = vadd.f32 %v5753_v18, %v5658_v58  ;;  %v6678_v24 = vld [vmem:[#allocation49_spill] sm:$0xff] }
 0x437   : > { %v2775_v35 = vadd.f32 %v6678_v24, %v5731_v34  ;;  %v6679_v58 = vld [vmem:[#allocation53_spill] sm:$0xff] }
 0x438   : > { %v3306_v36 = vadd.f32 %v3230_v63, %v2770_v52  ;;  %3496 = vmatmul.bf16.vlgmr.msra.gmra.mxu3 %v3404_v28  ;;  %v5919_v4 = vpop.f32.mrf.mxu3  ;;  %v2777_v18 = vadd.f32 %v6679_v58, %v5734_v12  ;;  %v6681_v12 = vld [vmem:[#allocation54_spill] sm:$0xff] }
 0x43a   : > { %v3342_v57 = vadd.f32 %v5891_v54, %v3306_v36  ;;  %v3071_v63 = vpop.f32.mrf.mxu0 }
 0x43c   : > { %v3374_v20 = vmax.f32 %v3342_v57, 0.0 }
 0x43d   : > { %v3231_v41 = vpop.f32.mrf.mxu2 }
 0x43e   : > { %v3232_v29 = vadd.f32 %v3231_v41, %v3143_v43  ;;  %v3160_v43 = vpop.f32.mrf.mxu1 }
 0x440   : > { %v3307_v14 = vadd.f32 %v3232_v29, %v2772_v0  ;;  %v5927_v38 = vpop.f32.mrf.mxu3 }
 0x442   : > { %v3343_v2 = vadd.f32 %v5891_v54, %v3307_v14  ;;  %3273 = vmatmul.bf16.gmra.mxu2 %v6677_v9  ;;  %v3148_v14 = vadd.f32 %v5758_v49, %v5667_v62  ;;  %v3073_v34 = vpop.f32.mrf.mxu0  ;;  %v6680_v9 = vld [vmem:[#allocation50_spill] sm:$0xff] }
 0x444   : > { %v3375_v16 = vmax.f32 %v3343_v2, 0.0 }
 0x445   : > { %v3234_v15 = vpop.f32.mrf.mxu2 }
 0x446   : > { %v3235_v52 = vadd.f32 %v3234_v15, %v3146_v7  ;;  %v3405_v28 = vpack.c.bf16 %v3375_v16, %v3374_v20  ;;  %v3162_v7 = vpop.f32.mrf.mxu1  ;;  %v3151_v20 = vadd.f32 %v5768_v1, %v5675_v25  ;;  %v2780_v15 = vadd.f32 %v6681_v12, %v5741_v59  ;;  %v6682_v25 = vld [vmem:[#allocation55_spill] sm:$0xff] }
 0x447   : > { %v2782_v1 = vadd.f32 %v6682_v25, %v5749_v11  ;;  %v2785_v12 = vadd.f32 %v5817_v6, %v5756_v40 }
 0x448   : > { %v3308_v36 = vadd.f32 %v3235_v52, %v2775_v35  ;;  %3501 = vmatmul.bf16.gmra.mxu3 %v3405_v28  ;;  %v5936_v28 = vpop.f32.mrf.mxu3 }
 0x44a   : > { %v3344_v0 = vadd.f32 %v5891_v54, %v3308_v36  ;;  %v3076_v36 = vpop.f32.mrf.mxu0 }
 0x44c   : > { %v3376_v62 = vmax.f32 %v3344_v0, 0.0 }
 0x44d   : > { %v3236_v41 = vpop.f32.mrf.mxu2 }
 0x44e   : > { %v3237_v57 = vadd.f32 %v3236_v41, %v3148_v14  ;;  %v3153_v14 = vadd.f32 %v5776_v55, %v5685_v47  ;;  %v3165_v41 = vpop.f32.mrf.mxu1  ;;  %v3156_v47 = vadd.f32 %v5904_v51, %v5900_v61 }
 0x450   : > { %v3309_v29 = vadd.f32 %v3237_v57, %v2777_v18 }
 0x452   : > { %v3345_v2 = vadd.f32 %v5891_v54, %v3309_v29  ;;  %3278 = vmatmul.bf16.gmra.mxu2 %v6680_v9  ;;  %v6683_v29 = vld [vmem:[#allocation56_spill] sm:$0xff] }
 0x454   : > { %v3377_v49 = vmax.f32 %v3345_v2, 0.0  ;;  %v5945_v2 = vpop.f32.mrf.mxu3 }
 0x455   : > { %v3239_v16 = vpop.f32.mrf.mxu2 }
 0x456   : > { %v3240_v24 = vadd.f32 %v3239_v16, %v3151_v20  ;;  %v3406_v35 = vpack.c.bf16 %v3377_v49, %v3376_v62  ;;  %v3078_v49 = vpop.f32.mrf.mxu0  ;;  %v3167_v16 = vpop.f32.mrf.mxu1 }
 0x458   : > { %v3310_v52 = vadd.f32 %v3240_v24, %v2780_v15  ;;  %3506 = vmatmul.bf16.gmra.mxu3 %v3406_v35  ;;  %v3158_v15 = vadd.f32 %v3157_v44, %v3068_v39  ;;  %v3161_v39 = vadd.f32 %v3160_v43, %v3071_v63 }
 0x45a   : > { %v3346_v57 = vadd.f32 %v5891_v54, %v3310_v52 }
 0x45c   : > { %v3378_v9 = vmax.f32 %v3346_v57, 0.0  ;;  %v5951_v35 = vpop.f32.mrf.mxu3  ;;  %v6684_v57 = vld [vmem:[#allocation62_spill] sm:$0xff] }
 0x45d   : > { %v3241_v58 = vpop.f32.mrf.mxu2 }
 0x45e   : > { %v3242_v18 = vadd.f32 %v3241_v58, %v3153_v14  ;;  %v2787_v14 = vadd.f32 %v5826_v5, %v5761_v42  ;;  %v3081_v25 = vpop.f32.mrf.mxu0  ;;  %v3170_v61 = vpop.f32.mrf.mxu1  ;;  %v2790_v5 = vadd.f32 %v5834_v23, %v5766_v26 }
 0x460   : > { %v3311_v0 = vadd.f32 %v3242_v18, %v2782_v1 }
 0x462   : > { %v3347_v59 = vadd.f32 %v5891_v54, %v3311_v0  ;;  %3283 = vmatmul.bf16.gmra.mxu2 %v6683_v29 }
 0x464   : > { %v3379_v20 = vmax.f32 %v3347_v59, 0.0  ;;  %v5958_v59 = vpop.f32.mrf.mxu3 }
 0x465   : > { %v3244_v62 = vpop.f32.mrf.mxu2 }
 0x466   : > { %v3407_v55 = vpack.c.bf16 %v3379_v20, %v3378_v9  ;;  %v3245_v11 = vadd.f32 %v3244_v62, %v3156_v47  ;;  %v3083_v42 = vpop.f32.mrf.mxu0  ;;  %v3172_v9 = vpop.f32.mrf.mxu1  ;;  %v3163_v20 = vadd.f32 %v3162_v7, %v3073_v34  ;;  %v3166_v7 = vadd.f32 %v3165_v41, %v3076_v36 }
 0x468   : > { %3511 = vmatmul.bf16.gmra.mxu3 %v3407_v55  ;;  %v3312_v24 = vadd.f32 %v3245_v11, %v2785_v12  ;;  %v2792_v55 = vadd.f32 %v5840_v22, %v5774_v10  ;;  %v2795_v10 = vadd.f32 %v5846_v30, %v5781_v32 }
 0x46a   : > { %v3348_v1 = vadd.f32 %v5891_v54, %v3312_v24  ;;  %v6685_v24 = vld [vmem:[#allocation65_spill] sm:$0xff] }
 0x46c   : > { %v3380_v0 = vmax.f32 %v3348_v1, 0.0  ;;  %v5965_v43 = vpop.f32.mrf.mxu3 }
 0x46d   : > { %v3246_v52 = vpop.f32.mrf.mxu2 }
 0x46e   : > { %v3247_v58 = vadd.f32 %v3246_v52, %v3158_v15  ;;  %v3086_v52 = vpop.f32.mrf.mxu0  ;;  %v3175_v23 = vpop.f32.mrf.mxu1 }
 0x470   : > { %v3313_v51 = vadd.f32 %v3247_v58, %v2787_v14 }
 0x472   : > { %v3349_v18 = vadd.f32 %v5891_v54, %v3313_v51  ;;  %3288 = vmatmul.bf16.gmra.mxu2 %v6684_v57  ;;  %v3168_v51 = vadd.f32 %v3167_v16, %v3078_v49  ;;  %v3171_v16 = vadd.f32 %v3170_v61, %v3081_v25 }
 0x474   : > { %v3381_v40 = vmax.f32 %v3349_v18, 0.0  ;;  %v5971_v22 = vpop.f32.mrf.mxu3 }
 0x475   : > { %v3249_v6 = vpop.f32.mrf.mxu2 }
 0x476   : > { %v3408_v44 = vpack.c.bf16 %v3381_v40, %v3380_v0  ;;  %v3250_v29 = vadd.f32 %v3249_v6, %v3161_v39  ;;  %v3088_v0 = vpop.f32.mrf.mxu0  ;;  %v2797_v40 = vadd.f32 %v5857_v21, %v5784_v33  ;;  %v3177_v39 = vpop.f32.mrf.mxu1  ;;  %v2800_v21 = vadd.f32 %v5863_v19, %v5788_v37 }
 0x477   : > { %v3176_v37 = vadd.f32 %v3175_v23, %v3086_v52  ;;  %v2807_v52 = vadd.f32 %v5884_v3, %v5801_v48  ;;  %v2810_v48 = vadd.f32 %v5896_v45, %v5805_v31 }
 0x478   : > { %3516 = vmatmul.bf16.gmra.mxu3 %v3408_v44  ;;  %v3314_v62 = vadd.f32 %v3250_v29, %v2790_v5 }
 0x47a   : > { %v3350_v12 = vadd.f32 %v5891_v54, %v3314_v62 }
 0x47c   : > { %v3382_v14 = vmax.f32 %v3350_v12, 0.0  ;;  %v5978_v30 = vpop.f32.mrf.mxu3 }
 0x47d   : > { %v3251_v47 = vpop.f32.mrf.mxu2 }
 0x47e   : > { %v3252_v11 = vadd.f32 %v3251_v47, %v3163_v20  ;;  %v3091_v20 = vpop.f32.mrf.mxu0  ;;  %v3180_v33 = vpop.f32.mrf.mxu1  ;;  %v3173_v47 = vadd.f32 %v3172_v9, %v3083_v42 }
 0x480   : > { %v3315_v63 = vadd.f32 %v3252_v11, %v2792_v55 }
 0x482   : > { %v3351_v15 = vadd.f32 %v5891_v54, %v3315_v63  ;;  %3293 = vmatmul.bf16.gmra.mxu2 %v6685_v24 }
 0x484   : > { %v3383_v26 = vmax.f32 %v3351_v15, 0.0  ;;  %v5984_v63 = vpop.f32.mrf.mxu3 }
 0x485   : > { %v3254_v34 = vpop.f32.mrf.mxu2 }
 0x486   : > { %v3409_v58 = vpack.c.bf16 %v3383_v26, %v3382_v14  ;;  %v3255_v1 = vadd.f32 %v3254_v34, %v3166_v7  ;;  %v3093_v61 = vpop.f32.mrf.mxu0  ;;  %v3182_v14 = vpop.f32.mrf.mxu1 }
 0x488   : > { %3521 = vmatmul.bf16.gmra.mxu3 %v3409_v58  ;;  %v3316_v18 = vadd.f32 %v3255_v1, %v2795_v10  ;;  %v3178_v58 = vadd.f32 %v3177_v39, %v3088_v0  ;;  %v3637_v10 = vld [vmem:[%s6476_s7 + $0x78] sm:$0xff] }
 0x489   : > { %3638 = vmatpush.msrb.mxu0 %v3637_v10 }
 0x48a   : > { %v3352_v44 = vadd.f32 %v5891_v54, %v3316_v18 }
 0x48c   : > { %v3384_v29 = vmax.f32 %v3352_v44, 0.0  ;;  %v5988_v9 = vpop.f32.mrf.mxu3 }
 0x48d   : > { %v3256_v57 = vpop.f32.mrf.mxu2 }
 0x48e   : > { %v3257_v6 = vadd.f32 %v3256_v57, %v3168_v51  ;;  %v3185_v51 = vpop.f32.mrf.mxu1 }
 0x490   : > { %v3317_v36 = vadd.f32 %v3257_v6, %v2797_v40 }
 0x492   : > { %v3353_v41 = vadd.f32 %v5891_v54, %v3317_v36  ;;  %3298 = vmatmul.bf16.gmra.mxu2 %v6594_v53  ;;  %v2802_v53 = vadd.f32 %v5869_v13, %v5794_v27  ;;  %v2805_v27 = vadd.f32 %v5874_v8, %v5798_v50  ;;  %v3096_v13 = vpop.f32.mrf.mxu0  ;;  %v3181_v36 = vadd.f32 %v3180_v33, %v3091_v20 }
 0x493   : > { %v2812_v20 = vadd.f32 %v5908_v46, %v5811_v60  ;;  %v2815_v60 = vadd.f32 %v5919_v4, %v5815_v56 }
 0x494   : > { %v3385_v32 = vmax.f32 %v3353_v41, 0.0  ;;  %v5999_v50 = vpop.f32.mrf.mxu3 }
 0x495   : > { %v3259_v49 = vpop.f32.mrf.mxu2 }
 0x496   : > { %v3410_v5 = vpack.c.bf16 %v3385_v32, %v3384_v29  ;;  %v3260_v62 = vadd.f32 %v3259_v49, %v3171_v16  ;;  %v3187_v29 = vpop.f32.mrf.mxu1  ;;  %v3183_v49 = vadd.f32 %v3182_v14, %v3093_v61 }
 0x498   : > { %3526 = vmatmul.bf16.gmra.mxu3 %v3410_v5  ;;  %v3318_v55 = vadd.f32 %v3260_v62, %v2800_v21  ;;  %v3636_v5 = vld [vmem:[%s6476_s7 + $0x70] sm:$0xff] }
 0x499   : > { %3639 = vmatpush.msrb.mxu0 %v3636_v5 }
 0x49a   : > { %v3354_v15 = vadd.f32 %v5891_v54, %v3318_v55  ;;  %v3098_v44 = vpop.f32.mrf.mxu0 }
 0x49c   : > { %v3386_v26 = vmax.f32 %v3354_v15, 0.0 }
 0x49d   : > { %v3261_v11 = vpop.f32.mrf.mxu2 }
 0x49e   : > { %v3262_v12 = vadd.f32 %v3261_v11, %v3173_v47  ;;  %v3190_v11 = vpop.f32.mrf.mxu1 }
 0x4a0   : > { %v3319_v25 = vadd.f32 %v3262_v12, %v2802_v53 }
 0x4a2   : > { %v3355_v24 = vadd.f32 %v5891_v54, %v3319_v25  ;;  %v3101_v21 = vpop.f32.mrf.mxu0  ;;  %v3186_v25 = vadd.f32 %v3185_v51, %v3096_v13 }
 0x4a4   : > { %v3387_v34 = vmax.f32 %v3355_v24, 0.0 }
 0x4a5   : > { %v3264_v7 = vpop.f32.mrf.mxu2 }
 0x4a6   : > { %v3411_v19 = vpack.c.bf16 %v3387_v34, %v3386_v26  ;;  %v3265_v42 = vadd.f32 %v3264_v7, %v3176_v37  ;;  %v3192_v46 = vpop.f32.mrf.mxu1  ;;  %v3188_v34 = vadd.f32 %v3187_v29, %v3098_v44  ;;  %v3635_v37 = vld [vmem:[%s6476_s7 + $0x68] sm:$0xff] }
 0x4a7   : > { %3640 = vmatpush.msrb.mxu0 %v3635_v37 }
 0x4a8   : > { %3531 = vmatmul.bf16.gmra.mxu3 %v3411_v19  ;;  %v3320_v1 = vadd.f32 %v3265_v42, %v2805_v27  ;;  %v2817_v42 = vadd.f32 %v5927_v38, %v5820_v17 }
 0x4aa   : > { %v3356_v57 = vadd.f32 %v5891_v54, %v3320_v1  ;;  %v3103_v14 = vpop.f32.mrf.mxu0 }
 0x4ac   : > { %v3388_v8 = vmax.f32 %v3356_v57, 0.0 }
 0x4ad   : > { %v3266_v18 = vpop.f32.mrf.mxu2 }
 0x4ae   : > { %v3267_v23 = vadd.f32 %v3266_v18, %v3178_v58  ;;  %v3195_v18 = vpop.f32.mrf.mxu1 }
 0x4b0   : > { %v3321_v40 = vadd.f32 %v3267_v23, %v2807_v52  ;;  %v3191_v23 = vadd.f32 %v3190_v11, %v3101_v21 }
 0x4b2   : > { %v3357_v6 = vadd.f32 %v5891_v54, %v3321_v40  ;;  %v3106_v1 = vpop.f32.mrf.mxu0 }
 0x4b3   : > { %v3196_v21 = vadd.f32 %v3195_v18, %v3106_v1 }
 0x4b4   : > { %v3389_v0 = vmax.f32 %v3357_v6, 0.0  ;;  %v6686_v6 = vld [vmem:[#allocation59_spill] sm:$0xff] }
 0x4b5   : > { %v3269_v39 = vpop.f32.mrf.mxu2  ;;  %v2820_v17 = vadd.f32 %v5936_v28, %v6686_v6 }
 0x4b6   : > { %v3412_v41 = vpack.c.bf16 %v3389_v0, %v3388_v8  ;;  %v3270_v32 = vadd.f32 %v3269_v39, %v3181_v36  ;;  %v3193_v8 = vadd.f32 %v3192_v46, %v3103_v14  ;;  %v3634_v39 = vld [vmem:[%s6476_s7 + $0x60] sm:$0xff]  ;;  %v6689_v14 = vld [vmem:[#allocation11_spill] sm:$0xff] }
 0x4b7   : > { %3641 = vmatpush.msrb.mxu0 %v3634_v39 }
 0x4b8   : > { %3536 = vmatmul.bf16.gmra.mxu3 %v3412_v41  ;;  %v3322_v16 = vadd.f32 %v3270_v32, %v2810_v48  ;;  %v6687_v41 = vld [vmem:[#allocation60_spill] sm:$0xff]  ;;  %v3197_v48 = vpop.f32.mrf.mxu1 }
 0x4b9   : > { %v2822_v29 = vadd.f32 %v5945_v2, %v6687_v41 }
 0x4ba   : > { %v3358_v47 = vadd.f32 %v5891_v54, %v3322_v16  ;;  %v3108_v36 = vpop.f32.mrf.mxu0 }
 0x4bb   : > { %v6003_v3 = vpop.f32.mrf.mxu3 }
 0x4bc   : > { %v3390_v53 = vmax.f32 %v3358_v47, 0.0 }
 0x4bd   : > { %v3271_v62 = vpop.f32.mrf.mxu2 }
 0x4be   : > { %v3272_v33 = vadd.f32 %v3271_v62, %v3183_v49 }
 0x4c0   : > { %v3323_v55 = vadd.f32 %v3272_v33, %v2812_v20 }
 0x4c2   : > { %v3359_v31 = vadd.f32 %v5891_v54, %v3323_v55  ;;  %v3111_v55 = vpop.f32.mrf.mxu0 }
 0x4c3   : > { %v6012_v45 = vpop.f32.mrf.mxu3 }
 0x4c4   : > { %v3391_v12 = vmax.f32 %v3359_v31, 0.0  ;;  %v3200_v31 = vpop.f32.mrf.mxu1 }
 0x4c5   : > { %v3274_v15 = vpop.f32.mrf.mxu2 }
 0x4c6   : > { %v3413_v61 = vpack.c.bf16 %v3391_v12, %v3390_v53  ;;  %v3275_v24 = vadd.f32 %v3274_v15, %v3186_v25  ;;  %v6688_v53 = vld [vmem:[#allocation9_spill] sm:$0xff]  ;;  %v3198_v15 = vadd.f32 %v3197_v48, %v3108_v36 }
 0x4c7   : > { %v2825_v2 = vadd.f32 %v5951_v35, %v6688_v53  ;;  %v6693_v53 = vld [vmem:[#allocation71_spill] sm:$0xff] }
 0x4c8   : > { %3541 = vmatmul.bf16.gmra.mxu3 %v3413_v61  ;;  %v3324_v7 = vadd.f32 %v3275_v24, %v2815_v60  ;;  %v3633_v61 = vld [vmem:[%s6476_s7 + $0x58] sm:$0xff]  ;;  %v2827_v60 = vadd.f32 %v5958_v59, %v6689_v14 }
 0x4c9   : > { %3642 = vmatpush.msrb.mxu0 %v3633_v61 }
 0x4ca   : > { %v3360_v13 = vadd.f32 %v5891_v54, %v3324_v7  ;;  %v3113_v37 = vpop.f32.mrf.mxu0 }
 0x4cb   : > { %v6016_v26 = vpop.f32.mrf.mxu3 }
 0x4cc   : > { %v3392_v10 = vmax.f32 %v3360_v13, 0.0 }
 0x4cd   : > { %v3276_v19 = vpop.f32.mrf.mxu2 }
 0x4ce   : > { %v3277_v27 = vadd.f32 %v3276_v19, %v3188_v34  ;;  %v3202_v19 = vpop.f32.mrf.mxu1 }
 0x4d0   : > { %v3325_v58 = vadd.f32 %v3277_v27, %v2817_v42 }
 0x4d2   : > { %v3361_v56 = vadd.f32 %v5891_v54, %v3325_v58 }
 0x4d3   : > { %v6025_v4 = vpop.f32.mrf.mxu3 }
 0x4d4   : > { %v3393_v51 = vmax.f32 %v3361_v56, 0.0  ;;  %v3201_v56 = vadd.f32 %v3200_v31, %v3111_v55 }
 0x4d5   : > { %v3279_v52 = vpop.f32.mrf.mxu2 }
 0x4d6   : > { %v3414_v57 = vpack.c.bf16 %v3393_v51, %v3392_v10  ;;  %v3280_v40 = vadd.f32 %v3279_v52, %v3191_v23  ;;  %v6690_v51 = vld [vmem:[#allocation69_spill] sm:$0xff]  ;;  %v3116_v52 = vpop.f32.mrf.mxu0  ;;  %v3203_v23 = vadd.f32 %v3202_v19, %v3113_v37  ;;  %v3205_v6 = vpop.f32.mrf.mxu1  ;;  %v3630_v19 = vld [vmem:[%s6476_s7 + $0x40] sm:$0xff] }
 0x4d7   : > { %v2830_v59 = vadd.f32 %v5965_v43, %v6690_v51 }
 0x4d8   : > { %3546 = vmatmul.bf16.gmra.mxu3 %v3414_v57  ;;  %v3326_v0 = vadd.f32 %v3280_v40, %v2820_v17  ;;  %v3632_v40 = vld [vmem:[%s6476_s7 + $0x50] sm:$0xff] }
 0x4d9   : > { %3643 = vmatpush.msrb.mxu0 %v3632_v40 }
 0x4da   : > { %v3362_v49 = vadd.f32 %v5891_v54, %v3326_v0 }
 0x4db   : > { %v6029_v38 = vpop.f32.mrf.mxu3 }
 0x4dc   : > { %v3394_v62 = vmax.f32 %v3362_v49, 0.0  ;;  %v3206_v49 = vadd.f32 %v3205_v6, %v3116_v52  ;;  %v6695_v52 = vld [vmem:[#allocation15_spill] sm:$0xff] }
 0x4dd   : > { %v3281_v44 = vpop.f32.mrf.mxu2 }
 0x4de   : > { %v3282_v32 = vadd.f32 %v3281_v44, %v3193_v8  ;;  %v6691_v8 = vld [vmem:[#allocation8_spill] sm:$0xff] }
 0x4df   : > { %v2832_v0 = vadd.f32 %v5971_v22, %v6691_v8 }
 0x4e0   : > { %v3327_v16 = vadd.f32 %v3282_v32, %v2822_v29 }
 0x4e2   : > { %v3363_v28 = vadd.f32 %v5891_v54, %v3327_v16 }
 0x4e3   : > { %v6038_v5 = vpop.f32.mrf.mxu3 }
 0x4e4   : > { %v3395_v20 = vmax.f32 %v3363_v28, 0.0  ;;  %v3631_v28 = vld [vmem:[%s6476_s7 + $0x48] sm:$0xff] }
 0x4e5   : > { %v3284_v33 = vpop.f32.mrf.mxu2  ;;  %3644 = vmatpush.msrb.mxu0 %v3631_v28  ;;  %v3626_v28 = vld [vmem:[%s6476_s7 + $0x20] sm:$0xff] }
 0x4e6   : > { %v3415_v47 = vpack.c.bf16 %v3395_v20, %v3394_v62  ;;  %v3285_v11 = vadd.f32 %v3284_v33, %v3196_v21  ;;  %v3118_v62 = vpop.f32.mrf.mxu0  ;;  %v3207_v20 = vpop.f32.mrf.mxu1  ;;  %v6692_v33 = vld [vmem:[#allocation13_spill] sm:$0xff] }
 0x4e7   : > { %v2835_v21 = vadd.f32 %v5978_v30, %v6692_v33  ;;  %v3208_v55 = vadd.f32 %v3207_v20, %v3118_v62  ;;  %3645 = vmatpush.msrb.mxu0 %v3630_v19 }
 0x4e8   : > { %3551 = vmatmul.bf16.gmra.mxu3 %v3415_v47  ;;  %v3328_v25 = vadd.f32 %v3285_v11, %v2825_v2  ;;  %v2837_v2 = vadd.f32 %v5984_v63, %v6693_v53 }
 0x4ea   : > { %v3364_v34 = vadd.f32 %v5891_v54, %v3328_v25 }
 0x4eb   : > { %v6042_v12 = vpop.f32.mrf.mxu3 }
 0x4ec   : > { %v3396_v27 = vmax.f32 %v3364_v34, 0.0 }
 0x4ed   : > { %v3286_v24 = vpop.f32.mrf.mxu2 }
 0x4ee   : > { %v3287_v46 = vadd.f32 %v3286_v24, %v3198_v15  ;;  %v3121_v25 = vpop.f32.mrf.mxu0  ;;  %v3210_v61 = vpop.f32.mrf.mxu1 }
 0x4ef   : > { %v3211_v30 = vadd.f32 %v3210_v61, %v3121_v25 }
 0x4f0   : > { %v3329_v7 = vadd.f32 %v3287_v46, %v2827_v60 }
 0x4f2   : > { %v3365_v35 = vadd.f32 %v5891_v54, %v3329_v7 }
 0x4f3   : > { %v6051_v42 = vpop.f32.mrf.mxu3 }
 0x4f4   : > { %v3397_v13 = vmax.f32 %v3365_v35, 0.0 }
 0x4f5   : > { %v3289_v58 = vpop.f32.mrf.mxu2 }
 0x4f6   : > { %v3416_v1 = vpack.c.bf16 %v3397_v13, %v3396_v27  ;;  %v3290_v10 = vadd.f32 %v3289_v58, %v3201_v56  ;;  %v3123_v27 = vpop.f32.mrf.mxu0  ;;  %v3212_v13 = vpop.f32.mrf.mxu1  ;;  %v6694_v58 = vld [vmem:[#allocation73_spill] sm:$0xff] }
 0x4f7   : > { %v2840_v56 = vadd.f32 %v5988_v9, %v6694_v58  ;;  %v3629_v9 = vld [vmem:[%s6476_s7 + $0x38] sm:$0xff] }
 0x4f8   : > { %3556 = vmatmul.bf16.gmra.mxu3 %v3416_v1  ;;  %v3330_v57 = vadd.f32 %v3290_v10, %v2830_v59  ;;  %v3213_v10 = vadd.f32 %v3212_v13, %v3123_v27  ;;  %3646 = vmatpush.msrb.mxu0 %v3629_v9 }
 0x4fa   : > { %v3366_v44 = vadd.f32 %v5891_v54, %v3330_v57 }
 0x4fb   : > { %v6055_v18 = vpop.f32.mrf.mxu3 }
 0x4fc   : > { %v3398_v29 = vmax.f32 %v3366_v44, 0.0 }
 0x4fd   : > { %v3291_v17 = vpop.f32.mrf.mxu2 }
 0x4fe   : > { %v3292_v39 = vadd.f32 %v3291_v17, %v3203_v23  ;;  %v2842_v23 = vadd.f32 %v5999_v50, %v6695_v52 }
 0x500   : > { %v3331_v36 = vadd.f32 %v3292_v39, %v2832_v0 }
 0x502   : > { %v3367_v43 = vadd.f32 %v5891_v54, %v3331_v36  ;;  %v3659_v36 = vld [vmem:[%s6477_s8] sm:$0xf] }
 0x503   : > { %v6064_v41 = vpop.f32.mrf.mxu3  ;;  %4391 = vmatpush.msk.msrb.mxu1 %vm3664_vm1, %v3659_v36 }
 0x504   : > { %v3399_v32 = vmax.f32 %v3367_v43, 0.0 }
 0x505   : > { %v3294_v48 = vpop.f32.mrf.mxu2 }
 0x506   : > { %v3417_v16 = vpack.c.bf16 %v3399_v32, %v3398_v29  ;;  %v3295_v22 = vadd.f32 %v3294_v48, %v3206_v49  ;;  %v3627_v48 = vld [vmem:[%s6476_s7 + $0x28] sm:$0xff] }
 0x508   : > { %3561 = vmatmul.bf16.gmra.mxu3 %v3417_v16  ;;  %v3332_v11 = vadd.f32 %v3295_v22, %v2835_v21  ;;  %v3625_v22 = vld [vmem:[%s6476_s7 + $0x18] sm:$0xff] }
 0x50a   : > { %v3368_v24 = vadd.f32 %v5891_v54, %v3332_v11 }
 0x50b   : > { %v6071_v47 = vpop.f32.mrf.mxu3 }
 0x50c   : > { %v3400_v34 = vmax.f32 %v3368_v24, 0.0 }
 0x50d   : > { %v3296_v31 = vpop.f32.mrf.mxu2 }
 0x50e   : > { %v3297_v15 = vadd.f32 %v3296_v31, %v3208_v55  ;;  %v6111_v55 = vld [vmem:[%s6475_s6] ss:$0 sm:$0xff]  ;;  %v3624_v31 = vld [vmem:[%s6476_s7 + $0x10] sm:$0xff] }
 0x50f   : > { %v6115_v11 = vadd.f32 %v6111_v55, %v6012_v45  ;;  %v6122_v53 = vadd.f32 %v6111_v55, %v6003_v3  ;;  %v6132_v45 = vadd.f32 %v6111_v55, %v6025_v4  ;;  %v6137_v24 = vadd.f32 %v6111_v55, %v6029_v38 }
 0x510   : > { %v3333_v14 = vadd.f32 %v3297_v15, %v2837_v2  ;;  %v6126_v2 = vadd.f32 %v6111_v55, %v6016_v26  ;;  %v6142_v26 = vadd.f32 %v6111_v55, %v6038_v5 }
 0x511   : > { %v3577_v15 = vadd.f32 %v6115_v11, %v6122_v53 }
 0x512   : > { %v3369_v60 = vadd.f32 %v5891_v54, %v3333_v14 }
 0x513   : > { %v6077_v46 = vpop.f32.mrf.mxu3  ;;  %v3578_v61 = vadd.f32 %v3577_v15, %v6126_v2 }
 0x514   : > { %v3401_v7 = vmax.f32 %v3369_v60, 0.0  ;;  %v6147_v60 = vadd.f32 %v6111_v55, %v6042_v12  ;;  %v3623_v12 = vld [vmem:[%s6476_s7 + $0x8] sm:$0xff]  ;;  %v6175_v19 = vadd.f32 %v6111_v55, %v6077_v46 }
 0x515   : > { %v3299_v37 = vpop.f32.mrf.mxu2  ;;  %v3579_v3 = vadd.f32 %v3578_v61, %v6132_v45 }
 0x516   : > { %v3418_v35 = vpack.c.bf16 %v3401_v7, %v3400_v34  ;;  %v3300_v63 = vadd.f32 %v3299_v37, %v3211_v30  ;;  %v6152_v34 = vadd.f32 %v6111_v55, %v6051_v42  ;;  %v6157_v7 = vadd.f32 %v6111_v55, %v6055_v18 }
 0x517   : > { %v3580_v14 = vadd.f32 %v3579_v3, %v6137_v24  ;;  %v6162_v37 = vadd.f32 %v6111_v55, %v6064_v41 }
 0x518   : > { %3566 = vmatmul.bf16.gmra.mxu3 %v3418_v35  ;;  %v3334_v51 = vadd.f32 %v3300_v63, %v2840_v56  ;;  %v6170_v35 = vadd.f32 %v6111_v55, %v6071_v47 }
 0x519   : > { %v3581_v4 = vadd.f32 %v3580_v14, %v6142_v26 }
 0x51a   : > { %v3370_v40 = vadd.f32 %v5891_v54, %v3334_v51 }
 0x51b   : > { %v6084_v1 = vpop.f32.mrf.mxu3  ;;  %v3582_v30 = vadd.f32 %v3581_v4, %v6147_v60 }
 0x51c   : > { %v3402_v0 = vmax.f32 %v3370_v40, 0.0  ;;  %v6180_v27 = vadd.f32 %v6111_v55, %v6084_v1 }
 0x51d   : > { %v3301_v59 = vpop.f32.mrf.mxu2  ;;  %v3583_v5 = vadd.f32 %v3582_v30, %v6152_v34 }
 0x51e   : > { %v3302_v57 = vadd.f32 %v3301_v59, %v3213_v10 }
 0x51f   : > { %v3584_v42 = vadd.f32 %v3583_v5, %v6157_v7 }
 0x520   : > { %v3335_v6 = vadd.f32 %v3302_v57, %v2842_v23 }
 0x521   : > { %v3585_v18 = vadd.f32 %v3584_v42, %v6162_v37 }
 0x522   : > { %v3371_v17 = vadd.f32 %v5891_v54, %v3335_v6  ;;  %v3628_v54 = vld [vmem:[%s6476_s7 + $0x30] sm:$0xff] }
 0x523   : > { %v3529_v8 = vpop.f32.mrf.mxu3  ;;  %3647 = vmatpush.msrb.mxu0 %v3628_v54  ;;  %v3586_v41 = vadd.f32 %v3585_v18, %v6170_v35 }
 0x524   : > { %v3403_v39 = vmax.f32 %v3371_v17, 0.0  ;;  %v6184_v58 = vadd.f32 %v6111_v55, %v3529_v8 }
 0x525   : > { %3648 = vmatpush.msrb.mxu0 %v3627_v48  ;;  %v3587_v13 = vadd.f32 %v3586_v41, %v6175_v19 }
 0x526   : > { %v3419_v44 = vpack.c.bf16 %v3403_v39, %v3402_v0 }
 0x527   : > { %3649 = vmatpush.msrb.mxu0 %v3626_v28  ;;  %v3588_v47 = vadd.f32 %v3587_v13, %v6180_v27 }
 0x528   : > { %3571 = vmatmul.bf16.gmra.mxu3 %v3419_v44 }
 0x529   : > { %3650 = vmatpush.msrb.mxu0 %v3625_v22  ;;  %v3589_v46 = vadd.f32 %v3588_v47, %v6184_v58  ;;  %v4668_v22 = vmov 256.0  }
 0x52a   : > { %4558 = vrcp.f32 %v4668_v22 }
 0x52b   : > { %v3532_v50 = vpop.f32.mrf.mxu3  ;;  %3651 = vmatpush.msrb.mxu0 %v3624_v31 }
 0x52c   : > { %v6188_v56 = vadd.f32 %v6111_v55, %v3532_v50 }
 0x52d   : > { %3652 = vmatpush.msrb.mxu0 %v3623_v12 }
 0x52e   : > { %v3590_v59 = vadd.f32 %v3589_v46, %v6188_v56 }
 0x530   : > { %v4559_v61 = vpop.eup %4558 }
 0x531   : > { %v3615_v30 = vmul.f32 256.0, %v4559_v61  ;;  %vm3619_vm2 = vweird.f32 %v4559_v61 }
 0x533   : > { %v3534_v43 = vpop.f32.mrf.mxu3 }
 0x534   : > { %v6192_v10 = vadd.f32 %v6111_v55, %v3534_v43 }
 0x536   : > { %v3591_v52 = vadd.f32 %v3590_v59, %v6192_v10 }
 0x53b   : > { %v3537_v29 = vpop.f32.mrf.mxu3 }
 0x53c   : > { %v6196_v1 = vadd.f32 %v6111_v55, %v3537_v29 }
 0x53e   : > { %v3592_v57 = vadd.f32 %v3591_v52, %v6196_v1 }
 0x543   : > { %v3539_v32 = vpop.f32.mrf.mxu3 }
 0x544   : > { %v6200_v23 = vadd.f32 %v6111_v55, %v3539_v32 }
 0x546   : > { %v3593_v6 = vadd.f32 %v3592_v57, %v6200_v23 }
 0x54b   : > { %v3542_v49 = vpop.f32.mrf.mxu3 }
 0x54c   : > { %v6204_v40 = vadd.f32 %v6111_v55, %v3542_v49  ;;  %v3622_v49 = vld [vmem:[%s6476_s7] sm:$0xff] }
 0x54d   : > { %3653 = vmatpush.msrb.mxu0 %v3622_v49 }
 0x54e   : > { %v3594_v0 = vadd.f32 %v3593_v6, %v6204_v40 }
 0x553   : > { %v3544_v16 = vpop.f32.mrf.mxu3 }
 0x554   : > { %v6208_v17 = vadd.f32 %v6111_v55, %v3544_v16 }
 0x556   : > { %v3595_v44 = vadd.f32 %v3594_v0, %v6208_v17 }
 0x55b   : > { %v3547_v62 = vpop.f32.mrf.mxu3 }
 0x55c   : > { %v6212_v39 = vadd.f32 %v6111_v55, %v3547_v62 }
 0x55e   : > { %v3596_v36 = vadd.f32 %v3595_v44, %v6212_v39 }
 0x563   : > { %v3549_v20 = vpop.f32.mrf.mxu3 }
 0x564   : > { %v6216_v9 = vadd.f32 %v6111_v55, %v3549_v20 }
 0x566   : > { %v3597_v43 = vadd.f32 %v3596_v36, %v6216_v9 }
 0x56b   : > { %v3552_v33 = vpop.f32.mrf.mxu3 }
 0x56c   : > { %v6220_v50 = vadd.f32 %v6111_v55, %v3552_v33 }
 0x56e   : > { %v3598_v32 = vadd.f32 %v3597_v43, %v6220_v50 }
 0x573   : > { %v3554_v21 = vpop.f32.mrf.mxu3 }
 0x574   : > { %v6224_v54 = vadd.f32 %v6111_v55, %v3554_v21 }
 0x576   : > { %v3599_v16 = vadd.f32 %v3598_v32, %v6224_v54 }
 0x57b   : > { %v3557_v25 = vpop.f32.mrf.mxu3 }
 0x57c   : > { %v6228_v48 = vadd.f32 %v6111_v55, %v3557_v25 }
 0x57e   : > { %v3600_v62 = vadd.f32 %v3599_v16, %v6228_v48 }
 0x583   : > { %v3559_v38 = vpop.f32.mrf.mxu3 }
 0x584   : > { %v6235_v28 = vadd.f32 %v6111_v55, %v3559_v38 }
 0x586   : > { %v3601_v33 = vadd.f32 %v3600_v62, %v6235_v28 }
 0x58b   : > { %v3562_v63 = vpop.f32.mrf.mxu3 }
 0x58c   : > { %v6239_v20 = vadd.f32 %v6111_v55, %v3562_v63  ;;  %v3616_v63 = vsub.f32 1.0, %v3615_v30 }
 0x58e   : > { %v3602_v15 = vadd.f32 %v3601_v33, %v6239_v20  ;;  %v3617_v47 = vmul.f32 %v4559_v61, %v3616_v63 }
 0x590   : > { %v3618_v59 = vadd.f32 %v4559_v61, %v3617_v47  ;;  %v6696_v47 = vld [vmem:[#allocation16_spill] sm:$0xff] }
 0x592   : > { %v3620_v6 = vsel %vm3619_vm2, %v4559_v61, %v3618_v59 }
 0x593   : > { %v3564_v51 = vpop.f32.mrf.mxu3 }
 0x594   : > { %v6243_v21 = vadd.f32 %v6111_v55, %v3564_v51 }
 0x596   : > { %v3603_v3 = vadd.f32 %v3602_v15, %v6243_v21 }
 0x59b   : > { %v3567_v8 = vpop.f32.mrf.mxu3 }
 0x59c   : > { %v6247_v25 = vadd.f32 %v6111_v55, %v3567_v8 }
 0x59e   : > { %v3604_v4 = vadd.f32 %v3603_v3, %v6247_v25 }
 0x5a3   : > { %v3569_v29 = vpop.f32.mrf.mxu3 }
 0x5a4   : > { %v6251_v14 = vadd.f32 %v6111_v55, %v3569_v29 }
 0x5a6   : > { %v3605_v5 = vadd.f32 %v3604_v4, %v6251_v14 }
 0x5ab   : > { %v3572_v31 = vpop.f32.mrf.mxu3 }
 0x5ac   : > { %v6255_v38 = vadd.f32 %v6111_v55, %v3572_v31 }
 0x5ae   : > { %v3606_v42 = vadd.f32 %v3605_v5, %v6255_v38  ;;  %v4564_v5 = vld [vmem:[%s6471_s2] sm:$0x3] }
 0x5b3   : > { %v3574_v12 = vpop.f32.mrf.mxu3 }
 0x5b4   : > { %v6260_v18 = vadd.f32 %v6111_v55, %v3574_v12  ;;  %v6268_v12 = vperm.slane %v4564_v5, 1 }
 0x5b6   : > { %v3607_v41 = vadd.f32 %v3606_v42, %v6260_v18 }
 0x5b8   : > { %v3608_v13 = vrot.slane %v3607_v41, 4 }
 0x5ba   : > { %v3609_v46 = vadd.f32 %v3608_v13, %v3607_v41 }
 0x5bc   : > { %v3610_v51 = vrot.slane %v3609_v46, 2 }
 0x5be   : > { %v3611_v52 = vadd.f32 %v3610_v51, %v3609_v46  ;;  %v627_v46 = vadd.f32 %v6696_v47, %v6268_v12  ;;  %v6697_v51 = vld [vmem:[#allocation17_spill] sm:$0xff] }
 0x5bf   : > { %v629_v59 = vadd.f32 %v6697_v51, %v6268_v12 }
 0x5c0   : > { %v3612_v57 = vrot.slane %v3611_v52, 1 }
 0x5c2   : > { %v3613_v8 = vadd.f32 %v3612_v57, %v3611_v52  ;;  %v6698_v52 = vld [vmem:[#allocation20_spill] sm:$0xff] }
 0x5c3   : > { %v632_v57 = vadd.f32 %v6698_v52, %v6268_v12  ;;  %v6707_v52 = vld [vmem:[#allocation35_spill] sm:$0xff] }
 0x5c4   : > { %v3621_v0 = vmul.f32 %v3620_v6, %v3613_v8 }
 0x5c6   : > { %3654 = vmatmul.f32.vlgmr.msrb.gmra.mxu0 %v3621_v0 }
 0x643   : > { %v3655_v44 = vpop.f32.mrf.mxu0 }
 0x644   : > { %v3658_v36 = vmax.f32 %v3655_v44, 0.0 }
 0x646   : > { %4392 = vmatmul.msk.f32.vlgmr.msrb.gmra.mxu1 %vm3660_vm8, %v3658_v36 }
 0x6c3   : > { %v3685_v55 = vpop.f32.mrf.mxu1 }
 0x6c4   : > { %v4393_v43 = vmul.f32 -1.442695, %v3685_v55 }
 0x6c6   : > { %4560 = vpow2.f32 %v4393_v43  ;;  %v6701_v43 = vld [vmem:[#allocation25_spill] sm:$0xff] }
 0x6cc   : > { %v4561_v29 = vpop.eup %4560 }
 0x6cd   : > { %v3691_v32 = vadd.f32 1.0, %v4561_v29 }
 0x6cf   : > { %4562 = vrcp.f32 %v3691_v32  ;;  %v3703_v31 = vand.u32 2147483648, %v3691_v32  ;;  %vm3697_vm10 = vweird.f32 %v3691_v32  ;;  %v3701_v15 = vand.u32 2147483647, %v3691_v32 }
 0x6d1   : > { %v3704_v3 = vor.u32 1.1754944e-38, %v3703_v31  ;;  %vm3702_vm12 = vcmp.eq.f32.partialorder %v3701_v15, 8.507059e+37 }
 0x6d5   : > { %v4563_v49 = vpop.eup %4562 }
 0x6d6   : > { %v3693_v16 = vmul.f32 %v4563_v49, %v3691_v32  ;;  %vm3698_vm9 = vweird.f32 %v4563_v49 }
 0x6d7   : > { %vm3699_vm11 = vmor %vm3697_vm10, %vm3698_vm9 }
 0x6d8   : > { %v3694_v62 = vsub.f32 1.0, %v3693_v16 }
 0x6da   : > { %v3695_v22 = vmul.f32 %v4563_v49, %v3694_v62 }
 0x6dc   : > { %v3696_v33 = vadd.f32 %v4563_v49, %v3695_v22 }
 0x6de   : > { %v3700_v61 = vsel %vm3699_vm11, %v4563_v49, %v3696_v33  ;;  %v6702_v49 = vld [vmem:[#allocation28_spill] sm:$0xff]  ;;  %v6704_v33 = vld [vmem:[#allocation31_spill] sm:$0xff] }
 0x6df   : > { %v3705_v4 = vsel %vm3702_vm12, %v3704_v3, %v3700_v61  ;;  %v642_v16 = vadd.f32 %v6702_v49, %v6268_v12  ;;  %v647_v31 = vadd.f32 %v6704_v33, %v6268_v12  ;;  %v6711_v49 = vld [vmem:[#allocation43_spill] sm:$0xff] }
 0x6e0   : > { %v6263_v30 = vperm.slane %v3705_v4, 0 }
 0x6e2   : > { %v3708_v42 = vmul.f32 %v6263_v30, %v6122_v53  ;;  %v3709_v63 = vmul.f32 %v6263_v30, %v6115_v11  ;;  %v3710_v41 = vmul.f32 %v6263_v30, %v6126_v2  ;;  %v3711_v13 = vmul.f32 %v6263_v30, %v6132_v45  ;;  %v6699_v11 = vld [vmem:[#allocation21_spill] sm:$0xff]  ;;  %v6700_v2 = vld [vmem:[#allocation24_spill] sm:$0xff] }
 0x6e3   : > { %v3712_v53 = vmul.f32 %v6263_v30, %v6137_v24  ;;  %v634_v6 = vadd.f32 %v6699_v11, %v6268_v12  ;;  %v637_v8 = vadd.f32 %v6700_v2, %v6268_v12  ;;  %v3713_v45 = vmul.f32 %v6263_v30, %v6142_v26  ;;  %v6703_v26 = vld [vmem:[#allocation29_spill] sm:$0xff] }
 0x6e4   : > { %v3714_v0 = vmul.f32 %v6263_v30, %v6147_v60  ;;  %v3740_v44 = vadd.f32 %v3708_v42, %v627_v46  ;;  %v3741_v36 = vadd.f32 %v3709_v63, %v629_v59  ;;  %v3742_v55 = vadd.f32 %v3710_v41, %v632_v57  ;;  %v6705_v63 = vld [vmem:[#allocation32_spill] sm:$0xff]  ;;  %v6706_v46 = vld [vmem:[#allocation34_spill] sm:$0xff] }
 0x6e5   : > { %v639_v24 = vadd.f32 %v6701_v43, %v6268_v12  ;;  %v3715_v29 = vmul.f32 %v6263_v30, %v6152_v34  ;;  %v3743_v32 = vadd.f32 %v3711_v13, %v634_v6  ;;  %v644_v62 = vadd.f32 %v6703_v26, %v6268_v12  ;;  %v6710_v43 = vld [vmem:[#allocation42_spill] sm:$0xff] }
 0x6e6   : > { %v3716_v22 = vmul.f32 %v6263_v30, %v6157_v7  ;;  %v3744_v60 = vadd.f32 %v3712_v53, %v637_v8  ;;  %v3717_v15 = vmul.f32 %v6263_v30, %v6162_v37  ;;  %v3718_v34 = vmul.f32 %v6263_v30, %v6170_v35 }
 0x6e7   : > { %v3745_v61 = vadd.f32 %v3713_v45, %v639_v24  ;;  %v3746_v3 = vadd.f32 %v3714_v0, %v642_v16  ;;  %v3772_v4 = vmax.f32 %v3740_v44, 0.0  ;;  %v3773_v5 = vmax.f32 %v3741_v36, 0.0  ;;  %v6709_v0 = vld [vmem:[#allocation39_spill] sm:$0xff] }
 0x6e8   : > { %v3774_v42 = vmax.f32 %v3742_v55, 0.0  ;;  %v649_v41 = vadd.f32 %v6705_v63, %v6268_v12  ;;  %v3719_v7 = vmul.f32 %v6263_v30, %v6175_v19  ;;  %v3747_v13 = vadd.f32 %v3715_v29, %v644_v62 }
 0x6e9   : > { %v3775_v47 = vmax.f32 %v3743_v32, 0.0  ;;  %v652_v51 = vadd.f32 %v6706_v46, %v6268_v12  ;;  %v3720_v37 = vmul.f32 %v6263_v30, %v6180_v27  ;;  %v3748_v35 = vadd.f32 %v3716_v22, %v647_v31  ;;  %3804 = vst [vmem:[%s6321_s29] sm:$0xff] %v3772_v4  ;;  %v6708_v27 = vld [vmem:[#allocation38_spill] sm:$0xff]  ;;  %v6714_v4 = vld [vmem:[#allocation52_spill] sm:$0xff]  ;;  %v6716_v46 = vld [vmem:[#allocation61_spill] sm:$0xff] }
 0x6ea   : > { %v3776_v59 = vmax.f32 %v3744_v60, 0.0  ;;  %v654_v19 = vadd.f32 %v6707_v52, %v6268_v12  ;;  %v3721_v57 = vmul.f32 %v6263_v30, %v6184_v58  ;;  %v3749_v53 = vadd.f32 %v3717_v15, %v649_v41  ;;  %3805 = vst [vmem:[%s6321_s29 + $0x8] sm:$0xff] %v3773_v5  ;;  %v6712_v22 = vld [vmem:[#allocation46_spill] sm:$0xff]  ;;  %v6713_v15 = vld [vmem:[#allocation48_spill] sm:$0xff]  ;;  %v6715_v41 = vld [vmem:[#allocation57_spill] sm:$0xff] }
 0x6eb   : > { %v3777_v11 = vmax.f32 %v3745_v61, 0.0  ;;  %v657_v6 = vadd.f32 %v6708_v27, %v6268_v12  ;;  %v3722_v2 = vmul.f32 %v6263_v30, %v6188_v56  ;;  %v3750_v8 = vadd.f32 %v3718_v34, %v652_v51  ;;  %3806 = vst [vmem:[%s6321_s29 + $0x10] sm:$0xff] %v3774_v42 }
 0x6ec   : > { %v3778_v45 = vmax.f32 %v3746_v3, 0.0  ;;  %v659_v44 = vadd.f32 %v6709_v0, %v6268_v12  ;;  %v3723_v58 = vmul.f32 %v6263_v30, %v6192_v10  ;;  %v3751_v36 = vadd.f32 %v3719_v7, %v654_v19  ;;  %3807 = vst [vmem:[%s6321_s29 + $0x18] sm:$0xff] %v3775_v47 }
 0x6ed   : > { %v3779_v55 = vmax.f32 %v3747_v13, 0.0  ;;  %v662_v24 = vadd.f32 %v6710_v43, %v6268_v12  ;;  %v3724_v56 = vmul.f32 %v6263_v30, %v6196_v1  ;;  %v3752_v29 = vadd.f32 %v3720_v37, %v657_v6  ;;  %3808 = vst [vmem:[%s6321_s29 + $0x20] sm:$0xff] %v3776_v59  ;;  %v6717_v59 = vld [vmem:[#allocation64_spill] sm:$0xff]  ;;  %v6721_v43 = vld [vmem:[#allocation70_spill] sm:$0xff] }
 0x6ee   : > { %v3780_v32 = vmax.f32 %v3748_v35, 0.0  ;;  %v664_v16 = vadd.f32 %v6711_v49, %v6268_v12  ;;  %v3725_v10 = vmul.f32 %v6263_v30, %v6200_v23  ;;  %v3753_v26 = vadd.f32 %v3721_v57, %v659_v44  ;;  %3809 = vst [vmem:[%s6321_s29 + $0x28] sm:$0xff] %v3777_v11  ;;  %v6720_v44 = vld [vmem:[#allocation68_spill] sm:$0xff] }
 0x6ef   : > { %v3781_v62 = vmax.f32 %v3749_v53, 0.0  ;;  %v667_v60 = vadd.f32 %v6712_v22, %v6268_v12  ;;  %v3726_v1 = vmul.f32 %v6263_v30, %v6204_v40  ;;  %v3754_v33 = vadd.f32 %v3722_v2, %v662_v24  ;;  %3810 = vst [vmem:[%s6321_s29 + $0x30] sm:$0xff] %v3778_v45  ;;  %v6718_v53 = vld [vmem:[#allocation66_spill] sm:$0xff]  ;;  %v6719_v2 = vld [vmem:[#allocation67_spill] sm:$0xff] }
 0x6f0   : > { %v3782_v31 = vmax.f32 %v3750_v8, 0.0  ;;  %v669_v34 = vadd.f32 %v6713_v15, %v6268_v12  ;;  %v3727_v23 = vmul.f32 %v6263_v30, %v6208_v17  ;;  %v3755_v61 = vadd.f32 %v3723_v58, %v664_v16  ;;  %3811 = vst [vmem:[%s6321_s29 + $0x38] sm:$0xff] %v3779_v55 }
 0x6f1   : > { %v3783_v3 = vmax.f32 %v3751_v36, 0.0  ;;  %v672_v5 = vadd.f32 %v6714_v4, %v6268_v12  ;;  %v3728_v40 = vmul.f32 %v6263_v30, %v6212_v39  ;;  %v3756_v42 = vadd.f32 %v3724_v56, %v667_v60  ;;  %3812 = vst [vmem:[%s6321_s29 + $0x40] sm:$0xff] %v3780_v32  ;;  %v6722_v32 = vld [vmem:[#allocation72_spill] sm:$0xff] }
 0x6f2   : > { %v3784_v63 = vmax.f32 %v3752_v29, 0.0  ;;  %v674_v7 = vadd.f32 %v6715_v41, %v6268_v12  ;;  %v3729_v17 = vmul.f32 %v6263_v30, %v6216_v9  ;;  %v3757_v13 = vadd.f32 %v3725_v10, %v669_v34  ;;  %3813 = vst [vmem:[%s6321_s29 + $0x48] sm:$0xff] %v3781_v62  ;;  %v6725_v34 = vld [vmem:[#allocation78_spill] sm:$0xff]  ;;  %v6726_v4 = vld [vmem:[#allocation80_spill] sm:$0xff] }
 0x6f3   : > { %v3785_v47 = vmax.f32 %v3753_v26, 0.0  ;;  %v677_v51 = vadd.f32 %v6716_v46, %v6268_v12  ;;  %v3730_v39 = vmul.f32 %v6263_v30, %v6220_v50  ;;  %v3758_v37 = vadd.f32 %v3726_v1, %v672_v5  ;;  %3814 = vst [vmem:[%s6321_s29 + $0x50] sm:$0xff] %v3782_v31  ;;  %v6723_v26 = vld [vmem:[#allocation74_spill] sm:$0xff]  ;;  %v6724_v1 = vld [vmem:[#allocation76_spill] sm:$0xff] }
 0x6f4   : > { %v3786_v35 = vmax.f32 %v3754_v33, 0.0  ;;  %v679_v52 = vadd.f32 %v6717_v59, %v6268_v12  ;;  %v3731_v9 = vmul.f32 %v6263_v30, %v6224_v54  ;;  %v3759_v19 = vadd.f32 %v3727_v23, %v674_v7  ;;  %3815 = vst [vmem:[%s6321_s29 + $0x58] sm:$0xff] %v3783_v3 }
 0x6f5   : > { %v3787_v57 = vmax.f32 %v3755_v61, 0.0  ;;  %v682_v11 = vadd.f32 %v6718_v53, %v6268_v12  ;;  %v3732_v50 = vmul.f32 %v6263_v30, %v6228_v48  ;;  %v3760_v27 = vadd.f32 %v3728_v40, %v677_v51  ;;  %3816 = vst [vmem:[%s6321_s29 + $0x60] sm:$0xff] %v3784_v63 }
 0x6f6   : > { %v3788_v6 = vmax.f32 %v3756_v42, 0.0  ;;  %v684_v8 = vadd.f32 %v6719_v2, %v6268_v12  ;;  %v3733_v54 = vmul.f32 %v6263_v30, %v6235_v28  ;;  %v3761_v45 = vadd.f32 %v3729_v17, %v679_v52  ;;  %3817 = vst [vmem:[%s6321_s29 + $0x68] sm:$0xff] %v3785_v47  ;;  %v6727_v42 = vld [vmem:[#allocation82_spill] sm:$0xff] }
 0x6f7   : > { %v3789_v0 = vmax.f32 %v3757_v13, 0.0  ;;  %v687_v58 = vadd.f32 %v6720_v44, %v6268_v12  ;;  %v3734_v48 = vmul.f32 %v6263_v30, %v6239_v20  ;;  %v3762_v36 = vadd.f32 %v3730_v39, %v682_v11  ;;  %3818 = vst [vmem:[%s6321_s29 + $0x70] sm:$0xff] %v3786_v35 }
 0x6f8   : > { %v3790_v55 = vmax.f32 %v3758_v37, 0.0  ;;  %v689_v24 = vadd.f32 %v6721_v43, %v6268_v12  ;;  %v3735_v28 = vmul.f32 %v6263_v30, %v6243_v21  ;;  %v3763_v56 = vadd.f32 %v3731_v9, %v684_v8  ;;  %3819 = vst [vmem:[%s6321_s29 + $0x78] sm:$0xff] %v3787_v57 }
 0x6f9   : > { %v3791_v29 = vmax.f32 %v3759_v19, 0.0  ;;  %v692_v49 = vadd.f32 %v6722_v32, %v6268_v12  ;;  %v3736_v20 = vmul.f32 %v6263_v30, %v6247_v25  ;;  %v3764_v16 = vadd.f32 %v3732_v50, %v687_v58  ;;  %3820 = vst [vmem:[%s6321_s29 + $0x80] sm:$0xff] %v3788_v6 }
 0x6fa   : > { %v3792_v10 = vmax.f32 %v3760_v27, 0.0  ;;  %v694_v62 = vadd.f32 %v6723_v26, %v6268_v12  ;;  %v3737_v21 = vmul.f32 %v6263_v30, %v6251_v14  ;;  %v3765_v22 = vadd.f32 %v3733_v54, %v689_v24  ;;  %3821 = vst [vmem:[%s6321_s29 + $0x88] sm:$0xff] %v3789_v0 }
 0x6fb   : > { %v3793_v60 = vmax.f32 %v3761_v45, 0.0  ;;  %v697_v33 = vadd.f32 %v6724_v1, %v6268_v12  ;;  %v3738_v25 = vmul.f32 %v6263_v30, %v6255_v38  ;;  %v3766_v31 = vadd.f32 %v3734_v48, %v692_v49  ;;  %3822 = vst [vmem:[%s6321_s29 + $0x90] sm:$0xff] %v3790_v55 }
 0x6fc   : > { %v3794_v15 = vmax.f32 %v3762_v36, 0.0  ;;  %v699_v23 = vadd.f32 %v6725_v34, %v6268_v12  ;;  %v3739_v14 = vmul.f32 %v6263_v30, %v6260_v18  ;;  %v3767_v61 = vadd.f32 %v3735_v28, %v694_v62  ;;  %3823 = vst [vmem:[%s6321_s29 + $0x98] sm:$0xff] %v3791_v29 }
 0x6fd   : > { %v3795_v3 = vmax.f32 %v3763_v56, 0.0  ;;  %v702_v5 = vadd.f32 %v6726_v4, %v6268_v12  ;;  %v3768_v38 = vadd.f32 %v3736_v20, %v697_v33  ;;  %v3796_v40 = vmax.f32 %v3764_v16, 0.0  ;;  %3824 = vst [vmem:[%s6321_s29 + $0xa0] sm:$0xff] %v3792_v10 }
 0x6fe   : > { %v704_v63 = vadd.f32 %v6727_v42, %v6268_v12  ;;  %v3769_v41 = vadd.f32 %v3737_v21, %v699_v23  ;;  %v3797_v7 = vmax.f32 %v3765_v22, 0.0  ;;  %3825 = vst [vmem:[%s6321_s29 + $0xa8] sm:$0xff] %v3793_v60  ;;  %v3798_v30 = vmax.f32 %v3766_v31, 0.0 }
 0x6ff   : > { %v3770_v18 = vadd.f32 %v3738_v25, %v702_v5  ;;  %3826 = vst [vmem:[%s6321_s29 + $0xb0] sm:$0xff] %v3794_v15  ;;  %v3799_v13 = vmax.f32 %v3767_v61, 0.0  ;;  %v3800_v12 = vmax.f32 %v3768_v38, 0.0 }
 0x700   : > { %v3771_v17 = vadd.f32 %v3739_v14, %v704_v63  ;;  %3827 = vst [vmem:[%s6321_s29 + $0xb8] sm:$0xff] %v3795_v3  ;;  %v3801_v47 = vmax.f32 %v3769_v41, 0.0 }
 0x701   : > { %3828 = vst [vmem:[%s6321_s29 + $0xc0] sm:$0xff] %v3796_v40  ;;  %v3802_v46 = vmax.f32 %v3770_v18, 0.0 }
 0x702   : > { %3829 = vst [vmem:[%s6321_s29 + $0xc8] sm:$0xff] %v3797_v7  ;;  %v3803_v51 = vmax.f32 %v3771_v17, 0.0 }
 0x703   : > { %3830 = vst [vmem:[%s6321_s29 + $0xd0] sm:$0xff] %v3798_v30 }
 0x704   : > { %3831 = vst [vmem:[%s6321_s29 + $0xd8] sm:$0xff] %v3799_v13 }
 0x705   : > { %3832 = vst [vmem:[%s6321_s29 + $0xe0] sm:$0xff] %v3800_v12 }
 0x706   : > { %3833 = vst [vmem:[%s6321_s29 + $0xe8] sm:$0xff] %v3801_v47 }
 0x707   : > { %3834 = vst [vmem:[%s6321_s29 + $0xf0] sm:$0xff] %v3802_v46 }
 0x708   : > { %3835 = vst [vmem:[%s6321_s29 + $0xf8] sm:$0xff] %v3803_v51 }
 0x709   : > { %4622 = shalt.err (!%p4619_p8)
}
 0x70a   : > { %s4669_s27 = smov 128   ;;  %s4670_s29 = smov 8  }
 0x70b   : > { %4503 = dma.vmem_to_hbm [thread:$0]  (%p4759_p5), %s3850_s21, 4096, %s3852_s22, %s3837_s23, %s4669_s27, %s4669_s27, %s4670_s29  }
 0x70c PF: > { %p4515_p9 = scmp.ge.s32.totalorder %s4661_s12, 2  ;;  %s3866_s17 = sand.u32 1, %s4649_s30  }
 0x70d   : > { %s3867_s26 = scalar_lea.sflag [#allocation4], %s3866_s17 }
 0x70e   : > { %p4510_p10 = pnand %p4515_p9, %p4763_p6 }
 0x710   : > { %p4511_p11 = pneg %p4510_p10 }
 0x712   : > { %4644 = dma.done.wait (%p4511_p11), %s3867_s26, 4096  }
 0x713   : > { %4646 = vsyncadd (%p4511_p11), %s3867_s26, 4294963200  ;;  %p20_p12 = scmp.ge.s32.totalorder %s4746_s15, 4   ;;  %s6728_s30 = smov %s4653_s10 }
 0x714   : > { %s6729_s10 = smov %s4657_s11  ;;  %s6730_s11 = smov %s4757_s18 }
 0x715   : > { %s6731_s12 = smov %s4746_s15  ;;  %22 = sbr.rel (!%p20_p12) target bundleno = 4 (0x4), region = 98 }
 0x71a   :  { %3873 = vsyncpa [#allocation3], 1 }
 0x71b   :  { %3875 = vsyncpa [#allocation3 + $0x1], 1 }
 0x71c   :  { %3876 = vsyncpa [#allocation4], 1 }
 0x71d   :  { %3878 = vsyncpa [#allocation4 + $0x1], 1 }

// kernel: tpu_custom_call.1
= control target key start
LH: loop header
LB: loop body
LE: loop exit
PB: predicated region body
PF: predicated region fallthrough
CT: control target
= control target key end

     0   :  { %14 = vsyncpa [#allocation3], 0  ;;  %s6469_s0 = inlined_call_operand.vmem [shape: bf16[2,256,16], index: 0, kind: input, shape index: {}]   ;;  %s6470_s1 = inlined_call_operand.vmem [shape: bf16[16,256], index: 1, kind: input, shape index: {}]   ;;  %s6471_s2 = inlined_call_operand.vmem [shape: f32[1,256], index: 2, kind: input, shape index: {}]   ;;  %s6472_s3 = inlined_call_operand.hbm [shape: bf16[3,384,128], index: 3, kind: input, shape index: {}]   ;;  %s6473_s4 = inlined_call_operand.vmem [shape: f32[1,128], index: 4, kind: input, shape index: {}]   ;;  %s6474_s5 = inlined_call_operand.vmem [shape: bf16[128,128], index: 5, kind: input, shape index: {}]   ;;  %s6475_s6 = inlined_call_operand.vmem [shape: f32[1,128], index: 6, kind: input, shape index: {}]   ;;  %s6476_s7 = inlined_call_operand.vmem [shape: f32[128,4], index: 7, kind: input, shape index: {}]   ;;  %s6477_s8 = inlined_call_operand.vmem [shape: f32[4,128], index: 8, kind: input, shape index: {}]   ;;  %s6478_s9 = inlined_call_operand.hbm [shape: f32[2,256,128], index: 9, kind: output, shape index: {}]  }
   0x1   :  { %15 = vsyncpa [#allocation4], 0 }
   0x2   :  { %17 = vsyncpa [#allocation4 + $0x1], 0  ;;  %s4721_s30 = smov 0   ;;  %s4723_s10 = smov 0  }
   0x3   :  { %s4725_s11 = smov 0   ;;  %s4727_s12 = smov 0  }
   0x4 LB: > { %s4742_s13 = sadd.s32 4294967295, %s4661_s12   ;;  %s3926_s14 = sadd.s32 4294967294, %s4661_s12   ;;  %s4661_s12 = sphi %s4727_s12, %s6731_s12   ;;  %s4657_s11 = sphi %s4725_s11, %s6730_s11   ;;  %s4653_s10 = sphi %s4723_s10, %s6729_s10   ;;  %s4649_s30 = sphi %s4721_s30, %s6728_s30  }
   0x5   : > { %s4746_s15 = sadd.s32 1, %s4661_s12   ;;  %s224_s16 = sadd.s32 1, %s4657_s11 }
   0x6   : > { %s221_s17 = ssub.s32 %s4661_s12, %s4746_s15  ;;  %p234_p0 = scmp.ne.s32.totalorder %s4657_s11, %s4653_s10 }
   0x7   : > { %p222_p1 = scmp.eq.s32.totalorder %s221_s17, 0  ;;  %p235_p2 = scmp.eq.s32.totalorder %s4742_s13, 1 }
   0x8   : > { %p240_p3 = scmp.ne.s32.totalorder %s4653_s10, %s4649_s30  ;;  %p241_p4 = scmp.eq.s32.totalorder %s3926_s14, 1 }
   0x9   : > { %s4757_s18 = scalar_select %p222_p1, %s4657_s11, %s224_s16  }
   0xa   : > { %p4759_p5 = por %p235_p2, %p234_p0  ;;  %p4763_p6 = por %p241_p4, %p240_p3 }
   0xb   : > { %p3927_p7 = scmp.ge.s32.totalorder %s4661_s12, 1  ;;  %p248_p8 = scmp.lt.s32.totalorder %s4661_s12, 3 }
   0xc   : > { %p4513_p9 = scmp.eq.s32.totalorder %s4742_s13, 0  ;;  %s265_s23 = sshll.u32 %s6472_s3, 4  ;;  %s266_s23 = int_to_ptr.hbm [resolvable:$true] %s265_s23 }
   0xd   : > { %p249_p10 = pnand %p3927_p7, %p248_p8  ;;  %s4663_s24 = smov [#allocation2]  }
   0xe   : > { %s267_s25 = sshll.u32 %s4663_s24, 4  ;;  %s4664_s26 = smov 64   ;;  %s268_s25 = int_to_ptr.vmem [resolvable:$true] %s267_s25 }
   0xf   : > { %p4505_p11 = pneg %p249_p10  ;;  %s4665_s27 = smov 4  }
  0x10   : > { %306 = sbr.rel (%p249_p10) target bundleno = 1804 (0x70c), region = 56 }
  0x11   : > { %p4506_p12 = pnand %p4513_p9, %p4505_p11 }
  0x13   : > { %4508 = dma.hbm_to_vmem [thread:$0]  (!%p4506_p12), %s266_s23, 9216, %s268_s25, [#allocation3], %s4664_s26, %s4664_s26, %s4665_s27  }
  0x15   : > { %4640 = dma.done.wait (%p4513_p9), [#allocation3], 9216  }
  0x16   : > { %4642 = vsyncadd (%p4513_p9), [#allocation3], 4294958080  ;;  %p343_p13 = scmp.lt.s32.totalorder %s4742_s13, 1  ;;  %v4001_v0 = vld [vmem:[%s6470_s1] sm:$0xf]  ;;  %vm479_vm0 = vcmask 130048   ;;  %v738_v27 = vlaneseq }
  0x17   : > { %v4417_v1 = vld [vmem:[%s6470_s1 + $0x4] sm:$0xf0]  ;;  %v4457_v9 = vld [vmem:[#allocation2 + $0x138] sm:$0xff]  ;;  %v4416_v10 = vld [vmem:[%s6470_s1 + $0x4] sm:$0xf]  ;;  %v6481_v53 = vmov 0.0  }
  0x18   : > { %s344_s28 = scalar_select %p343_p13, %s4742_s13, 1  ;;  %v4002_v2 = vor.u32 %v4417_v1, %v4001_v0  ;;  %v4003_v11 = vld [vmem:[%s6470_s1 + $0x8] sm:$0xf0]  ;;  %2255 = vmatpush.bf16.msra.mxu3 %v4457_v9  ;;  %v4456_v13 = vld [vmem:[#allocation2 + $0x130] sm:$0xff]  ;;  %v4454_v15 = vld [vmem:[#allocation2 + $0x120] sm:$0xff]  ;;  %v4842_v30 = vshrl.u32 %v738_v27, 7 }
  0x19   : > { %v4006_v12 = vor.u32 %v4416_v10, %v4003_v11  ;;  %v4455_v14 = vld [vmem:[#allocation2 + $0x128] sm:$0xff]  ;;  %v4453_v17 = vld [vmem:[#allocation2 + $0x118] sm:$0xff]  ;;  %v4452_v18 = vld [vmem:[#allocation2 + $0x110] sm:$0xff]  ;;  %s340_s27 = sand.u32 1, %s4653_s10   ;;  %s4498_s14 = sshll.u32 %s4742_s13, 8 }
  0x1a   : > { %s4399_s29 = sshll.u32 %s344_s28, 7  ;;  %535 = vmatpush.bf16.msra.mxu0 %v4002_v2  ;;  %v4451_v19 = vld [vmem:[#allocation2 + $0x108] sm:$0xff]  ;;  %v4450_v20 = vld [vmem:[#allocation2 + $0x100] sm:$0xff]  ;;  %v740_v32 = vadd.s32 8, %v4842_v30  ;;  %vm1379_vm1 = vcmp.lt.s32.totalorder %v4842_v30, 1  ;;  %v741_v35 = vadd.s32 16, %v4842_v30 }
  0x1b   : > { %s4784_s17 = scalar_lea.vmem %s6469_s0, %s4399_s29  ;;  %624 = vmatpush.bf16.msra.mxu1 %v4006_v12  ;;  %v383_v22 = vld [vmem:[%s6471_s2] sm:$0x3]  ;;  %vm1508_vm2 = vcmp.lt.s32.totalorder %v4842_v30, 7  ;;  %v742_v0 = vadd.s32 24, %v4842_v30  ;;  %s3932_s28 = sshll.u32 %s340_s27, 8 }
  0x1c   : > { %v4400_v3 = vld [vmem:[%s4784_s17] sm:$0xff]  ;;  %v4401_v4 = vld [vmem:[%s4784_s17 + $0x8] sm:$0xff]  ;;  %v4402_v5 = vld [vmem:[%s4784_s17 + $0x10] sm:$0xff]  ;;  %2256 = vmatpush.bf16.msra.mxu3 %v4456_v13  ;;  %v4832_v23 = vperm.slane %v383_v22, 0  ;;  %v782_v39 = vand.u32 15, %v740_v32  ;;  %v789_v45 = vand.u32 15, %v741_v35 }
  0x1d   : > { %4007 = vmatmul.msk.bf16.vlgmr.msra.gmra.mxu0 %vm479_vm0, %v4400_v3  ;;  %v4403_v6 = vld [vmem:[%s4784_s17 + $0x18] sm:$0xff]  ;;  %v4801_v7 = vld [vmem:[%s4784_s17 + $0x20] sm:$0xff]  ;;  %v4806_v8 = vld [vmem:[%s4784_s17 + $0x28] sm:$0xff]  ;;  %s6321_s29 = scalar_lea.vmem [#allocation5], %s3932_s28  ;;  %s3837_s23 = scalar_lea.sflag [#allocation4], %s340_s27 }
  0x1e   : > { %4023 = vmatmul.msk.bf16.vlgmr.msra.gmra.mxu1 %vm479_vm0, %v4400_v3  ;;  %v4818_v16 = vld [vmem:[%s4784_s17 + $0x30] sm:$0xff]  ;;  %v4824_v21 = vld [vmem:[%s4784_s17 + $0x38] sm:$0xff]  ;;  %v4835_v24 = vld [vmem:[%s4784_s17 + $0x40] sm:$0xff]  ;;  %vm1252_vm3 = vcmp.le.s32.totalorder %v782_v39, 14  ;;  %vm1157_vm4 = vcmp.ge.s32.totalorder %v789_v45, 1  ;;  %s3849_s21 = sshll.u32 %s6321_s29, 4  ;;  %s3850_s21 = int_to_ptr.vmem [resolvable:$true] %s3849_s21 }
  0x1f   : > { %v4853_v40 = vld [vmem:[%s4784_s17 + $0x48] sm:$0xff]  ;;  %v4055_v54 = vsel %vm1252_vm3, 1.0, %v6481_v53  ;;  %v4040_v57 = vsel %vm1157_vm4, 1.0, %v6481_v53 }
  0x20   : > { %2257 = vmatpush.bf16.msra.mxu3 %v4455_v14  ;;  %v4887_v14 = vld [vmem:[%s4784_s17 + $0x50] sm:$0xff] }
  0x24   : > { %2258 = vmatpush.bf16.msra.mxu3 %v4454_v15 }
  0x28   : > { %2259 = vmatpush.bf16.msra.mxu3 %v4453_v17 }
  0x2c   : > { %2260 = vmatpush.bf16.msra.mxu3 %v4452_v18 }
  0x2d   : > { %4008 = vmatmul.msk.bf16.gmra.mxu0 %vm479_vm0, %v4401_v4 }
  0x2e   : > { %4024 = vmatmul.msk.bf16.gmra.mxu1 %vm479_vm0, %v4401_v4 }
  0x30   : > { %2261 = vmatpush.bf16.msra.mxu3 %v4451_v19 }
  0x34   : > { %2262 = vmatpush.bf16.msra.mxu3 %v4450_v20 }
  0x3d   : > { %4009 = vmatmul.msk.bf16.gmra.mxu0 %vm479_vm0, %v4402_v5 }
  0x3e   : > { %4025 = vmatmul.msk.bf16.gmra.mxu1 %vm479_vm0, %v4402_v5 }
  0x4d   : > { %4010 = vmatmul.msk.bf16.gmra.mxu0 %vm479_vm0, %v4403_v6 }
  0x4e   : > { %4026 = vmatmul.msk.bf16.gmra.mxu1 %vm479_vm0, %v4403_v6  ;;  %v743_v6 = vadd.s32 32, %v4842_v30 }
  0x5d   : > { %4011 = vmatmul.msk.bf16.gmra.mxu0 %vm479_vm0, %v4801_v7 }
  0x5e   : > { %4027 = vmatmul.msk.bf16.gmra.mxu1 %vm479_vm0, %v4801_v7  ;;  %v796_v7 = vand.u32 15, %v742_v0 }
  0x60   : > { %vm1254_vm5 = vcmp.le.s32.totalorder %v796_v7, 14 }
  0x6d   : > { %4012 = vmatmul.msk.bf16.gmra.mxu0 %vm479_vm0, %v4806_v8 }
  0x6e   : > { %4028 = vmatmul.msk.bf16.gmra.mxu1 %vm479_vm0, %v4806_v8 }
  0x7d   : > { %4013 = vmatmul.msk.bf16.gmra.mxu0 %vm479_vm0, %v4818_v16 }
  0x7e   : > { %4029 = vmatmul.msk.bf16.gmra.mxu1 %vm479_vm0, %v4818_v16 }
  0x8d   : > { %4014 = vmatmul.msk.bf16.gmra.mxu0 %vm479_vm0, %v4824_v21 }
  0x8e   : > { %4030 = vmatmul.msk.bf16.gmra.mxu1 %vm479_vm0, %v4824_v21 }
  0x9a   : > { %v537_v25 = vpop.f32.mrf.mxu0 }
  0x9b   : > { %v538_v26 = vadd.f32 %v537_v25, %v4832_v23  ;;  %v803_v25 = vand.u32 15, %v743_v6 }
  0x9d   : > { %4015 = vmatmul.msk.bf16.gmra.mxu0 %vm479_vm0, %v4835_v24  ;;  %v4840_v28 = vmax.f32 %v538_v26, 0.0  ;;  %vm1159_vm6 = vcmp.ge.s32.totalorder %v803_v25, 1 }
  0x9e   : > { %v4041_v39 = vsel %vm1159_vm6, 1.0, %v6481_v53  ;;  %4031 = vmatmul.msk.bf16.gmra.mxu1 %vm479_vm0, %v4835_v24  ;;  %v751_v24 = vadd.s32 96, %v4842_v30 }
  0x9f   : > { %v1605_v34 = vpack.c.bf16 %v4840_v28, %v4840_v28  ;;  %v6480_v36 = vrot.slane %v4840_v28, 7  ;;  %v6479_v49 = vrot.slane %v4840_v28, 1 }
  0xa1   : > { %v1765_v41 = vunpack.c.l.b16 %v1605_v34 }
  0xa2   : > { %v539_v29 = vpop.f32.mrf.mxu0 }
  0xa3   : > { %v540_v31 = vadd.f32 %v539_v29, %v4832_v23 }
  0xa5   : > { %v707_v33 = vmax.f32 %v540_v31, 0.0 }
  0xa7   : > { %v1348_v37 = vrot.slane %v707_v33, 7  ;;  %v1606_v38 = vpack.c.bf16 %v707_v33, %v707_v33  ;;  %v1477_v46 = vrot.slane %v707_v33, 1 }
  0xa9   : > { %v1766_v42 = vunpack.c.l.b16 %v1606_v38  ;;  %v4859_v43 = vsel %vm1379_vm1, %v6480_v36, %v1348_v37  ;;  %v1539_v55 = vsel %vm1508_vm2, %v6479_v49, %v1477_v46 }
  0xaa   : > { %v542_v44 = vpop.f32.mrf.mxu0  ;;  %v1573_v61 = vpack.c.bf16 %v1539_v55, %v1539_v55 }
  0xab   : > { %v543_v47 = vadd.f32 %v542_v44, %v4832_v23  ;;  %v4862_v48 = vpack.c.b16 %v1766_v42, %v1765_v41 }
  0xac   : > { %v1861_v4 = vunpack.c.l.b16 %v1573_v61 }
  0xad   : > { %6532 = vst [vmem:[#allocation8_spill] sm:$0xff] %v4862_v48  ;;  %v708_v50 = vmax.f32 %v543_v47, 0.0  ;;  %4016 = vmatmul.msk.bf16.gmra.mxu0 %vm479_vm0, %v4853_v40  ;;  %2263 = vmatmul.bf16.vlgmr.msra.gmra.mxu3 %v4862_v48 }
  0xae   : > { %4032 = vmatmul.msk.bf16.gmra.mxu1 %vm479_vm0, %v4853_v40 }
  0xaf   : > { %v1349_v51 = vrot.slane %v708_v50, 7  ;;  %v1478_v52 = vrot.slane %v708_v50, 1  ;;  %v1607_v2 = vpack.c.bf16 %v708_v50, %v708_v50  ;;  %v744_v50 = vadd.s32 40, %v4842_v30 }
  0xb1   : > { %v1538_v56 = vsel %vm1508_vm2, %v1477_v46, %v1478_v52  ;;  %v1409_v58 = vsel %vm1379_vm1, %v1348_v37, %v1349_v51  ;;  %v1767_v15 = vunpack.c.l.b16 %v1607_v2  ;;  %v4056_v37 = vsel %vm1254_vm5, 1.0, %v6481_v53 }
  0xb2   : > { %v544_v59 = vpop.f32.mrf.mxu0  ;;  %v1542_v60 = vmul.f32 %v4055_v54, %v1538_v56  ;;  %v1414_v1 = vmul.f32 %v4040_v57, %v1409_v58  ;;  %v745_v57 = vadd.s32 48, %v4842_v30  ;;  %v810_v8 = vand.u32 15, %v744_v50 }
  0xb3   : > { %v545_v62 = vadd.f32 %v544_v59, %v4832_v23 }
  0xb4   : > { %v1574_v63 = vpack.c.bf16 %v1542_v60, %v1542_v60  ;;  %v1446_v13 = vpack.c.bf16 %v1414_v1, %v1414_v1  ;;  %v817_v6 = vand.u32 15, %v745_v57  ;;  %vm1256_vm7 = vcmp.le.s32.totalorder %v810_v8, 14 }
  0xb5   : > { %v709_v3 = vmax.f32 %v545_v62, 0.0 }
  0xb6   : > { %v1862_v5 = vunpack.c.l.b16 %v1574_v63  ;;  %v1671_v29 = vunpack.c.l.b16 %v1446_v13  ;;  %v4915_v63 = vld [vmem:[%s4784_s17 + $0x58] sm:$0xff]  ;;  %vm1161_vm8 = vcmp.ge.s32.totalorder %v817_v6, 1 }
  0xb7   : > { %v1350_v9 = vrot.slane %v709_v3, 7  ;;  %v1479_v10 = vrot.slane %v709_v3, 1  ;;  %v1608_v11 = vpack.c.bf16 %v709_v3, %v709_v3 }
  0xb8   : > { %v4884_v12 = vpack.c.b16 %v1862_v5, %v1861_v4 }
  0xb9   : > { %v1768_v17 = vunpack.c.l.b16 %v1608_v11  ;;  %v1537_v18 = vsel %vm1508_vm2, %v1478_v52, %v1479_v10  ;;  %v1408_v19 = vsel %vm1379_vm1, %v1349_v51, %v1350_v9 }
  0xba   : > { %v547_v20 = vpop.f32.mrf.mxu0  ;;  %v1447_v22 = vpack.c.bf16 %v1408_v19, %v1408_v19  ;;  %v1575_v45 = vpack.c.bf16 %v1537_v18, %v1537_v18  ;;  %v4057_v19 = vsel %vm1256_vm7, 1.0, %v6481_v53 }
  0xbb   : > { %v548_v26 = vadd.f32 %v547_v20, %v4832_v23  ;;  %v4894_v27 = vpack.c.b16 %v1768_v17, %v1767_v15 }
  0xbc   : > { %v1672_v31 = vunpack.c.l.b16 %v1447_v22  ;;  %v1863_v55 = vunpack.c.l.b16 %v1575_v45  ;;  %v4042_v22 = vsel %vm1161_vm8, 1.0, %v6481_v53 }
  0xbd   : > { %6533 = vst [vmem:[#allocation9_spill] sm:$0xff] %v4894_v27  ;;  %v710_v32 = vmax.f32 %v548_v26, 0.0  ;;  %4017 = vmatmul.msk.bf16.gmra.mxu0 %vm479_vm0, %v4887_v14  ;;  %2268 = vmatmul.bf16.gmra.mxu3 %v4894_v27 }
  0xbe   : > { %v4899_v33 = vpack.c.b16 %v1672_v31, %v1671_v29  ;;  %4033 = vmatmul.msk.bf16.gmra.mxu1 %vm479_vm0, %v4887_v14 }
  0xbf   : > { %v1351_v34 = vrot.slane %v710_v32, 7  ;;  %v1480_v35 = vrot.slane %v710_v32, 1  ;;  %v1609_v52 = vpack.c.bf16 %v710_v32, %v710_v32 }
  0xc1   : > { %v1536_v38 = vsel %vm1508_vm2, %v1479_v10, %v1480_v35  ;;  %v1407_v41 = vsel %vm1379_vm1, %v1350_v9, %v1351_v34  ;;  %v1769_v0 = vunpack.c.l.b16 %v1609_v52  ;;  %v4943_v52 = vld [vmem:[%s4784_s17 + $0x60] sm:$0xff] }
  0xc2   : > { %v549_v42 = vpop.f32.mrf.mxu0  ;;  %v1544_v44 = vmul.f32 %v4056_v37, %v1536_v38  ;;  %v1416_v51 = vmul.f32 %v4041_v39, %v1407_v41 }
  0xc3   : > { %v550_v46 = vadd.f32 %v549_v42, %v4832_v23 }
  0xc4   : > { %v1576_v47 = vpack.c.bf16 %v1544_v44, %v1544_v44  ;;  %v1448_v62 = vpack.c.bf16 %v1416_v51, %v1416_v51  ;;  %v747_v44 = vadd.s32 64, %v4842_v30 }
  0xc5   : > { %v711_v54 = vmax.f32 %v550_v46, 0.0 }
  0xc6   : > { %v1864_v56 = vunpack.c.l.b16 %v1576_v47  ;;  %v1673_v11 = vunpack.c.l.b16 %v1448_v62 }
  0xc7   : > { %v1352_v58 = vrot.slane %v711_v54, 7  ;;  %v1481_v59 = vrot.slane %v711_v54, 1  ;;  %v1610_v60 = vpack.c.bf16 %v711_v54, %v711_v54 }
  0xc8   : > { %v4912_v61 = vpack.c.b16 %v1864_v56, %v1863_v55 }
  0xc9   : > { %v1770_v1 = vunpack.c.l.b16 %v1610_v60  ;;  %v1535_v2 = vsel %vm1508_vm2, %v1480_v35, %v1481_v59  ;;  %v1406_v3 = vsel %vm1379_vm1, %v1351_v34, %v1352_v58  ;;  %v746_v35 = vadd.s32 56, %v4842_v30 }
  0xca   : > { %6534 = vst [vmem:[#allocation10_spill] sm:$0xff] %v4912_v61  ;;  %v552_v4 = vpop.f32.mrf.mxu0  ;;  %v1449_v5 = vpack.c.bf16 %v1406_v3, %v1406_v3  ;;  %v1577_v31 = vpack.c.bf16 %v1535_v2, %v1535_v2  ;;  %v831_v60 = vand.u32 15, %v747_v44 }
  0xcb   : > { %v553_v9 = vadd.f32 %v552_v4, %v4832_v23  ;;  %v4922_v10 = vpack.c.b16 %v1770_v1, %v1769_v0  ;;  %v824_v16 = vand.u32 15, %v746_v35  ;;  %v4465_v0 = vld [vmem:[#allocation2 + $0x178] sm:$0xff] }
  0xcc   : > { %v1674_v7 = vunpack.c.l.b16 %v1449_v5  ;;  %v1865_v41 = vunpack.c.l.b16 %v1577_v31  ;;  %2344 = vmatpush.bf16.msrb.mxu0 %v4465_v0  ;;  %vm1163_vm10 = vcmp.ge.s32.totalorder %v831_v60, 1 }
  0xcd   : > { %6535 = vst [vmem:[#allocation11_spill] sm:$0xff] %v4922_v10  ;;  %v712_v13 = vmax.f32 %v553_v9, 0.0  ;;  %4018 = vmatmul.msk.bf16.gmra.mxu0 %vm479_vm0, %v4915_v63  ;;  %2273 = vmatmul.bf16.gmra.mxu3 %v4922_v10  ;;  %vm1258_vm9 = vcmp.le.s32.totalorder %v824_v16, 14 }
  0xce   : > { %v4927_v15 = vpack.c.b16 %v1674_v7, %v1673_v11  ;;  %v4058_v9 = vsel %vm1258_vm9, 1.0, %v6481_v53  ;;  %v4464_v11 = vld [vmem:[#allocation2 + $0x170] sm:$0xff]  ;;  %4034 = vmatmul.msk.bf16.gmra.mxu1 %vm479_vm0, %v4915_v63 }
  0xcf   : > { %v1353_v17 = vrot.slane %v712_v13, 7  ;;  %v1482_v18 = vrot.slane %v712_v13, 1  ;;  %v1611_v38 = vpack.c.bf16 %v712_v13, %v712_v13  ;;  %v4043_v13 = vsel %vm1163_vm10, 1.0, %v6481_v53 }
  0xd0   : > { %2345 = vmatpush.bf16.msrb.mxu0 %v4464_v11 }
  0xd1   : > { %v1534_v20 = vsel %vm1508_vm2, %v1481_v59, %v1482_v18  ;;  %v1405_v25 = vsel %vm1379_vm1, %v1352_v58, %v1353_v17  ;;  %v1771_v54 = vunpack.c.l.b16 %v1611_v38  ;;  %v749_v38 = vadd.s32 80, %v4842_v30 }
  0xd2   : > { %v554_v26 = vpop.f32.mrf.mxu0  ;;  %v1546_v29 = vmul.f32 %v4057_v19, %v1534_v20  ;;  %v1418_v37 = vmul.f32 %v4042_v22, %v1405_v25  ;;  %v4463_v25 = vld [vmem:[#allocation2 + $0x168] sm:$0xff] }
  0xd3   : > { %v555_v32 = vadd.f32 %v554_v26, %v4832_v23 }
  0xd4   : > { %v1578_v34 = vpack.c.bf16 %v1546_v29, %v1546_v29  ;;  %v1450_v51 = vpack.c.bf16 %v1418_v37, %v1418_v37  ;;  %v748_v29 = vadd.s32 72, %v4842_v30  ;;  %2346 = vmatpush.bf16.msrb.mxu0 %v4463_v25 }
  0xd5   : > { %v713_v39 = vmax.f32 %v555_v32, 0.0 }
  0xd6   : > { %v1866_v42 = vunpack.c.l.b16 %v1578_v34  ;;  %v1675_v1 = vunpack.c.l.b16 %v1450_v51 }
  0xd7   : > { %v1354_v45 = vrot.slane %v713_v39, 7  ;;  %v1483_v46 = vrot.slane %v713_v39, 1  ;;  %v1612_v47 = vpack.c.bf16 %v713_v39, %v713_v39 }
  0xd8   : > { %v4940_v50 = vpack.c.b16 %v1866_v42, %v1865_v41  ;;  %v4462_v42 = vld [vmem:[#allocation2 + $0x160] sm:$0xff] }
  0xd9   : > { %v1772_v55 = vunpack.c.l.b16 %v1612_v47  ;;  %v1533_v56 = vsel %vm1508_vm2, %v1482_v18, %v1483_v46  ;;  %v1404_v57 = vsel %vm1379_vm1, %v1353_v17, %v1354_v45  ;;  %v4971_v47 = vld [vmem:[%s4784_s17 + $0x68] sm:$0xff]  ;;  %2347 = vmatpush.bf16.msrb.mxu0 %v4462_v42 }
  0xda   : > { %6536 = vst [vmem:[#allocation12_spill] sm:$0xff] %v4940_v50  ;;  %v557_v58 = vpop.f32.mrf.mxu0  ;;  %v1451_v59 = vpack.c.bf16 %v1404_v57, %v1404_v57  ;;  %v1579_v20 = vpack.c.bf16 %v1533_v56, %v1533_v56 }
  0xdb   : > { %v558_v8 = vadd.f32 %v557_v58, %v4832_v23  ;;  %v4950_v62 = vpack.c.b16 %v1772_v55, %v1771_v54  ;;  %v845_v58 = vand.u32 15, %v749_v38 }
  0xdc   : > { %v1676_v2 = vunpack.c.l.b16 %v1451_v59  ;;  %v1867_v35 = vunpack.c.l.b16 %v1579_v20 }
  0xdd   : > { %6537 = vst [vmem:[#allocation13_spill] sm:$0xff] %v4950_v62  ;;  %v714_v3 = vmax.f32 %v558_v8, 0.0  ;;  %4019 = vmatmul.msk.bf16.gmra.mxu0 %vm479_vm0, %v4943_v52  ;;  %2278 = vmatmul.bf16.gmra.mxu3 %v4950_v62  ;;  %v4461_v8 = vld [vmem:[#allocation2 + $0x158] sm:$0xff]  ;;  %vm1165_vm12 = vcmp.ge.s32.totalorder %v845_v58, 1 }
  0xde   : > { %v4955_v4 = vpack.c.b16 %v1676_v2, %v1675_v1  ;;  %2348 = vmatpush.bf16.msrb.mxu0 %v4461_v8 }
  0xdf   : > { %v1355_v5 = vrot.slane %v714_v3, 7  ;;  %v1484_v6 = vrot.slane %v714_v3, 1  ;;  %v1613_v32 = vpack.c.bf16 %v714_v3, %v714_v3 }
  0xe1   : > { %v1532_v7 = vsel %vm1508_vm2, %v1483_v46, %v1484_v6  ;;  %v1403_v17 = vsel %vm1379_vm1, %v1354_v45, %v1355_v5  ;;  %v838_v45 = vand.u32 15, %v748_v29  ;;  %v1773_v16 = vunpack.c.l.b16 %v1613_v32 }
  0xe2   : > { %v559_v18 = vpop.f32.mrf.mxu0  ;;  %v1548_v19 = vmul.f32 %v4058_v9, %v1532_v7  ;;  %v1420_v31 = vmul.f32 %v4043_v13, %v1403_v17  ;;  %v4985_v9 = vpop.f32.mrf.mxu1  ;;  %v4460_v7 = vld [vmem:[#allocation2 + $0x150] sm:$0xff]  ;;  %v4044_v17 = vsel %vm1165_vm12, 1.0, %v6481_v53 }
  0xe3   : > { %v560_v22 = vadd.f32 %v559_v18, %v4832_v23  ;;  %vm1260_vm11 = vcmp.le.s32.totalorder %v838_v45, 14  ;;  %6540 = vst [vmem:[#allocation16_spill] sm:$0xff] %v4985_v9  ;;  %2349 = vmatpush.bf16.msrb.mxu0 %v4460_v7 }
  0xe4   : > { %v1580_v26 = vpack.c.bf16 %v1548_v19, %v1548_v19  ;;  %v1452_v46 = vpack.c.bf16 %v1420_v31, %v1420_v31  ;;  %v4059_v11 = vsel %vm1260_vm11, 1.0, %v6481_v53  ;;  %v750_v31 = vadd.s32 88, %v4842_v30 }
  0xe5   : > { %v715_v34 = vmax.f32 %v560_v22, 0.0 }
  0xe6   : > { %v1868_v37 = vunpack.c.l.b16 %v1580_v26  ;;  %v1677_v0 = vunpack.c.l.b16 %v1452_v46  ;;  %v4459_v26 = vld [vmem:[#allocation2 + $0x148] sm:$0xff] }
  0xe7   : > { %v1356_v39 = vrot.slane %v715_v34, 7  ;;  %v1485_v21 = vrot.slane %v715_v34, 1  ;;  %v1614_v41 = vpack.c.bf16 %v715_v34, %v715_v34  ;;  %2350 = vmatpush.bf16.msrb.mxu0 %v4459_v26 }
  0xe8   : > { %v4968_v44 = vpack.c.b16 %v1868_v37, %v1867_v35 }
  0xe9   : > { %v1774_v51 = vunpack.c.l.b16 %v1614_v41  ;;  %v1531_v54 = vsel %vm1508_vm2, %v1484_v6, %v1485_v21  ;;  %v1402_v55 = vsel %vm1379_vm1, %v1355_v5, %v1356_v39 }
  0xea   : > { %6538 = vst [vmem:[#allocation14_spill] sm:$0xff] %v4968_v44  ;;  %v562_v56 = vpop.f32.mrf.mxu0  ;;  %v1453_v57 = vpack.c.bf16 %v1402_v55, %v1402_v55  ;;  %v1581_v20 = vpack.c.bf16 %v1531_v54, %v1531_v54  ;;  %v4998_v45 = vpop.f32.mrf.mxu1  ;;  %v5003_v54 = vld [vmem:[%s4784_s17 + $0x70] sm:$0xff]  ;;  %4035 = vmatmul.msk.bf16.gmra.mxu1 %vm479_vm0, %v4943_v52 }
  0xeb   : > { %v563_v59 = vadd.f32 %v562_v56, %v4832_v23  ;;  %v4978_v60 = vpack.c.b16 %v1774_v51, %v1773_v16  ;;  %6541 = vst [vmem:[#allocation17_spill] sm:$0xff] %v4998_v45  ;;  %v852_v16 = vand.u32 15, %v750_v31 }
  0xec   : > { %v1678_v1 = vunpack.c.l.b16 %v1453_v57  ;;  %v1869_v37 = vunpack.c.l.b16 %v1581_v20 }
  0xed   : > { %6539 = vst [vmem:[#allocation15_spill] sm:$0xff] %v4978_v60  ;;  %v716_v2 = vmax.f32 %v563_v59, 0.0  ;;  %4020 = vmatmul.msk.bf16.gmra.mxu0 %vm479_vm0, %v4971_v47  ;;  %2283 = vmatmul.bf16.gmra.mxu3 %v4978_v60  ;;  %vm1262_vm13 = vcmp.le.s32.totalorder %v852_v16, 14 }
  0xee   : > { %v4983_v3 = vpack.c.b16 %v1678_v1, %v1677_v0  ;;  %v859_v0 = vand.u32 15, %v751_v24 }
  0xef   : > { %v1357_v5 = vrot.slane %v716_v2, 7  ;;  %v1486_v6 = vrot.slane %v716_v2, 1  ;;  %v1615_v34 = vpack.c.bf16 %v716_v2, %v716_v2 }
  0xf0   : > { %vm1167_vm14 = vcmp.ge.s32.totalorder %v859_v0, 1 }
  0xf1   : > { %v1530_v13 = vsel %vm1508_vm2, %v1485_v21, %v1486_v6  ;;  %v1401_v22 = vsel %vm1379_vm1, %v1356_v39, %v1357_v5  ;;  %v4458_v39 = vld [vmem:[#allocation2 + $0x140] sm:$0xff]  ;;  %v1775_v55 = vunpack.c.l.b16 %v1615_v34 }
  0xf2   : > { %v564_v18 = vpop.f32.mrf.mxu0  ;;  %v1550_v19 = vmul.f32 %v4059_v11, %v1530_v13  ;;  %v1422_v32 = vmul.f32 %v4044_v17, %v1401_v22  ;;  %2351 = vmatpush.bf16.msrb.mxu0 %v4458_v39  ;;  %v4045_v22 = vsel %vm1167_vm14, 1.0, %v6481_v53  ;;  %v753_v39 = vadd.s32 112, %v4842_v30 }
  0xf3   : > { %v565_v25 = vadd.f32 %v564_v18, %v4832_v23  ;;  %v5017_v18 = vpop.f32.mrf.mxu1 }
  0xf4   : > { %v1582_v29 = vpack.c.bf16 %v1550_v19, %v1550_v19  ;;  %v1454_v51 = vpack.c.bf16 %v1422_v32, %v1422_v32  ;;  %6544 = vst [vmem:[#allocation20_spill] sm:$0xff] %v5017_v18  ;;  %v4060_v19 = vsel %vm1262_vm13, 1.0, %v6481_v53 }
  0xf5   : > { %v717_v35 = vmax.f32 %v565_v25, 0.0 }
  0xf6   : > { %v1870_v38 = vunpack.c.l.b16 %v1582_v29  ;;  %v1679_v11 = vunpack.c.l.b16 %v1454_v51 }
  0xf7   : > { %v1358_v21 = vrot.slane %v717_v35, 7  ;;  %v1487_v41 = vrot.slane %v717_v35, 1  ;;  %v1616_v42 = vpack.c.bf16 %v717_v35, %v717_v35  ;;  %v752_v35 = vadd.s32 104, %v4842_v30 }
  0xf8   : > { %v5000_v46 = vpack.c.b16 %v1870_v38, %v1869_v37 }
  0xf9   : > { %v1776_v56 = vunpack.c.l.b16 %v1616_v42  ;;  %v1529_v57 = vsel %vm1508_vm2, %v1486_v6, %v1487_v41  ;;  %v1400_v58 = vsel %vm1379_vm1, %v1357_v5, %v1358_v21 }
  0xfa   : > { %6542 = vst [vmem:[#allocation18_spill] sm:$0xff] %v5000_v46  ;;  %v567_v59 = vpop.f32.mrf.mxu0  ;;  %v1455_v8 = vpack.c.bf16 %v1400_v58, %v1400_v58  ;;  %v1583_v31 = vpack.c.bf16 %v1529_v57, %v1529_v57  ;;  %v5035_v58 = vld [vmem:[%s4784_s17 + $0x78] sm:$0xff]  ;;  %s3848_s17 = scalar_lea.hbm %s6478_s9, %s4498_s14  ;;  %s4615_s14 = scalar_lea.hbm %s6478_s9, 512 }
  0xfb   : > { %v568_v1 = vadd.f32 %v567_v59, %v4832_v23  ;;  %v5010_v2 = vpack.c.b16 %v1776_v56, %v1775_v55  ;;  %v5030_v55 = vpop.f32.mrf.mxu1  ;;  %v866_v56 = vand.u32 15, %v752_v35  ;;  %4036 = vmatmul.msk.bf16.gmra.mxu1 %vm479_vm0, %v4971_v47  ;;  %s3851_s22 = sshll.u32 %s3848_s17, 4  ;;  %s3852_s22 = int_to_ptr.hbm [resolvable:$true] %s3851_s22 }
  0xfc   : > { %v1680_v7 = vunpack.c.l.b16 %v1455_v8  ;;  %6545 = vst [vmem:[#allocation21_spill] sm:$0xff] %v5030_v55  ;;  %s4609_s24 = sshra.s32 %s3852_s22, 4  ;;  %s4610_s24 = int_to_ptr.hbm [resolvable:$true] %s4609_s24 }
  0xfd   : > { %6543 = vst [vmem:[#allocation19_spill] sm:$0xff] %v5010_v2  ;;  %v718_v13 = vmax.f32 %v568_v1, 0.0  ;;  %4021 = vmatmul.msk.bf16.gmra.mxu0 %vm479_vm0, %v5003_v54  ;;  %2288 = vmatmul.bf16.gmra.mxu3 %v5010_v2  ;;  %vm1264_vm15 = vcmp.le.s32.totalorder %v866_v56, 14  ;;  %s4611_s25 = scalar_lea.hbm %s4610_s24, 256  ;;  %p4616_p3 = scmp.lt.s32.totalorder %s4610_s24, %s6478_s9 }
  0xfe   : > { %v5015_v6 = vpack.c.b16 %v1680_v7, %v1679_v11  ;;  %p4612_p0 = scmp.ne.s32.totalorder %s4610_s24, %s4611_s25  ;;  %p4617_p4 = scmp.lt.s32.totalorder %s4615_s14, %s4611_s25 }
  0xff   : > { %v1359_v5 = vrot.slane %v718_v13, 7  ;;  %v1488_v17 = vrot.slane %v718_v13, 1  ;;  %v1617_v38 = vpack.c.bf16 %v718_v13, %v718_v13  ;;  %v873_v13 = vand.u32 15, %v753_v39 }
 0x100   : > { %p4613_p1 = pnand %p4612_p0, %p4759_p5  ;;  %p4618_p7 = por %p4617_p4, %p4616_p3 }
 0x101   : > { %v1528_v20 = vsel %vm1508_vm2, %v1487_v41, %v1488_v17  ;;  %v1399_v25 = vsel %vm1379_vm1, %v1358_v21, %v1359_v5  ;;  %v1871_v41 = vunpack.c.l.b16 %v1583_v31  ;;  %v1777_v59 = vunpack.c.l.b16 %v1617_v38 }
 0x102   : > { %v569_v26 = vpop.f32.mrf.mxu0  ;;  %v1552_v29 = vmul.f32 %v4060_v19, %v1528_v20  ;;  %v1424_v37 = vmul.f32 %v4045_v22, %v1399_v25  ;;  %vm1169_vm3 = vcmp.ge.s32.totalorder %v873_v13, 1  ;;  %p4614_p2 = pneg %p4613_p1 }
 0x103   : > { %v570_v32 = vadd.f32 %v569_v26, %v4832_v23  ;;  %v5049_v31 = vpop.f32.mrf.mxu1  ;;  %v4046_v35 = vsel %vm1169_vm3, 1.0, %v6481_v53 }
 0x104   : > { %v1584_v34 = vpack.c.bf16 %v1552_v29, %v1552_v29  ;;  %v1456_v57 = vpack.c.bf16 %v1424_v37, %v1424_v37  ;;  %6548 = vst [vmem:[#allocation24_spill] sm:$0xff] %v5049_v31  ;;  %v761_v31 = vadd.s32 176, %v4842_v30  ;;  %p4619_p8 = pnand %p4618_p7, %p4614_p2 }
 0x105   : > { %v719_v24 = vmax.f32 %v570_v32, 0.0  ;;  %v4061_v32 = vsel %vm1264_vm15, 1.0, %v6481_v53 }
 0x106   : > { %v1872_v42 = vunpack.c.l.b16 %v1584_v34  ;;  %v1681_v22 = vunpack.c.l.b16 %v1456_v57 }
 0x107   : > { %v1360_v21 = vrot.slane %v719_v24, 7  ;;  %v1489_v16 = vrot.slane %v719_v24, 1  ;;  %v1618_v51 = vpack.c.bf16 %v719_v24, %v719_v24 }
 0x108   : > { %v5032_v40 = vpack.c.b16 %v1872_v42, %v1871_v41 }
 0x109   : > { %v1778_v8 = vunpack.c.l.b16 %v1618_v51  ;;  %v1527_v0 = vsel %vm1508_vm2, %v1488_v17, %v1489_v16  ;;  %v1398_v1 = vsel %vm1379_vm1, %v1359_v5, %v1360_v21  ;;  %v754_v51 = vadd.s32 120, %v4842_v30 }
 0x10a   : > { %6546 = vst [vmem:[#allocation22_spill] sm:$0xff] %v5032_v40  ;;  %v572_v11 = vpop.f32.mrf.mxu0  ;;  %v1457_v7 = vpack.c.bf16 %v1398_v1, %v1398_v1  ;;  %v1585_v41 = vpack.c.bf16 %v1527_v0, %v1527_v0  ;;  %v755_v1 = vadd.s32 128, %v4842_v30 }
 0x10b   : > { %v573_v19 = vadd.f32 %v572_v11, %v4832_v23  ;;  %v5042_v20 = vpack.c.b16 %v1778_v8, %v1777_v59  ;;  %v5062_v13 = vpop.f32.mrf.mxu1  ;;  %v880_v0 = vand.u32 15, %v754_v51  ;;  %4037 = vmatmul.msk.bf16.gmra.mxu1 %vm479_vm0, %v5003_v54 }
 0x10c   : > { %v1682_v25 = vunpack.c.l.b16 %v1457_v7  ;;  %6549 = vst [vmem:[#allocation25_spill] sm:$0xff] %v5062_v13 }
 0x10d   : > { %6547 = vst [vmem:[#allocation23_spill] sm:$0xff] %v5042_v20  ;;  %v720_v26 = vmax.f32 %v573_v19, 0.0  ;;  %4022 = vmatmul.msk.bf16.gmra.mxu0 %vm479_vm0, %v5035_v58  ;;  %2293 = vmatmul.bf16.gmra.mxu3 %v5042_v20  ;;  %vm1266_vm4 = vcmp.le.s32.totalorder %v880_v0, 14 }
 0x10e   : > { %v5047_v17 = vpack.c.b16 %v1682_v25, %v1681_v22 }
 0x10f   : > { %v1361_v5 = vrot.slane %v720_v26, 7  ;;  %v1490_v29 = vrot.slane %v720_v26, 1  ;;  %v1619_v57 = vpack.c.bf16 %v720_v26, %v720_v26 }
 0x111   : > { %v1526_v34 = vsel %vm1508_vm2, %v1489_v16, %v1490_v29  ;;  %v1397_v37 = vsel %vm1379_vm1, %v1360_v21, %v1361_v5  ;;  %v1873_v16 = vunpack.c.l.b16 %v1585_v41  ;;  %v1779_v22 = vunpack.c.l.b16 %v1619_v57 }
 0x112   : > { %v574_v38 = vpop.f32.mrf.mxu0  ;;  %v1554_v24 = vmul.f32 %v4061_v32, %v1526_v34  ;;  %v1426_v56 = vmul.f32 %v4046_v35, %v1397_v37  ;;  %v887_v37 = vand.u32 15, %v755_v1  ;;  %v4062_v57 = vsel %vm1266_vm4, 1.0, %v6481_v53 }
 0x113   : > { %v575_v42 = vadd.f32 %v574_v38, %v4832_v23 }
 0x114   : > { %v1586_v39 = vpack.c.bf16 %v1554_v24, %v1554_v24  ;;  %v1458_v19 = vpack.c.bf16 %v1426_v56, %v1426_v56  ;;  %vm1171_vm5 = vcmp.ge.s32.totalorder %v887_v37, 1  ;;  %v5077_v56 = vpop.f32.mrf.mxu1 }
 0x115   : > { %v721_v59 = vmax.f32 %v575_v42, 0.0  ;;  %6552 = vst [vmem:[#allocation28_spill] sm:$0xff] %v5077_v56 }
 0x116   : > { %v1874_v8 = vunpack.c.l.b16 %v1586_v39  ;;  %v1683_v41 = vunpack.c.l.b16 %v1458_v19 }
 0x117   : > { %v1362_v11 = vrot.slane %v721_v59, 7  ;;  %v1491_v21 = vrot.slane %v721_v59, 1  ;;  %v1620_v7 = vpack.c.bf16 %v721_v59, %v721_v59 }
 0x118   : > { %v5064_v14 = vpack.c.b16 %v1874_v8, %v1873_v16  ;;  %v4047_v16 = vsel %vm1171_vm5, 1.0, %v6481_v53 }
 0x119   : > { %v1780_v25 = vunpack.c.l.b16 %v1620_v7  ;;  %v1525_v32 = vsel %vm1508_vm2, %v1490_v29, %v1491_v21  ;;  %v1396_v26 = vsel %vm1379_vm1, %v1361_v5, %v1362_v11 }
 0x11a   : > { %6550 = vst [vmem:[#allocation26_spill] sm:$0xff] %v5064_v14  ;;  %v577_v34 = vpop.f32.mrf.mxu0  ;;  %v1459_v35 = vpack.c.bf16 %v1396_v26, %v1396_v26  ;;  %v1587_v0 = vpack.c.bf16 %v1525_v32, %v1525_v32 }
 0x11b   : > { %v578_v38 = vadd.f32 %v577_v34, %v4832_v23  ;;  %v5071_v24 = vpack.c.b16 %v1780_v25, %v1779_v22  ;;  %v756_v25 = vadd.s32 136, %v4842_v30 }
 0x11c   : > { %v1684_v42 = vunpack.c.l.b16 %v1459_v35  ;;  %v5090_v49 = vpop.f32.mrf.mxu1  ;;  %4038 = vmatmul.msk.bf16.gmra.mxu1 %vm479_vm0, %v5035_v58 }
 0x11d   : > { %6551 = vst [vmem:[#allocation27_spill] sm:$0xff] %v5071_v24  ;;  %v722_v39 = vmax.f32 %v578_v38, 0.0  ;;  %2298 = vmatmul.bf16.gmra.mxu3 %v5071_v24  ;;  %2352 = vmatmul.bf16.vlgmr.msrb.gmra.mxu0 %v4884_v12  ;;  %v757_v38 = vadd.s32 144, %v4842_v30  ;;  %v894_v32 = vand.u32 15, %v756_v25 }
 0x11e   : > { %v5075_v51 = vpack.c.b16 %v1684_v42, %v1683_v41  ;;  %6553 = vst [vmem:[#allocation29_spill] sm:$0xff] %v5090_v49 }
 0x11f   : > { %v1363_v29 = vrot.slane %v722_v39, 7  ;;  %v1492_v5 = vrot.slane %v722_v39, 1  ;;  %v1621_v34 = vpack.c.bf16 %v722_v39, %v722_v39  ;;  %vm1268_vm6 = vcmp.le.s32.totalorder %v894_v32, 14 }
 0x121   : > { %v1524_v59 = vsel %vm1508_vm2, %v1491_v21, %v1492_v5  ;;  %v1395_v8 = vsel %vm1379_vm1, %v1362_v11, %v1363_v29  ;;  %v1875_v21 = vunpack.c.l.b16 %v1587_v0  ;;  %v901_v0 = vand.u32 15, %v757_v38 }
 0x122   : > { %v579_v1 = vpop.f32.mrf.mxu0  ;;  %v1556_v7 = vmul.f32 %v4062_v57, %v1524_v59  ;;  %v1428_v26 = vmul.f32 %v4047_v16, %v1395_v8  ;;  %v1781_v59 = vunpack.c.l.b16 %v1621_v34 }
 0x123   : > { %v580_v19 = vadd.f32 %v579_v1, %v4832_v23  ;;  %vm1173_vm7 = vcmp.ge.s32.totalorder %v901_v0, 1  ;;  %v758_v0 = vadd.s32 152, %v4842_v30 }
 0x124   : > { %v1588_v22 = vpack.c.bf16 %v1556_v7, %v1556_v7  ;;  %v1460_v57 = vpack.c.bf16 %v1428_v26, %v1428_v26  ;;  %v5105_v34 = vpop.f32.mrf.mxu1  ;;  %v4048_v32 = vsel %vm1173_vm7, 1.0, %v6481_v53 }
 0x125   : > { %v723_v35 = vmax.f32 %v580_v19, 0.0  ;;  %6555 = vst [vmem:[#allocation31_spill] sm:$0xff] %v5105_v34 }
 0x126   : > { %v1876_v37 = vunpack.c.l.b16 %v1588_v22 }
 0x127   : > { %v1364_v41 = vrot.slane %v723_v35, 7  ;;  %v1493_v11 = vrot.slane %v723_v35, 1  ;;  %v1622_v42 = vpack.c.bf16 %v723_v35, %v723_v35  ;;  %v1685_v35 = vunpack.c.l.b16 %v1460_v57 }
 0x128   : > { %v5092_v63 = vpack.c.b16 %v1876_v37, %v1875_v21  ;;  %v4063_v37 = vsel %vm1268_vm6, 1.0, %v6481_v53  ;;  %v759_v53 = vadd.s32 160, %v4842_v30 }
 0x129   : > { %v1782_v1 = vunpack.c.l.b16 %v1622_v42  ;;  %v1523_v16 = vsel %vm1508_vm2, %v1492_v5, %v1493_v11  ;;  %v1394_v39 = vsel %vm1379_vm1, %v1363_v29, %v1364_v41 }
 0x12a   : > { %v582_v8 = vpop.f32.mrf.mxu0  ;;  %v1461_v7 = vpack.c.bf16 %v1394_v39, %v1394_v39  ;;  %v1589_v39 = vpack.c.bf16 %v1523_v16, %v1523_v16 }
 0x12b   : > { %v583_v19 = vadd.f32 %v582_v8, %v4832_v23  ;;  %v5099_v22 = vpack.c.b16 %v1782_v1, %v1781_v59 }
 0x12c   : > { %v1686_v21 = vunpack.c.l.b16 %v1461_v7  ;;  %v5120_v56 = vpop.f32.mrf.mxu1 }
 0x12d   : > { %6554 = vst [vmem:[#allocation30_spill] sm:$0xff] %v5099_v22  ;;  %v724_v25 = vmax.f32 %v583_v19, 0.0  ;;  %2303 = vmatmul.bf16.gmra.mxu3 %v5099_v22  ;;  %2357 = vmatmul.bf16.gmra.mxu0 %v4912_v61 }
 0x12e   : > { %v5103_v26 = vpack.c.b16 %v1686_v21, %v1685_v35  ;;  %6556 = vst [vmem:[#allocation32_spill] sm:$0xff] %v5120_v56 }
 0x12f   : > { %v1365_v5 = vrot.slane %v724_v25, 7  ;;  %v1494_v29 = vrot.slane %v724_v25, 1  ;;  %v1623_v35 = vpack.c.bf16 %v724_v25, %v724_v25 }
 0x130   : > { %v5108_v38 = vpop.f32.mrf.mxu3 }
 0x131   : > { %v1522_v42 = vsel %vm1508_vm2, %v1493_v11, %v1494_v29  ;;  %v1393_v57 = vsel %vm1379_vm1, %v1364_v41, %v1365_v5  ;;  %v1877_v11 = vunpack.c.l.b16 %v1589_v39 }
 0x132   : > { %v584_v59 = vpop.f32.mrf.mxu0  ;;  %v1558_v1 = vmul.f32 %v4063_v37, %v1522_v42  ;;  %v1430_v19 = vmul.f32 %v4048_v32, %v1393_v57  ;;  %v908_v37 = vand.u32 15, %v758_v0 }
 0x133   : > { %v585_v8 = vadd.f32 %v584_v59, %v4832_v23  ;;  %v1783_v59 = vunpack.c.l.b16 %v1623_v35 }
 0x134   : > { %v1590_v7 = vpack.c.bf16 %v1558_v1, %v1558_v1  ;;  %v1462_v42 = vpack.c.bf16 %v1430_v19, %v1430_v19  ;;  %vm1270_vm8 = vcmp.le.s32.totalorder %v908_v37, 14  ;;  %v5137_v19 = vpop.f32.mrf.mxu1 }
 0x135   : > { %v725_v21 = vmax.f32 %v585_v8, 0.0  ;;  %v915_v8 = vand.u32 15, %v759_v53  ;;  %6558 = vst [vmem:[#allocation34_spill] sm:$0xff] %v5137_v19  ;;  %v6559_v53 = vmov 0.0  }
 0x136   : > { %v1878_v36 = vunpack.c.l.b16 %v1590_v7  ;;  %v4064_v35 = vsel %vm1270_vm8, 1.0, %v6559_v53  ;;  %vm3660_vm8 = vcmask 31744  }
 0x137   : > { %v1366_v34 = vrot.slane %v725_v21, 7  ;;  %v1495_v41 = vrot.slane %v725_v21, 1  ;;  %v1624_v49 = vpack.c.bf16 %v725_v21, %v725_v21  ;;  %vm1175_vm9 = vcmp.ge.s32.totalorder %v915_v8, 1 }
 0x138   : > { %v5122_v52 = vpop.f32.mrf.mxu3  ;;  %v5124_v16 = vpack.c.b16 %v1878_v36, %v1877_v11  ;;  %v1687_v36 = vunpack.c.l.b16 %v1462_v42  ;;  %v4049_v42 = vsel %vm1175_vm9, 1.0, %v6559_v53 }
 0x139   : > { %v1784_v1 = vunpack.c.l.b16 %v1624_v49  ;;  %v1521_v25 = vsel %vm1508_vm2, %v1494_v29, %v1495_v41  ;;  %v1392_v32 = vsel %vm1379_vm1, %v1365_v5, %v1366_v34 }
 0x13a   : > { %v587_v57 = vpop.f32.mrf.mxu0  ;;  %v1463_v39 = vpack.c.bf16 %v1392_v32, %v1392_v32 }
 0x13b   : > { %v588_v7 = vadd.f32 %v587_v57, %v4832_v23  ;;  %v5131_v21 = vpack.c.b16 %v1784_v1, %v1783_v59 }
 0x13c   : > { %v1688_v11 = vunpack.c.l.b16 %v1463_v39  ;;  %v1591_v39 = vpack.c.bf16 %v1521_v25, %v1521_v25  ;;  %v5152_v45 = vpop.f32.mrf.mxu1 }
 0x13d   : > { %6557 = vst [vmem:[#allocation33_spill] sm:$0xff] %v5131_v21  ;;  %v726_v0 = vmax.f32 %v588_v7, 0.0  ;;  %2308 = vmatmul.bf16.gmra.mxu3 %v5131_v21  ;;  %2362 = vmatmul.bf16.gmra.mxu0 %v4940_v50 }
 0x13e   : > { %v5135_v49 = vpack.c.b16 %v1688_v11, %v1687_v36  ;;  %v760_v36 = vadd.s32 168, %v4842_v30  ;;  %6560 = vst [vmem:[#allocation35_spill] sm:$0xff] %v5152_v45  ;;  %v4424_v45 = vld [vmem:[#allocation2 + $0x30] sm:$0xff] }
 0x13f   : > { %v1367_v29 = vrot.slane %v726_v0, 7  ;;  %v1496_v5 = vrot.slane %v726_v0, 1  ;;  %v1625_v19 = vpack.c.bf16 %v726_v0, %v726_v0 }
 0x140   : > { %v5140_v32 = vpop.f32.mrf.mxu3 }
 0x141   : > { %v1520_v37 = vsel %vm1508_vm2, %v1495_v41, %v1496_v5  ;;  %v1391_v59 = vsel %vm1379_vm1, %v1366_v34, %v1367_v29  ;;  %v1879_v41 = vunpack.c.l.b16 %v1591_v39 }
 0x142   : > { %v589_v1 = vpop.f32.mrf.mxu0  ;;  %v1560_v57 = vmul.f32 %v4064_v35, %v1520_v37  ;;  %v1432_v11 = vmul.f32 %v4049_v42, %v1391_v59  ;;  %v922_v35 = vand.u32 15, %v760_v36 }
 0x143   : > { %v590_v8 = vadd.f32 %v589_v1, %v4832_v23  ;;  %v1785_v1 = vunpack.c.l.b16 %v1625_v19 }
 0x144   : > { %v1592_v7 = vpack.c.bf16 %v1560_v57, %v1560_v57  ;;  %v1464_v37 = vpack.c.bf16 %v1432_v11, %v1432_v11  ;;  %vm1272_vm10 = vcmp.le.s32.totalorder %v922_v35, 14  ;;  %v5169_v19 = vpop.f32.mrf.mxu1 }
 0x145   : > { %v727_v56 = vmax.f32 %v590_v8, 0.0  ;;  %v929_v8 = vand.u32 15, %v761_v31  ;;  %6563 = vst [vmem:[#allocation38_spill] sm:$0xff] %v5169_v19  ;;  %v4065_v31 = vsel %vm1272_vm10, 1.0, %v6559_v53 }
 0x146   : > { %v1880_v13 = vunpack.c.l.b16 %v1592_v7 }
 0x147   : > { %v1368_v55 = vrot.slane %v727_v56, 7  ;;  %v1497_v34 = vrot.slane %v727_v56, 1  ;;  %v1626_v18 = vpack.c.bf16 %v727_v56, %v727_v56  ;;  %vm1177_vm11 = vcmp.ge.s32.totalorder %v929_v8, 1 }
 0x148   : > { %v5154_v47 = vpop.f32.mrf.mxu3  ;;  %v5156_v25 = vpack.c.b16 %v1880_v13, %v1879_v41  ;;  %v1689_v13 = vunpack.c.l.b16 %v1464_v37  ;;  %v4050_v37 = vsel %vm1177_vm11, 1.0, %v6559_v53 }
 0x149   : > { %v1786_v57 = vunpack.c.l.b16 %v1626_v18  ;;  %v1519_v0 = vsel %vm1508_vm2, %v1496_v5, %v1497_v34  ;;  %v1390_v42 = vsel %vm1379_vm1, %v1367_v29, %v1368_v55 }
 0x14a   : > { %6561 = vst [vmem:[#allocation36_spill] sm:$0xff] %v5156_v25  ;;  %v592_v59 = vpop.f32.mrf.mxu0  ;;  %v1465_v39 = vpack.c.bf16 %v1390_v42, %v1390_v42 }
 0x14b   : > { %v593_v56 = vadd.f32 %v592_v59, %v4832_v23  ;;  %v5163_v7 = vpack.c.b16 %v1786_v57, %v1785_v1  ;;  %v4425_v1 = vld [vmem:[#allocation2 + $0x38] sm:$0xff] }
 0x14c   : > { %v1690_v41 = vunpack.c.l.b16 %v1465_v39  ;;  %v1593_v39 = vpack.c.bf16 %v1519_v0, %v1519_v0  ;;  %2577 = vmatpush.bf16.msrb.mxu1 %v4425_v1  ;;  %v5184_v54 = vpop.f32.mrf.mxu1 }
 0x14d   : > { %6562 = vst [vmem:[#allocation37_spill] sm:$0xff] %v5163_v7  ;;  %v728_v36 = vmax.f32 %v593_v56, 0.0  ;;  %2313 = vmatmul.bf16.gmra.mxu3 %v5163_v7  ;;  %2367 = vmatmul.bf16.gmra.mxu0 %v4968_v44 }
 0x14e   : > { %v5167_v18 = vpack.c.b16 %v1690_v41, %v1689_v13  ;;  %v762_v13 = vadd.s32 184, %v4842_v30  ;;  %v1881_v9 = vunpack.c.l.b16 %v1593_v39  ;;  %6564 = vst [vmem:[#allocation39_spill] sm:$0xff] %v5184_v54  ;;  %v4448_v54 = vld [vmem:[#allocation2 + $0xf0] sm:$0xff] }
 0x14f   : > { %v1369_v5 = vrot.slane %v728_v36, 7  ;;  %v1498_v29 = vrot.slane %v728_v36, 1  ;;  %v1627_v19 = vpack.c.bf16 %v728_v36, %v728_v36 }
 0x150   : > { %v5172_v11 = vpop.f32.mrf.mxu3  ;;  %2578 = vmatpush.bf16.msrb.mxu1 %v4424_v45  ;;  %v936_v1 = vand.u32 15, %v762_v13 }
 0x151   : > { %v1518_v35 = vsel %vm1508_vm2, %v1497_v34, %v1498_v29  ;;  %v1389_v57 = vsel %vm1379_vm1, %v1368_v55, %v1369_v5  ;;  %v763_v55 = vadd.s32 192, %v4842_v30 }
 0x152   : > { %v594_v42 = vpop.f32.mrf.mxu0  ;;  %v1562_v59 = vmul.f32 %v4065_v31, %v1518_v35  ;;  %v1434_v41 = vmul.f32 %v4050_v37, %v1389_v57  ;;  %v1787_v37 = vunpack.c.l.b16 %v1627_v19  ;;  %v4423_v57 = vld [vmem:[#allocation2 + $0x28] sm:$0xff]  ;;  %vm1274_vm12 = vcmp.le.s32.totalorder %v936_v1, 14  ;;  %v4449_v1 = vld [vmem:[#allocation2 + $0xf8] sm:$0xff] }
 0x153   : > { %v595_v8 = vadd.f32 %v594_v42, %v4832_v23  ;;  %2166 = vmatpush.bf16.msra.mxu2 %v4449_v1 }
 0x154   : > { %v1594_v56 = vpack.c.bf16 %v1562_v59, %v1562_v59  ;;  %v1466_v35 = vpack.c.bf16 %v1434_v41, %v1434_v41  ;;  %2579 = vmatpush.bf16.msrb.mxu1 %v4423_v57  ;;  %v5201_v41 = vpop.f32.mrf.mxu1 }
 0x155   : > { %v729_v34 = vmax.f32 %v595_v8, 0.0  ;;  %6567 = vst [vmem:[#allocation42_spill] sm:$0xff] %v5201_v41 }
 0x156   : > { %v1882_v7 = vunpack.c.l.b16 %v1594_v56  ;;  %v943_v56 = vand.u32 15, %v763_v55  ;;  %v4066_v55 = vsel %vm1274_vm12, 1.0, %v6559_v53 }
 0x157   : > { %v1370_v21 = vrot.slane %v729_v34, 7  ;;  %v1499_v22 = vrot.slane %v729_v34, 1  ;;  %v1628_v24 = vpack.c.bf16 %v729_v34, %v729_v34  ;;  %2167 = vmatpush.bf16.msra.mxu2 %v4448_v54 }
 0x158   : > { %v5186_v0 = vpop.f32.mrf.mxu3  ;;  %v5188_v31 = vpack.c.b16 %v1882_v7, %v1881_v9  ;;  %v1691_v9 = vunpack.c.l.b16 %v1466_v35  ;;  %vm1179_vm13 = vcmp.ge.s32.totalorder %v943_v56, 1  ;;  %v4421_v35 = vld [vmem:[#allocation2 + $0x18] sm:$0xff] }
 0x159   : > { %v1788_v36 = vunpack.c.l.b16 %v1628_v24  ;;  %v1517_v42 = vsel %vm1508_vm2, %v1498_v29, %v1499_v22  ;;  %v1388_v59 = vsel %vm1379_vm1, %v1369_v5, %v1370_v21  ;;  %v4422_v24 = vld [vmem:[#allocation2 + $0x20] sm:$0xff]  ;;  %v4051_v57 = vsel %vm1179_vm13, 1.0, %v6559_v53 }
 0x15a   : > { %6565 = vst [vmem:[#allocation40_spill] sm:$0xff] %v5188_v31  ;;  %v597_v39 = vpop.f32.mrf.mxu0  ;;  %v1467_v8 = vpack.c.bf16 %v1388_v59, %v1388_v59  ;;  %2580 = vmatpush.bf16.msrb.mxu1 %v4422_v24  ;;  %v1595_v56 = vpack.c.bf16 %v1517_v42, %v1517_v42  ;;  %v765_v42 = vadd.s32 208, %v4842_v30 }
 0x15b   : > { %v598_v45 = vadd.f32 %v597_v39, %v4832_v23  ;;  %v5195_v34 = vpack.c.b16 %v1788_v36, %v1787_v37 }
 0x15c   : > { %v1692_v7 = vunpack.c.l.b16 %v1467_v8  ;;  %v1883_v20 = vunpack.c.l.b16 %v1595_v56  ;;  %v5215_v58 = vpop.f32.mrf.mxu1 }
 0x15d   : > { %6566 = vst [vmem:[#allocation41_spill] sm:$0xff] %v5195_v34  ;;  %v730_v19 = vmax.f32 %v598_v45, 0.0  ;;  %2318 = vmatmul.bf16.gmra.mxu3 %v5195_v34  ;;  %2372 = vmatmul.bf16.gmra.mxu0 %v5000_v46  ;;  %v4420_v34 = vld [vmem:[#allocation2 + $0x10] sm:$0xff] }
 0x15e   : > { %v5199_v29 = vpack.c.b16 %v1692_v7, %v1691_v9  ;;  %2581 = vmatpush.bf16.msrb.mxu1 %v4421_v35  ;;  %v764_v7 = vadd.s32 200, %v4842_v30  ;;  %6568 = vst [vmem:[#allocation43_spill] sm:$0xff] %v5215_v58  ;;  %v4444_v58 = vld [vmem:[#allocation2 + $0xd0] sm:$0xff] }
 0x15f   : > { %v1371_v5 = vrot.slane %v730_v19, 7  ;;  %v1500_v13 = vrot.slane %v730_v19, 1 }
 0x160   : > { %v5204_v37 = vpop.f32.mrf.mxu3  ;;  %v950_v35 = vand.u32 15, %v764_v7 }
 0x161   : > { %v1516_v36 = vsel %vm1508_vm2, %v1499_v22, %v1500_v13  ;;  %v1387_v59 = vsel %vm1379_vm1, %v1370_v21, %v1371_v5  ;;  %v1629_v22 = vpack.c.bf16 %v730_v19, %v730_v19 }
 0x162   : > { %v599_v39 = vpop.f32.mrf.mxu0  ;;  %v1564_v8 = vmul.f32 %v4066_v55, %v1516_v36  ;;  %v1436_v24 = vmul.f32 %v4051_v57, %v1387_v59  ;;  %2582 = vmatpush.bf16.msrb.mxu1 %v4420_v34  ;;  %v4447_v59 = vld [vmem:[#allocation2 + $0xe8] sm:$0xff]  ;;  %vm1276_vm0 = vcmp.le.s32.totalorder %v950_v35, 14 }
 0x163   : > { %v600_v45 = vadd.f32 %v599_v39, %v4832_v23  ;;  %v1789_v36 = vunpack.c.l.b16 %v1629_v22  ;;  %v4419_v39 = vld [vmem:[#allocation2 + $0x8] sm:$0xff]  ;;  %2168 = vmatpush.bf16.msra.mxu2 %v4447_v59  ;;  %v4445_v59 = vld [vmem:[#allocation2 + $0xd8] sm:$0xff] }
 0x164   : > { %v1596_v9 = vpack.c.bf16 %v1564_v8, %v1564_v8  ;;  %v1468_v19 = vpack.c.bf16 %v1436_v24, %v1436_v24 }
 0x165   : > { %v731_v41 = vmax.f32 %v600_v45, 0.0 }
 0x166   : > { %v1884_v21 = vunpack.c.l.b16 %v1596_v9  ;;  %2583 = vmatpush.bf16.msrb.mxu1 %v4419_v39  ;;  %v4441_v9 = vld [vmem:[#allocation2 + $0xb8] sm:$0xff] }
 0x167   : > { %v1372_v2 = vrot.slane %v731_v41, 7  ;;  %v1501_v60 = vrot.slane %v731_v41, 1  ;;  %v1630_v62 = vpack.c.bf16 %v731_v41, %v731_v41  ;;  %2755 = vmatpush.bf16.msrb.mxu3 %v4441_v9 }
 0x168   : > { %v5218_v55 = vpop.f32.mrf.mxu3  ;;  %v5220_v1 = vpack.c.b16 %v1884_v21, %v1883_v20  ;;  %v957_v20 = vand.u32 15, %v765_v42  ;;  %v4067_v42 = vsel %vm1276_vm0, 1.0, %v6559_v53 }
 0x169   : > { %v1790_v57 = vunpack.c.l.b16 %v1630_v62  ;;  %v1515_v8 = vsel %vm1508_vm2, %v1500_v13, %v1501_v60  ;;  %v1386_v41 = vsel %vm1379_vm1, %v1371_v5, %v1372_v2  ;;  %v1693_v62 = vunpack.c.l.b16 %v1468_v19  ;;  %v4446_v13 = vld [vmem:[#allocation2 + $0xe0] sm:$0xff]  ;;  %v4440_v19 = vld [vmem:[#allocation2 + $0xb0] sm:$0xff] }
 0x16a   : > { %6569 = vst [vmem:[#allocation44_spill] sm:$0xff] %v5220_v1  ;;  %v602_v54 = vpop.f32.mrf.mxu0  ;;  %v1469_v34 = vpack.c.bf16 %v1386_v41, %v1386_v41  ;;  %v4418_v5 = vld [vmem:[#allocation2] sm:$0xff]  ;;  %2169 = vmatpush.bf16.msra.mxu2 %v4446_v13  ;;  %vm1181_vm14 = vcmp.ge.s32.totalorder %v957_v20, 1 }
 0x16b   : > { %v603_v56 = vadd.f32 %v602_v54, %v4832_v23  ;;  %v5227_v45 = vpack.c.b16 %v1790_v57, %v1789_v36  ;;  %v5233_v57 = vpop.f32.mrf.mxu1  ;;  %2584 = vmatpush.bf16.msrb.mxu1 %v4418_v5  ;;  %v6503_v54 = vmov 0   ;;  %2756 = vmatpush.bf16.msrb.mxu3 %v4440_v19  ;;  %v4052_v9 = vsel %vm1181_vm14, 1.0, %v6559_v53 }
 0x16c   : > { %v1694_v7 = vunpack.c.l.b16 %v1469_v34  ;;  %6571 = vst [vmem:[#allocation46_spill] sm:$0xff] %v5233_v57  ;;  %v766_v5 = vadd.s32 216, %v4842_v30 }
 0x16d   : > { %6570 = vst [vmem:[#allocation45_spill] sm:$0xff] %v5227_v45  ;;  %v732_v24 = vmax.f32 %v603_v56, 0.0  ;;  %2323 = vmatmul.bf16.gmra.mxu3 %v5227_v45  ;;  %2377 = vmatmul.bf16.gmra.mxu0 %v5032_v40  ;;  %v1597_v56 = vpack.c.bf16 %v1515_v8, %v1515_v8  ;;  %v767_v8 = vadd.s32 224, %v4842_v30 }
 0x16e   : > { %v5231_v22 = vpack.c.b16 %v1694_v7, %v1693_v62  ;;  %2585 = vmatmul.bf16.vlgmr.msrb.gmra.mxu1 %v6503_v54  ;;  %2170 = vmatpush.bf16.msra.mxu2 %v4445_v59  ;;  %v4439_v7 = vld [vmem:[#allocation2 + $0xa8] sm:$0xff] }
 0x16f   : > { %v1373_v21 = vrot.slane %v732_v24, 7  ;;  %v1502_v36 = vrot.slane %v732_v24, 1  ;;  %2757 = vmatpush.bf16.msrb.mxu3 %v4439_v7  ;;  %v1885_v19 = vunpack.c.l.b16 %v1597_v56 }
 0x170   : > { %v5236_v35 = vpop.f32.mrf.mxu3 }
 0x171   : > { %6572 = vst [vmem:[#allocation47_spill] sm:$0xff] %v5236_v35  ;;  %v1514_v39 = vsel %vm1508_vm2, %v1501_v60, %v1502_v36  ;;  %v1385_v62 = vsel %vm1379_vm1, %v1372_v2, %v1373_v21  ;;  %v1631_v60 = vpack.c.bf16 %v732_v24, %v732_v24  ;;  %v964_v24 = vand.u32 15, %v766_v5  ;;  %v4437_v5 = vld [vmem:[#allocation2 + $0x98] sm:$0xff] }
 0x172   : > { %v604_v41 = vpop.f32.mrf.mxu0  ;;  %v1566_v34 = vmul.f32 %v4067_v42, %v1514_v39  ;;  %v1438_v45 = vmul.f32 %v4052_v9, %v1385_v62  ;;  %2171 = vmatpush.bf16.msra.mxu2 %v4444_v58  ;;  %v4443_v9 = vld [vmem:[#allocation2 + $0xc8] sm:$0xff] }
 0x173   : > { %v605_v20 = vadd.f32 %v604_v41, %v4832_v23  ;;  %v5247_v2 = vpop.f32.mrf.mxu1  ;;  %v4438_v41 = vld [vmem:[#allocation2 + $0xa0] sm:$0xff]  ;;  %vm1278_vm15 = vcmp.le.s32.totalorder %v964_v24, 14 }
 0x174   : > { %v1598_v13 = vpack.c.bf16 %v1566_v34, %v1566_v34  ;;  %6573 = vst [vmem:[#allocation48_spill] sm:$0xff] %v5247_v2  ;;  %v1470_v62 = vpack.c.bf16 %v1438_v45, %v1438_v45  ;;  %2758 = vmatpush.bf16.msrb.mxu3 %v4438_v41  ;;  %v4442_v45 = vld [vmem:[#allocation2 + $0xc0] sm:$0xff] }
 0x175   : > { %v733_v57 = vmax.f32 %v605_v20, 0.0  ;;  %v1791_v20 = vunpack.c.l.b16 %v1631_v60 }
 0x176   : > { %v1886_v42 = vunpack.c.l.b16 %v1598_v13  ;;  %v971_v13 = vand.u32 15, %v767_v8  ;;  %2172 = vmatpush.bf16.msra.mxu2 %v4443_v9 }
 0x177   : > { %v1374_v39 = vrot.slane %v733_v57, 7  ;;  %v1503_v54 = vrot.slane %v733_v57, 1  ;;  %v1632_v48 = vpack.c.bf16 %v733_v57, %v733_v57 }
 0x178   : > { %v5249_v59 = vpop.f32.mrf.mxu3  ;;  %v5251_v34 = vpack.c.b16 %v1886_v42, %v1885_v19  ;;  %2759 = vmatpush.bf16.msrb.mxu3 %v4437_v5  ;;  %vm1183_vm3 = vcmp.ge.s32.totalorder %v971_v13, 1  ;;  %v4433_v13 = vld [vmem:[#allocation2 + $0x78] sm:$0xff] }
 0x179   : > { %6574 = vst [vmem:[#allocation49_spill] sm:$0xff] %v5249_v59  ;;  %v1792_v10 = vunpack.c.l.b16 %v1632_v48  ;;  %v1513_v56 = vsel %vm1508_vm2, %v1502_v36, %v1503_v54  ;;  %v1384_v57 = vsel %vm1379_vm1, %v1373_v21, %v1374_v39  ;;  %v1695_v36 = vunpack.c.l.b16 %v1470_v62 }
 0x17a   : > { %6575 = vst [vmem:[#allocation50_spill] sm:$0xff] %v5251_v34  ;;  %v607_v7 = vpop.f32.mrf.mxu0  ;;  %v1471_v19 = vpack.c.bf16 %v1384_v57, %v1384_v57  ;;  %2173 = vmatpush.bf16.msra.mxu2 %v4442_v45  ;;  %v4053_v62 = vsel %vm1183_vm3, 1.0, %v6559_v53  ;;  %v1599_v5 = vpack.c.bf16 %v1513_v56, %v1513_v56  ;;  %v4434_v56 = vld [vmem:[#allocation2 + $0x80] sm:$0xff] }
 0x17b   : > { %v608_v58 = vadd.f32 %v607_v7, %v4832_v23  ;;  %v5258_v2 = vpack.c.b16 %v1792_v10, %v1791_v20  ;;  %v5262_v8 = vpop.f32.mrf.mxu1  ;;  %v4068_v10 = vsel %vm1278_vm15, 1.0, %v6559_v53  ;;  %v4436_v20 = vld [vmem:[#allocation2 + $0x90] sm:$0xff] }
 0x17c   : > { %v1696_v60 = vunpack.c.l.b16 %v1471_v19  ;;  %6577 = vst [vmem:[#allocation52_spill] sm:$0xff] %v5262_v8  ;;  %2760 = vmatpush.bf16.msrb.mxu3 %v4436_v20  ;;  %v1887_v27 = vunpack.c.l.b16 %v1599_v5 }
 0x17d   : > { %6576 = vst [vmem:[#allocation51_spill] sm:$0xff] %v5258_v2  ;;  %v734_v48 = vmax.f32 %v608_v58, 0.0  ;;  %2328 = vmatmul.bf16.gmra.mxu3 %v5258_v2  ;;  %2382 = vmatmul.bf16.gmra.mxu0 %v5064_v14  ;;  %v4435_v58 = vld [vmem:[#allocation2 + $0x88] sm:$0xff] }
 0x17e   : > { %v5265_v41 = vpack.c.b16 %v1696_v60, %v1695_v36  ;;  %2666 = vmatpush.bf16.msrb.mxu2 %v4433_v13  ;;  %v768_v60 = vadd.s32 232, %v4842_v30 }
 0x17f   : > { %v1375_v21 = vrot.slane %v734_v48, 7  ;;  %v1504_v42 = vrot.slane %v734_v48, 1  ;;  %v1633_v2 = vpack.c.bf16 %v734_v48, %v734_v48 }
 0x180   : > { %6578 = vst [vmem:[#allocation53_spill] sm:$0xff] %v5265_v41  ;;  %v5267_v24 = vpop.f32.mrf.mxu3  ;;  %2761 = vmatpush.bf16.msrb.mxu3 %v4435_v58 }
 0x181   : > { %6579 = vst [vmem:[#allocation54_spill] sm:$0xff] %v5267_v24  ;;  %v1512_v9 = vsel %vm1508_vm2, %v1503_v54, %v1504_v42  ;;  %v1383_v7 = vsel %vm1379_vm1, %v1374_v39, %v1375_v21  ;;  %v769_v39 = vadd.s32 240, %v4842_v30  ;;  %v1793_v13 = vunpack.c.l.b16 %v1633_v2 }
 0x182   : > { %v609_v57 = vpop.f32.mrf.mxu0  ;;  %v1568_v19 = vmul.f32 %v4068_v10, %v1512_v9  ;;  %v1440_v8 = vmul.f32 %v4053_v62, %v1383_v7  ;;  %v978_v9 = vand.u32 15, %v768_v60  ;;  %v770_v2 = vadd.s32 248, %v4842_v30 }
 0x183   : > { %v610_v45 = vadd.f32 %v609_v57, %v4832_v23  ;;  %v5281_v62 = vpop.f32.mrf.mxu1 }
 0x184   : > { %v1600_v36 = vpack.c.bf16 %v1568_v19, %v1568_v19  ;;  %v1472_v57 = vpack.c.bf16 %v1440_v8, %v1440_v8  ;;  %6582 = vst [vmem:[#allocation57_spill] sm:$0xff] %v5281_v62  ;;  %2762 = vmatpush.bf16.msrb.mxu3 %v4434_v56  ;;  %vm1280_vm4 = vcmp.le.s32.totalorder %v978_v9, 14  ;;  %v992_v9 = vand.u32 15, %v770_v2 }
 0x185   : > { %v735_v54 = vmax.f32 %v610_v45, 0.0  ;;  %v985_v45 = vand.u32 15, %v769_v39  ;;  %v775_v39 = vand.u32 15, %v4842_v30 }
 0x186   : > { %v1888_v24 = vunpack.c.l.b16 %v1600_v36  ;;  %v1697_v8 = vunpack.c.l.b16 %v1472_v57  ;;  %vm1282_vm7 = vcmp.le.s32.totalorder %v992_v9, 14 }
 0x187   : > { %v1376_v41 = vrot.slane %v735_v54, 7  ;;  %v1505_v59 = vrot.slane %v735_v54, 1  ;;  %v1634_v20 = vpack.c.bf16 %v735_v54, %v735_v54  ;;  %vm1185_vm5 = vcmp.ge.s32.totalorder %v985_v45, 1 }
 0x188   : > { %v5277_v35 = vpop.f32.mrf.mxu3  ;;  %v5279_v10 = vpack.c.b16 %v1888_v24, %v1887_v27  ;;  %vm1155_vm6 = vcmp.ge.s32.totalorder %v775_v39, 1 }
 0x189   : > { %6580 = vst [vmem:[#allocation55_spill] sm:$0xff] %v5277_v35  ;;  %v1794_v19 = vunpack.c.l.b16 %v1634_v20  ;;  %v1511_v48 = vsel %vm1508_vm2, %v1504_v42, %v1505_v59  ;;  %v1382_v7 = vsel %vm1379_vm1, %v1375_v21, %v1376_v41  ;;  %v4069_v20 = vsel %vm1280_vm4, 1.0, %v6559_v53 }
 0x18a   : > { %6581 = vst [vmem:[#allocation56_spill] sm:$0xff] %v5279_v10  ;;  %v612_v58 = vpop.f32.mrf.mxu0  ;;  %v1473_v5 = vpack.c.bf16 %v1382_v7, %v1382_v7 }
 0x18b   : > { %v613_v36 = vadd.f32 %v612_v58, %v4832_v23  ;;  %v5288_v27 = vpack.c.b16 %v1794_v19, %v1793_v13  ;;  %v4054_v13 = vsel %vm1185_vm5, 1.0, %v6559_v53 }
 0x18c   : > { %v1698_v24 = vunpack.c.l.b16 %v1473_v5  ;;  %v1601_v5 = vpack.c.bf16 %v1511_v48, %v1511_v48 }
 0x18d   : > { %6583 = vst [vmem:[#allocation58_spill] sm:$0xff] %v5288_v27  ;;  %v736_v60 = vmax.f32 %v613_v36, 0.0  ;;  %2333 = vmatmul.bf16.gmra.mxu3 %v5288_v27  ;;  %2387 = vmatmul.bf16.gmra.mxu0 %v5092_v63  ;;  %v5305_v36 = vpop.f32.mrf.mxu1 }
 0x18e   : > { %v5293_v42 = vpack.c.b16 %v1698_v24, %v1697_v8  ;;  %6586 = vst [vmem:[#allocation61_spill] sm:$0xff] %v5305_v36  ;;  %v1889_v27 = vunpack.c.l.b16 %v1601_v5 }
 0x18f   : > { %v1377_v21 = vrot.slane %v736_v60, 7  ;;  %v1506_v54 = vrot.slane %v736_v60, 1  ;;  %v1635_v8 = vpack.c.bf16 %v736_v60, %v736_v60 }
 0x190   : > { %6584 = vst [vmem:[#allocation59_spill] sm:$0xff] %v5293_v42  ;;  %v5297_v56 = vpop.f32.mrf.mxu3 }
 0x191   : > { %6585 = vst [vmem:[#allocation60_spill] sm:$0xff] %v5297_v56  ;;  %v1510_v57 = vsel %vm1508_vm2, %v1505_v59, %v1506_v54  ;;  %v1381_v19 = vsel %vm1379_vm1, %v1376_v41, %v1377_v21  ;;  %v4039_v59 = vsel %vm1155_vm6, 1.0, %v6559_v53  ;;  %v1795_v48 = vunpack.c.l.b16 %v1635_v8 }
 0x192   : > { %v614_v7 = vpop.f32.mrf.mxu0  ;;  %v1570_v58 = vmul.f32 %v4069_v20, %v1510_v57  ;;  %v1442_v2 = vmul.f32 %v4054_v13, %v1381_v19  ;;  %v4070_v20 = vsel %vm1282_vm7, 1.0, %v6559_v53  ;;  %v6588_v13 = vrot.slane %v4840_v28, 7 }
 0x193   : > { %v615_v45 = vadd.f32 %v614_v7, %v4832_v23  ;;  %v1445_v23 = vpack.c.bf16 %v4859_v43, %v4859_v43  ;;  %v6589_v53 = vrot.slane %v4840_v28, 1 }
 0x194   : > { %v1602_v24 = vpack.c.bf16 %v1570_v58, %v1570_v58  ;;  %v1474_v60 = vpack.c.bf16 %v1442_v2, %v1442_v2 }
 0x195   : > { %v737_v62 = vmax.f32 %v615_v45, 0.0  ;;  %v5333_v28 = vpop.f32.mrf.mxu1 }
 0x196   : > { %v1890_v56 = vunpack.c.l.b16 %v1602_v24  ;;  %6591 = vst [vmem:[#allocation64_spill] sm:$0xff] %v5333_v28  ;;  %v4470_v28 = vld [vmem:[#allocation2 + $0x1a0] sm:$0xff] }
 0x197   : > { %v1378_v42 = vrot.slane %v737_v62, 7  ;;  %v1507_v35 = vrot.slane %v737_v62, 1  ;;  %v1636_v41 = vpack.c.bf16 %v737_v62, %v737_v62 }
 0x198   : > { %v5311_v39 = vpack.c.b16 %v1890_v56, %v1889_v27  ;;  %v5313_v57 = vpop.f32.mrf.mxu3 }
 0x199   : > { %v1796_v9 = vunpack.c.l.b16 %v1636_v41  ;;  %v1411_v19 = vsel %vm1379_vm1, %v1378_v42, %v6588_v13  ;;  %v1509_v62 = vsel %vm1508_vm2, %v1506_v54, %v1507_v35  ;;  %v1540_v7 = vsel %vm1508_vm2, %v1507_v35, %v6589_v53 }
 0x19a   : > { %6587 = vst [vmem:[#allocation62_spill] sm:$0xff] %v5311_v39  ;;  %v5325_v43 = vpop.f32.mrf.mxu0  ;;  %v1412_v27 = vmul.f32 %v4039_v59, %v1411_v19  ;;  %v1572_v56 = vmul.f32 %v4070_v20, %v1540_v7  ;;  %v1603_v58 = vpack.c.bf16 %v1509_v62, %v1509_v62  ;;  %v1380_v5 = vsel %vm1379_vm1, %v1377_v21, %v1378_v42 }
 0x19b   : > { %v5329_v45 = vpack.c.b16 %v1796_v9, %v1795_v48  ;;  %v1475_v8 = vpack.c.bf16 %v1380_v5, %v1380_v5  ;;  %v1699_v35 = vunpack.c.l.b16 %v1474_v60  ;;  %v1670_v59 = vunpack.c.l.b16 %v1445_v23  ;;  %v4432_v48 = vld [vmem:[#allocation2 + $0x70] sm:$0xff] }
 0x19c   : > { %v1444_v24 = vpack.c.bf16 %v1412_v27, %v1412_v27  ;;  %v1604_v2 = vpack.c.bf16 %v1572_v56, %v1572_v56  ;;  %v1891_v20 = vunpack.c.l.b16 %v1603_v58  ;;  %2667 = vmatpush.bf16.msrb.mxu2 %v4432_v48  ;;  %v6594_v53 = vmov 0   ;;  %v4473_v48 = vld [vmem:[#allocation2 + $0x1b8] sm:$0xff] }
 0x19d   : > { %6590 = vst [vmem:[#allocation63_spill] sm:$0xff] %v5329_v45  ;;  %2338 = vmatmul.bf16.gmra.mxu3 %v5329_v45  ;;  %2392 = vmatmul.bf16.gmra.mxu0 %v5124_v16  ;;  %v1700_v54 = vunpack.c.l.b16 %v1475_v8  ;;  %v5343_v62 = vpop.f32.mrf.mxu1  ;;  %vm3664_vm1 = vcmask 1043456  }
 0x19e   : > { %v1669_v41 = vunpack.c.l.b16 %v1444_v24  ;;  %v1892_v13 = vunpack.c.l.b16 %v1604_v2  ;;  %6593 = vst [vmem:[#allocation66_spill] sm:$0xff] %v5343_v62  ;;  %v4431_v2 = vld [vmem:[#allocation2 + $0x68] sm:$0xff]  ;;  %3037 = vmatpush.bf16.msra.mxu0 %v4473_v48 }
 0x19f   : > { %v5335_v19 = vpack.c.b16 %v1700_v54, %v1699_v35 }
 0x1a0   : > { %v1701_v30 = vpack.c.b16 %v1670_v59, %v1669_v41  ;;  %v5337_v42 = vpack.c.b16 %v1892_v13, %v1891_v20  ;;  %v5341_v9 = vpop.f32.mrf.mxu3  ;;  %2668 = vmatpush.bf16.msrb.mxu2 %v4431_v2 }
 0x1a2   : > { %6592 = vst [vmem:[#allocation65_spill] sm:$0xff] %v5337_v42  ;;  %2174 = vmatmul.bf16.vlgmr.msra.gmra.mxu2 %v1701_v30  ;;  %v5339_v21 = vpop.f32.mrf.mxu0  ;;  %2590 = vmatmul.bf16.gmra.mxu1 %v1701_v30 }
 0x1a5   : > { %v5351_v7 = vpop.f32.mrf.mxu1 }
 0x1a6   : > { %6595 = vst [vmem:[#allocation67_spill] sm:$0xff] %v5351_v7 }
 0x1a8   : > { %v5347_v23 = vpop.f32.mrf.mxu3 }
 0x1aa   : > { %v5345_v60 = vpop.f32.mrf.mxu0 }
 0x1ad   : > { %2397 = vmatmul.bf16.gmra.mxu0 %v5156_v25  ;;  %2763 = vmatmul.bf16.vlgmr.msrb.gmra.mxu3 %v6594_v53  ;;  %v5361_v5 = vpop.f32.mrf.mxu1 }
 0x1ae   : > { %6596 = vst [vmem:[#allocation68_spill] sm:$0xff] %v5361_v5  ;;  %v4430_v5 = vld [vmem:[#allocation2 + $0x60] sm:$0xff] }
 0x1af   : > { %2669 = vmatpush.bf16.msrb.mxu2 %v4430_v5 }
 0x1b0   : > { %v5357_v56 = vpop.f32.mrf.mxu3 }
 0x1b2   : > { %2179 = vmatmul.bf16.gmra.mxu2 %v4899_v33  ;;  %v5354_v27 = vpop.f32.mrf.mxu0  ;;  %2595 = vmatmul.bf16.gmra.mxu1 %v4899_v33 }
 0x1b5   : > { %v5371_v35 = vpop.f32.mrf.mxu1 }
 0x1b6   : > { %6598 = vst [vmem:[#allocation70_spill] sm:$0xff] %v5371_v35 }
 0x1b8   : > { %v5365_v8 = vpop.f32.mrf.mxu3 }
 0x1b9   : > { %6597 = vst [vmem:[#allocation69_spill] sm:$0xff] %v5365_v8 }
 0x1ba   : > { %v5359_v58 = vpop.f32.mrf.mxu0 }
 0x1bd   : > { %2402 = vmatmul.bf16.gmra.mxu0 %v5188_v31  ;;  %2768 = vmatmul.bf16.gmra.mxu3 %v4884_v12  ;;  %v5379_v12 = vpop.f32.mrf.mxu1 }
 0x1be   : > { %6600 = vst [vmem:[#allocation72_spill] sm:$0xff] %v5379_v12  ;;  %v4472_v12 = vld [vmem:[#allocation2 + $0x1b0] sm:$0xff] }
 0x1bf   : > { %3038 = vmatpush.bf16.msra.mxu0 %v4472_v12  ;;  %v4467_v12 = vld [vmem:[#allocation2 + $0x188] sm:$0xff] }
 0x1c0   : > { %v5375_v41 = vpop.f32.mrf.mxu3 }
 0x1c1   : > { %6599 = vst [vmem:[#allocation71_spill] sm:$0xff] %v5375_v41 }
 0x1c2   : > { %2184 = vmatmul.bf16.gmra.mxu2 %v4927_v15  ;;  %v5368_v24 = vpop.f32.mrf.mxu0  ;;  %2600 = vmatmul.bf16.gmra.mxu1 %v4927_v15 }
 0x1c5   : > { %v5387_v13 = vpop.f32.mrf.mxu1 }
 0x1c6   : > { %6602 = vst [vmem:[#allocation74_spill] sm:$0xff] %v5387_v13  ;;  %v4471_v13 = vld [vmem:[#allocation2 + $0x1a8] sm:$0xff] }
 0x1c7   : > { %3039 = vmatpush.bf16.msra.mxu0 %v4471_v13 }
 0x1c8   : > { %v5385_v20 = vpop.f32.mrf.mxu3 }
 0x1c9   : > { %6601 = vst [vmem:[#allocation73_spill] sm:$0xff] %v5385_v20 }
 0x1ca   : > { %v5373_v54 = vpop.f32.mrf.mxu0 }
 0x1cb   : > { %3040 = vmatpush.bf16.msra.mxu0 %v4470_v28 }
 0x1cd   : > { %2407 = vmatmul.bf16.gmra.mxu0 %v5220_v1  ;;  %2773 = vmatmul.bf16.gmra.mxu3 %v4912_v61  ;;  %v5399_v7 = vpop.f32.mrf.mxu1  ;;  %v4468_v61 = vld [vmem:[#allocation2 + $0x190] sm:$0xff] }
 0x1ce   : > { %6604 = vst [vmem:[#allocation76_spill] sm:$0xff] %v5399_v7  ;;  %v4466_v7 = vld [vmem:[#allocation2 + $0x180] sm:$0xff] }
 0x1d0   : > { %v5393_v2 = vpop.f32.mrf.mxu3 }
 0x1d1   : > { %6603 = vst [vmem:[#allocation75_spill] sm:$0xff] %v5393_v2 }
 0x1d2   : > { %2189 = vmatmul.bf16.gmra.mxu2 %v4955_v4  ;;  %v5382_v59 = vpop.f32.mrf.mxu0  ;;  %2605 = vmatmul.bf16.gmra.mxu1 %v4955_v4 }
 0x1d5   : > { %v5407_v48 = vpop.f32.mrf.mxu1 }
 0x1d6   : > { %6606 = vst [vmem:[#allocation78_spill] sm:$0xff] %v5407_v48 }
 0x1d8   : > { %v5401_v62 = vpop.f32.mrf.mxu3 }
 0x1d9   : > { %6605 = vst [vmem:[#allocation77_spill] sm:$0xff] %v5401_v62 }
 0x1da   : > { %v5389_v30 = vpop.f32.mrf.mxu0 }
 0x1dd   : > { %2412 = vmatmul.bf16.gmra.mxu0 %v5251_v34  ;;  %2778 = vmatmul.bf16.gmra.mxu3 %v4940_v50  ;;  %v4469_v50 = vld [vmem:[#allocation2 + $0x198] sm:$0xff]  ;;  %v5415_v28 = vpop.f32.mrf.mxu1 }
 0x1de   : > { %3041 = vmatpush.bf16.msra.mxu0 %v4469_v50  ;;  %6608 = vst [vmem:[#allocation80_spill] sm:$0xff] %v5415_v28 }
 0x1e0   : > { %v5411_v5 = vpop.f32.mrf.mxu3 }
 0x1e1   : > { %6607 = vst [vmem:[#allocation79_spill] sm:$0xff] %v5411_v5 }
 0x1e2   : > { %2194 = vmatmul.bf16.gmra.mxu2 %v4983_v3  ;;  %v5396_v35 = vpop.f32.mrf.mxu0  ;;  %2610 = vmatmul.bf16.gmra.mxu1 %v4983_v3 }
 0x1e3   : > { %3042 = vmatpush.bf16.msra.mxu0 %v4468_v61  ;;  %v4429_v61 = vld [vmem:[#allocation2 + $0x58] sm:$0xff] }
 0x1e4   : > { %2670 = vmatpush.bf16.msrb.mxu2 %v4429_v61 }
 0x1e5   : > { %v5423_v48 = vpop.f32.mrf.mxu1 }
 0x1e6   : > { %6610 = vst [vmem:[#allocation82_spill] sm:$0xff] %v5423_v48 }
 0x1e7   : > { %3043 = vmatpush.bf16.msra.mxu0 %v4467_v12 }
 0x1ea   : > { %v5403_v36 = vpop.f32.mrf.mxu0 }
 0x1eb   : > { %3044 = vmatpush.bf16.msra.mxu0 %v4466_v7 }
 0x1ed   : > { %2417 = vmatmul.bf16.gmra.mxu0 %v5279_v10  ;;  %2783 = vmatmul.bf16.gmra.mxu3 %v4968_v44  ;;  %v5417_v44 = vpop.f32.mrf.mxu3  ;;  %v2586_v7 = vpop.f32.mrf.mxu1 }
 0x1ee   : > { %6609 = vst [vmem:[#allocation81_spill] sm:$0xff] %v5417_v44 }
 0x1f2   : > { %2199 = vmatmul.bf16.gmra.mxu2 %v5015_v6  ;;  %2615 = vmatmul.bf16.gmra.mxu1 %v5015_v6  ;;  %v5413_v13 = vpop.f32.mrf.mxu0 }
 0x1f5   : > { %v5427_v28 = vpop.f32.mrf.mxu3  ;;  %v2588_v48 = vpop.f32.mrf.mxu1 }
 0x1f6   : > { %6611 = vst [vmem:[#allocation83_spill] sm:$0xff] %v5427_v28 }
 0x1fa   : > { %v5421_v50 = vpop.f32.mrf.mxu0 }
 0x1fd   : > { %2422 = vmatmul.bf16.gmra.mxu0 %v5311_v39  ;;  %2788 = vmatmul.bf16.gmra.mxu3 %v5000_v46  ;;  %v5433_v46 = vpop.f32.mrf.mxu3 }
 0x1fe   : > { %6612 = vst [vmem:[#allocation84_spill] sm:$0xff] %v5433_v46 }
 0x202   : > { %2204 = vmatmul.bf16.gmra.mxu2 %v5047_v17  ;;  %2620 = vmatmul.bf16.gmra.mxu1 %v5047_v17  ;;  %v5429_v12 = vpop.f32.mrf.mxu0 }
 0x205   : > { %v5439_v44 = vpop.f32.mrf.mxu3 }
 0x206   : > { %6613 = vst [vmem:[#allocation85_spill] sm:$0xff] %v5439_v44 }
 0x20a   : > { %v5435_v45 = vpop.f32.mrf.mxu0 }
 0x20d   : > { %2427 = vmatmul.bf16.gmra.mxu0 %v5337_v42  ;;  %2793 = vmatmul.bf16.gmra.mxu3 %v5032_v40  ;;  %v4428_v40 = vld [vmem:[#allocation2 + $0x50] sm:$0xff]  ;;  %v5447_v46 = vpop.f32.mrf.mxu3 }
 0x20e   : > { %2671 = vmatpush.bf16.msrb.mxu2 %v4428_v40  ;;  %6614 = vst [vmem:[#allocation86_spill] sm:$0xff] %v5447_v46 }
 0x212   : > { %2209 = vmatmul.bf16.gmra.mxu2 %v5075_v51  ;;  %2625 = vmatmul.bf16.gmra.mxu1 %v5075_v51  ;;  %v5441_v61 = vpop.f32.mrf.mxu0 }
 0x215   : > { %v5458_v40 = vpop.f32.mrf.mxu3 }
 0x21a   : > { %v5449_v5 = vpop.f32.mrf.mxu0 }
 0x21d   : > { %2798 = vmatmul.bf16.gmra.mxu3 %v5064_v14  ;;  %3045 = vmatmul.bf16.vlgmr.msra.gmra.mxu0 %v4899_v33 }
 0x21f   : > { %v2591_v42 = vpop.f32.mrf.mxu1 }
 0x222   : > { %2214 = vmatmul.bf16.gmra.mxu2 %v5103_v26  ;;  %2630 = vmatmul.bf16.gmra.mxu1 %v5103_v26  ;;  %v5460_v41 = vpop.f32.mrf.mxu0 }
 0x225   : > { %v2175_v28 = vpop.f32.mrf.mxu2 }
 0x226   : > { %v2265_v44 = vadd.f32 %v5108_v38, %v2175_v28 }
 0x227   : > { %v2593_v62 = vpop.f32.mrf.mxu1 }
 0x228   : > { %v2354_v2 = vadd.f32 %v5325_v43, %v2265_v44 }
 0x22a   : > { %v5453_v14 = vadd.f32 %v2586_v7, %v2354_v2  ;;  %v5471_v28 = vpop.f32.mrf.mxu0 }
 0x22d   : > { %v2177_v33 = vpop.f32.mrf.mxu2  ;;  %2803 = vmatmul.bf16.gmra.mxu3 %v5092_v63  ;;  %3050 = vmatmul.bf16.gmra.mxu0 %v4927_v15 }
 0x22e   : > { %v2267_v20 = vadd.f32 %v5122_v52, %v2177_v33  ;;  %v5469_v52 = vpop.f32.mrf.mxu3 }
 0x22f   : > { %v2596_v46 = vpop.f32.mrf.mxu1 }
 0x230   : > { %v2356_v8 = vadd.f32 %v5339_v21, %v2267_v20 }
 0x232   : > { %2219 = vmatmul.bf16.gmra.mxu2 %v5135_v49  ;;  %2635 = vmatmul.bf16.gmra.mxu1 %v5135_v49  ;;  %v5465_v44 = vadd.f32 %v2588_v48, %v2356_v8 }
 0x235   : > { %v2180_v38 = vpop.f32.mrf.mxu2 }
 0x236   : > { %v2270_v43 = vadd.f32 %v5140_v32, %v2180_v38  ;;  %v4427_v32 = vld [vmem:[#allocation2 + $0x48] sm:$0xff]  ;;  %v5483_v48 = vpop.f32.mrf.mxu3 }
 0x237   : > { %v2598_v2 = vpop.f32.mrf.mxu1  ;;  %2672 = vmatpush.bf16.msrb.mxu2 %v4427_v32 }
 0x238   : > { %v2359_v15 = vadd.f32 %v5345_v60, %v2270_v43 }
 0x23a   : > { %v5473_v7 = vadd.f32 %v2591_v42, %v2359_v15  ;;  %v5485_v42 = vpop.f32.mrf.mxu0 }
 0x23d   : > { %v2182_v33 = vpop.f32.mrf.mxu2  ;;  %2808 = vmatmul.bf16.gmra.mxu3 %v5124_v16  ;;  %3055 = vmatmul.bf16.gmra.mxu0 %v4955_v4 }
 0x23e   : > { %v2272_v21 = vadd.f32 %v5154_v47, %v2182_v33 }
 0x23f   : > { %v2601_v8 = vpop.f32.mrf.mxu1 }
 0x240   : > { %v2361_v20 = vadd.f32 %v5354_v27, %v2272_v21  ;;  %v5491_v27 = vpop.f32.mrf.mxu3 }
 0x242   : > { %2224 = vmatmul.bf16.gmra.mxu2 %v5167_v18  ;;  %2640 = vmatmul.bf16.gmra.mxu1 %v5167_v18  ;;  %v5481_v60 = vadd.f32 %v2593_v62, %v2361_v20  ;;  %v5495_v62 = vpop.f32.mrf.mxu0 }
 0x245   : > { %v2185_v38 = vpop.f32.mrf.mxu2 }
 0x246   : > { %v2275_v4 = vadd.f32 %v5172_v11, %v2185_v38 }
 0x247   : > { %v2603_v43 = vpop.f32.mrf.mxu1 }
 0x248   : > { %v2364_v47 = vadd.f32 %v5359_v58, %v2275_v4  ;;  %v5504_v4 = vpop.f32.mrf.mxu3 }
 0x249   : > { %6615 = vst [vmem:[#allocation87_spill] sm:$0xff] %v5504_v4 }
 0x24a   : > { %v5489_v15 = vadd.f32 %v2596_v46, %v2364_v47  ;;  %v4481_v46 = vld [vmem:[#allocation2 + $0x1f8] sm:$0xff]  ;;  %v4480_v47 = vld [vmem:[#allocation2 + $0x1f0] sm:$0xff] }
 0x24b   : > { %3126 = vmatpush.bf16.msra.mxu1 %v4481_v46 }
 0x24d   : > { %v2187_v33 = vpop.f32.mrf.mxu2  ;;  %2813 = vmatmul.bf16.gmra.mxu3 %v5156_v25  ;;  %3060 = vmatmul.bf16.gmra.mxu0 %v4983_v3  ;;  %v5506_v25 = vpop.f32.mrf.mxu0 }
 0x24e   : > { %v2277_v21 = vadd.f32 %v5186_v0, %v2187_v33 }
 0x24f   : > { %v2606_v20 = vpop.f32.mrf.mxu1  ;;  %3127 = vmatpush.bf16.msra.mxu1 %v4480_v47 }
 0x250   : > { %v2366_v32 = vadd.f32 %v5368_v24, %v2277_v21  ;;  %v4479_v24 = vld [vmem:[#allocation2 + $0x1e8] sm:$0xff] }
 0x252   : > { %2229 = vmatmul.bf16.gmra.mxu2 %v5199_v29  ;;  %2645 = vmatmul.bf16.gmra.mxu1 %v5199_v29  ;;  %v5501_v11 = vadd.f32 %v2598_v2, %v2366_v32  ;;  %v4478_v32 = vld [vmem:[#allocation2 + $0x1e0] sm:$0xff] }
 0x253   : > { %3128 = vmatpush.bf16.msra.mxu1 %v4479_v24 }
 0x255   : > { %v2190_v58 = vpop.f32.mrf.mxu2  ;;  %v5517_v4 = vpop.f32.mrf.mxu0 }
 0x256   : > { %v2280_v38 = vadd.f32 %v5204_v37, %v2190_v58  ;;  %v5515_v58 = vpop.f32.mrf.mxu3 }
 0x257   : > { %v2608_v3 = vpop.f32.mrf.mxu1  ;;  %6616 = vst [vmem:[#allocation88_spill] sm:$0xff] %v5515_v58  ;;  %3129 = vmatpush.bf16.msra.mxu1 %v4478_v32  ;;  %v6618_v32 = vld [vmem:[#allocation49_spill] sm:$0xff] }
 0x258   : > { %v2369_v0 = vadd.f32 %v5373_v54, %v2280_v38  ;;  %v4426_v54 = vld [vmem:[#allocation2 + $0x40] sm:$0xff]  ;;  %v6617_v38 = vld [vmem:[#allocation47_spill] sm:$0xff] }
 0x259   : > { %2673 = vmatpush.bf16.msrb.mxu2 %v4426_v54 }
 0x25a   : > { %v5509_v33 = vadd.f32 %v2601_v8, %v2369_v0 }
 0x25d   : > { %v2192_v21 = vpop.f32.mrf.mxu2  ;;  %2818 = vmatmul.bf16.gmra.mxu3 %v5188_v31  ;;  %3065 = vmatmul.bf16.gmra.mxu0 %v5015_v6  ;;  %v4477_v6 = vld [vmem:[#allocation2 + $0x1d8] sm:$0xff]  ;;  %v4475_v31 = vld [vmem:[#allocation2 + $0x1c8] sm:$0xff]  ;;  %v5529_v58 = vpop.f32.mrf.mxu0 }
 0x25e   : > { %v2282_v2 = vadd.f32 %v5218_v55, %v2192_v21  ;;  %3130 = vmatpush.bf16.msra.mxu1 %v4477_v6  ;;  %v4474_v6 = vld [vmem:[#allocation2 + $0x1c0] sm:$0xff] }
 0x25f   : > { %v2611_v37 = vpop.f32.mrf.mxu1 }
 0x260   : > { %v2371_v46 = vadd.f32 %v5382_v59, %v2282_v2  ;;  %v4476_v59 = vld [vmem:[#allocation2 + $0x1d0] sm:$0xff]  ;;  %v5527_v2 = vpop.f32.mrf.mxu3 }
 0x262   : > { %2234 = vmatmul.bf16.gmra.mxu2 %v5231_v22  ;;  %2650 = vmatmul.bf16.gmra.mxu1 %v5231_v22  ;;  %v5521_v8 = vadd.f32 %v2603_v43, %v2371_v46 }
 0x263   : > { %3131 = vmatpush.bf16.msra.mxu1 %v4476_v59 }
 0x265   : > { %v2195_v55 = vpop.f32.mrf.mxu2  ;;  %v5541_v59 = vpop.f32.mrf.mxu0 }
 0x266   : > { %v2285_v47 = vadd.f32 %v6617_v38, %v2195_v55 }
 0x267   : > { %v2613_v0 = vpop.f32.mrf.mxu1  ;;  %3132 = vmatpush.bf16.msra.mxu1 %v4475_v31 }
 0x268   : > { %v2374_v24 = vadd.f32 %v5389_v30, %v2285_v47  ;;  %v5539_v38 = vpop.f32.mrf.mxu3 }
 0x269   : > { %6620 = vst [vmem:[#allocation47_spill] sm:$0xff] %v5539_v38 }
 0x26a   : > { %v5525_v21 = vadd.f32 %v2606_v20, %v2374_v24  ;;  %v6619_v20 = vld [vmem:[#allocation53_spill] sm:$0xff] }
 0x26b   : > { %3133 = vmatpush.bf16.msra.mxu1 %v4474_v6 }
 0x26d   : > { %v2197_v43 = vpop.f32.mrf.mxu2  ;;  %2823 = vmatmul.bf16.gmra.mxu3 %v5220_v1  ;;  %3070 = vmatmul.bf16.gmra.mxu0 %v5047_v17  ;;  %v6621_v17 = vld [vmem:[#allocation54_spill] sm:$0xff]  ;;  %v5552_v1 = vpop.f32.mrf.mxu0 }
 0x26e   : > { %v2287_v46 = vadd.f32 %v6618_v32, %v2197_v43 }
 0x26f   : > { %v2616_v54 = vpop.f32.mrf.mxu1 }
 0x270   : > { %v2376_v30 = vadd.f32 %v5396_v35, %v2287_v46  ;;  %v5550_v6 = vpop.f32.mrf.mxu3 }
 0x271   : > { %6623 = vst [vmem:[#allocation49_spill] sm:$0xff] %v5550_v6 }
 0x272   : > { %2239 = vmatmul.bf16.gmra.mxu2 %v6619_v20  ;;  %2655 = vmatmul.bf16.gmra.mxu1 %v6619_v20  ;;  %v5537_v55 = vadd.f32 %v2608_v3, %v2376_v30  ;;  %v6622_v3 = vld [vmem:[#allocation55_spill] sm:$0xff] }
 0x275   : > { %v2200_v47 = vpop.f32.mrf.mxu2 }
 0x276   : > { %v2290_v24 = vadd.f32 %v6621_v17, %v2200_v47  ;;  %v6624_v47 = vld [vmem:[#allocation59_spill] sm:$0xff] }
 0x277   : > { %v2618_v43 = vpop.f32.mrf.mxu1 }
 0x278   : > { %v2379_v31 = vadd.f32 %v5403_v36, %v2290_v24  ;;  %v4489_v36 = vld [vmem:[#allocation2 + $0x238] sm:$0xff]  ;;  %v6625_v24 = vld [vmem:[#allocation60_spill] sm:$0xff] }
 0x279   : > { %3215 = vmatpush.bf16.msra.mxu2 %v4489_v36  ;;  %v6627_v36 = vld [vmem:[#allocation9_spill] sm:$0xff] }
 0x27a   : > { %v5545_v32 = vadd.f32 %v2611_v37, %v2379_v31 }
 0x27d   : > { %v2202_v35 = vpop.f32.mrf.mxu2  ;;  %2828 = vmatmul.bf16.gmra.mxu3 %v5251_v34  ;;  %3075 = vmatmul.bf16.gmra.mxu0 %v5075_v51  ;;  %v5563_v34 = vpop.f32.mrf.mxu0 }
 0x27e   : > { %v2292_v46 = vadd.f32 %v6622_v3, %v2202_v35  ;;  %v5561_v3 = vpop.f32.mrf.mxu3 }
 0x27f   : > { %v2621_v30 = vpop.f32.mrf.mxu1  ;;  %6626 = vst [vmem:[#allocation53_spill] sm:$0xff] %v5561_v3 }
 0x280   : > { %v2381_v38 = vadd.f32 %v5413_v13, %v2292_v46 }
 0x282   : > { %2244 = vmatmul.bf16.gmra.mxu2 %v6624_v47  ;;  %2660 = vmatmul.bf16.gmra.mxu1 %v6624_v47  ;;  %v5557_v37 = vadd.f32 %v2613_v0, %v2381_v38 }
 0x285   : > { %v2205_v17 = vpop.f32.mrf.mxu2 }
 0x286   : > { %v2295_v51 = vadd.f32 %v6625_v24, %v2205_v17  ;;  %v5575_v17 = vpop.f32.mrf.mxu3 }
 0x287   : > { %v2623_v31 = vpop.f32.mrf.mxu1  ;;  %6628 = vst [vmem:[#allocation54_spill] sm:$0xff] %v5575_v17 }
 0x288   : > { %v2384_v35 = vadd.f32 %v5421_v50, %v2295_v51 }
 0x28a   : > { %v5565_v6 = vadd.f32 %v2616_v54, %v2384_v35  ;;  %v5577_v54 = vpop.f32.mrf.mxu0 }
 0x28d   : > { %v2207_v13 = vpop.f32.mrf.mxu2  ;;  %2833 = vmatmul.bf16.gmra.mxu3 %v5279_v10  ;;  %3080 = vmatmul.bf16.gmra.mxu0 %v5103_v26 }
 0x28e   : > { %v2297_v0 = vadd.f32 %v5313_v57, %v2207_v13  ;;  %v5583_v13 = vpop.f32.mrf.mxu3 }
 0x28f   : > { %v2626_v38 = vpop.f32.mrf.mxu1  ;;  %6629 = vst [vmem:[#allocation55_spill] sm:$0xff] %v5583_v13 }
 0x290   : > { %v2386_v46 = vadd.f32 %v5429_v12, %v2297_v0 }
 0x292   : > { %2249 = vmatmul.bf16.gmra.mxu2 %v5335_v19  ;;  %3134 = vmatmul.bf16.vlgmr.msra.gmra.mxu1 %v6627_v36  ;;  %v5573_v50 = vadd.f32 %v2618_v43, %v2386_v46  ;;  %v5587_v43 = vpop.f32.mrf.mxu0 }
 0x295   : > { %v2210_v24 = vpop.f32.mrf.mxu2 }
 0x296   : > { %v2300_v51 = vadd.f32 %v5341_v9, %v2210_v24  ;;  %v6630_v9 = vld [vmem:[#allocation11_spill] sm:$0xff] }
 0x297   : > { %v2628_v35 = vpop.f32.mrf.mxu1 }
 0x298   : > { %v2389_v26 = vadd.f32 %v5435_v45, %v2300_v51  ;;  %v4488_v45 = vld [vmem:[#allocation2 + $0x230] sm:$0xff] }
 0x299   : > { %3216 = vmatpush.bf16.msra.mxu2 %v4488_v45  ;;  %v6633_v45 = vld [vmem:[#allocation13_spill] sm:$0xff] }
 0x29a   : > { %v5581_v57 = vadd.f32 %v2621_v30, %v2389_v26  ;;  %v5596_v26 = vpop.f32.mrf.mxu0 }
 0x29d   : > { %v2212_v12 = vpop.f32.mrf.mxu2  ;;  %2838 = vmatmul.bf16.gmra.mxu3 %v5311_v39  ;;  %3085 = vmatmul.bf16.gmra.mxu0 %v5135_v49 }
 0x29e   : > { %v2302_v0 = vadd.f32 %v5347_v23, %v2212_v12 }
 0x29f   : > { %v2631_v46 = vpop.f32.mrf.mxu1 }
 0x2a0   : > { %v2391_v10 = vadd.f32 %v5441_v61, %v2302_v0  ;;  %v6631_v61 = vld [vmem:[#allocation69_spill] sm:$0xff] }
 0x2a2   : > { %2674 = vmatmul.bf16.vlgmr.msrb.gmra.mxu2 %v6594_v53  ;;  %3139 = vmatmul.bf16.gmra.mxu1 %v6630_v9  ;;  %v5593_v30 = vadd.f32 %v2623_v31, %v2391_v10  ;;  %v5604_v10 = vpop.f32.mrf.mxu0  ;;  %v6632_v31 = vld [vmem:[#allocation8_spill] sm:$0xff] }
 0x2a5   : > { %v2215_v24 = vpop.f32.mrf.mxu2 }
 0x2a6   : > { %v2305_v51 = vadd.f32 %v5357_v56, %v2215_v24 }
 0x2a7   : > { %v2633_v39 = vpop.f32.mrf.mxu1 }
 0x2a8   : > { %v2394_v49 = vadd.f32 %v5449_v5, %v2305_v51  ;;  %v6634_v51 = vld [vmem:[#allocation71_spill] sm:$0xff] }
 0x2aa   : > { %v5599_v23 = vadd.f32 %v2626_v38, %v2394_v49 }
 0x2ad   : > { %v2217_v12 = vpop.f32.mrf.mxu2  ;;  %3090 = vmatmul.bf16.gmra.mxu0 %v5167_v18  ;;  %v5614_v18 = vpop.f32.mrf.mxu0 }
 0x2ae   : > { %v2307_v0 = vadd.f32 %v6631_v61, %v2217_v12  ;;  %v6635_v61 = vld [vmem:[#allocation73_spill] sm:$0xff] }
 0x2af   : > { %v2636_v24 = vpop.f32.mrf.mxu1 }
 0x2b0   : > { %v2396_v13 = vadd.f32 %v5460_v41, %v2307_v0 }
 0x2b2   : > { %2679 = vmatmul.bf16.gmra.mxu2 %v6632_v31  ;;  %3144 = vmatmul.bf16.gmra.mxu1 %v6633_v45  ;;  %v5608_v56 = vadd.f32 %v2628_v35, %v2396_v13  ;;  %v6636_v35 = vld [vmem:[#allocation15_spill] sm:$0xff]  ;;  %v4487_v13 = vld [vmem:[#allocation2 + $0x228] sm:$0xff] }
 0x2b3   : > { %3217 = vmatpush.bf16.msra.mxu2 %v4487_v13 }
 0x2b5   : > { %v2220_v5 = vpop.f32.mrf.mxu2 }
 0x2b6   : > { %v2310_v38 = vadd.f32 %v6634_v51, %v2220_v5  ;;  %v6637_v51 = vld [vmem:[#allocation75_spill] sm:$0xff] }
 0x2b7   : > { %v2638_v12 = vpop.f32.mrf.mxu1 }
 0x2b8   : > { %v2399_v49 = vadd.f32 %v5471_v28, %v2310_v38 }
 0x2ba   : > { %v5612_v17 = vadd.f32 %v2631_v46, %v2399_v49  ;;  %v5623_v46 = vpop.f32.mrf.mxu0 }
 0x2bd   : > { %v2222_v41 = vpop.f32.mrf.mxu2  ;;  %3095 = vmatmul.bf16.gmra.mxu0 %v5199_v29 }
 0x2be   : > { %v2312_v0 = vadd.f32 %v6635_v61, %v2222_v41 }
 0x2bf   : > { %v2641_v49 = vpop.f32.mrf.mxu1 }
 0x2c0   : > { %v2401_v31 = vadd.f32 %v5485_v42, %v2312_v0  ;;  %v6638_v42 = vld [vmem:[#allocation77_spill] sm:$0xff] }
 0x2c2   : > { %2684 = vmatmul.bf16.gmra.mxu2 %v6627_v36  ;;  %3149 = vmatmul.bf16.gmra.mxu1 %v6636_v35  ;;  %v5621_v5 = vadd.f32 %v2633_v39, %v2401_v31  ;;  %v5631_v61 = vpop.f32.mrf.mxu0  ;;  %v6639_v31 = vld [vmem:[#allocation19_spill] sm:$0xff] }
 0x2c5   : > { %v2225_v28 = vpop.f32.mrf.mxu2 }
 0x2c6   : > { %v2315_v38 = vadd.f32 %v6637_v51, %v2225_v28 }
 0x2c7   : > { %v2643_v0 = vpop.f32.mrf.mxu1 }
 0x2c8   : > { %v2404_v29 = vadd.f32 %v5495_v62, %v2315_v38  ;;  %v6640_v62 = vld [vmem:[#allocation79_spill] sm:$0xff] }
 0x2ca   : > { %v5627_v3 = vadd.f32 %v2636_v24, %v2404_v29  ;;  %v5640_v38 = vpop.f32.mrf.mxu0 }
 0x2cd   : > { %v2227_v41 = vpop.f32.mrf.mxu2  ;;  %3100 = vmatmul.bf16.gmra.mxu0 %v5231_v22 }
 0x2ce   : > { %v2317_v36 = vadd.f32 %v6638_v42, %v2227_v41 }
 0x2cf   : > { %v2646_v29 = vpop.f32.mrf.mxu1 }
 0x2d0   : > { %v2406_v39 = vadd.f32 %v5506_v25, %v2317_v36  ;;  %v6641_v25 = vld [vmem:[#allocation81_spill] sm:$0xff]  ;;  %v4486_v36 = vld [vmem:[#allocation2 + $0x220] sm:$0xff] }
 0x2d1   : > { %3218 = vmatpush.bf16.msra.mxu2 %v4486_v36 }
 0x2d2   : > { %2689 = vmatmul.bf16.gmra.mxu2 %v6630_v9  ;;  %3154 = vmatmul.bf16.gmra.mxu1 %v6639_v31  ;;  %v5636_v13 = vadd.f32 %v2638_v12, %v2406_v39  ;;  %v6642_v12 = vld [vmem:[#allocation23_spill] sm:$0xff] }
 0x2d5   : > { %v2230_v28 = vpop.f32.mrf.mxu2 }
 0x2d6   : > { %v2320_v24 = vadd.f32 %v6640_v62, %v2230_v28  ;;  %v6643_v62 = vld [vmem:[#allocation83_spill] sm:$0xff] }
 0x2d8   : > { %v2409_v51 = vadd.f32 %v5517_v4, %v2320_v24  ;;  %v5651_v4 = vpop.f32.mrf.mxu0 }
 0x2da   : > { %v5642_v22 = vadd.f32 %v2641_v49, %v2409_v51  ;;  %v2648_v49 = vpop.f32.mrf.mxu1 }
 0x2dd   : > { %v2232_v41 = vpop.f32.mrf.mxu2  ;;  %3105 = vmatmul.bf16.gmra.mxu0 %v6619_v20 }
 0x2de   : > { %v2322_v42 = vadd.f32 %v6641_v25, %v2232_v41 }
 0x2e0   : > { %v2411_v9 = vadd.f32 %v5529_v58, %v2322_v42  ;;  %v5658_v58 = vpop.f32.mrf.mxu0 }
 0x2e2   : > { %2694 = vmatmul.bf16.gmra.mxu2 %v6633_v45  ;;  %3159 = vmatmul.bf16.gmra.mxu1 %v6642_v12  ;;  %v5649_v39 = vadd.f32 %v2643_v0, %v2411_v9  ;;  %v6644_v45 = vld [vmem:[#allocation84_spill] sm:$0xff]  ;;  %v2651_v0 = vpop.f32.mrf.mxu1  ;;  %v6645_v9 = vld [vmem:[#allocation27_spill] sm:$0xff] }
 0x2e5   : > { %v2235_v28 = vpop.f32.mrf.mxu2 }
 0x2e6   : > { %v2325_v24 = vadd.f32 %v6643_v62, %v2235_v28 }
 0x2e8   : > { %v2414_v20 = vadd.f32 %v5541_v59, %v2325_v24  ;;  %v6646_v59 = vld [vmem:[#allocation85_spill] sm:$0xff]  ;;  %v5667_v62 = vpop.f32.mrf.mxu0 }
 0x2ea   : > { %v5655_v51 = vadd.f32 %v2646_v29, %v2414_v20  ;;  %v2653_v24 = vpop.f32.mrf.mxu1 }
 0x2ed   : > { %v2237_v41 = vpop.f32.mrf.mxu2  ;;  %3110 = vmatmul.bf16.gmra.mxu0 %v6624_v47 }
 0x2ee   : > { %v2327_v25 = vadd.f32 %v6644_v45, %v2237_v41 }
 0x2f0   : > { %v2416_v42 = vadd.f32 %v5552_v1, %v2327_v25  ;;  %v6647_v1 = vld [vmem:[#allocation86_spill] sm:$0xff]  ;;  %v5675_v25 = vpop.f32.mrf.mxu0 }
 0x2f2   : > { %2699 = vmatmul.bf16.gmra.mxu2 %v6636_v35  ;;  %3164 = vmatmul.bf16.gmra.mxu1 %v6645_v9  ;;  %v5664_v36 = vadd.f32 %v2648_v49, %v2416_v42  ;;  %v6648_v49 = vld [vmem:[#allocation30_spill] sm:$0xff]  ;;  %v4485_v42 = vld [vmem:[#allocation2 + $0x218] sm:$0xff] }
 0x2f3   : > { %3219 = vmatpush.bf16.msra.mxu2 %v4485_v42 }
 0x2f5   : > { %v2240_v28 = vpop.f32.mrf.mxu2 }
 0x2f6   : > { %v2330_v29 = vadd.f32 %v6646_v59, %v2240_v28 }
 0x2f8   : > { %v2419_v47 = vadd.f32 %v5563_v34, %v2330_v29  ;;  %v2656_v34 = vpop.f32.mrf.mxu1 }
 0x2fa   : > { %v5670_v20 = vadd.f32 %v2651_v0, %v2419_v47  ;;  %v5685_v47 = vpop.f32.mrf.mxu0 }
 0x2fd   : > { %v2242_v41 = vpop.f32.mrf.mxu2  ;;  %3115 = vmatmul.bf16.gmra.mxu0 %v5335_v19 }
 0x2fe   : > { %v2332_v45 = vadd.f32 %v6647_v1, %v2242_v41  ;;  %v6649_v1 = vld [vmem:[#allocation33_spill] sm:$0xff] }
 0x300   : > { %v2421_v35 = vadd.f32 %v5577_v54, %v2332_v45  ;;  %v2658_v54 = vpop.f32.mrf.mxu1 }
 0x302   : > { %2704 = vmatmul.bf16.gmra.mxu2 %v6639_v31  ;;  %3169 = vmatmul.bf16.gmra.mxu1 %v6648_v49  ;;  %v5679_v28 = vadd.f32 %v2653_v24, %v2421_v35 }
 0x305   : > { %v2245_v0 = vpop.f32.mrf.mxu2 }
 0x306   : > { %v2335_v59 = vadd.f32 %v5458_v40, %v2245_v0 }
 0x308   : > { %v2424_v19 = vadd.f32 %v5587_v43, %v2335_v59  ;;  %v2661_v35 = vpop.f32.mrf.mxu1 }
 0x30a   : > { %v5683_v29 = vadd.f32 %v2656_v34, %v2424_v19  ;;  %v4497_v34 = vld [vmem:[%s6474_s5 + $0x38] sm:$0xff]  ;;  %v6650_v19 = vld [vmem:[#allocation37_spill] sm:$0xff] }
 0x30b   : > { %3488 = vmatpush.bf16.msra.mxu3 %v4497_v34 }
 0x30d   : > { %v2247_v41 = vpop.f32.mrf.mxu2  ;;  %3120 = vmatmul.bf16.gmra.mxu0 %v6594_v53 }
 0x30e   : > { %v2337_v31 = vadd.f32 %v5469_v52, %v2247_v41 }
 0x310   : > { %v2426_v24 = vadd.f32 %v5596_v26, %v2337_v31  ;;  %v2663_v59 = vpop.f32.mrf.mxu1 }
 0x312   : > { %2709 = vmatmul.bf16.gmra.mxu2 %v6642_v12  ;;  %3174 = vmatmul.bf16.gmra.mxu1 %v6649_v1  ;;  %v5692_v45 = vadd.f32 %v2658_v54, %v2426_v24 }
 0x315   : > { %v2250_v40 = vpop.f32.mrf.mxu2 }
 0x316   : > { %v2340_v43 = vadd.f32 %v5483_v48, %v2250_v40  ;;  %v4484_v48 = vld [vmem:[#allocation2 + $0x210] sm:$0xff] }
 0x317   : > { %3220 = vmatpush.bf16.msra.mxu2 %v4484_v48  ;;  %v4496_v40 = vld [vmem:[%s6474_s5 + $0x30] sm:$0xff]  ;;  %v4495_v48 = vld [vmem:[%s6474_s5 + $0x28] sm:$0xff] }
 0x318   : > { %v2429_v42 = vadd.f32 %v5604_v10, %v2340_v43  ;;  %3489 = vmatpush.bf16.msra.mxu3 %v4496_v40  ;;  %v5721_v43 = vpop.f32.mrf.mxu1 }
 0x31a   : > { %v5699_v52 = vadd.f32 %v2661_v35, %v2429_v42 }
 0x31c   : > { %3490 = vmatpush.bf16.msra.mxu3 %v4495_v48 }
 0x31d   : > { %v2252_v26 = vpop.f32.mrf.mxu2 }
 0x31e   : > { %v2342_v12 = vadd.f32 %v5491_v27, %v2252_v26  ;;  %v6651_v27 = vld [vmem:[#allocation41_spill] sm:$0xff] }
 0x320   : > { %v2431_v0 = vadd.f32 %v5614_v18, %v2342_v12 }
 0x322   : > { %2714 = vmatmul.bf16.gmra.mxu2 %v6645_v9  ;;  %3179 = vmatmul.bf16.gmra.mxu1 %v6650_v19  ;;  %v5705_v54 = vadd.f32 %v2663_v59, %v2431_v0 }
 0x325   : > { %v2675_v10 = vpop.f32.mrf.mxu2 }
 0x326   : > { %v5708_v41 = vadd.f32 %v2675_v10, %v5453_v14 }
 0x32d   : > { %v2677_v31 = vpop.f32.mrf.mxu2 }
 0x32e   : > { %v5711_v24 = vadd.f32 %v2677_v31, %v5465_v44  ;;  %v6652_v44 = vld [vmem:[#allocation45_spill] sm:$0xff]  ;;  %v4482_v31 = vld [vmem:[#allocation2 + $0x200] sm:$0xff] }
 0x332   : > { %2719 = vmatmul.bf16.gmra.mxu2 %v6648_v49  ;;  %3184 = vmatmul.bf16.gmra.mxu1 %v6651_v27  ;;  %v4483_v49 = vld [vmem:[#allocation2 + $0x208] sm:$0xff] }
 0x333   : > { %3221 = vmatpush.bf16.msra.mxu2 %v4483_v49 }
 0x335   : > { %v2680_v18 = vpop.f32.mrf.mxu2 }
 0x336   : > { %v5716_v9 = vadd.f32 %v2680_v18, %v5473_v7  ;;  %v5728_v7 = vpop.f32.mrf.mxu1 }
 0x337   : > { %3222 = vmatpush.bf16.msra.mxu2 %v4482_v31 }
 0x33d   : > { %v2682_v14 = vpop.f32.mrf.mxu2 }
 0x33e   : > { %v5724_v35 = vadd.f32 %v2682_v14, %v5481_v60  ;;  %v5736_v0 = vpop.f32.mrf.mxu1  ;;  %v6653_v60 = vld [vmem:[#allocation51_spill] sm:$0xff] }
 0x342   : > { %2724 = vmatmul.bf16.gmra.mxu2 %v6649_v1  ;;  %3189 = vmatmul.bf16.gmra.mxu1 %v6652_v44 }
 0x345   : > { %v2685_v42 = vpop.f32.mrf.mxu2 }
 0x346   : > { %v5731_v34 = vadd.f32 %v2685_v42, %v5489_v15  ;;  %v5746_v15 = vpop.f32.mrf.mxu1 }
 0x34d   : > { %v2687_v26 = vpop.f32.mrf.mxu2 }
 0x34e   : > { %v5734_v12 = vadd.f32 %v2687_v26, %v5501_v11  ;;  %v5753_v18 = vpop.f32.mrf.mxu1 }
 0x352   : > { %2729 = vmatmul.bf16.gmra.mxu2 %v6650_v19  ;;  %3194 = vmatmul.bf16.gmra.mxu1 %v6653_v60  ;;  %v6654_v19 = vld [vmem:[#allocation58_spill] sm:$0xff] }
 0x355   : > { %v2690_v1 = vpop.f32.mrf.mxu2 }
 0x356   : > { %v5741_v59 = vadd.f32 %v2690_v1, %v5509_v33  ;;  %v5758_v49 = vpop.f32.mrf.mxu1 }
 0x35d   : > { %v2692_v10 = vpop.f32.mrf.mxu2 }
 0x35e   : > { %v5749_v11 = vadd.f32 %v2692_v10, %v5521_v8  ;;  %v6655_v8 = vld [vmem:[#allocation63_spill] sm:$0xff]  ;;  %v5768_v1 = vpop.f32.mrf.mxu1 }
 0x362   : > { %2734 = vmatmul.bf16.gmra.mxu2 %v6651_v27  ;;  %3199 = vmatmul.bf16.gmra.mxu1 %v6654_v19 }
 0x365   : > { %v2695_v33 = vpop.f32.mrf.mxu2 }
 0x366   : > { %v5756_v40 = vadd.f32 %v2695_v33, %v5525_v21  ;;  %v4494_v21 = vld [vmem:[%s6474_s5 + $0x20] sm:$0xff] }
 0x367   : > { %3491 = vmatpush.bf16.msra.mxu3 %v4494_v21 }
 0x36d   : > { %v2697_v14 = vpop.f32.mrf.mxu2 }
 0x36e   : > { %v5761_v42 = vadd.f32 %v2697_v14, %v5537_v55  ;;  %v5776_v55 = vpop.f32.mrf.mxu1 }
 0x372   : > { %2739 = vmatmul.bf16.gmra.mxu2 %v6652_v44  ;;  %3204 = vmatmul.bf16.gmra.mxu1 %v6655_v8 }
 0x375   : > { %v2700_v27 = vpop.f32.mrf.mxu2 }
 0x376   : > { %v5766_v26 = vadd.f32 %v2700_v27, %v5545_v32 }
 0x37d   : > { %v2702_v48 = vpop.f32.mrf.mxu2 }
 0x37e   : > { %v5774_v10 = vadd.f32 %v2702_v48, %v5557_v37 }
 0x382   : > { %2744 = vmatmul.bf16.gmra.mxu2 %v6653_v60  ;;  %3209 = vmatmul.bf16.gmra.mxu1 %v6594_v53  ;;  %v4493_v60 = vld [vmem:[%s6474_s5 + $0x18] sm:$0xff] }
 0x383   : > { %3492 = vmatpush.bf16.msra.mxu3 %v4493_v60 }
 0x385   : > { %v2705_v44 = vpop.f32.mrf.mxu2 }
 0x386   : > { %v5781_v32 = vadd.f32 %v2705_v44, %v5565_v6  ;;  %v6656_v6 = vld [vmem:[#allocation10_spill] sm:$0xff] }
 0x38d   : > { %v2707_v31 = vpop.f32.mrf.mxu2 }
 0x38e   : > { %v5784_v33 = vadd.f32 %v2707_v31, %v5573_v50 }
 0x392   : > { %2749 = vmatmul.bf16.gmra.mxu2 %v6654_v19 }
 0x395   : > { %v2710_v14 = vpop.f32.mrf.mxu2 }
 0x396   : > { %v5788_v37 = vadd.f32 %v2710_v14, %v5581_v57  ;;  %v6657_v57 = vld [vmem:[#allocation12_spill] sm:$0xff] }
 0x39d   : > { %v2712_v8 = vpop.f32.mrf.mxu2 }
 0x39e   : > { %v5794_v27 = vadd.f32 %v2712_v8, %v5593_v30  ;;  %v4492_v30 = vld [vmem:[%s6474_s5 + $0x10] sm:$0xff] }
 0x39f   : > { %3493 = vmatpush.bf16.msra.mxu3 %v4492_v30  ;;  %v4491_v30 = vld [vmem:[%s6474_s5 + $0x8] sm:$0xff] }
 0x3a2   : > { %3223 = vmatmul.bf16.vlgmr.msra.gmra.mxu2 %v6656_v6  ;;  %v5817_v6 = vpop.f32.mrf.mxu3 }
 0x3a3   : > { %3494 = vmatpush.bf16.msra.mxu3 %v4491_v30 }
 0x3a5   : > { %v2715_v21 = vpop.f32.mrf.mxu2 }
 0x3a6   : > { %v5798_v50 = vadd.f32 %v2715_v21, %v5599_v23  ;;  %v6658_v23 = vld [vmem:[#allocation14_spill] sm:$0xff] }
 0x3ad   : > { %v2717_v19 = vpop.f32.mrf.mxu2 }
 0x3ae   : > { %v5801_v48 = vadd.f32 %v2717_v19, %v5608_v56  ;;  %v6659_v19 = vld [vmem:[#allocation18_spill] sm:$0xff] }
 0x3b2   : > { %3228 = vmatmul.bf16.gmra.mxu2 %v6657_v57 }
 0x3b5   : > { %v2720_v44 = vpop.f32.mrf.mxu2 }
 0x3b6   : > { %v5805_v31 = vadd.f32 %v2720_v44, %v5612_v17 }
 0x3bd   : > { %v2722_v14 = vpop.f32.mrf.mxu2 }
 0x3be   : > { %v5811_v60 = vadd.f32 %v2722_v14, %v5621_v5  ;;  %v5826_v5 = vpop.f32.mrf.mxu3 }
 0x3c2   : > { %3233 = vmatmul.bf16.gmra.mxu2 %v6658_v23 }
 0x3c5   : > { %v2725_v8 = vpop.f32.mrf.mxu2 }
 0x3c6   : > { %v5815_v56 = vadd.f32 %v2725_v8, %v5627_v3  ;;  %v5834_v23 = vpop.f32.mrf.mxu3 }
 0x3cd   : > { %v2727_v21 = vpop.f32.mrf.mxu2 }
 0x3ce   : > { %v5820_v17 = vadd.f32 %v2727_v21, %v5636_v13  ;;  %v6662_v13 = vld [vmem:[#allocation22_spill] sm:$0xff] }
 0x3d2   : > { %3238 = vmatmul.bf16.gmra.mxu2 %v6659_v19 }
 0x3d5   : > { %v2730_v57 = vpop.f32.mrf.mxu2 }
 0x3d6   : > { %v5824_v44 = vadd.f32 %v2730_v57, %v5642_v22  ;;  %v5840_v22 = vpop.f32.mrf.mxu3 }
 0x3d8   : > { %6660 = vst [vmem:[#allocation59_spill] sm:$0xff] %v5824_v44  ;;  %v6665_v44 = vld [vmem:[#allocation26_spill] sm:$0xff] }
 0x3dd   : > { %v2732_v3 = vpop.f32.mrf.mxu2 }
 0x3de   : > { %v5832_v14 = vadd.f32 %v2732_v3, %v5649_v39  ;;  %v5846_v30 = vpop.f32.mrf.mxu3 }
 0x3e0   : > { %6661 = vst [vmem:[#allocation60_spill] sm:$0xff] %v5832_v14 }
 0x3e2   : > { %3243 = vmatmul.bf16.gmra.mxu2 %v6662_v13  ;;  %v4490_v13 = vld [vmem:[%s6474_s5] sm:$0xff] }
 0x3e3   : > { %3495 = vmatpush.bf16.msra.mxu3 %v4490_v13 }
 0x3e5   : > { %v2735_v8 = vpop.f32.mrf.mxu2 }
 0x3e6   : > { %v5838_v21 = vadd.f32 %v2735_v8, %v5655_v51 }
 0x3e8   : > { %6663 = vst [vmem:[#allocation9_spill] sm:$0xff] %v5838_v21  ;;  %v5857_v21 = vpop.f32.mrf.mxu3 }
 0x3ed   : > { %v2737_v19 = vpop.f32.mrf.mxu2 }
 0x3ee   : > { %v5843_v57 = vadd.f32 %v2737_v19, %v5664_v36 }
 0x3f0   : > { %6664 = vst [vmem:[#allocation11_spill] sm:$0xff] %v5843_v57  ;;  %v5863_v19 = vpop.f32.mrf.mxu3 }
 0x3f2   : > { %3248 = vmatmul.bf16.gmra.mxu2 %v6665_v44 }
 0x3f5   : > { %v2740_v39 = vpop.f32.mrf.mxu2 }
 0x3f6   : > { %v5849_v3 = vadd.f32 %v2740_v39, %v5670_v20 }
 0x3f8   : > { %6666 = vst [vmem:[#allocation69_spill] sm:$0xff] %v5849_v3  ;;  %v5869_v13 = vpop.f32.mrf.mxu3 }
 0x3fd   : > { %v2742_v51 = vpop.f32.mrf.mxu2 }
 0x3fe   : > { %v5855_v8 = vadd.f32 %v2742_v51, %v5679_v28 }
 0x400   : > { %6667 = vst [vmem:[#allocation8_spill] sm:$0xff] %v5855_v8  ;;  %v5874_v8 = vpop.f32.mrf.mxu3 }
 0x402   : > { %3253 = vmatmul.bf16.gmra.mxu2 %v5092_v63 }
 0x405   : > { %v2745_v36 = vpop.f32.mrf.mxu2 }
 0x406   : > { %v5861_v44 = vadd.f32 %v2745_v36, %v5683_v29  ;;  %v6672_v36 = vld [vmem:[#allocation36_spill] sm:$0xff] }
 0x408   : > { %6668 = vst [vmem:[#allocation13_spill] sm:$0xff] %v5861_v44  ;;  %v5884_v3 = vpop.f32.mrf.mxu3 }
 0x40d   : > { %v2747_v20 = vpop.f32.mrf.mxu2 }
 0x40e   : > { %v5866_v39 = vadd.f32 %v2747_v20, %v5692_v45  ;;  %v3136_v45 = vadd.f32 %v5721_v43, %v5623_v46 }
 0x410   : > { %6669 = vst [vmem:[#allocation71_spill] sm:$0xff] %v5866_v39 }
 0x412   : > { %3258 = vmatmul.bf16.gmra.mxu2 %v5124_v16  ;;  %v6673_v16 = vld [vmem:[#allocation87_spill] sm:$0xff] }
 0x413   : > { %v2765_v39 = vadd.f32 %v6673_v16, %v5708_v41 }
 0x415   : > { %v2750_v28 = vpop.f32.mrf.mxu2 }
 0x416   : > { %v5872_v51 = vadd.f32 %v2750_v28, %v5699_v52  ;;  %v3138_v28 = vadd.f32 %v5728_v7, %v5631_v61  ;;  %v5900_v61 = vpop.f32.mrf.mxu0  ;;  %v3141_v7 = vadd.f32 %v5736_v0, %v5640_v38  ;;  %v6676_v38 = vld [vmem:[#allocation47_spill] sm:$0xff] }
 0x417   : > { %v2772_v0 = vadd.f32 %v6676_v38, %v5724_v35 }
 0x418   : > { %6670 = vst [vmem:[#allocation73_spill] sm:$0xff] %v5872_v51  ;;  %v5904_v51 = vpop.f32.mrf.mxu1 }
 0x41d   : > { %v2752_v63 = vpop.f32.mrf.mxu2 }
 0x41e   : > { %v5877_v29 = vadd.f32 %v2752_v63, %v5705_v54  ;;  %v5891_v54 = vld [vmem:[%s6473_s4] ss:$0 sm:$0xff] }
 0x420   : > { %6671 = vst [vmem:[#allocation15_spill] sm:$0xff] %v5877_v29 }
 0x422   : > { %3263 = vmatmul.bf16.gmra.mxu2 %v6672_v36  ;;  %v6674_v36 = vld [vmem:[#allocation88_spill] sm:$0xff] }
 0x423   : > { %v2767_v46 = vadd.f32 %v6674_v36, %v5711_v24 }
 0x425   : > { %v3224_v20 = vpop.f32.mrf.mxu2 }
 0x426   : > { %v3225_v44 = vadd.f32 %v3224_v20, %v3136_v45  ;;  %v5896_v45 = vpop.f32.mrf.mxu3 }
 0x428   : > { %v3304_v52 = vadd.f32 %v3225_v44, %v2765_v39  ;;  %v6675_v39 = vld [vmem:[#allocation40_spill] sm:$0xff] }
 0x42a   : > { %v3340_v29 = vadd.f32 %v5891_v54, %v3304_v52  ;;  %v2770_v52 = vadd.f32 %v5527_v2, %v5716_v9  ;;  %v6677_v9 = vld [vmem:[#allocation44_spill] sm:$0xff] }
 0x42c   : > { %v3372_v20 = vmax.f32 %v3340_v29, 0.0 }
 0x42d   : > { %v3226_v63 = vpop.f32.mrf.mxu2 }
 0x42e   : > { %v3227_v43 = vadd.f32 %v3226_v63, %v3138_v28 }
 0x430   : > { %v3305_v41 = vadd.f32 %v3227_v43, %v2767_v46  ;;  %v5908_v46 = vpop.f32.mrf.mxu3  ;;  %v3143_v43 = vadd.f32 %v5746_v15, %v5651_v4 }
 0x432   : > { %v3341_v44 = vadd.f32 %v5891_v54, %v3305_v41  ;;  %3268 = vmatmul.bf16.gmra.mxu2 %v6675_v39  ;;  %v3068_v39 = vpop.f32.mrf.mxu0 }
 0x434   : > { %v3373_v16 = vmax.f32 %v3341_v44, 0.0  ;;  %v3157_v44 = vpop.f32.mrf.mxu1 }
 0x435   : > { %v3229_v24 = vpop.f32.mrf.mxu2 }
 0x436   : > { %v3404_v28 = vpack.c.bf16 %v3373_v16, %v3372_v20  ;;  %v3230_v63 = vadd.f32 %v3229_v24, %v3141_v7  ;;  %v3146_v7 = vadd.f32 %v5753_v18, %v5658_v58  ;;  %v6678_v24 = vld [vmem:[#allocation49_spill] sm:$0xff] }
 0x437   : > { %v2775_v35 = vadd.f32 %v6678_v24, %v5731_v34  ;;  %v6679_v58 = vld [vmem:[#allocation53_spill] sm:$0xff] }
 0x438   : > { %v3306_v36 = vadd.f32 %v3230_v63, %v2770_v52  ;;  %3496 = vmatmul.bf16.vlgmr.msra.gmra.mxu3 %v3404_v28  ;;  %v5919_v4 = vpop.f32.mrf.mxu3  ;;  %v2777_v18 = vadd.f32 %v6679_v58, %v5734_v12  ;;  %v6681_v12 = vld [vmem:[#allocation54_spill] sm:$0xff] }
 0x43a   : > { %v3342_v57 = vadd.f32 %v5891_v54, %v3306_v36  ;;  %v3071_v63 = vpop.f32.mrf.mxu0 }
 0x43c   : > { %v3374_v20 = vmax.f32 %v3342_v57, 0.0 }
 0x43d   : > { %v3231_v41 = vpop.f32.mrf.mxu2 }
 0x43e   : > { %v3232_v29 = vadd.f32 %v3231_v41, %v3143_v43  ;;  %v3160_v43 = vpop.f32.mrf.mxu1 }
 0x440   : > { %v3307_v14 = vadd.f32 %v3232_v29, %v2772_v0  ;;  %v5927_v38 = vpop.f32.mrf.mxu3 }
 0x442   : > { %v3343_v2 = vadd.f32 %v5891_v54, %v3307_v14  ;;  %3273 = vmatmul.bf16.gmra.mxu2 %v6677_v9  ;;  %v3148_v14 = vadd.f32 %v5758_v49, %v5667_v62  ;;  %v3073_v34 = vpop.f32.mrf.mxu0  ;;  %v6680_v9 = vld [vmem:[#allocation50_spill] sm:$0xff] }
 0x444   : > { %v3375_v16 = vmax.f32 %v3343_v2, 0.0 }
 0x445   : > { %v3234_v15 = vpop.f32.mrf.mxu2 }
 0x446   : > { %v3235_v52 = vadd.f32 %v3234_v15, %v3146_v7  ;;  %v3405_v28 = vpack.c.bf16 %v3375_v16, %v3374_v20  ;;  %v3162_v7 = vpop.f32.mrf.mxu1  ;;  %v3151_v20 = vadd.f32 %v5768_v1, %v5675_v25  ;;  %v2780_v15 = vadd.f32 %v6681_v12, %v5741_v59  ;;  %v6682_v25 = vld [vmem:[#allocation55_spill] sm:$0xff] }
 0x447   : > { %v2782_v1 = vadd.f32 %v6682_v25, %v5749_v11  ;;  %v2785_v12 = vadd.f32 %v5817_v6, %v5756_v40 }
 0x448   : > { %v3308_v36 = vadd.f32 %v3235_v52, %v2775_v35  ;;  %3501 = vmatmul.bf16.gmra.mxu3 %v3405_v28  ;;  %v5936_v28 = vpop.f32.mrf.mxu3 }
 0x44a   : > { %v3344_v0 = vadd.f32 %v5891_v54, %v3308_v36  ;;  %v3076_v36 = vpop.f32.mrf.mxu0 }
 0x44c   : > { %v3376_v62 = vmax.f32 %v3344_v0, 0.0 }
 0x44d   : > { %v3236_v41 = vpop.f32.mrf.mxu2 }
 0x44e   : > { %v3237_v57 = vadd.f32 %v3236_v41, %v3148_v14  ;;  %v3153_v14 = vadd.f32 %v5776_v55, %v5685_v47  ;;  %v3165_v41 = vpop.f32.mrf.mxu1  ;;  %v3156_v47 = vadd.f32 %v5904_v51, %v5900_v61 }
 0x450   : > { %v3309_v29 = vadd.f32 %v3237_v57, %v2777_v18 }
 0x452   : > { %v3345_v2 = vadd.f32 %v5891_v54, %v3309_v29  ;;  %3278 = vmatmul.bf16.gmra.mxu2 %v6680_v9  ;;  %v6683_v29 = vld [vmem:[#allocation56_spill] sm:$0xff] }
 0x454   : > { %v3377_v49 = vmax.f32 %v3345_v2, 0.0  ;;  %v5945_v2 = vpop.f32.mrf.mxu3 }
 0x455   : > { %v3239_v16 = vpop.f32.mrf.mxu2 }
 0x456   : > { %v3240_v24 = vadd.f32 %v3239_v16, %v3151_v20  ;;  %v3406_v35 = vpack.c.bf16 %v3377_v49, %v3376_v62  ;;  %v3078_v49 = vpop.f32.mrf.mxu0  ;;  %v3167_v16 = vpop.f32.mrf.mxu1 }
 0x458   : > { %v3310_v52 = vadd.f32 %v3240_v24, %v2780_v15  ;;  %3506 = vmatmul.bf16.gmra.mxu3 %v3406_v35  ;;  %v3158_v15 = vadd.f32 %v3157_v44, %v3068_v39  ;;  %v3161_v39 = vadd.f32 %v3160_v43, %v3071_v63 }
 0x45a   : > { %v3346_v57 = vadd.f32 %v5891_v54, %v3310_v52 }
 0x45c   : > { %v3378_v9 = vmax.f32 %v3346_v57, 0.0  ;;  %v5951_v35 = vpop.f32.mrf.mxu3  ;;  %v6684_v57 = vld [vmem:[#allocation62_spill] sm:$0xff] }
 0x45d   : > { %v3241_v58 = vpop.f32.mrf.mxu2 }
 0x45e   : > { %v3242_v18 = vadd.f32 %v3241_v58, %v3153_v14  ;;  %v2787_v14 = vadd.f32 %v5826_v5, %v5761_v42  ;;  %v3081_v25 = vpop.f32.mrf.mxu0  ;;  %v3170_v61 = vpop.f32.mrf.mxu1  ;;  %v2790_v5 = vadd.f32 %v5834_v23, %v5766_v26 }
 0x460   : > { %v3311_v0 = vadd.f32 %v3242_v18, %v2782_v1 }
 0x462   : > { %v3347_v59 = vadd.f32 %v5891_v54, %v3311_v0  ;;  %3283 = vmatmul.bf16.gmra.mxu2 %v6683_v29 }
 0x464   : > { %v3379_v20 = vmax.f32 %v3347_v59, 0.0  ;;  %v5958_v59 = vpop.f32.mrf.mxu3 }
 0x465   : > { %v3244_v62 = vpop.f32.mrf.mxu2 }
 0x466   : > { %v3407_v55 = vpack.c.bf16 %v3379_v20, %v3378_v9  ;;  %v3245_v11 = vadd.f32 %v3244_v62, %v3156_v47  ;;  %v3083_v42 = vpop.f32.mrf.mxu0  ;;  %v3172_v9 = vpop.f32.mrf.mxu1  ;;  %v3163_v20 = vadd.f32 %v3162_v7, %v3073_v34  ;;  %v3166_v7 = vadd.f32 %v3165_v41, %v3076_v36 }
 0x468   : > { %3511 = vmatmul.bf16.gmra.mxu3 %v3407_v55  ;;  %v3312_v24 = vadd.f32 %v3245_v11, %v2785_v12  ;;  %v2792_v55 = vadd.f32 %v5840_v22, %v5774_v10  ;;  %v2795_v10 = vadd.f32 %v5846_v30, %v5781_v32 }
 0x46a   : > { %v3348_v1 = vadd.f32 %v5891_v54, %v3312_v24  ;;  %v6685_v24 = vld [vmem:[#allocation65_spill] sm:$0xff] }
 0x46c   : > { %v3380_v0 = vmax.f32 %v3348_v1, 0.0  ;;  %v5965_v43 = vpop.f32.mrf.mxu3 }
 0x46d   : > { %v3246_v52 = vpop.f32.mrf.mxu2 }
 0x46e   : > { %v3247_v58 = vadd.f32 %v3246_v52, %v3158_v15  ;;  %v3086_v52 = vpop.f32.mrf.mxu0  ;;  %v3175_v23 = vpop.f32.mrf.mxu1 }
 0x470   : > { %v3313_v51 = vadd.f32 %v3247_v58, %v2787_v14 }
 0x472   : > { %v3349_v18 = vadd.f32 %v5891_v54, %v3313_v51  ;;  %3288 = vmatmul.bf16.gmra.mxu2 %v6684_v57  ;;  %v3168_v51 = vadd.f32 %v3167_v16, %v3078_v49  ;;  %v3171_v16 = vadd.f32 %v3170_v61, %v3081_v25 }
 0x474   : > { %v3381_v40 = vmax.f32 %v3349_v18, 0.0  ;;  %v5971_v22 = vpop.f32.mrf.mxu3 }
 0x475   : > { %v3249_v6 = vpop.f32.mrf.mxu2 }
 0x476   : > { %v3408_v44 = vpack.c.bf16 %v3381_v40, %v3380_v0  ;;  %v3250_v29 = vadd.f32 %v3249_v6, %v3161_v39  ;;  %v3088_v0 = vpop.f32.mrf.mxu0  ;;  %v2797_v40 = vadd.f32 %v5857_v21, %v5784_v33  ;;  %v3177_v39 = vpop.f32.mrf.mxu1  ;;  %v2800_v21 = vadd.f32 %v5863_v19, %v5788_v37 }
 0x477   : > { %v3176_v37 = vadd.f32 %v3175_v23, %v3086_v52  ;;  %v2807_v52 = vadd.f32 %v5884_v3, %v5801_v48  ;;  %v2810_v48 = vadd.f32 %v5896_v45, %v5805_v31 }
 0x478   : > { %3516 = vmatmul.bf16.gmra.mxu3 %v3408_v44  ;;  %v3314_v62 = vadd.f32 %v3250_v29, %v2790_v5 }
 0x47a   : > { %v3350_v12 = vadd.f32 %v5891_v54, %v3314_v62 }
 0x47c   : > { %v3382_v14 = vmax.f32 %v3350_v12, 0.0  ;;  %v5978_v30 = vpop.f32.mrf.mxu3 }
 0x47d   : > { %v3251_v47 = vpop.f32.mrf.mxu2 }
 0x47e   : > { %v3252_v11 = vadd.f32 %v3251_v47, %v3163_v20  ;;  %v3091_v20 = vpop.f32.mrf.mxu0  ;;  %v3180_v33 = vpop.f32.mrf.mxu1  ;;  %v3173_v47 = vadd.f32 %v3172_v9, %v3083_v42 }
 0x480   : > { %v3315_v63 = vadd.f32 %v3252_v11, %v2792_v55 }
 0x482   : > { %v3351_v15 = vadd.f32 %v5891_v54, %v3315_v63  ;;  %3293 = vmatmul.bf16.gmra.mxu2 %v6685_v24 }
 0x484   : > { %v3383_v26 = vmax.f32 %v3351_v15, 0.0  ;;  %v5984_v63 = vpop.f32.mrf.mxu3 }
 0x485   : > { %v3254_v34 = vpop.f32.mrf.mxu2 }
 0x486   : > { %v3409_v58 = vpack.c.bf16 %v3383_v26, %v3382_v14  ;;  %v3255_v1 = vadd.f32 %v3254_v34, %v3166_v7  ;;  %v3093_v61 = vpop.f32.mrf.mxu0  ;;  %v3182_v14 = vpop.f32.mrf.mxu1 }
 0x488   : > { %3521 = vmatmul.bf16.gmra.mxu3 %v3409_v58  ;;  %v3316_v18 = vadd.f32 %v3255_v1, %v2795_v10  ;;  %v3178_v58 = vadd.f32 %v3177_v39, %v3088_v0  ;;  %v3637_v10 = vld [vmem:[%s6476_s7 + $0x78] sm:$0xff] }
 0x489   : > { %3638 = vmatpush.msrb.mxu0 %v3637_v10 }
 0x48a   : > { %v3352_v44 = vadd.f32 %v5891_v54, %v3316_v18 }
 0x48c   : > { %v3384_v29 = vmax.f32 %v3352_v44, 0.0  ;;  %v5988_v9 = vpop.f32.mrf.mxu3 }
 0x48d   : > { %v3256_v57 = vpop.f32.mrf.mxu2 }
 0x48e   : > { %v3257_v6 = vadd.f32 %v3256_v57, %v3168_v51  ;;  %v3185_v51 = vpop.f32.mrf.mxu1 }
 0x490   : > { %v3317_v36 = vadd.f32 %v3257_v6, %v2797_v40 }
 0x492   : > { %v3353_v41 = vadd.f32 %v5891_v54, %v3317_v36  ;;  %3298 = vmatmul.bf16.gmra.mxu2 %v6594_v53  ;;  %v2802_v53 = vadd.f32 %v5869_v13, %v5794_v27  ;;  %v2805_v27 = vadd.f32 %v5874_v8, %v5798_v50  ;;  %v3096_v13 = vpop.f32.mrf.mxu0  ;;  %v3181_v36 = vadd.f32 %v3180_v33, %v3091_v20 }
 0x493   : > { %v2812_v20 = vadd.f32 %v5908_v46, %v5811_v60  ;;  %v2815_v60 = vadd.f32 %v5919_v4, %v5815_v56 }
 0x494   : > { %v3385_v32 = vmax.f32 %v3353_v41, 0.0  ;;  %v5999_v50 = vpop.f32.mrf.mxu3 }
 0x495   : > { %v3259_v49 = vpop.f32.mrf.mxu2 }
 0x496   : > { %v3410_v5 = vpack.c.bf16 %v3385_v32, %v3384_v29  ;;  %v3260_v62 = vadd.f32 %v3259_v49, %v3171_v16  ;;  %v3187_v29 = vpop.f32.mrf.mxu1  ;;  %v3183_v49 = vadd.f32 %v3182_v14, %v3093_v61 }
 0x498   : > { %3526 = vmatmul.bf16.gmra.mxu3 %v3410_v5  ;;  %v3318_v55 = vadd.f32 %v3260_v62, %v2800_v21  ;;  %v3636_v5 = vld [vmem:[%s6476_s7 + $0x70] sm:$0xff] }
 0x499   : > { %3639 = vmatpush.msrb.mxu0 %v3636_v5 }
 0x49a   : > { %v3354_v15 = vadd.f32 %v5891_v54, %v3318_v55  ;;  %v3098_v44 = vpop.f32.mrf.mxu0 }
 0x49c   : > { %v3386_v26 = vmax.f32 %v3354_v15, 0.0 }
 0x49d   : > { %v3261_v11 = vpop.f32.mrf.mxu2 }
 0x49e   : > { %v3262_v12 = vadd.f32 %v3261_v11, %v3173_v47  ;;  %v3190_v11 = vpop.f32.mrf.mxu1 }
 0x4a0   : > { %v3319_v25 = vadd.f32 %v3262_v12, %v2802_v53 }
 0x4a2   : > { %v3355_v24 = vadd.f32 %v5891_v54, %v3319_v25  ;;  %v3101_v21 = vpop.f32.mrf.mxu0  ;;  %v3186_v25 = vadd.f32 %v3185_v51, %v3096_v13 }
 0x4a4   : > { %v3387_v34 = vmax.f32 %v3355_v24, 0.0 }
 0x4a5   : > { %v3264_v7 = vpop.f32.mrf.mxu2 }
 0x4a6   : > { %v3411_v19 = vpack.c.bf16 %v3387_v34, %v3386_v26  ;;  %v3265_v42 = vadd.f32 %v3264_v7, %v3176_v37  ;;  %v3192_v46 = vpop.f32.mrf.mxu1  ;;  %v3188_v34 = vadd.f32 %v3187_v29, %v3098_v44  ;;  %v3635_v37 = vld [vmem:[%s6476_s7 + $0x68] sm:$0xff] }
 0x4a7   : > { %3640 = vmatpush.msrb.mxu0 %v3635_v37 }
 0x4a8   : > { %3531 = vmatmul.bf16.gmra.mxu3 %v3411_v19  ;;  %v3320_v1 = vadd.f32 %v3265_v42, %v2805_v27  ;;  %v2817_v42 = vadd.f32 %v5927_v38, %v5820_v17 }
 0x4aa   : > { %v3356_v57 = vadd.f32 %v5891_v54, %v3320_v1  ;;  %v3103_v14 = vpop.f32.mrf.mxu0 }
 0x4ac   : > { %v3388_v8 = vmax.f32 %v3356_v57, 0.0 }
 0x4ad   : > { %v3266_v18 = vpop.f32.mrf.mxu2 }
 0x4ae   : > { %v3267_v23 = vadd.f32 %v3266_v18, %v3178_v58  ;;  %v3195_v18 = vpop.f32.mrf.mxu1 }
 0x4b0   : > { %v3321_v40 = vadd.f32 %v3267_v23, %v2807_v52  ;;  %v3191_v23 = vadd.f32 %v3190_v11, %v3101_v21 }
 0x4b2   : > { %v3357_v6 = vadd.f32 %v5891_v54, %v3321_v40  ;;  %v3106_v1 = vpop.f32.mrf.mxu0 }
 0x4b3   : > { %v3196_v21 = vadd.f32 %v3195_v18, %v3106_v1 }
 0x4b4   : > { %v3389_v0 = vmax.f32 %v3357_v6, 0.0  ;;  %v6686_v6 = vld [vmem:[#allocation59_spill] sm:$0xff] }
 0x4b5   : > { %v3269_v39 = vpop.f32.mrf.mxu2  ;;  %v2820_v17 = vadd.f32 %v5936_v28, %v6686_v6 }
 0x4b6   : > { %v3412_v41 = vpack.c.bf16 %v3389_v0, %v3388_v8  ;;  %v3270_v32 = vadd.f32 %v3269_v39, %v3181_v36  ;;  %v3193_v8 = vadd.f32 %v3192_v46, %v3103_v14  ;;  %v3634_v39 = vld [vmem:[%s6476_s7 + $0x60] sm:$0xff]  ;;  %v6689_v14 = vld [vmem:[#allocation11_spill] sm:$0xff] }
 0x4b7   : > { %3641 = vmatpush.msrb.mxu0 %v3634_v39 }
 0x4b8   : > { %3536 = vmatmul.bf16.gmra.mxu3 %v3412_v41  ;;  %v3322_v16 = vadd.f32 %v3270_v32, %v2810_v48  ;;  %v6687_v41 = vld [vmem:[#allocation60_spill] sm:$0xff]  ;;  %v3197_v48 = vpop.f32.mrf.mxu1 }
 0x4b9   : > { %v2822_v29 = vadd.f32 %v5945_v2, %v6687_v41 }
 0x4ba   : > { %v3358_v47 = vadd.f32 %v5891_v54, %v3322_v16  ;;  %v3108_v36 = vpop.f32.mrf.mxu0 }
 0x4bb   : > { %v6003_v3 = vpop.f32.mrf.mxu3 }
 0x4bc   : > { %v3390_v53 = vmax.f32 %v3358_v47, 0.0 }
 0x4bd   : > { %v3271_v62 = vpop.f32.mrf.mxu2 }
 0x4be   : > { %v3272_v33 = vadd.f32 %v3271_v62, %v3183_v49 }
 0x4c0   : > { %v3323_v55 = vadd.f32 %v3272_v33, %v2812_v20 }
 0x4c2   : > { %v3359_v31 = vadd.f32 %v5891_v54, %v3323_v55  ;;  %v3111_v55 = vpop.f32.mrf.mxu0 }
 0x4c3   : > { %v6012_v45 = vpop.f32.mrf.mxu3 }
 0x4c4   : > { %v3391_v12 = vmax.f32 %v3359_v31, 0.0  ;;  %v3200_v31 = vpop.f32.mrf.mxu1 }
 0x4c5   : > { %v3274_v15 = vpop.f32.mrf.mxu2 }
 0x4c6   : > { %v3413_v61 = vpack.c.bf16 %v3391_v12, %v3390_v53  ;;  %v3275_v24 = vadd.f32 %v3274_v15, %v3186_v25  ;;  %v6688_v53 = vld [vmem:[#allocation9_spill] sm:$0xff]  ;;  %v3198_v15 = vadd.f32 %v3197_v48, %v3108_v36 }
 0x4c7   : > { %v2825_v2 = vadd.f32 %v5951_v35, %v6688_v53  ;;  %v6693_v53 = vld [vmem:[#allocation71_spill] sm:$0xff] }
 0x4c8   : > { %3541 = vmatmul.bf16.gmra.mxu3 %v3413_v61  ;;  %v3324_v7 = vadd.f32 %v3275_v24, %v2815_v60  ;;  %v3633_v61 = vld [vmem:[%s6476_s7 + $0x58] sm:$0xff]  ;;  %v2827_v60 = vadd.f32 %v5958_v59, %v6689_v14 }
 0x4c9   : > { %3642 = vmatpush.msrb.mxu0 %v3633_v61 }
 0x4ca   : > { %v3360_v13 = vadd.f32 %v5891_v54, %v3324_v7  ;;  %v3113_v37 = vpop.f32.mrf.mxu0 }
 0x4cb   : > { %v6016_v26 = vpop.f32.mrf.mxu3 }
 0x4cc   : > { %v3392_v10 = vmax.f32 %v3360_v13, 0.0 }
 0x4cd   : > { %v3276_v19 = vpop.f32.mrf.mxu2 }
 0x4ce   : > { %v3277_v27 = vadd.f32 %v3276_v19, %v3188_v34  ;;  %v3202_v19 = vpop.f32.mrf.mxu1 }
 0x4d0   : > { %v3325_v58 = vadd.f32 %v3277_v27, %v2817_v42 }
 0x4d2   : > { %v3361_v56 = vadd.f32 %v5891_v54, %v3325_v58 }
 0x4d3   : > { %v6025_v4 = vpop.f32.mrf.mxu3 }
 0x4d4   : > { %v3393_v51 = vmax.f32 %v3361_v56, 0.0  ;;  %v3201_v56 = vadd.f32 %v3200_v31, %v3111_v55 }
 0x4d5   : > { %v3279_v52 = vpop.f32.mrf.mxu2 }
 0x4d6   : > { %v3414_v57 = vpack.c.bf16 %v3393_v51, %v3392_v10  ;;  %v3280_v40 = vadd.f32 %v3279_v52, %v3191_v23  ;;  %v6690_v51 = vld [vmem:[#allocation69_spill] sm:$0xff]  ;;  %v3116_v52 = vpop.f32.mrf.mxu0  ;;  %v3203_v23 = vadd.f32 %v3202_v19, %v3113_v37  ;;  %v3205_v6 = vpop.f32.mrf.mxu1  ;;  %v3630_v19 = vld [vmem:[%s6476_s7 + $0x40] sm:$0xff] }
 0x4d7   : > { %v2830_v59 = vadd.f32 %v5965_v43, %v6690_v51 }
 0x4d8   : > { %3546 = vmatmul.bf16.gmra.mxu3 %v3414_v57  ;;  %v3326_v0 = vadd.f32 %v3280_v40, %v2820_v17  ;;  %v3632_v40 = vld [vmem:[%s6476_s7 + $0x50] sm:$0xff] }
 0x4d9   : > { %3643 = vmatpush.msrb.mxu0 %v3632_v40 }
 0x4da   : > { %v3362_v49 = vadd.f32 %v5891_v54, %v3326_v0 }
 0x4db   : > { %v6029_v38 = vpop.f32.mrf.mxu3 }
 0x4dc   : > { %v3394_v62 = vmax.f32 %v3362_v49, 0.0  ;;  %v3206_v49 = vadd.f32 %v3205_v6, %v3116_v52  ;;  %v6695_v52 = vld [vmem:[#allocation15_spill] sm:$0xff] }
 0x4dd   : > { %v3281_v44 = vpop.f32.mrf.mxu2 }
 0x4de   : > { %v3282_v32 = vadd.f32 %v3281_v44, %v3193_v8  ;;  %v6691_v8 = vld [vmem:[#allocation8_spill] sm:$0xff] }
 0x4df   : > { %v2832_v0 = vadd.f32 %v5971_v22, %v6691_v8 }
 0x4e0   : > { %v3327_v16 = vadd.f32 %v3282_v32, %v2822_v29 }
 0x4e2   : > { %v3363_v28 = vadd.f32 %v5891_v54, %v3327_v16 }
 0x4e3   : > { %v6038_v5 = vpop.f32.mrf.mxu3 }
 0x4e4   : > { %v3395_v20 = vmax.f32 %v3363_v28, 0.0  ;;  %v3631_v28 = vld [vmem:[%s6476_s7 + $0x48] sm:$0xff] }
 0x4e5   : > { %v3284_v33 = vpop.f32.mrf.mxu2  ;;  %3644 = vmatpush.msrb.mxu0 %v3631_v28  ;;  %v3626_v28 = vld [vmem:[%s6476_s7 + $0x20] sm:$0xff] }
 0x4e6   : > { %v3415_v47 = vpack.c.bf16 %v3395_v20, %v3394_v62  ;;  %v3285_v11 = vadd.f32 %v3284_v33, %v3196_v21  ;;  %v3118_v62 = vpop.f32.mrf.mxu0  ;;  %v3207_v20 = vpop.f32.mrf.mxu1  ;;  %v6692_v33 = vld [vmem:[#allocation13_spill] sm:$0xff] }
 0x4e7   : > { %v2835_v21 = vadd.f32 %v5978_v30, %v6692_v33  ;;  %v3208_v55 = vadd.f32 %v3207_v20, %v3118_v62  ;;  %3645 = vmatpush.msrb.mxu0 %v3630_v19 }
 0x4e8   : > { %3551 = vmatmul.bf16.gmra.mxu3 %v3415_v47  ;;  %v3328_v25 = vadd.f32 %v3285_v11, %v2825_v2  ;;  %v2837_v2 = vadd.f32 %v5984_v63, %v6693_v53 }
 0x4ea   : > { %v3364_v34 = vadd.f32 %v5891_v54, %v3328_v25 }
 0x4eb   : > { %v6042_v12 = vpop.f32.mrf.mxu3 }
 0x4ec   : > { %v3396_v27 = vmax.f32 %v3364_v34, 0.0 }
 0x4ed   : > { %v3286_v24 = vpop.f32.mrf.mxu2 }
 0x4ee   : > { %v3287_v46 = vadd.f32 %v3286_v24, %v3198_v15  ;;  %v3121_v25 = vpop.f32.mrf.mxu0  ;;  %v3210_v61 = vpop.f32.mrf.mxu1 }
 0x4ef   : > { %v3211_v30 = vadd.f32 %v3210_v61, %v3121_v25 }
 0x4f0   : > { %v3329_v7 = vadd.f32 %v3287_v46, %v2827_v60 }
 0x4f2   : > { %v3365_v35 = vadd.f32 %v5891_v54, %v3329_v7 }
 0x4f3   : > { %v6051_v42 = vpop.f32.mrf.mxu3 }
 0x4f4   : > { %v3397_v13 = vmax.f32 %v3365_v35, 0.0 }
 0x4f5   : > { %v3289_v58 = vpop.f32.mrf.mxu2 }
 0x4f6   : > { %v3416_v1 = vpack.c.bf16 %v3397_v13, %v3396_v27  ;;  %v3290_v10 = vadd.f32 %v3289_v58, %v3201_v56  ;;  %v3123_v27 = vpop.f32.mrf.mxu0  ;;  %v3212_v13 = vpop.f32.mrf.mxu1  ;;  %v6694_v58 = vld [vmem:[#allocation73_spill] sm:$0xff] }
 0x4f7   : > { %v2840_v56 = vadd.f32 %v5988_v9, %v6694_v58  ;;  %v3629_v9 = vld [vmem:[%s6476_s7 + $0x38] sm:$0xff] }
 0x4f8   : > { %3556 = vmatmul.bf16.gmra.mxu3 %v3416_v1  ;;  %v3330_v57 = vadd.f32 %v3290_v10, %v2830_v59  ;;  %v3213_v10 = vadd.f32 %v3212_v13, %v3123_v27  ;;  %3646 = vmatpush.msrb.mxu0 %v3629_v9 }
 0x4fa   : > { %v3366_v44 = vadd.f32 %v5891_v54, %v3330_v57 }
 0x4fb   : > { %v6055_v18 = vpop.f32.mrf.mxu3 }
 0x4fc   : > { %v3398_v29 = vmax.f32 %v3366_v44, 0.0 }
 0x4fd   : > { %v3291_v17 = vpop.f32.mrf.mxu2 }
 0x4fe   : > { %v3292_v39 = vadd.f32 %v3291_v17, %v3203_v23  ;;  %v2842_v23 = vadd.f32 %v5999_v50, %v6695_v52 }
 0x500   : > { %v3331_v36 = vadd.f32 %v3292_v39, %v2832_v0 }
 0x502   : > { %v3367_v43 = vadd.f32 %v5891_v54, %v3331_v36  ;;  %v3659_v36 = vld [vmem:[%s6477_s8] sm:$0xf] }
 0x503   : > { %v6064_v41 = vpop.f32.mrf.mxu3  ;;  %4391 = vmatpush.msk.msrb.mxu1 %vm3664_vm1, %v3659_v36 }
 0x504   : > { %v3399_v32 = vmax.f32 %v3367_v43, 0.0 }
 0x505   : > { %v3294_v48 = vpop.f32.mrf.mxu2 }
 0x506   : > { %v3417_v16 = vpack.c.bf16 %v3399_v32, %v3398_v29  ;;  %v3295_v22 = vadd.f32 %v3294_v48, %v3206_v49  ;;  %v3627_v48 = vld [vmem:[%s6476_s7 + $0x28] sm:$0xff] }
 0x508   : > { %3561 = vmatmul.bf16.gmra.mxu3 %v3417_v16  ;;  %v3332_v11 = vadd.f32 %v3295_v22, %v2835_v21  ;;  %v3625_v22 = vld [vmem:[%s6476_s7 + $0x18] sm:$0xff] }
 0x50a   : > { %v3368_v24 = vadd.f32 %v5891_v54, %v3332_v11 }
 0x50b   : > { %v6071_v47 = vpop.f32.mrf.mxu3 }
 0x50c   : > { %v3400_v34 = vmax.f32 %v3368_v24, 0.0 }
 0x50d   : > { %v3296_v31 = vpop.f32.mrf.mxu2 }
 0x50e   : > { %v3297_v15 = vadd.f32 %v3296_v31, %v3208_v55  ;;  %v6111_v55 = vld [vmem:[%s6475_s6] ss:$0 sm:$0xff]  ;;  %v3624_v31 = vld [vmem:[%s6476_s7 + $0x10] sm:$0xff] }
 0x50f   : > { %v6115_v11 = vadd.f32 %v6111_v55, %v6012_v45  ;;  %v6122_v53 = vadd.f32 %v6111_v55, %v6003_v3  ;;  %v6132_v45 = vadd.f32 %v6111_v55, %v6025_v4  ;;  %v6137_v24 = vadd.f32 %v6111_v55, %v6029_v38 }
 0x510   : > { %v3333_v14 = vadd.f32 %v3297_v15, %v2837_v2  ;;  %v6126_v2 = vadd.f32 %v6111_v55, %v6016_v26  ;;  %v6142_v26 = vadd.f32 %v6111_v55, %v6038_v5 }
 0x511   : > { %v3577_v15 = vadd.f32 %v6115_v11, %v6122_v53 }
 0x512   : > { %v3369_v60 = vadd.f32 %v5891_v54, %v3333_v14 }
 0x513   : > { %v6077_v46 = vpop.f32.mrf.mxu3  ;;  %v3578_v61 = vadd.f32 %v3577_v15, %v6126_v2 }
 0x514   : > { %v3401_v7 = vmax.f32 %v3369_v60, 0.0  ;;  %v6147_v60 = vadd.f32 %v6111_v55, %v6042_v12  ;;  %v3623_v12 = vld [vmem:[%s6476_s7 + $0x8] sm:$0xff]  ;;  %v6175_v19 = vadd.f32 %v6111_v55, %v6077_v46 }
 0x515   : > { %v3299_v37 = vpop.f32.mrf.mxu2  ;;  %v3579_v3 = vadd.f32 %v3578_v61, %v6132_v45 }
 0x516   : > { %v3418_v35 = vpack.c.bf16 %v3401_v7, %v3400_v34  ;;  %v3300_v63 = vadd.f32 %v3299_v37, %v3211_v30  ;;  %v6152_v34 = vadd.f32 %v6111_v55, %v6051_v42  ;;  %v6157_v7 = vadd.f32 %v6111_v55, %v6055_v18 }
 0x517   : > { %v3580_v14 = vadd.f32 %v3579_v3, %v6137_v24  ;;  %v6162_v37 = vadd.f32 %v6111_v55, %v6064_v41 }
 0x518   : > { %3566 = vmatmul.bf16.gmra.mxu3 %v3418_v35  ;;  %v3334_v51 = vadd.f32 %v3300_v63, %v2840_v56  ;;  %v6170_v35 = vadd.f32 %v6111_v55, %v6071_v47 }
 0x519   : > { %v3581_v4 = vadd.f32 %v3580_v14, %v6142_v26 }
 0x51a   : > { %v3370_v40 = vadd.f32 %v5891_v54, %v3334_v51 }
 0x51b   : > { %v6084_v1 = vpop.f32.mrf.mxu3  ;;  %v3582_v30 = vadd.f32 %v3581_v4, %v6147_v60 }
 0x51c   : > { %v3402_v0 = vmax.f32 %v3370_v40, 0.0  ;;  %v6180_v27 = vadd.f32 %v6111_v55, %v6084_v1 }
 0x51d   : > { %v3301_v59 = vpop.f32.mrf.mxu2  ;;  %v3583_v5 = vadd.f32 %v3582_v30, %v6152_v34 }
 0x51e   : > { %v3302_v57 = vadd.f32 %v3301_v59, %v3213_v10 }
 0x51f   : > { %v3584_v42 = vadd.f32 %v3583_v5, %v6157_v7 }
 0x520   : > { %v3335_v6 = vadd.f32 %v3302_v57, %v2842_v23 }
 0x521   : > { %v3585_v18 = vadd.f32 %v3584_v42, %v6162_v37 }
 0x522   : > { %v3371_v17 = vadd.f32 %v5891_v54, %v3335_v6  ;;  %v3628_v54 = vld [vmem:[%s6476_s7 + $0x30] sm:$0xff] }
 0x523   : > { %v3529_v8 = vpop.f32.mrf.mxu3  ;;  %3647 = vmatpush.msrb.mxu0 %v3628_v54  ;;  %v3586_v41 = vadd.f32 %v3585_v18, %v6170_v35 }
 0x524   : > { %v3403_v39 = vmax.f32 %v3371_v17, 0.0  ;;  %v6184_v58 = vadd.f32 %v6111_v55, %v3529_v8 }
 0x525   : > { %3648 = vmatpush.msrb.mxu0 %v3627_v48  ;;  %v3587_v13 = vadd.f32 %v3586_v41, %v6175_v19 }
 0x526   : > { %v3419_v44 = vpack.c.bf16 %v3403_v39, %v3402_v0 }
 0x527   : > { %3649 = vmatpush.msrb.mxu0 %v3626_v28  ;;  %v3588_v47 = vadd.f32 %v3587_v13, %v6180_v27 }
 0x528   : > { %3571 = vmatmul.bf16.gmra.mxu3 %v3419_v44 }
 0x529   : > { %3650 = vmatpush.msrb.mxu0 %v3625_v22  ;;  %v3589_v46 = vadd.f32 %v3588_v47, %v6184_v58  ;;  %v4668_v22 = vmov 256.0  }
 0x52a   : > { %4558 = vrcp.f32 %v4668_v22 }
 0x52b   : > { %v3532_v50 = vpop.f32.mrf.mxu3  ;;  %3651 = vmatpush.msrb.mxu0 %v3624_v31 }
 0x52c   : > { %v6188_v56 = vadd.f32 %v6111_v55, %v3532_v50 }
 0x52d   : > { %3652 = vmatpush.msrb.mxu0 %v3623_v12 }
 0x52e   : > { %v3590_v59 = vadd.f32 %v3589_v46, %v6188_v56 }
 0x530   : > { %v4559_v61 = vpop.eup %4558 }
 0x531   : > { %v3615_v30 = vmul.f32 256.0, %v4559_v61  ;;  %vm3619_vm2 = vweird.f32 %v4559_v61 }
 0x533   : > { %v3534_v43 = vpop.f32.mrf.mxu3 }
 0x534   : > { %v6192_v10 = vadd.f32 %v6111_v55, %v3534_v43 }
 0x536   : > { %v3591_v52 = vadd.f32 %v3590_v59, %v6192_v10 }
 0x53b   : > { %v3537_v29 = vpop.f32.mrf.mxu3 }
 0x53c   : > { %v6196_v1 = vadd.f32 %v6111_v55, %v3537_v29 }
 0x53e   : > { %v3592_v57 = vadd.f32 %v3591_v52, %v6196_v1 }
 0x543   : > { %v3539_v32 = vpop.f32.mrf.mxu3 }
 0x544   : > { %v6200_v23 = vadd.f32 %v6111_v55, %v3539_v32 }
 0x546   : > { %v3593_v6 = vadd.f32 %v3592_v57, %v6200_v23 }
 0x54b   : > { %v3542_v49 = vpop.f32.mrf.mxu3 }
 0x54c   : > { %v6204_v40 = vadd.f32 %v6111_v55, %v3542_v49  ;;  %v3622_v49 = vld [vmem:[%s6476_s7] sm:$0xff] }
 0x54d   : > { %3653 = vmatpush.msrb.mxu0 %v3622_v49 }
 0x54e   : > { %v3594_v0 = vadd.f32 %v3593_v6, %v6204_v40 }
 0x553   : > { %v3544_v16 = vpop.f32.mrf.mxu3 }
 0x554   : > { %v6208_v17 = vadd.f32 %v6111_v55, %v3544_v16 }
 0x556   : > { %v3595_v44 = vadd.f32 %v3594_v0, %v6208_v17 }
 0x55b   : > { %v3547_v62 = vpop.f32.mrf.mxu3 }
 0x55c   : > { %v6212_v39 = vadd.f32 %v6111_v55, %v3547_v62 }
 0x55e   : > { %v3596_v36 = vadd.f32 %v3595_v44, %v6212_v39 }
 0x563   : > { %v3549_v20 = vpop.f32.mrf.mxu3 }
 0x564   : > { %v6216_v9 = vadd.f32 %v6111_v55, %v3549_v20 }
 0x566   : > { %v3597_v43 = vadd.f32 %v3596_v36, %v6216_v9 }
 0x56b   : > { %v3552_v33 = vpop.f32.mrf.mxu3 }
 0x56c   : > { %v6220_v50 = vadd.f32 %v6111_v55, %v3552_v33 }
 0x56e   : > { %v3598_v32 = vadd.f32 %v3597_v43, %v6220_v50 }
 0x573   : > { %v3554_v21 = vpop.f32.mrf.mxu3 }
 0x574   : > { %v6224_v54 = vadd.f32 %v6111_v55, %v3554_v21 }
 0x576   : > { %v3599_v16 = vadd.f32 %v3598_v32, %v6224_v54 }
 0x57b   : > { %v3557_v25 = vpop.f32.mrf.mxu3 }
 0x57c   : > { %v6228_v48 = vadd.f32 %v6111_v55, %v3557_v25 }
 0x57e   : > { %v3600_v62 = vadd.f32 %v3599_v16, %v6228_v48 }
 0x583   : > { %v3559_v38 = vpop.f32.mrf.mxu3 }
 0x584   : > { %v6235_v28 = vadd.f32 %v6111_v55, %v3559_v38 }
 0x586   : > { %v3601_v33 = vadd.f32 %v3600_v62, %v6235_v28 }
 0x58b   : > { %v3562_v63 = vpop.f32.mrf.mxu3 }
 0x58c   : > { %v6239_v20 = vadd.f32 %v6111_v55, %v3562_v63  ;;  %v3616_v63 = vsub.f32 1.0, %v3615_v30 }
 0x58e   : > { %v3602_v15 = vadd.f32 %v3601_v33, %v6239_v20  ;;  %v3617_v47 = vmul.f32 %v4559_v61, %v3616_v63 }
 0x590   : > { %v3618_v59 = vadd.f32 %v4559_v61, %v3617_v47  ;;  %v6696_v47 = vld [vmem:[#allocation16_spill] sm:$0xff] }
 0x592   : > { %v3620_v6 = vsel %vm3619_vm2, %v4559_v61, %v3618_v59 }
 0x593   : > { %v3564_v51 = vpop.f32.mrf.mxu3 }
 0x594   : > { %v6243_v21 = vadd.f32 %v6111_v55, %v3564_v51 }
 0x596   : > { %v3603_v3 = vadd.f32 %v3602_v15, %v6243_v21 }
 0x59b   : > { %v3567_v8 = vpop.f32.mrf.mxu3 }
 0x59c   : > { %v6247_v25 = vadd.f32 %v6111_v55, %v3567_v8 }
 0x59e   : > { %v3604_v4 = vadd.f32 %v3603_v3, %v6247_v25 }
 0x5a3   : > { %v3569_v29 = vpop.f32.mrf.mxu3 }
 0x5a4   : > { %v6251_v14 = vadd.f32 %v6111_v55, %v3569_v29 }
 0x5a6   : > { %v3605_v5 = vadd.f32 %v3604_v4, %v6251_v14 }
 0x5ab   : > { %v3572_v31 = vpop.f32.mrf.mxu3 }
 0x5ac   : > { %v6255_v38 = vadd.f32 %v6111_v55, %v3572_v31 }
 0x5ae   : > { %v3606_v42 = vadd.f32 %v3605_v5, %v6255_v38  ;;  %v4564_v5 = vld [vmem:[%s6471_s2] sm:$0x3] }
 0x5b3   : > { %v3574_v12 = vpop.f32.mrf.mxu3 }
 0x5b4   : > { %v6260_v18 = vadd.f32 %v6111_v55, %v3574_v12  ;;  %v6268_v12 = vperm.slane %v4564_v5, 1 }
 0x5b6   : > { %v3607_v41 = vadd.f32 %v3606_v42, %v6260_v18 }
 0x5b8   : > { %v3608_v13 = vrot.slane %v3607_v41, 4 }
 0x5ba   : > { %v3609_v46 = vadd.f32 %v3608_v13, %v3607_v41 }
 0x5bc   : > { %v3610_v51 = vrot.slane %v3609_v46, 2 }
 0x5be   : > { %v3611_v52 = vadd.f32 %v3610_v51, %v3609_v46  ;;  %v627_v46 = vadd.f32 %v6696_v47, %v6268_v12  ;;  %v6697_v51 = vld [vmem:[#allocation17_spill] sm:$0xff] }
 0x5bf   : > { %v629_v59 = vadd.f32 %v6697_v51, %v6268_v12 }
 0x5c0   : > { %v3612_v57 = vrot.slane %v3611_v52, 1 }
 0x5c2   : > { %v3613_v8 = vadd.f32 %v3612_v57, %v3611_v52  ;;  %v6698_v52 = vld [vmem:[#allocation20_spill] sm:$0xff] }
 0x5c3   : > { %v632_v57 = vadd.f32 %v6698_v52, %v6268_v12  ;;  %v6707_v52 = vld [vmem:[#allocation35_spill] sm:$0xff] }
 0x5c4   : > { %v3621_v0 = vmul.f32 %v3620_v6, %v3613_v8 }
 0x5c6   : > { %3654 = vmatmul.f32.vlgmr.msrb.gmra.mxu0 %v3621_v0 }
 0x643   : > { %v3655_v44 = vpop.f32.mrf.mxu0 }
 0x644   : > { %v3658_v36 = vmax.f32 %v3655_v44, 0.0 }
 0x646   : > { %4392 = vmatmul.msk.f32.vlgmr.msrb.gmra.mxu1 %vm3660_vm8, %v3658_v36 }
 0x6c3   : > { %v3685_v55 = vpop.f32.mrf.mxu1 }
 0x6c4   : > { %v4393_v43 = vmul.f32 -1.442695, %v3685_v55 }
 0x6c6   : > { %4560 = vpow2.f32 %v4393_v43  ;;  %v6701_v43 = vld [vmem:[#allocation25_spill] sm:$0xff] }
 0x6cc   : > { %v4561_v29 = vpop.eup %4560 }
 0x6cd   : > { %v3691_v32 = vadd.f32 1.0, %v4561_v29 }
 0x6cf   : > { %4562 = vrcp.f32 %v3691_v32  ;;  %v3703_v31 = vand.u32 2147483648, %v3691_v32  ;;  %vm3697_vm10 = vweird.f32 %v3691_v32  ;;  %v3701_v15 = vand.u32 2147483647, %v3691_v32 }
 0x6d1   : > { %v3704_v3 = vor.u32 1.1754944e-38, %v3703_v31  ;;  %vm3702_vm12 = vcmp.eq.f32.partialorder %v3701_v15, 8.507059e+37 }
 0x6d5   : > { %v4563_v49 = vpop.eup %4562 }
 0x6d6   : > { %v3693_v16 = vmul.f32 %v4563_v49, %v3691_v32  ;;  %vm3698_vm9 = vweird.f32 %v4563_v49 }
 0x6d7   : > { %vm3699_vm11 = vmor %vm3697_vm10, %vm3698_vm9 }
 0x6d8   : > { %v3694_v62 = vsub.f32 1.0, %v3693_v16 }
 0x6da   : > { %v3695_v22 = vmul.f32 %v4563_v49, %v3694_v62 }
 0x6dc   : > { %v3696_v33 = vadd.f32 %v4563_v49, %v3695_v22 }
 0x6de   : > { %v3700_v61 = vsel %vm3699_vm11, %v4563_v49, %v3696_v33  ;;  %v6702_v49 = vld [vmem:[#allocation28_spill] sm:$0xff]  ;;  %v6704_v33 = vld [vmem:[#allocation31_spill] sm:$0xff] }
 0x6df   : > { %v3705_v4 = vsel %vm3702_vm12, %v3704_v3, %v3700_v61  ;;  %v642_v16 = vadd.f32 %v6702_v49, %v6268_v12  ;;  %v647_v31 = vadd.f32 %v6704_v33, %v6268_v12  ;;  %v6711_v49 = vld [vmem:[#allocation43_spill] sm:$0xff] }
 0x6e0   : > { %v6263_v30 = vperm.slane %v3705_v4, 0 }
 0x6e2   : > { %v3708_v42 = vmul.f32 %v6263_v30, %v6122_v53  ;;  %v3709_v63 = vmul.f32 %v6263_v30, %v6115_v11  ;;  %v3710_v41 = vmul.f32 %v6263_v30, %v6126_v2  ;;  %v3711_v13 = vmul.f32 %v6263_v30, %v6132_v45  ;;  %v6699_v11 = vld [vmem:[#allocation21_spill] sm:$0xff]  ;;  %v6700_v2 = vld [vmem:[#allocation24_spill] sm:$0xff] }
 0x6e3   : > { %v3712_v53 = vmul.f32 %v6263_v30, %v6137_v24  ;;  %v634_v6 = vadd.f32 %v6699_v11, %v6268_v12  ;;  %v637_v8 = vadd.f32 %v6700_v2, %v6268_v12  ;;  %v3713_v45 = vmul.f32 %v6263_v30, %v6142_v26  ;;  %v6703_v26 = vld [vmem:[#allocation29_spill] sm:$0xff] }
 0x6e4   : > { %v3714_v0 = vmul.f32 %v6263_v30, %v6147_v60  ;;  %v3740_v44 = vadd.f32 %v3708_v42, %v627_v46  ;;  %v3741_v36 = vadd.f32 %v3709_v63, %v629_v59  ;;  %v3742_v55 = vadd.f32 %v3710_v41, %v632_v57  ;;  %v6705_v63 = vld [vmem:[#allocation32_spill] sm:$0xff]  ;;  %v6706_v46 = vld [vmem:[#allocation34_spill] sm:$0xff] }
 0x6e5   : > { %v639_v24 = vadd.f32 %v6701_v43, %v6268_v12  ;;  %v3715_v29 = vmul.f32 %v6263_v30, %v6152_v34  ;;  %v3743_v32 = vadd.f32 %v3711_v13, %v634_v6  ;;  %v644_v62 = vadd.f32 %v6703_v26, %v6268_v12  ;;  %v6710_v43 = vld [vmem:[#allocation42_spill] sm:$0xff] }
 0x6e6   : > { %v3716_v22 = vmul.f32 %v6263_v30, %v6157_v7  ;;  %v3744_v60 = vadd.f32 %v3712_v53, %v637_v8  ;;  %v3717_v15 = vmul.f32 %v6263_v30, %v6162_v37  ;;  %v3718_v34 = vmul.f32 %v6263_v30, %v6170_v35 }
 0x6e7   : > { %v3745_v61 = vadd.f32 %v3713_v45, %v639_v24  ;;  %v3746_v3 = vadd.f32 %v3714_v0, %v642_v16  ;;  %v3772_v4 = vmax.f32 %v3740_v44, 0.0  ;;  %v3773_v5 = vmax.f32 %v3741_v36, 0.0  ;;  %v6709_v0 = vld [vmem:[#allocation39_spill] sm:$0xff] }
 0x6e8   : > { %v3774_v42 = vmax.f32 %v3742_v55, 0.0  ;;  %v649_v41 = vadd.f32 %v6705_v63, %v6268_v12  ;;  %v3719_v7 = vmul.f32 %v6263_v30, %v6175_v19  ;;  %v3747_v13 = vadd.f32 %v3715_v29, %v644_v62 }
 0x6e9   : > { %v3775_v47 = vmax.f32 %v3743_v32, 0.0  ;;  %v652_v51 = vadd.f32 %v6706_v46, %v6268_v12  ;;  %v3720_v37 = vmul.f32 %v6263_v30, %v6180_v27  ;;  %v3748_v35 = vadd.f32 %v3716_v22, %v647_v31  ;;  %3804 = vst [vmem:[%s6321_s29] sm:$0xff] %v3772_v4  ;;  %v6708_v27 = vld [vmem:[#allocation38_spill] sm:$0xff]  ;;  %v6714_v4 = vld [vmem:[#allocation52_spill] sm:$0xff]  ;;  %v6716_v46 = vld [vmem:[#allocation61_spill] sm:$0xff] }
 0x6ea   : > { %v3776_v59 = vmax.f32 %v3744_v60, 0.0  ;;  %v654_v19 = vadd.f32 %v6707_v52, %v6268_v12  ;;  %v3721_v57 = vmul.f32 %v6263_v30, %v6184_v58  ;;  %v3749_v53 = vadd.f32 %v3717_v15, %v649_v41  ;;  %3805 = vst [vmem:[%s6321_s29 + $0x8] sm:$0xff] %v3773_v5  ;;  %v6712_v22 = vld [vmem:[#allocation46_spill] sm:$0xff]  ;;  %v6713_v15 = vld [vmem:[#allocation48_spill] sm:$0xff]  ;;  %v6715_v41 = vld [vmem:[#allocation57_spill] sm:$0xff] }
 0x6eb   : > { %v3777_v11 = vmax.f32 %v3745_v61, 0.0  ;;  %v657_v6 = vadd.f32 %v6708_v27, %v6268_v12  ;;  %v3722_v2 = vmul.f32 %v6263_v30, %v6188_v56  ;;  %v3750_v8 = vadd.f32 %v3718_v34, %v652_v51  ;;  %3806 = vst [vmem:[%s6321_s29 + $0x10] sm:$0xff] %v3774_v42 }
 0x6ec   : > { %v3778_v45 = vmax.f32 %v3746_v3, 0.0  ;;  %v659_v44 = vadd.f32 %v6709_v0, %v6268_v12  ;;  %v3723_v58 = vmul.f32 %v6263_v30, %v6192_v10  ;;  %v3751_v36 = vadd.f32 %v3719_v7, %v654_v19  ;;  %3807 = vst [vmem:[%s6321_s29 + $0x18] sm:$0xff] %v3775_v47 }
 0x6ed   : > { %v3779_v55 = vmax.f32 %v3747_v13, 0.0  ;;  %v662_v24 = vadd.f32 %v6710_v43, %v6268_v12  ;;  %v3724_v56 = vmul.f32 %v6263_v30, %v6196_v1  ;;  %v3752_v29 = vadd.f32 %v3720_v37, %v657_v6  ;;  %3808 = vst [vmem:[%s6321_s29 + $0x20] sm:$0xff] %v3776_v59  ;;  %v6717_v59 = vld [vmem:[#allocation64_spill] sm:$0xff]  ;;  %v6721_v43 = vld [vmem:[#allocation70_spill] sm:$0xff] }
 0x6ee   : > { %v3780_v32 = vmax.f32 %v3748_v35, 0.0  ;;  %v664_v16 = vadd.f32 %v6711_v49, %v6268_v12  ;;  %v3725_v10 = vmul.f32 %v6263_v30, %v6200_v23  ;;  %v3753_v26 = vadd.f32 %v3721_v57, %v659_v44  ;;  %3809 = vst [vmem:[%s6321_s29 + $0x28] sm:$0xff] %v3777_v11  ;;  %v6720_v44 = vld [vmem:[#allocation68_spill] sm:$0xff] }
 0x6ef   : > { %v3781_v62 = vmax.f32 %v3749_v53, 0.0  ;;  %v667_v60 = vadd.f32 %v6712_v22, %v6268_v12  ;;  %v3726_v1 = vmul.f32 %v6263_v30, %v6204_v40  ;;  %v3754_v33 = vadd.f32 %v3722_v2, %v662_v24  ;;  %3810 = vst [vmem:[%s6321_s29 + $0x30] sm:$0xff] %v3778_v45  ;;  %v6718_v53 = vld [vmem:[#allocation66_spill] sm:$0xff]  ;;  %v6719_v2 = vld [vmem:[#allocation67_spill] sm:$0xff] }
 0x6f0   : > { %v3782_v31 = vmax.f32 %v3750_v8, 0.0  ;;  %v669_v34 = vadd.f32 %v6713_v15, %v6268_v12  ;;  %v3727_v23 = vmul.f32 %v6263_v30, %v6208_v17  ;;  %v3755_v61 = vadd.f32 %v3723_v58, %v664_v16  ;;  %3811 = vst [vmem:[%s6321_s29 + $0x38] sm:$0xff] %v3779_v55 }
 0x6f1   : > { %v3783_v3 = vmax.f32 %v3751_v36, 0.0  ;;  %v672_v5 = vadd.f32 %v6714_v4, %v6268_v12  ;;  %v3728_v40 = vmul.f32 %v6263_v30, %v6212_v39  ;;  %v3756_v42 = vadd.f32 %v3724_v56, %v667_v60  ;;  %3812 = vst [vmem:[%s6321_s29 + $0x40] sm:$0xff] %v3780_v32  ;;  %v6722_v32 = vld [vmem:[#allocation72_spill] sm:$0xff] }
 0x6f2   : > { %v3784_v63 = vmax.f32 %v3752_v29, 0.0  ;;  %v674_v7 = vadd.f32 %v6715_v41, %v6268_v12  ;;  %v3729_v17 = vmul.f32 %v6263_v30, %v6216_v9  ;;  %v3757_v13 = vadd.f32 %v3725_v10, %v669_v34  ;;  %3813 = vst [vmem:[%s6321_s29 + $0x48] sm:$0xff] %v3781_v62  ;;  %v6725_v34 = vld [vmem:[#allocation78_spill] sm:$0xff]  ;;  %v6726_v4 = vld [vmem:[#allocation80_spill] sm:$0xff] }
 0x6f3   : > { %v3785_v47 = vmax.f32 %v3753_v26, 0.0  ;;  %v677_v51 = vadd.f32 %v6716_v46, %v6268_v12  ;;  %v3730_v39 = vmul.f32 %v6263_v30, %v6220_v50  ;;  %v3758_v37 = vadd.f32 %v3726_v1, %v672_v5  ;;  %3814 = vst [vmem:[%s6321_s29 + $0x50] sm:$0xff] %v3782_v31  ;;  %v6723_v26 = vld [vmem:[#allocation74_spill] sm:$0xff]  ;;  %v6724_v1 = vld [vmem:[#allocation76_spill] sm:$0xff] }
 0x6f4   : > { %v3786_v35 = vmax.f32 %v3754_v33, 0.0  ;;  %v679_v52 = vadd.f32 %v6717_v59, %v6268_v12  ;;  %v3731_v9 = vmul.f32 %v6263_v30, %v6224_v54  ;;  %v3759_v19 = vadd.f32 %v3727_v23, %v674_v7  ;;  %3815 = vst [vmem:[%s6321_s29 + $0x58] sm:$0xff] %v3783_v3 }
 0x6f5   : > { %v3787_v57 = vmax.f32 %v3755_v61, 0.0  ;;  %v682_v11 = vadd.f32 %v6718_v53, %v6268_v12  ;;  %v3732_v50 = vmul.f32 %v6263_v30, %v6228_v48  ;;  %v3760_v27 = vadd.f32 %v3728_v40, %v677_v51  ;;  %3816 = vst [vmem:[%s6321_s29 + $0x60] sm:$0xff] %v3784_v63 }
 0x6f6   : > { %v3788_v6 = vmax.f32 %v3756_v42, 0.0  ;;  %v684_v8 = vadd.f32 %v6719_v2, %v6268_v12  ;;  %v3733_v54 = vmul.f32 %v6263_v30, %v6235_v28  ;;  %v3761_v45 = vadd.f32 %v3729_v17, %v679_v52  ;;  %3817 = vst [vmem:[%s6321_s29 + $0x68] sm:$0xff] %v3785_v47  ;;  %v6727_v42 = vld [vmem:[#allocation82_spill] sm:$0xff] }
 0x6f7   : > { %v3789_v0 = vmax.f32 %v3757_v13, 0.0  ;;  %v687_v58 = vadd.f32 %v6720_v44, %v6268_v12  ;;  %v3734_v48 = vmul.f32 %v6263_v30, %v6239_v20  ;;  %v3762_v36 = vadd.f32 %v3730_v39, %v682_v11  ;;  %3818 = vst [vmem:[%s6321_s29 + $0x70] sm:$0xff] %v3786_v35 }
 0x6f8   : > { %v3790_v55 = vmax.f32 %v3758_v37, 0.0  ;;  %v689_v24 = vadd.f32 %v6721_v43, %v6268_v12  ;;  %v3735_v28 = vmul.f32 %v6263_v30, %v6243_v21  ;;  %v3763_v56 = vadd.f32 %v3731_v9, %v684_v8  ;;  %3819 = vst [vmem:[%s6321_s29 + $0x78] sm:$0xff] %v3787_v57 }
 0x6f9   : > { %v3791_v29 = vmax.f32 %v3759_v19, 0.0  ;;  %v692_v49 = vadd.f32 %v6722_v32, %v6268_v12  ;;  %v3736_v20 = vmul.f32 %v6263_v30, %v6247_v25  ;;  %v3764_v16 = vadd.f32 %v3732_v50, %v687_v58  ;;  %3820 = vst [vmem:[%s6321_s29 + $0x80] sm:$0xff] %v3788_v6 }
 0x6fa   : > { %v3792_v10 = vmax.f32 %v3760_v27, 0.0  ;;  %v694_v62 = vadd.f32 %v6723_v26, %v6268_v12  ;;  %v3737_v21 = vmul.f32 %v6263_v30, %v6251_v14  ;;  %v3765_v22 = vadd.f32 %v3733_v54, %v689_v24  ;;  %3821 = vst [vmem:[%s6321_s29 + $0x88] sm:$0xff] %v3789_v0 }
 0x6fb   : > { %v3793_v60 = vmax.f32 %v3761_v45, 0.0  ;;  %v697_v33 = vadd.f32 %v6724_v1, %v6268_v12  ;;  %v3738_v25 = vmul.f32 %v6263_v30, %v6255_v38  ;;  %v3766_v31 = vadd.f32 %v3734_v48, %v692_v49  ;;  %3822 = vst [vmem:[%s6321_s29 + $0x90] sm:$0xff] %v3790_v55 }
 0x6fc   : > { %v3794_v15 = vmax.f32 %v3762_v36, 0.0  ;;  %v699_v23 = vadd.f32 %v6725_v34, %v6268_v12  ;;  %v3739_v14 = vmul.f32 %v6263_v30, %v6260_v18  ;;  %v3767_v61 = vadd.f32 %v3735_v28, %v694_v62  ;;  %3823 = vst [vmem:[%s6321_s29 + $0x98] sm:$0xff] %v3791_v29 }
 0x6fd   : > { %v3795_v3 = vmax.f32 %v3763_v56, 0.0  ;;  %v702_v5 = vadd.f32 %v6726_v4, %v6268_v12  ;;  %v3768_v38 = vadd.f32 %v3736_v20, %v697_v33  ;;  %v3796_v40 = vmax.f32 %v3764_v16, 0.0  ;;  %3824 = vst [vmem:[%s6321_s29 + $0xa0] sm:$0xff] %v3792_v10 }
 0x6fe   : > { %v704_v63 = vadd.f32 %v6727_v42, %v6268_v12  ;;  %v3769_v41 = vadd.f32 %v3737_v21, %v699_v23  ;;  %v3797_v7 = vmax.f32 %v3765_v22, 0.0  ;;  %3825 = vst [vmem:[%s6321_s29 + $0xa8] sm:$0xff] %v3793_v60  ;;  %v3798_v30 = vmax.f32 %v3766_v31, 0.0 }
 0x6ff   : > { %v3770_v18 = vadd.f32 %v3738_v25, %v702_v5  ;;  %3826 = vst [vmem:[%s6321_s29 + $0xb0] sm:$0xff] %v3794_v15  ;;  %v3799_v13 = vmax.f32 %v3767_v61, 0.0  ;;  %v3800_v12 = vmax.f32 %v3768_v38, 0.0 }
 0x700   : > { %v3771_v17 = vadd.f32 %v3739_v14, %v704_v63  ;;  %3827 = vst [vmem:[%s6321_s29 + $0xb8] sm:$0xff] %v3795_v3  ;;  %v3801_v47 = vmax.f32 %v3769_v41, 0.0 }
 0x701   : > { %3828 = vst [vmem:[%s6321_s29 + $0xc0] sm:$0xff] %v3796_v40  ;;  %v3802_v46 = vmax.f32 %v3770_v18, 0.0 }
 0x702   : > { %3829 = vst [vmem:[%s6321_s29 + $0xc8] sm:$0xff] %v3797_v7  ;;  %v3803_v51 = vmax.f32 %v3771_v17, 0.0 }
 0x703   : > { %3830 = vst [vmem:[%s6321_s29 + $0xd0] sm:$0xff] %v3798_v30 }
 0x704   : > { %3831 = vst [vmem:[%s6321_s29 + $0xd8] sm:$0xff] %v3799_v13 }
 0x705   : > { %3832 = vst [vmem:[%s6321_s29 + $0xe0] sm:$0xff] %v3800_v12 }
 0x706   : > { %3833 = vst [vmem:[%s6321_s29 + $0xe8] sm:$0xff] %v3801_v47 }
 0x707   : > { %3834 = vst [vmem:[%s6321_s29 + $0xf0] sm:$0xff] %v3802_v46 }
 0x708   : > { %3835 = vst [vmem:[%s6321_s29 + $0xf8] sm:$0xff] %v3803_v51 }
 0x709   : > { %4622 = shalt.err (!%p4619_p8)
}
 0x70a   : > { %s4669_s27 = smov 128   ;;  %s4670_s29 = smov 8  }
 0x70b   : > { %4503 = dma.vmem_to_hbm [thread:$0]  (%p4759_p5), %s3850_s21, 4096, %s3852_s22, %s3837_s23, %s4669_s27, %s4669_s27, %s4670_s29  }
 0x70c PF: > { %p4515_p9 = scmp.ge.s32.totalorder %s4661_s12, 2  ;;  %s3866_s17 = sand.u32 1, %s4649_s30  }
 0x70d   : > { %s3867_s26 = scalar_lea.sflag [#allocation4], %s3866_s17 }
 0x70e   : > { %p4510_p10 = pnand %p4515_p9, %p4763_p6 }
 0x710   : > { %p4511_p11 = pneg %p4510_p10 }
 0x712   : > { %4644 = dma.done.wait (%p4511_p11), %s3867_s26, 4096  }
 0x713   : > { %4646 = vsyncadd (%p4511_p11), %s3867_s26, 4294963200  ;;  %p20_p12 = scmp.ge.s32.totalorder %s4746_s15, 4   ;;  %s6728_s30 = smov %s4653_s10 }
 0x714   : > { %s6729_s10 = smov %s4657_s11  ;;  %s6730_s11 = smov %s4757_s18 }
 0x715   : > { %s6731_s12 = smov %s4746_s15  ;;  %22 = sbr.rel (!%p20_p12) target bundleno = 4 (0x4), region = 98 }
 0x71a   :  { %3873 = vsyncpa [#allocation3], 1 }
 0x71b   :  { %3875 = vsyncpa [#allocation3 + $0x1], 1 }
 0x71c   :  { %3876 = vsyncpa [#allocation4], 1 }
 0x71d   :  { %3878 = vsyncpa [#allocation4 + $0x1], 1 }

</bundles_post_ra>
